<compile_context>
chip_gen: v7x
topology: tpu7x:2x2x1
jax: 0.10.0
libtpu: 0.0.40
codegen_flags: <defaults>
</compile_context>

<pallas_src>
import numpy as np

import jax
import jax.numpy as jnp
from jax.experimental import pallas as pl
from jax.experimental.pallas import tpu as pltpu

# ----------------------------- hyper parameters ------------------------------
DIM = 16              # args.dim
N_HOP = 2             # args.n_hop
N_MEMORY = 8          # args.n_memory
N_ENTITY = 64
N_RELATION = 16
BATCH = 8
KSIZE = 3             # self.kernel_size
N_OUT_CH = 32         # self.num_of_output_channels
L2_WEIGHT = 1e-4      # args.l2_weight
BN_EPS = 1e-5
ITEM_UPDATE_MODE = "plus_transform"   # args.item_update_mode
USING_ALL_HOPS = True                 # args.using_all_hops

N_COMP = 8                            # 4 head + 4 relation components stacked on H
HW = N_COMP * DIM                     # conv "spatial" size H*W = 8*16 = 128
FC_IN = DIM * N_COMP * N_OUT_CH       # 4096
FC_OUT = N_MEMORY * DIM * 4           # 512
MD = N_MEMORY * DIM                   # lane-dense (memory, dim) packing = 128
CONV_K = N_MEMORY * KSIZE * KSIZE     # 72
CONV_KP = 80                          # bf16-sublane-aligned contraction dim (72 -> 80)

# Hamilton-product tables:  M1_j = sum_i SIGN[j][i] * (abcd_i * h_i) * r_{PERM[j][i]}
PERM = ((0, 1, 2, 3), (1, 0, 3, 2), (2, 3, 0, 1), (3, 2, 1, 0))
SIGN = ((1, -1, -1, -1), (1, 1, 1, -1), (1, -1, 1, 1), (1, 1, -1, 1))


# ------------------------------- Pallas kernels -------------------------------
def conv_bn_relu_kernel(p_ref, w_ref, b_ref, o_ref):
    """relu(patches @ w_fold + b_fold); BN2d folded into w/b; bf16 output."""
    y = jnp.dot(p_ref[...], w_ref[...], preferred_element_type=jnp.float32)
    y = jnp.maximum(y + b_ref[...], 0.0)
    o_ref[...] = y.astype(o_ref.dtype)


def conv_bn_relu(patches, wfold, bfold):
    return pl.pallas_call(
        conv_bn_relu_kernel,
        out_shape=jax.ShapeDtypeStruct((N_HOP, BATCH * HW, N_OUT_CH), jnp.bfloat16),
        grid=(N_HOP,),
        in_specs=[
            pl.BlockSpec((None, BATCH * HW, CONV_KP), lambda h: (h, 0, 0)),
            pl.BlockSpec((None, CONV_KP, N_OUT_CH), lambda h: (h, 0, 0)),
            pl.BlockSpec((None, 1, N_OUT_CH), lambda h: (h, 0, 0)),
        ],
        out_specs=pl.BlockSpec((None, BATCH * HW, N_OUT_CH), lambda h: (h, 0, 0)),
        compiler_params=pltpu.CompilerParams(dimension_semantics=("parallel",)),
    )(patches, wfold, bfold)


def fc_bn_relu_kernel(x_ref, w_ref, b_ref, o_ref):
    """relu(x @ w_fold + b_fold); BN1d folded; bf16 operands, f32 accumulation."""
    y = jnp.dot(x_ref[...], w_ref[...], preferred_element_type=jnp.float32)
    o_ref[...] = jnp.maximum(y + b_ref[...], 0.0)


def fc_bn_relu(x, fcw, fcb):
    return pl.pallas_call(
        fc_bn_relu_kernel,
        out_shape=jax.ShapeDtypeStruct((N_HOP, BATCH, FC_OUT), jnp.float32),
        grid=(N_HOP,),
        in_specs=[
            pl.BlockSpec((None, BATCH, FC_IN), lambda h: (h, 0, 0)),
            pl.BlockSpec((None, FC_IN, FC_OUT), lambda h: (h, 0, 0)),
            pl.BlockSpec((None, 1, FC_OUT), lambda h: (h, 0, 0)),
        ],
        out_specs=pl.BlockSpec((None, BATCH, FC_OUT), lambda h: (h, 0, 0)),
        compiler_params=pltpu.CompilerParams(dimension_semantics=("parallel",)),
    )(x, fcw, fcb)


def hop_chain_kernel(y_ref, h_ref, r_ref, t_ref, item0_ref, twT_ref,
                     sseg_ref, rexp_ref, sd_ref, ttile_ref,
                     out_ref, item_sc, usum_sc):
    """Serial per-hop chain.  Refs (hop dim squeezed by BlockSpec):
         y_ref    : (B, 4*MD) f32   fc output, columns ordered (comp i, memory m, d)
         h_ref    : (4B, MD)  f32   rows i*B+b, lanes m*D+d : head components
         r_ref    : (4B, MD)  f32   relation components (same layout)
         t_ref    : (4B, MD)  f32   tail components, rows j*B+b
         item0_ref: (4B, D)   f32   initial item embeddings (bn_item folded)
         twT_ref  : (D, D)    f32   transform_matrix.weight.T
         sseg_ref : (MD, M)   f32   constant: segment-sum over d within each memory
         rexp_ref : (M, MD)   f32   constant: expand per-memory prob over d lanes
         sd_ref   : (MD, D)   f32   constant: segment-sum over m for each d
         ttile_ref: (D, MD)   f32   constant: tile (B,D) item over the m lanes
         out_ref  : (B, 128)  f32   sigmoid scores broadcast over lanes
       Scratch carried across the hop grid axis (requires 'arbitrary' semantics):
         item_sc  : (4B, D) f32     current item embeddings (s,x,y,z stacked)
         usum_sc  : (B, D)  f32     running sum of o_s over hops
    """
    hop = pl.program_id(0)
    B = BATCH

    @pl.when(hop == 0)
    def _init():
        item_sc[...] = item0_ref[...]
        usum_sc[...] = jnp.zeros_like(usum_sc)

    y = y_ref[...]
    h = h_ref[...]
    r = r_ref[...]
    t = t_ref[...]
    item = item_sc[...]                                        # (4B, D)

    # abcd slab matched to h's row layout (4 lane-aligned 128-wide slices of y).
    abcd = jnp.concatenate([y[:, i * MD:(i + 1) * MD] for i in range(4)], axis=0)
    p = abcd * h                                               # p_i rows = i*B+b
    pi = [p[i * B:(i + 1) * B] for i in range(4)]
    ri = [r[i * B:(i + 1) * B] for i in range(4)]

    # Hamilton product: Q_j = sum_i SIGN[j][i] * p_i * r_{PERM[j][i]}   (full-vreg VPU ops)
    q = []
    for j in range(4):
        acc = None
        for i in range(4):
            term = pi[i] * ri[PERM[j][i]]
            term = term if SIGN[j][i] > 0 else -term
            acc = term if acc is None else acc + term
        q.append(acc)
    Q = jnp.concatenate(q, axis=0)                             # (4B, MD)

    # attention scores: lane segment-sum over d via constant matmul on the MXU
    item_t = jnp.dot(item, ttile_ref[...], preferred_element_type=jnp.float32)   # (4B, MD)
    sc = jnp.dot(Q * item_t, sseg_ref[...], preferred_element_type=jnp.float32)  # (4B, M)

    # one vectorized softmax over memory for all 4 components at once
    mx = jnp.max(sc, axis=-1, keepdims=True)
    e = jnp.exp(sc - mx)
    den = jnp.sum(e, axis=-1, keepdims=True)
    probs = e * pl.reciprocal(den)                             # (4B, M), exact reciprocal

    # o_j[b, d] = sum_m probs_j[b, m] * t_j[b, m, d]  (expand over d, segment-sum over m)
    pe = jnp.dot(probs, rexp_ref[...], preferred_element_type=jnp.float32)        # (4B, MD)
    o = jnp.dot(pe * t, sd_ref[...], preferred_element_type=jnp.float32)          # (4B, D)

    if USING_ALL_HOPS:
        usum_sc[...] = usum_sc[...] + o[0:B]                   # o_s component
    else:
        usum_sc[...] = o[0:B]

    # item update ('plus_transform'), 4 components batched into one matmul
    item_sc[...] = jnp.dot(item + o, twT_ref[...], preferred_element_type=jnp.float32)

    # predict on the final hop (lane-dense output slab)
    @pl.when(hop == pl.num_programs(0) - 1)
    def _predict():
        it = item_sc[...]
        isum = (it[0:B] + it[B:2 * B] + it[2 * B:3 * B] + it[3 * B:4 * B])
        s = jnp.sum(isum * usum_sc[...], axis=-1, keepdims=True)      # (B, 1)
        out_ref[...] = jnp.broadcast_to(jax.nn.sigmoid(s), (B, 128))


def hop_chain(y, h_all, r_all, t_all, item0, twT, sseg, rexp, sd, ttile):
    return pl.pallas_call(
        hop_chain_kernel,
        out_shape=jax.ShapeDtypeStruct((BATCH, 128), jnp.float32),
        grid=(N_HOP,),
        in_specs=[
            pl.BlockSpec((None, BATCH, FC_OUT), lambda h: (h, 0, 0)),
            pl.BlockSpec((None, 4 * BATCH, MD), lambda h: (h, 0, 0)),
            pl.BlockSpec((None, 4 * BATCH, MD), lambda h: (h, 0, 0)),
            pl.BlockSpec((None, 4 * BATCH, MD), lambda h: (h, 0, 0)),
            pl.BlockSpec((4 * BATCH, DIM), lambda h: (0, 0)),
            pl.BlockSpec((DIM, DIM), lambda h: (0, 0)),
            pl.BlockSpec((MD, N_MEMORY), lambda h: (0, 0)),
            pl.BlockSpec((N_MEMORY, MD), lambda h: (0, 0)),
            pl.BlockSpec((MD, DIM), lambda h: (0, 0)),
            pl.BlockSpec((DIM, MD), lambda h: (0, 0)),
        ],
        out_specs=pl.BlockSpec((BATCH, 128), lambda h: (0, 0)),
        scratch_shapes=[pltpu.VMEM((4 * BATCH, DIM), jnp.float32),
                        pltpu.VMEM((BATCH, DIM), jnp.float32)],
        compiler_params=pltpu.CompilerParams(dimension_semantics=("arbitrary",)),
    )(y, h_all, r_all, t_all, item0, twT, sseg, rexp, sd, ttile)


# ------------------------------ parameter setup -------------------------------
def init_params(key):
    keys = list(jax.random.split(key, 64))
    it = iter(keys)

    def nrm(shape, scale=0.1):
        return (scale * jax.random.normal(next(it), shape)).astype(jnp.float32)

    def bn(n):
        return dict(gamma=(1.0 + 0.1 * jax.random.normal(next(it), (n,))).astype(jnp.float32),
                    beta=(0.1 * jax.random.normal(next(it), (n,))).astype(jnp.float32),
                    mean=(0.1 * jax.random.normal(next(it), (n,))).astype(jnp.float32),
                    var=(1.0 + 0.5 * jax.random.uniform(next(it), (n,))).astype(jnp.float32))

    p = {}
    for name in ["emb_s_a", "emb_x_a", "emb_y_a", "emb_z_a"]:
        p[name] = nrm((N_ENTITY, DIM))
    for name in ["rel_s_b", "rel_x_b", "rel_y_b", "rel_z_b"]:
        p[name] = nrm((N_RELATION, DIM))
    p["bn_item"] = [bn(DIM) for _ in range(4)]
    p["bn_conv1"] = bn(N_OUT_CH)
    p["conv_w"] = [nrm((N_OUT_CH, N_MEMORY, KSIZE, KSIZE)) for _ in range(N_HOP)]
    p["conv_b"] = [nrm((N_OUT_CH,)) for _ in range(N_HOP)]
    p["fc_w"] = [nrm((FC_OUT, FC_IN), scale=0.02) for _ in range(N_HOP)]   # PyTorch Linear layout
    p["fc_b"] = [nrm((FC_OUT,)) for _ in range(N_HOP)]
    p["bn_conv2"] = [bn(FC_OUT) for _ in range(N_HOP)]
    p["transform_w"] = nrm((DIM, DIM))
    return p


def _bn_fold(bnp):
    s = bnp["gamma"] * jax.lax.rsqrt(bnp["var"] + BN_EPS)
    return s, bnp["beta"] - bnp["mean"] * s


def prepare_params(p):
    """One-time folding / relayout: eval-mode BN into weights, fc row+column
    permutation (kills the runtime transpose, makes quaternion slices lane-dense),
    bf16 weight streams, constant attention matrices."""
    prep = {}

    # item embedding tables with bn_item folded (used only for the item gather)
    ent_names = ["emb_s_a", "emb_x_a", "emb_y_a", "emb_z_a"]
    item_tabs = []
    for j in range(4):
        s, sh = _bn_fold(p["bn_item"][j])
        item_tabs.append(p[ent_names[j]] * s[None, :] + sh[None, :])
    prep["item_emb"] = item_tabs
    prep["ent_emb"] = [p[n] for n in ent_names]
    prep["rel_emb"] = [p[n] for n in ["rel_s_b", "rel_x_b", "rel_y_b", "rel_z_b"]]

    # conv weight (im2col form) folded with shared bn_conv1, K padded 72 -> 80, bf16
    s1, sh1 = _bn_fold(p["bn_conv1"])
    wf, bf = [], []
    for hop in range(N_HOP):
        w_col = p["conv_w"][hop].reshape(N_OUT_CH, -1).T * s1[None, :]     # (72, 32)
        w_col = jnp.pad(w_col, ((0, CONV_KP - CONV_K), (0, 0)))
        wf.append(w_col.astype(jnp.bfloat16))
        bf.append((p["conv_b"][hop] * s1 + sh1).reshape(1, N_OUT_CH))
    prep["conv_wfold"] = jnp.stack(wf, axis=0)                             # (N_HOP, 80, 32) bf16
    prep["conv_bfold"] = jnp.stack(bf, axis=0)                             # (N_HOP, 1, 32) f32

    # fc weight: BN1d folded, pre-transposed, row-permuted (c,hw)->(hw,c) to match the
    # conv kernel's natural (b,hw,c) flatten, column-permuted (m,comp,d)->(comp,m,d)
    # so each quaternion component of the output is a lane-dense 128-wide slab; bf16.
    fw_l, fb_l = [], []
    for hop in range(N_HOP):
        s2, sh2 = _bn_fold(p["bn_conv2"][hop])
        fw = p["fc_w"][hop].T * s2[None, :]                                # (4096, 512), rows c*HW+hw
        fb = p["fc_b"][hop] * s2 + sh2                                     # (512,), cols m*4D+i*D+d
        fw = fw.reshape(N_OUT_CH, HW, FC_OUT).transpose(1, 0, 2).reshape(FC_IN, FC_OUT)
        fw = fw.reshape(FC_IN, N_MEMORY, 4, DIM).transpose(0, 2, 1, 3).reshape(FC_IN, FC_OUT)
        fb = fb.reshape(N_MEMORY, 4, DIM).transpose(1, 0, 2).reshape(1, FC_OUT)
        fw_l.append(fw.astype(jnp.bfloat16))
        fb_l.append(fb)
    prep["fcw"] = jnp.stack(fw_l, axis=0)                                  # (N_HOP, 4096, 512) bf16
    prep["fcb"] = jnp.stack(fb_l, axis=0)                                  # (N_HOP, 1, 512) f32

    prep["twT"] = p["transform_w"].T                                       # Linear: x @ W.T

    # constant segment-sum / expansion matrices for the in-kernel attention
    lane = np.arange(MD)
    sseg = (lane[:, None] // DIM == np.arange(N_MEMORY)[None, :]).astype(np.float32)  # (128, M)
    sd = (lane[:, None] % DIM == np.arange(DIM)[None, :]).astype(np.float32)          # (128, D)
    prep["sseg"] = jnp.asarray(sseg)
    prep["rexp"] = jnp.asarray(sseg.T)
    prep["sd"] = jnp.asarray(sd)
    prep["ttile"] = jnp.asarray(sd.T)
    return prep


# ---------------------------------- JAX glue -----------------------------------
def im2col(x):
    """x: (B, M, 8, D) NCHW -> (B*8*D, CONV_KP) bf16 patch matrix (zero pad 1, stride 1)."""
    B_, M_, H_, W_ = x.shape
    xp = jnp.pad(x, ((0, 0), (0, 0), (1, 1), (1, 1)))
    cols = [xp[:, :, ki:ki + H_, kj:kj + W_] for ki in range(KSIZE) for kj in range(KSIZE)]
    patches = jnp.stack(cols, axis=2)              # (B, M, 9, H, W)
    patches = patches.transpose(0, 3, 4, 1, 2)     # (B, H, W, M, 9)
    patches = patches.reshape(B_ * H_ * W_, M_ * KSIZE * KSIZE)
    patches = jnp.pad(patches, ((0, 0), (0, CONV_KP - CONV_K)))
    return patches.astype(jnp.bfloat16)


def forward(prep, items, labels, memories_h, memories_r, memories_t):
    take = lambda tab, idx: jnp.take(tab, idx, axis=0)   # embedding gather (glue)

    # initial item embeddings (bn_item folded into the table); components stacked on rows
    item0 = jnp.concatenate([take(prep["item_emb"][j], items) for j in range(4)], axis=0)

    patches_l, h_l, r_l, t_l = [], [], [], []
    l2 = jnp.float32(0.0)
    for hop in range(N_HOP):
        h4 = [take(prep["ent_emb"][i], memories_h[hop]) for i in range(4)]   # (B, M, D)
        r4 = [take(prep["rel_emb"][i], memories_r[hop]) for i in range(4)]
        t4 = [take(prep["ent_emb"][i], memories_t[hop]) for i in range(4)]
        for e in h4 + t4 + r4:                      # L2 regularizer in plain JAX
            l2 = l2 + jnp.sum(e * e)

        x_nchw = jnp.stack(h4 + r4, axis=2)         # (B, M, 8, D): conv input (NCHW)
        patches_l.append(im2col(x_nchw))            # (B*HW, 80) bf16
        # lane-dense (component-stacked) operands for the serial hop chain
        h_l.append(jnp.concatenate([v.reshape(BATCH, MD) for v in h4], axis=0))
        r_l.append(jnp.concatenate([v.reshape(BATCH, MD) for v in r4], axis=0))
        t_l.append(jnp.concatenate([v.reshape(BATCH, MD) for v in t4], axis=0))

    patches = jnp.stack(patches_l, axis=0)          # (N_HOP, B*HW, 80) bf16
    h_all = jnp.stack(h_l, axis=0)                  # (N_HOP, 4B, 128) f32
    r_all = jnp.stack(r_l, axis=0)
    t_all = jnp.stack(t_l, axis=0)

    # hop-parallel conv (+ folded BN2d + relu)
    conv = conv_bn_relu(patches, prep["conv_wfold"], prep["conv_bfold"])   # (N_HOP, B*HW, 32) bf16
    # contiguous (b, hw, c) flatten; row-permuted fc weight makes this transpose-free
    fc_in = conv.reshape(N_HOP, BATCH, FC_IN)

    # hop-parallel fc (+ folded BN1d + relu); heavy weight stream stays out of the serial kernel
    y = fc_bn_relu(fc_in, prep["fcw"], prep["fcb"])                        # (N_HOP, B, 512) f32

    # serial quaternion/attention/item-update/predict chain
    scores = hop_chain(y, h_all, r_all, t_all, item0, prep["twT"],
                       prep["sseg"], prep["rexp"], prep["sd"], prep["ttile"])[:, 0]

    # ------------------------------- losses ------------------------------------
    yl = labels.astype(jnp.float32)
    eps = 1e-12
    base_loss = -jnp.mean(yl * jnp.log(jnp.clip(scores, eps, 1.0)) +
                          (1.0 - yl) * jnp.log(jnp.clip(1.0 - scores, eps, 1.0)))
    l2_loss = L2_WEIGHT * l2
    kge_loss = jnp.float32(0.0)
    loss = base_loss + kge_loss + l2_loss
    return dict(base_loss=base_loss, kge_loss=kge_loss, l2_loss=l2_loss,
                loss=loss, scores=scores)


# ----------------------------------- main --------------------------------------
if __name__ == "__main__":
    key = jax.random.PRNGKey(0)
    pkey, ikey, lkey, *mkeys = jax.random.split(key, 3 + 3 * N_HOP)
    params = init_params(pkey)
    prep = prepare_params(params)

    items = jax.random.randint(ikey, (BATCH,), 0, N_ENTITY)
    labels = jax.random.randint(lkey, (BATCH,), 0, 2)
    memories_h = [jax.random.randint(mkeys[3 * i + 0], (BATCH, N_MEMORY), 0, N_ENTITY)
                  for i in range(N_HOP)]
    memories_r = [jax.random.randint(mkeys[3 * i + 1], (BATCH, N_MEMORY), 0, N_RELATION)
                  for i in range(N_HOP)]
    memories_t = [jax.random.randint(mkeys[3 * i + 2], (BATCH, N_MEMORY), 0, N_ENTITY)
                  for i in range(N_HOP)]

    fwd = jax.jit(forward)
    out = fwd(prep, items, labels, memories_h, memories_r, memories_t)
    jax.block_until_ready(out)
    # TODO(synk): training-mode batch-stat BatchNorm / stochastic Dropout not reproduced
    #             (eval semantics; BN folded).  fc/conv run in bf16 with f32 accumulation.
    print("KERNEL_OK")
</pallas_src>

<mosaic_0001>
module attributes {stable_mosaic.version = 11 : i64} {
  func.func @conv_bn_relu_kernel(%arg0: i32, %arg1: memref<1x1024x80xbf16, #tpu.memory_space<vmem>>, %arg2: memref<1x80x32xbf16, #tpu.memory_space<vmem>>, %arg3: memref<1x1x32xf32, #tpu.memory_space<vmem>>, %arg4: memref<1x1024x32xbf16, #tpu.memory_space<vmem>>) attributes {dimension_semantics = [#tpu.dimension_semantics<parallel>], iteration_bounds = array<i64: 2>, scalar_prefetch = 0 : i64, scratch_operands = 0 : i64, tpu.core_type = #tpu.core_type<tc>, window_params = [{transform_indices = @transform_0, window_bounds = array<i64: 1, 1024, 80>}, {transform_indices = @transform_1, window_bounds = array<i64: 1, 80, 32>}, {transform_indices = @transform_2, window_bounds = array<i64: 1, 1, 32>}, {transform_indices = @transform_3, window_bounds = array<i64: 1, 1024, 32>}]} {
    %c0 = arith.constant 0 : index
    %c0_0 = arith.constant 0 : index
    %c0_1 = arith.constant 0 : index
    %0 = vector.load %arg1[%c0, %c0_0, %c0_1] : memref<1x1024x80xbf16, #tpu.memory_space<vmem>>, vector<1x1024x80xbf16>
    %1 = vector.shape_cast %0 : vector<1x1024x80xbf16> to vector<1024x80xbf16>
    %c0_2 = arith.constant 0 : index
    %c0_3 = arith.constant 0 : index
    %c0_4 = arith.constant 0 : index
    %2 = vector.load %arg2[%c0_2, %c0_3, %c0_4] : memref<1x80x32xbf16, #tpu.memory_space<vmem>>, vector<1x80x32xbf16>
    %3 = vector.shape_cast %2 : vector<1x80x32xbf16> to vector<80x32xbf16>
    %cst = arith.constant dense<0.000000e+00> : vector<1024x32xf32>
    %4 = tpu.matmul %1, %3, %cst {dimension_numbers = #tpu.dot_dimension_numbers<[1], [0], [0], [1], [0, 0, 1, 1], [], []>} : vector<1024x80xbf16>, vector<80x32xbf16>, vector<1024x32xf32> -> vector<1024x32xf32>
    %c0_5 = arith.constant 0 : index
    %c0_6 = arith.constant 0 : index
    %c0_7 = arith.constant 0 : index
    %5 = vector.load %arg3[%c0_5, %c0_6, %c0_7] : memref<1x1x32xf32, #tpu.memory_space<vmem>>, vector<1x1x32xf32>
    %6 = vector.shape_cast %5 : vector<1x1x32xf32> to vector<1x32xf32>
    %7 = vector.broadcast %6 : vector<1x32xf32> to vector<1024x32xf32>
    %8 = arith.addf %4, %7 : vector<1024x32xf32>
    %cst_8 = arith.constant 0.000000e+00 : f32
    %9 = vector.broadcast %cst_8 : f32 to vector<1024x32xf32>
    %10 = arith.maximumf %8, %9 : vector<1024x32xf32>
    %11 = arith.truncf %10 : vector<1024x32xf32> to vector<1024x32xbf16>
    %c0_9 = arith.constant 0 : index
    %c0_10 = arith.constant 0 : index
    %c0_11 = arith.constant 0 : index
    %12 = vector.load %arg4[%c0_9, %c0_10, %c0_11] : memref<1x1024x32xbf16, #tpu.memory_space<vmem>>, vector<1x1024x32xbf16>
    %13 = vector.shape_cast %12 : vector<1x1024x32xbf16> to vector<1024x32xbf16>
    %14 = vector.shape_cast %11 : vector<1024x32xbf16> to vector<1x1024x32xbf16>
    tpu.vector_store %arg4[%c0_9, %c0_10, %c0_11], %14 {strides = array<i32>} : memref<1x1024x32xbf16, #tpu.memory_space<vmem>>, vector<1x1024x32xbf16>,
    return
  }
  func.func @transform_0(%arg0: i32) -> (i32, i32, i32) {
    %c0_i32 = arith.constant 0 : i32
    %c0_i32_0 = arith.constant 0 : i32
    %c0_i32_1 = arith.constant 0 : i32
    return %arg0, %c0_i32, %c0_i32_0 : i32, i32, i32
  }
  func.func @transform_1(%arg0: i32) -> (i32, i32, i32) {
    %c0_i32 = arith.constant 0 : i32
    %c0_i32_0 = arith.constant 0 : i32
    %c0_i32_1 = arith.constant 0 : i32
    return %arg0, %c0_i32, %c0_i32_0 : i32, i32, i32
  }
  func.func @transform_2(%arg0: i32) -> (i32, i32, i32) {
    %c0_i32 = arith.constant 0 : i32
    %c0_i32_0 = arith.constant 0 : i32
    %c0_i32_1 = arith.constant 0 : i32
    return %arg0, %c0_i32, %c0_i32_0 : i32, i32, i32
  }
  func.func @transform_3(%arg0: i32) -> (i32, i32, i32) {
    %c0_i32 = arith.constant 0 : i32
    %c0_i32_0 = arith.constant 0 : i32
    %c0_i32_1 = arith.constant 0 : i32
    return %arg0, %c0_i32, %c0_i32_0 : i32, i32, i32
  }
}

module attributes {stable_mosaic.version = 11 : i64} {
  func.func @fc_bn_relu_kernel(%arg0: i32, %arg1: memref<1x8x4096xbf16, #tpu.memory_space<vmem>>, %arg2: memref<1x4096x512xbf16, #tpu.memory_space<vmem>>, %arg3: memref<1x1x512xf32, #tpu.memory_space<vmem>>, %arg4: memref<1x8x512xf32, #tpu.memory_space<vmem>>) attributes {dimension_semantics = [#tpu.dimension_semantics<parallel>], iteration_bounds = array<i64: 2>, scalar_prefetch = 0 : i64, scratch_operands = 0 : i64, tpu.core_type = #tpu.core_type<tc>, window_params = [{transform_indices = @transform_0, window_bounds = array<i64: 1, 8, 4096>}, {transform_indices = @transform_1, window_bounds = array<i64: 1, 4096, 512>}, {transform_indices = @transform_2, window_bounds = array<i64: 1, 1, 512>}, {transform_indices = @transform_3, window_bounds = array<i64: 1, 8, 512>}]} {
    %c0 = arith.constant 0 : index
    %c0_0 = arith.constant 0 : index
    %c0_1 = arith.constant 0 : index
    %0 = vector.load %arg1[%c0, %c0_0, %c0_1] : memref<1x8x4096xbf16, #tpu.memory_space<vmem>>, vector<1x8x4096xbf16>
    %1 = vector.shape_cast %0 : vector<1x8x4096xbf16> to vector<8x4096xbf16>
    %c0_2 = arith.constant 0 : index
    %c0_3 = arith.constant 0 : index
    %c0_4 = arith.constant 0 : index
    %2 = vector.load %arg2[%c0_2, %c0_3, %c0_4] : memref<1x4096x512xbf16, #tpu.memory_space<vmem>>, vector<1x4096x512xbf16>
    %3 = vector.shape_cast %2 : vector<1x4096x512xbf16> to vector<4096x512xbf16>
    %cst = arith.constant dense<0.000000e+00> : vector<8x512xf32>
    %4 = tpu.matmul %1, %3, %cst {dimension_numbers = #tpu.dot_dimension_numbers<[1], [0], [0], [1], [0, 0, 1, 1], [], []>} : vector<8x4096xbf16>, vector<4096x512xbf16>, vector<8x512xf32> -> vector<8x512xf32>
    %c0_5 = arith.constant 0 : index
    %c0_6 = arith.constant 0 : index
    %c0_7 = arith.constant 0 : index
    %5 = vector.load %arg3[%c0_5, %c0_6, %c0_7] : memref<1x1x512xf32, #tpu.memory_space<vmem>>, vector<1x1x512xf32>
    %6 = vector.shape_cast %5 : vector<1x1x512xf32> to vector<1x512xf32>
    %7 = vector.broadcast %6 : vector<1x512xf32> to vector<8x512xf32>
    %8 = arith.addf %4, %7 : vector<8x512xf32>
    %cst_8 = arith.constant 0.000000e+00 : f32
    %9 = vector.broadcast %cst_8 : f32 to vector<8x512xf32>
    %10 = arith.maximumf %8, %9 : vector<8x512xf32>
    %c0_9 = arith.constant 0 : index
    %c0_10 = arith.constant 0 : index
    %c0_11 = arith.constant 0 : index
    %11 = vector.load %arg4[%c0_9, %c0_10, %c0_11] : memref<1x8x512xf32, #tpu.memory_space<vmem>>, vector<1x8x512xf32>
    %12 = vector.shape_cast %11 : vector<1x8x512xf32> to vector<8x512xf32>
    %13 = vector.shape_cast %10 : vector<8x512xf32> to vector<1x8x512xf32>
    tpu.vector_store %arg4[%c0_9, %c0_10, %c0_11], %13 {strides = array<i32>} : memref<1x8x512xf32, #tpu.memory_space<vmem>>, vector<1x8x512xf32>,
    return
  }
  func.func @transform_0(%arg0: i32) -> (i32, i32, i32) {
    %c0_i32 = arith.constant 0 : i32
    %c0_i32_0 = arith.constant 0 : i32
    %c0_i32_1 = arith.constant 0 : i32
    return %arg0, %c0_i32, %c0_i32_0 : i32, i32, i32
  }
  func.func @transform_1(%arg0: i32) -> (i32, i32, i32) {
    %c0_i32 = arith.constant 0 : i32
    %c0_i32_0 = arith.constant 0 : i32
    %c0_i32_1 = arith.constant 0 : i32
    return %arg0, %c0_i32, %c0_i32_0 : i32, i32, i32
  }
  func.func @transform_2(%arg0: i32) -> (i32, i32, i32) {
    %c0_i32 = arith.constant 0 : i32
    %c0_i32_0 = arith.constant 0 : i32
    %c0_i32_1 = arith.constant 0 : i32
    return %arg0, %c0_i32, %c0_i32_0 : i32, i32, i32
  }
  func.func @transform_3(%arg0: i32) -> (i32, i32, i32) {
    %c0_i32 = arith.constant 0 : i32
    %c0_i32_0 = arith.constant 0 : i32
    %c0_i32_1 = arith.constant 0 : i32
    return %arg0, %c0_i32, %c0_i32_0 : i32, i32, i32
  }
}

module attributes {stable_mosaic.version = 11 : i64} {
  func.func @hop_chain_kernel(%arg0: i32, %arg1: memref<1x8x512xf32, #tpu.memory_space<vmem>>, %arg2: memref<1x32x128xf32, #tpu.memory_space<vmem>>, %arg3: memref<1x32x128xf32, #tpu.memory_space<vmem>>, %arg4: memref<1x32x128xf32, #tpu.memory_space<vmem>>, %arg5: memref<32x16xf32, #tpu.memory_space<vmem>>, %arg6: memref<16x16xf32, #tpu.memory_space<vmem>>, %arg7: memref<128x8xf32, #tpu.memory_space<vmem>>, %arg8: memref<8x128xf32, #tpu.memory_space<vmem>>, %arg9: memref<128x16xf32, #tpu.memory_space<vmem>>, %arg10: memref<16x128xf32, #tpu.memory_space<vmem>>, %arg11: memref<8x128xf32, #tpu.memory_space<vmem>>, %arg12: memref<32x16xf32, #tpu.memory_space<vmem>>, %arg13: memref<8x16xf32, #tpu.memory_space<vmem>>) attributes {dimension_semantics = [#tpu.dimension_semantics<arbitrary>], iteration_bounds = array<i64: 2>, scalar_prefetch = 0 : i64, scratch_operands = 2 : i64, tpu.core_type = #tpu.core_type<tc>, window_params = [{transform_indices = @transform_0, window_bounds = array<i64: 1, 8, 512>}, {transform_indices = @transform_1, window_bounds = array<i64: 1, 32, 128>}, {transform_indices = @transform_2, window_bounds = array<i64: 1, 32, 128>}, {transform_indices = @transform_3, window_bounds = array<i64: 1, 32, 128>}, {pipeline_mode = #tpu.pipeline_mode<synchronous>, transform_indices = @transform_4, window_bounds = array<i64: 32, 16>}, {pipeline_mode = #tpu.pipeline_mode<synchronous>, transform_indices = @transform_5, window_bounds = array<i64: 16, 16>}, {pipeline_mode = #tpu.pipeline_mode<synchronous>, transform_indices = @transform_6, window_bounds = array<i64: 128, 8>}, {pipeline_mode = #tpu.pipeline_mode<synchronous>, transform_indices = @transform_7, window_bounds = array<i64: 8, 128>}, {pipeline_mode = #tpu.pipeline_mode<synchronous>, transform_indices = @transform_8, window_bounds = array<i64: 128, 16>}, {pipeline_mode = #tpu.pipeline_mode<synchronous>, transform_indices = @transform_9, window_bounds = array<i64: 16, 128>}, {pipeline_mode = #tpu.pipeline_mode<synchronous>, transform_indices = @transform_10, window_bounds = array<i64: 8, 128>}]} {
    %c0_i32 = arith.constant 0 : i32
    %0 = arith.cmpi eq, %arg0, %c0_i32 : i32
    %1 = arith.extui %0 : i1 to i32
    %c0_i32_0 = arith.constant 0 : i32
    %2 = arith.cmpi ne, %1, %c0_i32_0 : i32
    scf.if %2 {
      %c0_43 = arith.constant 0 : index
      %c0_44 = arith.constant 0 : index
      %98 = vector.load %arg5[%c0_43, %c0_44] : memref<32x16xf32, #tpu.memory_space<vmem>>, vector<32x16xf32>
      %c0_45 = arith.constant 0 : index
      %c0_46 = arith.constant 0 : index
      %99 = vector.load %arg12[%c0_45, %c0_46] : memref<32x16xf32, #tpu.memory_space<vmem>>, vector<32x16xf32>
      tpu.vector_store %arg12[%c0_45, %c0_46], %98 {strides = array<i32>} : memref<32x16xf32, #tpu.memory_space<vmem>>, vector<32x16xf32>,
      %cst_47 = arith.constant 0.000000e+00 : f32
      %100 = vector.broadcast %cst_47 : f32 to vector<8x16xf32>
      %c0_48 = arith.constant 0 : index
      %c0_49 = arith.constant 0 : index
      %101 = vector.load %arg13[%c0_48, %c0_49] : memref<8x16xf32, #tpu.memory_space<vmem>>, vector<8x16xf32>
      tpu.vector_store %arg13[%c0_48, %c0_49], %100 {strides = array<i32>} : memref<8x16xf32, #tpu.memory_space<vmem>>, vector<8x16xf32>,
    } else {
    }
    %c0 = arith.constant 0 : index
    %c0_1 = arith.constant 0 : index
    %c0_2 = arith.constant 0 : index
    %3 = vector.load %arg1[%c0, %c0_1, %c0_2] : memref<1x8x512xf32, #tpu.memory_space<vmem>>, vector<1x8x512xf32>
    %4 = vector.shape_cast %3 : vector<1x8x512xf32> to vector<8x512xf32>
    %c0_3 = arith.constant 0 : index
    %c0_4 = arith.constant 0 : index
    %c0_5 = arith.constant 0 : index
    %5 = vector.load %arg2[%c0_3, %c0_4, %c0_5] : memref<1x32x128xf32, #tpu.memory_space<vmem>>, vector<1x32x128xf32>
    %6 = vector.shape_cast %5 : vector<1x32x128xf32> to vector<32x128xf32>
    %c0_6 = arith.constant 0 : index
    %c0_7 = arith.constant 0 : index
    %c0_8 = arith.constant 0 : index
    %7 = vector.load %arg3[%c0_6, %c0_7, %c0_8] : memref<1x32x128xf32, #tpu.memory_space<vmem>>, vector<1x32x128xf32>
    %8 = vector.shape_cast %7 : vector<1x32x128xf32> to vector<32x128xf32>
    %c0_9 = arith.constant 0 : index
    %c0_10 = arith.constant 0 : index
    %c0_11 = arith.constant 0 : index
    %9 = vector.load %arg4[%c0_9, %c0_10, %c0_11] : memref<1x32x128xf32, #tpu.memory_space<vmem>>, vector<1x32x128xf32>
    %10 = vector.shape_cast %9 : vector<1x32x128xf32> to vector<32x128xf32>
    %c0_12 = arith.constant 0 : index
    %c0_13 = arith.constant 0 : index
    %11 = vector.load %arg12[%c0_12, %c0_13] : memref<32x16xf32, #tpu.memory_space<vmem>>, vector<32x16xf32>
    %12 = vector.extract_strided_slice %4 {offsets = [0, 0], sizes = [8, 128], strides = [1, 1]} : vector<8x512xf32> to vector<8x128xf32>
    %13 = vector.extract_strided_slice %4 {offsets = [0, 128], sizes = [8, 128], strides = [1, 1]} : vector<8x512xf32> to vector<8x128xf32>
    %14 = vector.extract_strided_slice %4 {offsets = [0, 256], sizes = [8, 128], strides = [1, 1]} : vector<8x512xf32> to vector<8x128xf32>
    %15 = vector.extract_strided_slice %4 {offsets = [0, 384], sizes = [8, 128], strides = [1, 1]} : vector<8x512xf32> to vector<8x128xf32>
    %16 = tpu.concatenate %12, %13, %14, %15 in 0 : vector<8x128xf32>, vector<8x128xf32>, vector<8x128xf32>, vector<8x128xf32> -> vector<32x128xf32>
    %17 = arith.mulf %16, %6 : vector<32x128xf32>
    %18 = vector.extract_strided_slice %17 {offsets = [0, 0], sizes = [8, 128], strides = [1, 1]} : vector<32x128xf32> to vector<8x128xf32>
    %19 = vector.extract_strided_slice %17 {offsets = [8, 0], sizes = [8, 128], strides = [1, 1]} : vector<32x128xf32> to vector<8x128xf32>
    %20 = vector.extract_strided_slice %17 {offsets = [16, 0], sizes = [8, 128], strides = [1, 1]} : vector<32x128xf32> to vector<8x128xf32>
    %21 = vector.extract_strided_slice %17 {offsets = [24, 0], sizes = [8, 128], strides = [1, 1]} : vector<32x128xf32> to vector<8x128xf32>
    %22 = vector.extract_strided_slice %8 {offsets = [0, 0], sizes = [8, 128], strides = [1, 1]} : vector<32x128xf32> to vector<8x128xf32>
    %23 = vector.extract_strided_slice %8 {offsets = [8, 0], sizes = [8, 128], strides = [1, 1]} : vector<32x128xf32> to vector<8x128xf32>
    %24 = vector.extract_strided_slice %8 {offsets = [16, 0], sizes = [8, 128], strides = [1, 1]} : vector<32x128xf32> to vector<8x128xf32>
    %25 = vector.extract_strided_slice %8 {offsets = [24, 0], sizes = [8, 128], strides = [1, 1]} : vector<32x128xf32> to vector<8x128xf32>
    %26 = arith.mulf %18, %22 : vector<8x128xf32>
    %27 = arith.mulf %19, %23 : vector<8x128xf32>
    %cst = arith.constant 0.000000e+00 : f32
    %28 = vector.broadcast %cst : f32 to vector<8x128xf32>
    %29 = arith.subf %28, %27 : vector<8x128xf32>
    %30 = arith.addf %26, %29 : vector<8x128xf32>
    %31 = arith.mulf %20, %24 : vector<8x128xf32>
    %cst_14 = arith.constant 0.000000e+00 : f32
    %32 = vector.broadcast %cst_14 : f32 to vector<8x128xf32>
    %33 = arith.subf %32, %31 : vector<8x128xf32>
    %34 = arith.addf %30, %33 : vector<8x128xf32>
    %35 = arith.mulf %21, %25 : vector<8x128xf32>
    %cst_15 = arith.constant 0.000000e+00 : f32
    %36 = vector.broadcast %cst_15 : f32 to vector<8x128xf32>
    %37 = arith.subf %36, %35 : vector<8x128xf32>
    %38 = arith.addf %34, %37 : vector<8x128xf32>
    %39 = arith.mulf %18, %23 : vector<8x128xf32>
    %40 = arith.mulf %19, %22 : vector<8x128xf32>
    %41 = arith.addf %39, %40 : vector<8x128xf32>
    %42 = arith.mulf %20, %25 : vector<8x128xf32>
    %43 = arith.addf %41, %42 : vector<8x128xf32>
    %44 = arith.mulf %21, %24 : vector<8x128xf32>
    %cst_16 = arith.constant 0.000000e+00 : f32
    %45 = vector.broadcast %cst_16 : f32 to vector<8x128xf32>
    %46 = arith.subf %45, %44 : vector<8x128xf32>
    %47 = arith.addf %43, %46 : vector<8x128xf32>
    %48 = arith.mulf %18, %24 : vector<8x128xf32>
    %49 = arith.mulf %19, %25 : vector<8x128xf32>
    %cst_17 = arith.constant 0.000000e+00 : f32
    %50 = vector.broadcast %cst_17 : f32 to vector<8x128xf32>
    %51 = arith.subf %50, %49 : vector<8x128xf32>
    %52 = arith.addf %48, %51 : vector<8x128xf32>
    %53 = arith.mulf %20, %22 : vector<8x128xf32>
    %54 = arith.addf %52, %53 : vector<8x128xf32>
    %55 = arith.mulf %21, %23 : vector<8x128xf32>
    %56 = arith.addf %54, %55 : vector<8x128xf32>
    %57 = arith.mulf %18, %25 : vector<8x128xf32>
    %58 = arith.mulf %19, %24 : vector<8x128xf32>
    %59 = arith.addf %57, %58 : vector<8x128xf32>
    %60 = arith.mulf %20, %23 : vector<8x128xf32>
    %cst_18 = arith.constant 0.000000e+00 : f32
    %61 = vector.broadcast %cst_18 : f32 to vector<8x128xf32>
    %62 = arith.subf %61, %60 : vector<8x128xf32>
    %63 = arith.addf %59, %62 : vector<8x128xf32>
    %64 = arith.mulf %21, %22 : vector<8x128xf32>
    %65 = arith.addf %63, %64 : vector<8x128xf32>
    %66 = tpu.concatenate %38, %47, %56, %65 in 0 : vector<8x128xf32>, vector<8x128xf32>, vector<8x128xf32>, vector<8x128xf32> -> vector<32x128xf32>
    %c0_19 = arith.constant 0 : index
    %c0_20 = arith.constant 0 : index
    %67 = vector.load %arg10[%c0_19, %c0_20] : memref<16x128xf32, #tpu.memory_space<vmem>>, vector<16x128xf32>
    %cst_21 = arith.constant dense<0.000000e+00> : vector<32x128xf32>
    %68 = tpu.matmul %11, %67, %cst_21 {dimension_numbers = #tpu.dot_dimension_numbers<[1], [0], [0], [1], [0, 0, 1, 1], [], []>} : vector<32x16xf32>, vector<16x128xf32>, vector<32x128xf32> -> vector<32x128xf32>
    %69 = arith.mulf %66, %68 : vector<32x128xf32>
    %c0_22 = arith.constant 0 : index
    %c0_23 = arith.constant 0 : index
    %70 = vector.load %arg7[%c0_22, %c0_23] : memref<128x8xf32, #tpu.memory_space<vmem>>, vector<128x8xf32>
    %cst_24 = arith.constant dense<0.000000e+00> : vector<32x8xf32>
    %71 = tpu.matmul %69, %70, %cst_24 {dimension_numbers = #tpu.dot_dimension_numbers<[1], [0], [0], [1], [0, 0, 1, 1], [], []>} : vector<32x128xf32>, vector<128x8xf32>, vector<32x8xf32> -> vector<32x8xf32>
    %cst_25 = arith.constant dense<0xFF800000> : vector<32xf32>
    %72 = vector.multi_reduction <maximumf>, %71, %cst_25 [1] : vector<32x8xf32> to vector<32xf32>
    %73 = vector.shape_cast %72 : vector<32xf32> to vector<32x1xf32>
    %74 = vector.broadcast %73 : vector<32x1xf32> to vector<32x8xf32>
    %75 = arith.subf %71, %74 : vector<32x8xf32>
    %76 = math.exp %75 : vector<32x8xf32>
    %cst_26 = arith.constant dense<0.000000e+00> : vector<32xf32>
    %77 = vector.multi_reduction <add>, %76, %cst_26 [1] : vector<32x8xf32> to vector<32xf32>
    %78 = vector.shape_cast %77 : vector<32xf32> to vector<32x1xf32>
    %79 = tpu.reciprocal %78 : vector<32x1xf32> -> vector<32x1xf32>
    %80 = vector.broadcast %79 : vector<32x1xf32> to vector<32x8xf32>
    %81 = arith.mulf %76, %80 : vector<32x8xf32>
    %c0_27 = arith.constant 0 : index
    %c0_28 = arith.constant 0 : index
    %82 = vector.load %arg8[%c0_27, %c0_28] : memref<8x128xf32, #tpu.memory_space<vmem>>, vector<8x128xf32>
    %cst_29 = arith.constant dense<0.000000e+00> : vector<32x128xf32>
    %83 = tpu.matmul %81, %82, %cst_29 {dimension_numbers = #tpu.dot_dimension_numbers<[1], [0], [0], [1], [0, 0, 1, 1], [], []>} : vector<32x8xf32>, vector<8x128xf32>, vector<32x128xf32> -> vector<32x128xf32>
    %84 = arith.mulf %83, %10 : vector<32x128xf32>
    %c0_30 = arith.constant 0 : index
    %c0_31 = arith.constant 0 : index
    %85 = vector.load %arg9[%c0_30, %c0_31] : memref<128x16xf32, #tpu.memory_space<vmem>>, vector<128x16xf32>
    %cst_32 = arith.constant dense<0.000000e+00> : vector<32x16xf32>
    %86 = tpu.matmul %84, %85, %cst_32 {dimension_numbers = #tpu.dot_dimension_numbers<[1], [0], [0], [1], [0, 0, 1, 1], [], []>} : vector<32x128xf32>, vector<128x16xf32>, vector<32x16xf32> -> vector<32x16xf32>
    %c0_33 = arith.constant 0 : index
    %c0_34 = arith.constant 0 : index
    %87 = vector.load %arg13[%c0_33, %c0_34] : memref<8x16xf32, #tpu.memory_space<vmem>>, vector<8x16xf32>
    %88 = vector.extract_strided_slice %86 {offsets = [0, 0], sizes = [8, 16], strides = [1, 1]} : vector<32x16xf32> to vector<8x16xf32>
    %89 = arith.addf %87, %88 : vector<8x16xf32>
    %c0_35 = arith.constant 0 : index
    %c0_36 = arith.constant 0 : index
    %90 = vector.load %arg13[%c0_35, %c0_36] : memref<8x16xf32, #tpu.memory_space<vmem>>, vector<8x16xf32>
    tpu.vector_store %arg13[%c0_35, %c0_36], %89 {strides = array<i32>} : memref<8x16xf32, #tpu.memory_space<vmem>>, vector<8x16xf32>,
    %91 = arith.addf %11, %86 : vector<32x16xf32>
    %c0_37 = arith.constant 0 : index
    %c0_38 = arith.constant 0 : index
    %92 = vector.load %arg6[%c0_37, %c0_38] : memref<16x16xf32, #tpu.memory_space<vmem>>, vector<16x16xf32>
    %cst_39 = arith.constant dense<0.000000e+00> : vector<32x16xf32>
    %93 = tpu.matmul %91, %92, %cst_39 {dimension_numbers = #tpu.dot_dimension_numbers<[1], [0], [0], [1], [0, 0, 1, 1], [], []>} : vector<32x16xf32>, vector<16x16xf32>, vector<32x16xf32> -> vector<32x16xf32>
    %c0_40 = arith.constant 0 : index
    %c0_41 = arith.constant 0 : index
    %94 = vector.load %arg12[%c0_40, %c0_41] : memref<32x16xf32, #tpu.memory_space<vmem>>, vector<32x16xf32>
    tpu.vector_store %arg12[%c0_40, %c0_41], %93 {strides = array<i32>} : memref<32x16xf32, #tpu.memory_space<vmem>>, vector<32x16xf32>,
    %c1_i32 = arith.constant 1 : i32
    %95 = arith.cmpi eq, %arg0, %c1_i32 : i32
    %96 = arith.extui %95 : i1 to i32
    %c0_i32_42 = arith.constant 0 : i32
    %97 = arith.cmpi ne, %96, %c0_i32_42 : i32
    scf.if %97 {
      %c0_43 = arith.constant 0 : index
      %c0_44 = arith.constant 0 : index
      %98 = vector.load %arg12[%c0_43, %c0_44] : memref<32x16xf32, #tpu.memory_space<vmem>>, vector<32x16xf32>
      %99 = vector.extract_strided_slice %98 {offsets = [0, 0], sizes = [8, 16], strides = [1, 1]} : vector<32x16xf32> to vector<8x16xf32>
      %100 = vector.extract_strided_slice %98 {offsets = [8, 0], sizes = [8, 16], strides = [1, 1]} : vector<32x16xf32> to vector<8x16xf32>
      %101 = arith.addf %99, %100 : vector<8x16xf32>
      %102 = vector.extract_strided_slice %98 {offsets = [16, 0], sizes = [8, 16], strides = [1, 1]} : vector<32x16xf32> to vector<8x16xf32>
      %103 = arith.addf %101, %102 : vector<8x16xf32>
      %104 = vector.extract_strided_slice %98 {offsets = [24, 0], sizes = [8, 16], strides = [1, 1]} : vector<32x16xf32> to vector<8x16xf32>
      %105 = arith.addf %103, %104 : vector<8x16xf32>
      %c0_45 = arith.constant 0 : index
      %c0_46 = arith.constant 0 : index
      %106 = vector.load %arg13[%c0_45, %c0_46] : memref<8x16xf32, #tpu.memory_space<vmem>>, vector<8x16xf32>
      %107 = arith.mulf %105, %106 : vector<8x16xf32>
      %cst_47 = arith.constant dense<0.000000e+00> : vector<8xf32>
      %108 = vector.multi_reduction <add>, %107, %cst_47 [1] : vector<8x16xf32> to vector<8xf32>
      %109 = vector.shape_cast %108 : vector<8xf32> to vector<8x1xf32>
      %110 = arith.negf %109 : vector<8x1xf32>
      %111 = math.exp %110 : vector<8x1xf32>
      %cst_48 = arith.constant 1.000000e+00 : f32
      %112 = vector.broadcast %cst_48 : f32 to vector<8x1xf32>
      %113 = arith.addf %112, %111 : vector<8x1xf32>
      %114 = arith.divf %112, %113 : vector<8x1xf32>
      %115 = vector.shape_cast %114 : vector<8x1xf32> to vector<8x1xf32>
      %116 = vector.broadcast %115 : vector<8x1xf32> to vector<8x128xf32>
      %c0_49 = arith.constant 0 : index
      %c0_50 = arith.constant 0 : index
      %117 = vector.load %arg11[%c0_49, %c0_50] : memref<8x128xf32, #tpu.memory_space<vmem>>, vector<8x128xf32>
      tpu.vector_store %arg11[%c0_49, %c0_50], %116 {strides = array<i32>} : memref<8x128xf32, #tpu.memory_space<vmem>>, vector<8x128xf32>,
    } else {
    }
    return
  }
  func.func @transform_0(%arg0: i32) -> (i32, i32, i32) {
    %c0_i32 = arith.constant 0 : i32
    %c0_i32_0 = arith.constant 0 : i32
    %c0_i32_1 = arith.constant 0 : i32
    return %arg0, %c0_i32, %c0_i32_0 : i32, i32, i32
  }
  func.func @transform_1(%arg0: i32) -> (i32, i32, i32) {
    %c0_i32 = arith.constant 0 : i32
    %c0_i32_0 = arith.constant 0 : i32
    %c0_i32_1 = arith.constant 0 : i32
    return %arg0, %c0_i32, %c0_i32_0 : i32, i32, i32
  }
  func.func @transform_2(%arg0: i32) -> (i32, i32, i32) {
    %c0_i32 = arith.constant 0 : i32
    %c0_i32_0 = arith.constant 0 : i32
    %c0_i32_1 = arith.constant 0 : i32
    return %arg0, %c0_i32, %c0_i32_0 : i32, i32, i32
  }
  func.func @transform_3(%arg0: i32) -> (i32, i32, i32) {
    %c0_i32 = arith.constant 0 : i32
    %c0_i32_0 = arith.constant 0 : i32
    %c0_i32_1 = arith.constant 0 : i32
    return %arg0, %c0_i32, %c0_i32_0 : i32, i32, i32
  }
  func.func @transform_4(%arg0: i32) -> (i32, i32) {
    %c0_i32 = arith.constant 0 : i32
    %c0_i32_0 = arith.constant 0 : i32
    %c0_i32_1 = arith.constant 0 : i32
    return %c0_i32, %c0_i32_0 : i32, i32
  }
  func.func @transform_5(%arg0: i32) -> (i32, i32) {
    %c0_i32 = arith.constant 0 : i32
    %c0_i32_0 = arith.constant 0 : i32
    %c0_i32_1 = arith.constant 0 : i32
    return %c0_i32, %c0_i32_0 : i32, i32
  }
  func.func @transform_6(%arg0: i32) -> (i32, i32) {
    %c0_i32 = arith.constant 0 : i32
    %c0_i32_0 = arith.constant 0 : i32
    %c0_i32_1 = arith.constant 0 : i32
    return %c0_i32, %c0_i32_0 : i32, i32
  }
  func.func @transform_7(%arg0: i32) -> (i32, i32) {
    %c0_i32 = arith.constant 0 : i32
    %c0_i32_0 = arith.constant 0 : i32
    %c0_i32_1 = arith.constant 0 : i32
    return %c0_i32, %c0_i32_0 : i32, i32
  }
  func.func @transform_8(%arg0: i32) -> (i32, i32) {
    %c0_i32 = arith.constant 0 : i32
    %c0_i32_0 = arith.constant 0 : i32
    %c0_i32_1 = arith.constant 0 : i32
    return %c0_i32, %c0_i32_0 : i32, i32
  }
  func.func @transform_9(%arg0: i32) -> (i32, i32) {
    %c0_i32 = arith.constant 0 : i32
    %c0_i32_0 = arith.constant 0 : i32
    %c0_i32_1 = arith.constant 0 : i32
    return %c0_i32, %c0_i32_0 : i32, i32
  }
  func.func @transform_10(%arg0: i32) -> (i32, i32) {
    %c0_i32 = arith.constant 0 : i32
    %c0_i32_0 = arith.constant 0 : i32
    %c0_i32_1 = arith.constant 0 : i32
    return %c0_i32, %c0_i32_0 : i32, i32
  }
}

</mosaic_0001>

<bundles_post_ra>
// kernel: forward.3
= control target key start
LH: loop header
LB: loop body
LE: loop exit
PB: predicated region body
PF: predicated region fallthrough
CT: control target
= control target key end

     0   :  { %s3012_s12 = smov 0   ;;  %s3568_s0 = inlined_call_operand.vmem [shape: bf16[2,1024,80], index: 0, kind: input, shape index: {}]   ;;  %s3569_s1 = inlined_call_operand.vmem [shape: bf16[2,80,32], index: 1, kind: input, shape index: {}]   ;;  %s3570_s2 = inlined_call_operand.vmem [shape: f32[2,1,32], index: 2, kind: input, shape index: {}]   ;;  %s3571_s3 = inlined_call_operand.vmem [shape: bf16[2,1024,32], index: 3, kind: output, shape index: {}]  }
   0x1 LB: > { %s2284_s13 = sadd.s32 4294967295, %s2990_s12   ;;  %p2288_p0 = scmp.ge.s32.totalorder %s2990_s12, 1  ;;  %s2990_s12 = sphi %s3012_s12, %s13_s12  }
   0x2   : > { %p155_p1 = scmp.lt.s32.totalorder %s2990_s12, 3 }
   0x4   : > { %p156_p2 = pnand %p2288_p0, %p155_p1 }
   0x5   : > { %p187_p3 = scmp.lt.s32.totalorder (!%p156_p2), %s2284_s13, 1  ;;  %vm701_vm0 = vcmask (!%p156_p2), 654336   ;;  %vm2079_vm1 = vcmask (!%p156_p2), 257024  }
   0x6   : > { %159 = sbr.rel (%p156_p2) target bundleno = 380 (0x17c), region = 32 }
   0xd   : > { %s3573_s13 = smov (!%p187_p3, %s2284_s13), 1 }
   0xe   : > { %s2558_s14 = sshll.u32 %s3573_s13, 9  ;;  %s2905_s15 = smul.u32 40, %s3573_s13 }
   0xf   : > { %s3029_s18 = scalar_lea.vmem %s3568_s0, %s2558_s14  ;;  %s3166_s24 = scalar_lea.vmem %s3570_s2, %s3573_s13 }
  0x10   : > { %s196_s21 = scalar_lea.vmem %s3569_s1, %s2905_s15  ;;  %v2919_v3 = vld [vmem:[%s3029_s18] sm:$0xff]   ;;  %v2921_v7 = vld [vmem:[%s3029_s18 + $0x8] sm:$0xff]   ;;  %v2923_v9 = vld [vmem:[%s3029_s18 + $0x10] sm:$0xff]   ;;  %s3182_s27 = scalar_lea.vmem %s3571_s3, %s2558_s14 }
  0x11   : > { %v2914_v0 = vld [vmem:[%s196_s21] sm:$0xff]   ;;  %v2915_v1 = vld [vmem:[%s196_s21 + $0x8] sm:$0xff]   ;;  %v2916_v2 = vld [vmem:[%s196_s21 + $0x10] sm:$0xff]   ;;  %2767 = vmatprep.mubr.msk.bf16.mxu0 %vm701_vm0, %v2919_v3 }
  0x12   : > { %2757 = vmatprep.subr.bf16.mxu0 %v2914_v0  ;;  %2895 = vmatprep.subr.bf16.mxu1 %v2914_v0  ;;  %v2920_v4 = vld [vmem:[%s3029_s18 + $0x100] sm:$0xff]   ;;  %v2917_v5 = vld [vmem:[%s196_s21 + $0x18] sm:$0xff]   ;;  %v2922_v8 = vld [vmem:[%s3029_s18 + $0x108] sm:$0xff]  }
  0x13   : > { %2758 = vmatpush3.bf16.msra.mxu0 %v2914_v0  ;;  %2900 = vmatpush3.bf16.msra.mxu1 %v2914_v0  ;;  %v2918_v6 = vld [vmem:[%s196_s21 + $0x20] sm:$0xff]   ;;  %v2924_v10 = vld [vmem:[%s3029_s18 + $0x110] sm:$0xff]   ;;  %v2925_v11 = vld [vmem:[%s3029_s18 + $0x18] sm:$0xff]  }
  0x14   : > { %2759 = vmatprep.subr.bf16.mxu0 %v2915_v1  ;;  %2896 = vmatprep.subr.bf16.mxu1 %v2915_v1  ;;  %v2926_v12 = vld [vmem:[%s3029_s18 + $0x118] sm:$0xff]   ;;  %v2927_v13 = vld [vmem:[%s3029_s18 + $0x20] sm:$0xff]   ;;  %v2929_v15 = vld [vmem:[%s3029_s18 + $0x28] sm:$0xff]  }
  0x15   : > { %2831 = vmatprep.mubr.msk.bf16.mxu1 %vm701_vm0, %v2920_v4  ;;  %v2928_v14 = vld [vmem:[%s3029_s18 + $0x120] sm:$0xff]   ;;  %v2930_v16 = vld [vmem:[%s3029_s18 + $0x128] sm:$0xff]   ;;  %v2931_v17 = vld [vmem:[%s3029_s18 + $0x30] sm:$0xff]  }
  0x16   : > { %v2932_v18 = vld [vmem:[%s3029_s18 + $0x130] sm:$0xff]   ;;  %v2933_v19 = vld [vmem:[%s3029_s18 + $0x38] sm:$0xff]   ;;  %v2935_v21 = vld [vmem:[%s3029_s18 + $0x40] sm:$0xff]  }
  0x17   : > { %2760 = vmatpush3.bf16.msra.mxu0 %v2915_v1  ;;  %2901 = vmatpush3.bf16.msra.mxu1 %v2915_v1  ;;  %v2934_v20 = vld [vmem:[%s3029_s18 + $0x138] sm:$0xff]   ;;  %v2936_v22 = vld [vmem:[%s3029_s18 + $0x140] sm:$0xff]   ;;  %v2937_v23 = vld [vmem:[%s3029_s18 + $0x48] sm:$0xff]  }
  0x18   : > { %2761 = vmatprep.subr.bf16.mxu0 %v2916_v2  ;;  %2897 = vmatprep.subr.bf16.mxu1 %v2916_v2  ;;  %v2938_v24 = vld [vmem:[%s3029_s18 + $0x148] sm:$0xff]   ;;  %v2939_v25 = vld [vmem:[%s3029_s18 + $0x50] sm:$0xff]   ;;  %v2941_v27 = vld [vmem:[%s3029_s18 + $0x58] sm:$0xff]  }
  0x19   : > { %v2940_v26 = vld [vmem:[%s3029_s18 + $0x150] sm:$0xff]   ;;  %v2942_v28 = vld [vmem:[%s3029_s18 + $0x158] sm:$0xff]   ;;  %v2943_v29 = vld [vmem:[%s3029_s18 + $0x60] sm:$0xff]  }
  0x1a   : > { %v2944_v30 = vld [vmem:[%s3029_s18 + $0x160] sm:$0xff]   ;;  %v2945_v31 = vld [vmem:[%s3029_s18 + $0x68] sm:$0xff]   ;;  %v2947_v33 = vld [vmem:[%s3029_s18 + $0x70] sm:$0xff]  }
  0x1b   : > { %2762 = vmatpush3.bf16.msra.mxu0 %v2916_v2  ;;  %2902 = vmatpush3.bf16.msra.mxu1 %v2916_v2  ;;  %v2946_v32 = vld [vmem:[%s3029_s18 + $0x168] sm:$0xff]   ;;  %v2948_v34 = vld [vmem:[%s3029_s18 + $0x170] sm:$0xff]   ;;  %v2949_v35 = vld [vmem:[%s3029_s18 + $0x78] sm:$0xff]  }
  0x1c   : > { %2763 = vmatprep.subr.bf16.mxu0 %v2917_v5  ;;  %2898 = vmatprep.subr.bf16.mxu1 %v2917_v5  ;;  %v2950_v36 = vld [vmem:[%s3029_s18 + $0x178] sm:$0xff]   ;;  %v2951_v37 = vld [vmem:[%s3029_s18 + $0x80] sm:$0xff]   ;;  %v2953_v39 = vld [vmem:[%s3029_s18 + $0x88] sm:$0xff]  }
  0x1d   : > { %v2952_v38 = vld [vmem:[%s3029_s18 + $0x180] sm:$0xff]   ;;  %v2954_v40 = vld [vmem:[%s3029_s18 + $0x188] sm:$0xff]   ;;  %v2955_v41 = vld [vmem:[%s3029_s18 + $0x90] sm:$0xff]  }
  0x1e   : > { %v2956_v42 = vld [vmem:[%s3029_s18 + $0x190] sm:$0xff]   ;;  %v2957_v43 = vld [vmem:[%s3029_s18 + $0x98] sm:$0xff]   ;;  %v2959_v45 = vld [vmem:[%s3029_s18 + $0xa0] sm:$0xff]  }
  0x1f   : > { %2764 = vmatpush3.bf16.msra.mxu0 %v2917_v5  ;;  %2903 = vmatpush3.bf16.msra.mxu1 %v2917_v5  ;;  %v2958_v44 = vld [vmem:[%s3029_s18 + $0x198] sm:$0xff]   ;;  %v2960_v46 = vld [vmem:[%s3029_s18 + $0x1a0] sm:$0xff]   ;;  %v2961_v47 = vld [vmem:[%s3029_s18 + $0xa8] sm:$0xff]  }
  0x20   : > { %2765 = vmatprep.subr.bf16.mxu0 %v2918_v6  ;;  %2899 = vmatprep.subr.bf16.mxu1 %v2918_v6  ;;  %v2962_v48 = vld [vmem:[%s3029_s18 + $0x1a8] sm:$0xff]   ;;  %v2963_v49 = vld [vmem:[%s3029_s18 + $0xb0] sm:$0xff]   ;;  %v2965_v51 = vld [vmem:[%s3029_s18 + $0xb8] sm:$0xff]  }
  0x21   : > { %v2964_v50 = vld [vmem:[%s3029_s18 + $0x1b0] sm:$0xff]   ;;  %v2966_v52 = vld [vmem:[%s3029_s18 + $0x1b8] sm:$0xff]   ;;  %v2967_v53 = vld [vmem:[%s3029_s18 + $0xc0] sm:$0xff]  }
  0x22   : > { %v2968_v54 = vld [vmem:[%s3029_s18 + $0x1c0] sm:$0xff]   ;;  %v2969_v55 = vld [vmem:[%s3029_s18 + $0xc8] sm:$0xff]   ;;  %v2971_v57 = vld [vmem:[%s3029_s18 + $0xd0] sm:$0xff]  }
  0x23   : > { %2766 = vmatpush3.bf16.msra.mxu0 %v2918_v6  ;;  %2904 = vmatpush3.bf16.msra.mxu1 %v2918_v6  ;;  %v2970_v56 = vld [vmem:[%s3029_s18 + $0x1c8] sm:$0xff]   ;;  %v2972_v58 = vld [vmem:[%s3029_s18 + $0x1d0] sm:$0xff]   ;;  %v2973_v59 = vld [vmem:[%s3029_s18 + $0xd8] sm:$0xff]  }
  0x24   : > { %v2974_v60 = vld [vmem:[%s3029_s18 + $0x1d8] sm:$0xff]   ;;  %v2975_v61 = vld [vmem:[%s3029_s18 + $0xe0] sm:$0xff]   ;;  %v2977_v63 = vld [vmem:[%s3029_s18 + $0xe8] sm:$0xff]  }
  0x25   : > { %v2976_v62 = vld [vmem:[%s3029_s18 + $0x1e0] sm:$0xff]   ;;  %v2978_v0 = vld [vmem:[%s3029_s18 + $0x1e8] sm:$0xff]   ;;  %v2979_v1 = vld [vmem:[%s3029_s18 + $0xf0] sm:$0xff]  }
  0x26   : > { %2768 = vmatmul.mubr.msk.bf16.vlgmr.msra.gmra.mrb[0].mxu0 %vm701_vm0, %v2921_v7  ;;  %2832 = vmatmul.mubr.msk.bf16.vlgmr.msra.gmra.mrb[0].mxu1 %vm701_vm0, %v2922_v8  ;;  %v2980_v2 = vld [vmem:[%s3029_s18 + $0x1f0] sm:$0xff]   ;;  %v2981_v3 = vld [vmem:[%s3029_s18 + $0xf8] sm:$0xff]   ;;  %v3169_v5 = vld [vmem:[%s3166_s24] ss:$0 sm:$0xff] }
  0x27   : > { %2771 = vmatprep.mubr.msk.bf16.mxu0 %vm701_vm0, %v2923_v9  ;;  %2835 = vmatprep.mubr.msk.bf16.mxu1 %vm701_vm0, %v2924_v10  ;;  %v2982_v4 = vld [vmem:[%s3029_s18 + $0x1f8] sm:$0xff]  }
  0x2e   : > { %2772 = vmatmul.mubr.msk.bf16.gmra.mrb[4].mxu0 %vm701_vm0, %v2925_v11  ;;  %2836 = vmatmul.mubr.msk.bf16.gmra.mrb[4].mxu1 %vm701_vm0, %v2926_v12 }
  0x2f   : > { %2775 = vmatprep.mubr.msk.bf16.mxu0 %vm701_vm0, %v2927_v13  ;;  %2839 = vmatprep.mubr.msk.bf16.mxu1 %vm701_vm0, %v2928_v14 }
  0x36   : > { %2776 = vmatmul.mubr.msk.bf16.gmra.mrb[8].mxu0 %vm701_vm0, %v2929_v15  ;;  %2840 = vmatmul.mubr.msk.bf16.gmra.mrb[8].mxu1 %vm701_vm0, %v2930_v16 }
  0x37   : > { %2779 = vmatprep.mubr.msk.bf16.mxu0 %vm701_vm0, %v2931_v17  ;;  %2843 = vmatprep.mubr.msk.bf16.mxu1 %vm701_vm0, %v2932_v18 }
  0x3e   : > { %2780 = vmatmul.mubr.msk.bf16.gmra.mrb[12].mxu0 %vm701_vm0, %v2933_v19  ;;  %2844 = vmatmul.mubr.msk.bf16.gmra.mrb[12].mxu1 %vm701_vm0, %v2934_v20 }
  0x3f   : > { %2783 = vmatprep.mubr.msk.bf16.mxu0 %vm701_vm0, %v2935_v21  ;;  %2847 = vmatprep.mubr.msk.bf16.mxu1 %vm701_vm0, %v2936_v22 }
  0x46   : > { %2784 = vmatmul.mubr.msk.bf16.gmra.mrb[16].mxu0 %vm701_vm0, %v2937_v23  ;;  %2848 = vmatmul.mubr.msk.bf16.gmra.mrb[16].mxu1 %vm701_vm0, %v2938_v24 }
  0x47   : > { %2787 = vmatprep.mubr.msk.bf16.mxu0 %vm701_vm0, %v2939_v25  ;;  %2851 = vmatprep.mubr.msk.bf16.mxu1 %vm701_vm0, %v2940_v26 }
  0x4e   : > { %2788 = vmatmul.mubr.msk.bf16.gmra.mrb[20].mxu0 %vm701_vm0, %v2941_v27  ;;  %2852 = vmatmul.mubr.msk.bf16.gmra.mrb[20].mxu1 %vm701_vm0, %v2942_v28 }
  0x4f   : > { %2791 = vmatprep.mubr.msk.bf16.mxu0 %vm701_vm0, %v2943_v29  ;;  %2855 = vmatprep.mubr.msk.bf16.mxu1 %vm701_vm0, %v2944_v30 }
  0x56   : > { %2792 = vmatmul.mubr.msk.bf16.gmra.mrb[24].mxu0 %vm701_vm0, %v2945_v31  ;;  %2856 = vmatmul.mubr.msk.bf16.gmra.mrb[24].mxu1 %vm701_vm0, %v2946_v32 }
  0x57   : > { %2795 = vmatprep.mubr.msk.bf16.mxu0 %vm701_vm0, %v2947_v33  ;;  %2859 = vmatprep.mubr.msk.bf16.mxu1 %vm701_vm0, %v2948_v34 }
  0x5e   : > { %2796 = vmatmul.mubr.msk.bf16.gmra.mrb[28].mxu0 %vm701_vm0, %v2949_v35  ;;  %2860 = vmatmul.mubr.msk.bf16.gmra.mrb[28].mxu1 %vm701_vm0, %v2950_v36 }
  0x5f   : > { %2799 = vmatprep.mubr.msk.bf16.mxu0 %vm701_vm0, %v2951_v37  ;;  %2863 = vmatprep.mubr.msk.bf16.mxu1 %vm701_vm0, %v2952_v38 }
  0x66   : > { %2800 = vmatmul.mubr.msk.bf16.gmra.mrb[32].mxu0 %vm701_vm0, %v2953_v39  ;;  %2864 = vmatmul.mubr.msk.bf16.gmra.mrb[32].mxu1 %vm701_vm0, %v2954_v40 }
  0x67   : > { %2803 = vmatprep.mubr.msk.bf16.mxu0 %vm701_vm0, %v2955_v41  ;;  %2867 = vmatprep.mubr.msk.bf16.mxu1 %vm701_vm0, %v2956_v42 }
  0x6e   : > { %2804 = vmatmul.mubr.msk.bf16.gmra.mrb[36].mxu0 %vm701_vm0, %v2957_v43  ;;  %2868 = vmatmul.mubr.msk.bf16.gmra.mrb[36].mxu1 %vm701_vm0, %v2958_v44 }
  0x6f   : > { %2807 = vmatprep.mubr.msk.bf16.mxu0 %vm701_vm0, %v2959_v45  ;;  %2871 = vmatprep.mubr.msk.bf16.mxu1 %vm701_vm0, %v2960_v46 }
  0x76   : > { %2808 = vmatmul.mubr.msk.bf16.gmra.mrb[40].mxu0 %vm701_vm0, %v2961_v47  ;;  %2872 = vmatmul.mubr.msk.bf16.gmra.mrb[40].mxu1 %vm701_vm0, %v2962_v48 }
  0x77   : > { %2811 = vmatprep.mubr.msk.bf16.mxu0 %vm701_vm0, %v2963_v49  ;;  %2875 = vmatprep.mubr.msk.bf16.mxu1 %vm701_vm0, %v2964_v50 }
  0x7e   : > { %2812 = vmatmul.mubr.msk.bf16.gmra.mrb[44].mxu0 %vm701_vm0, %v2965_v51  ;;  %2876 = vmatmul.mubr.msk.bf16.gmra.mrb[44].mxu1 %vm701_vm0, %v2966_v52 }
  0x7f   : > { %2815 = vmatprep.mubr.msk.bf16.mxu0 %vm701_vm0, %v2967_v53  ;;  %2879 = vmatprep.mubr.msk.bf16.mxu1 %vm701_vm0, %v2968_v54 }
  0x86   : > { %2816 = vmatmul.mubr.msk.bf16.gmra.mrb[48].mxu0 %vm701_vm0, %v2969_v55  ;;  %2880 = vmatmul.mubr.msk.bf16.gmra.mrb[48].mxu1 %vm701_vm0, %v2970_v56 }
  0x87   : > { %2819 = vmatprep.mubr.msk.bf16.mxu0 %vm701_vm0, %v2971_v57  ;;  %2883 = vmatprep.mubr.msk.bf16.mxu1 %vm701_vm0, %v2972_v58 }
  0x8e   : > { %2820 = vmatmul.mubr.msk.bf16.gmra.mrb[52].mxu0 %vm701_vm0, %v2973_v59  ;;  %2884 = vmatmul.mubr.msk.bf16.gmra.mrb[52].mxu1 %vm701_vm0, %v2974_v60 }
  0x8f   : > { %2823 = vmatprep.mubr.msk.bf16.mxu0 %vm701_vm0, %v2975_v61  ;;  %2887 = vmatprep.mubr.msk.bf16.mxu1 %vm701_vm0, %v2976_v62 }
  0x96   : > { %2824 = vmatmul.mubr.msk.bf16.gmra.mrb[56].mxu0 %vm701_vm0, %v2977_v63  ;;  %2888 = vmatmul.mubr.msk.bf16.gmra.mrb[56].mxu1 %vm701_vm0, %v2978_v0 }
  0x97   : > { %2827 = vmatprep.mubr.msk.bf16.mxu0 %vm701_vm0, %v2979_v1  ;;  %2891 = vmatprep.mubr.msk.bf16.mxu1 %vm701_vm0, %v2980_v2 }
  0x9e   : > { %2828 = vmatmul.mubr.msk.bf16.gmra.mrb[60].mxu0 %vm701_vm0, %v2981_v3  ;;  %2892 = vmatmul.mubr.msk.bf16.gmra.mrb[60].mxu1 %vm701_vm0, %v2982_v4 }
  0xf9   : > { %v2769_v6 = vpop.f32.mrb[0].mxu0  ;;  %v2833_v7 = vpop.f32.mrb[0].mxu1 }
  0xfa   : > { %v937_v8 = vadd.f32 %v2769_v6, %v3169_v5  ;;  %v1193_v9 = vadd.f32 %v2833_v7, %v3169_v5  ;;  %v928_v10 = vpop.f32.mrb[1].mxu0  ;;  %v1184_v11 = vpop.f32.mrb[1].mxu1 }
  0xfb   : > { %v929_v12 = vadd.f32 %v3169_v5, %v928_v10  ;;  %v1185_v13 = vadd.f32 %v3169_v5, %v1184_v11  ;;  %v2770_v14 = vpop.f32.mrb[2].mxu0  ;;  %v2834_v15 = vpop.f32.mrb[2].mxu1 }
  0xfc   : > { %v1441_v16 = vmax.f32 %v937_v8, 0.0  ;;  %v1505_v17 = vmax.f32 %v1193_v9, 0.0  ;;  %v940_v18 = vadd.f32 %v2770_v14, %v3169_v5  ;;  %v1196_v19 = vadd.f32 %v2834_v15, %v3169_v5  ;;  %v931_v20 = vpop.f32.mrb[3].mxu0  ;;  %v1187_v21 = vpop.f32.mrb[3].mxu1 }
  0xfd   : > { %v1439_v22 = vmax.f32 %v929_v12, 0.0  ;;  %v1503_v23 = vmax.f32 %v1185_v13, 0.0  ;;  %v932_v24 = vadd.f32 %v3169_v5, %v931_v20  ;;  %v1188_v25 = vadd.f32 %v3169_v5, %v1187_v21 }
  0xfe   : > { %v2562_v26 = vpack.c.bf16 %v1441_v16, %v1441_v16  ;;  %v2626_v27 = vpack.c.bf16 %v1505_v17, %v1505_v17  ;;  %v1442_v28 = vmax.f32 %v940_v18, 0.0  ;;  %v1506_v29 = vmax.f32 %v1196_v19, 0.0 }
  0xff   : > { %v2560_v30 = vpack.c.bf16 %v1439_v22, %v1439_v22  ;;  %v2624_v31 = vpack.c.bf16 %v1503_v23, %v1503_v23  ;;  %v1440_v32 = vmax.f32 %v932_v24, 0.0  ;;  %v1504_v33 = vmax.f32 %v1188_v25, 0.0 }
 0x100   : > { %2082 = vst.msk [vmem:[%s3182_s27 + $0x8] sm:$0xf] %vm2079_vm1, %v2562_v26  ;;  %2146 = vst.msk [vmem:[%s3182_s27 + $0x108] sm:$0xf] %vm2079_vm1, %v2626_v27  ;;  %v2563_v34 = vpack.c.bf16 %v1442_v28, %v1442_v28  ;;  %v2627_v35 = vpack.c.bf16 %v1506_v29, %v1506_v29 }
 0x101   : > { %2080 = vst.msk [vmem:[%s3182_s27] sm:$0xf] %vm2079_vm1, %v2560_v30  ;;  %2144 = vst.msk [vmem:[%s3182_s27 + $0x100] sm:$0xf] %vm2079_vm1, %v2624_v31  ;;  %v2561_v36 = vpack.c.bf16 %v1440_v32, %v1440_v32  ;;  %v2625_v37 = vpack.c.bf16 %v1504_v33, %v1504_v33  ;;  %v2773_v38 = vpop.f32.mrb[4].mxu0  ;;  %v2837_v39 = vpop.f32.mrb[4].mxu1 }
 0x102   : > { %2083 = vst.msk [vmem:[%s3182_s27 + $0xc] sm:$0xf] %vm2079_vm1, %v2563_v34  ;;  %2147 = vst.msk [vmem:[%s3182_s27 + $0x10c] sm:$0xf] %vm2079_vm1, %v2627_v35  ;;  %v953_v40 = vadd.f32 %v2773_v38, %v3169_v5  ;;  %v1209_v41 = vadd.f32 %v2837_v39, %v3169_v5  ;;  %v944_v42 = vpop.f32.mrb[5].mxu0  ;;  %v1200_v43 = vpop.f32.mrb[5].mxu1 }
 0x103   : > { %2081 = vst.msk [vmem:[%s3182_s27 + $0x4] sm:$0xf] %vm2079_vm1, %v2561_v36  ;;  %2145 = vst.msk [vmem:[%s3182_s27 + $0x104] sm:$0xf] %vm2079_vm1, %v2625_v37  ;;  %v945_v44 = vadd.f32 %v3169_v5, %v944_v42  ;;  %v1201_v45 = vadd.f32 %v3169_v5, %v1200_v43  ;;  %v2774_v46 = vpop.f32.mrb[6].mxu0  ;;  %v2838_v47 = vpop.f32.mrb[6].mxu1 }
 0x104   : > { %v1445_v48 = vmax.f32 %v953_v40, 0.0  ;;  %v1509_v49 = vmax.f32 %v1209_v41, 0.0  ;;  %v956_v50 = vadd.f32 %v2774_v46, %v3169_v5  ;;  %v1212_v51 = vadd.f32 %v2838_v47, %v3169_v5  ;;  %v947_v52 = vpop.f32.mrb[7].mxu0  ;;  %v1203_v53 = vpop.f32.mrb[7].mxu1 }
 0x105   : > { %v1443_v54 = vmax.f32 %v945_v44, 0.0  ;;  %v1507_v55 = vmax.f32 %v1201_v45, 0.0  ;;  %v948_v56 = vadd.f32 %v3169_v5, %v947_v52  ;;  %v1204_v57 = vadd.f32 %v3169_v5, %v1203_v53 }
 0x106   : > { %v2566_v58 = vpack.c.bf16 %v1445_v48, %v1445_v48  ;;  %v2630_v59 = vpack.c.bf16 %v1509_v49, %v1509_v49  ;;  %v1446_v60 = vmax.f32 %v956_v50, 0.0  ;;  %v1510_v61 = vmax.f32 %v1212_v51, 0.0 }
 0x107   : > { %v2564_v62 = vpack.c.bf16 %v1443_v54, %v1443_v54  ;;  %v2628_v63 = vpack.c.bf16 %v1507_v55, %v1507_v55  ;;  %v1444_v0 = vmax.f32 %v948_v56, 0.0  ;;  %v1508_v1 = vmax.f32 %v1204_v57, 0.0 }
 0x108   : > { %2086 = vst.msk [vmem:[%s3182_s27 + $0x18] sm:$0xf] %vm2079_vm1, %v2566_v58  ;;  %2150 = vst.msk [vmem:[%s3182_s27 + $0x118] sm:$0xf] %vm2079_vm1, %v2630_v59  ;;  %v2567_v2 = vpack.c.bf16 %v1446_v60, %v1446_v60  ;;  %v2631_v3 = vpack.c.bf16 %v1510_v61, %v1510_v61 }
 0x109   : > { %2084 = vst.msk [vmem:[%s3182_s27 + $0x10] sm:$0xf] %vm2079_vm1, %v2564_v62  ;;  %2148 = vst.msk [vmem:[%s3182_s27 + $0x110] sm:$0xf] %vm2079_vm1, %v2628_v63  ;;  %v2565_v4 = vpack.c.bf16 %v1444_v0, %v1444_v0  ;;  %v2629_v6 = vpack.c.bf16 %v1508_v1, %v1508_v1  ;;  %v2777_v7 = vpop.f32.mrb[8].mxu0  ;;  %v2841_v8 = vpop.f32.mrb[8].mxu1 }
 0x10a   : > { %2087 = vst.msk [vmem:[%s3182_s27 + $0x1c] sm:$0xf] %vm2079_vm1, %v2567_v2  ;;  %2151 = vst.msk [vmem:[%s3182_s27 + $0x11c] sm:$0xf] %vm2079_vm1, %v2631_v3  ;;  %v969_v9 = vadd.f32 %v2777_v7, %v3169_v5  ;;  %v1225_v10 = vadd.f32 %v2841_v8, %v3169_v5  ;;  %v960_v11 = vpop.f32.mrb[9].mxu0  ;;  %v1216_v12 = vpop.f32.mrb[9].mxu1 }
 0x10b   : > { %2085 = vst.msk [vmem:[%s3182_s27 + $0x14] sm:$0xf] %vm2079_vm1, %v2565_v4  ;;  %2149 = vst.msk [vmem:[%s3182_s27 + $0x114] sm:$0xf] %vm2079_vm1, %v2629_v6  ;;  %v961_v13 = vadd.f32 %v3169_v5, %v960_v11  ;;  %v1217_v14 = vadd.f32 %v3169_v5, %v1216_v12  ;;  %v2778_v15 = vpop.f32.mrb[10].mxu0  ;;  %v2842_v16 = vpop.f32.mrb[10].mxu1 }
 0x10c   : > { %v1449_v17 = vmax.f32 %v969_v9, 0.0  ;;  %v1513_v18 = vmax.f32 %v1225_v10, 0.0  ;;  %v972_v19 = vadd.f32 %v2778_v15, %v3169_v5  ;;  %v1228_v20 = vadd.f32 %v2842_v16, %v3169_v5  ;;  %v963_v21 = vpop.f32.mrb[11].mxu0  ;;  %v1219_v22 = vpop.f32.mrb[11].mxu1 }
 0x10d   : > { %v1447_v23 = vmax.f32 %v961_v13, 0.0  ;;  %v1511_v24 = vmax.f32 %v1217_v14, 0.0  ;;  %v964_v25 = vadd.f32 %v3169_v5, %v963_v21  ;;  %v1220_v26 = vadd.f32 %v3169_v5, %v1219_v22 }
 0x10e   : > { %v2570_v27 = vpack.c.bf16 %v1449_v17, %v1449_v17  ;;  %v2634_v28 = vpack.c.bf16 %v1513_v18, %v1513_v18  ;;  %v1450_v29 = vmax.f32 %v972_v19, 0.0  ;;  %v1514_v30 = vmax.f32 %v1228_v20, 0.0 }
 0x10f   : > { %v2568_v31 = vpack.c.bf16 %v1447_v23, %v1447_v23  ;;  %v2632_v32 = vpack.c.bf16 %v1511_v24, %v1511_v24  ;;  %v1448_v33 = vmax.f32 %v964_v25, 0.0  ;;  %v1512_v34 = vmax.f32 %v1220_v26, 0.0 }
 0x110   : > { %2090 = vst.msk [vmem:[%s3182_s27 + $0x28] sm:$0xf] %vm2079_vm1, %v2570_v27  ;;  %2154 = vst.msk [vmem:[%s3182_s27 + $0x128] sm:$0xf] %vm2079_vm1, %v2634_v28  ;;  %v2571_v35 = vpack.c.bf16 %v1450_v29, %v1450_v29  ;;  %v2635_v36 = vpack.c.bf16 %v1514_v30, %v1514_v30 }
 0x111   : > { %2088 = vst.msk [vmem:[%s3182_s27 + $0x20] sm:$0xf] %vm2079_vm1, %v2568_v31  ;;  %2152 = vst.msk [vmem:[%s3182_s27 + $0x120] sm:$0xf] %vm2079_vm1, %v2632_v32  ;;  %v2569_v37 = vpack.c.bf16 %v1448_v33, %v1448_v33  ;;  %v2633_v38 = vpack.c.bf16 %v1512_v34, %v1512_v34  ;;  %v2781_v39 = vpop.f32.mrb[12].mxu0  ;;  %v2845_v40 = vpop.f32.mrb[12].mxu1 }
 0x112   : > { %2091 = vst.msk [vmem:[%s3182_s27 + $0x2c] sm:$0xf] %vm2079_vm1, %v2571_v35  ;;  %2155 = vst.msk [vmem:[%s3182_s27 + $0x12c] sm:$0xf] %vm2079_vm1, %v2635_v36  ;;  %v985_v41 = vadd.f32 %v2781_v39, %v3169_v5  ;;  %v1241_v42 = vadd.f32 %v2845_v40, %v3169_v5  ;;  %v976_v43 = vpop.f32.mrb[13].mxu0  ;;  %v1232_v44 = vpop.f32.mrb[13].mxu1 }
 0x113   : > { %2089 = vst.msk [vmem:[%s3182_s27 + $0x24] sm:$0xf] %vm2079_vm1, %v2569_v37  ;;  %2153 = vst.msk [vmem:[%s3182_s27 + $0x124] sm:$0xf] %vm2079_vm1, %v2633_v38  ;;  %v977_v45 = vadd.f32 %v3169_v5, %v976_v43  ;;  %v1233_v46 = vadd.f32 %v3169_v5, %v1232_v44  ;;  %v2782_v47 = vpop.f32.mrb[14].mxu0  ;;  %v2846_v48 = vpop.f32.mrb[14].mxu1 }
 0x114   : > { %v1453_v49 = vmax.f32 %v985_v41, 0.0  ;;  %v1517_v50 = vmax.f32 %v1241_v42, 0.0  ;;  %v988_v51 = vadd.f32 %v2782_v47, %v3169_v5  ;;  %v1244_v52 = vadd.f32 %v2846_v48, %v3169_v5  ;;  %v979_v53 = vpop.f32.mrb[15].mxu0  ;;  %v1235_v54 = vpop.f32.mrb[15].mxu1 }
 0x115   : > { %v1451_v55 = vmax.f32 %v977_v45, 0.0  ;;  %v1515_v56 = vmax.f32 %v1233_v46, 0.0  ;;  %v980_v57 = vadd.f32 %v3169_v5, %v979_v53  ;;  %v1236_v58 = vadd.f32 %v3169_v5, %v1235_v54 }
 0x116   : > { %v2574_v59 = vpack.c.bf16 %v1453_v49, %v1453_v49  ;;  %v2638_v60 = vpack.c.bf16 %v1517_v50, %v1517_v50  ;;  %v1454_v61 = vmax.f32 %v988_v51, 0.0  ;;  %v1518_v62 = vmax.f32 %v1244_v52, 0.0 }
 0x117   : > { %v2572_v63 = vpack.c.bf16 %v1451_v55, %v1451_v55  ;;  %v2636_v0 = vpack.c.bf16 %v1515_v56, %v1515_v56  ;;  %v1452_v1 = vmax.f32 %v980_v57, 0.0  ;;  %v1516_v2 = vmax.f32 %v1236_v58, 0.0 }
 0x118   : > { %2094 = vst.msk [vmem:[%s3182_s27 + $0x38] sm:$0xf] %vm2079_vm1, %v2574_v59  ;;  %2158 = vst.msk [vmem:[%s3182_s27 + $0x138] sm:$0xf] %vm2079_vm1, %v2638_v60  ;;  %v2575_v3 = vpack.c.bf16 %v1454_v61, %v1454_v61  ;;  %v2639_v4 = vpack.c.bf16 %v1518_v62, %v1518_v62 }
 0x119   : > { %2092 = vst.msk [vmem:[%s3182_s27 + $0x30] sm:$0xf] %vm2079_vm1, %v2572_v63  ;;  %2156 = vst.msk [vmem:[%s3182_s27 + $0x130] sm:$0xf] %vm2079_vm1, %v2636_v0  ;;  %v2573_v6 = vpack.c.bf16 %v1452_v1, %v1452_v1  ;;  %v2637_v7 = vpack.c.bf16 %v1516_v2, %v1516_v2  ;;  %v2785_v8 = vpop.f32.mrb[16].mxu0  ;;  %v2849_v9 = vpop.f32.mrb[16].mxu1 }
 0x11a   : > { %2095 = vst.msk [vmem:[%s3182_s27 + $0x3c] sm:$0xf] %vm2079_vm1, %v2575_v3  ;;  %2159 = vst.msk [vmem:[%s3182_s27 + $0x13c] sm:$0xf] %vm2079_vm1, %v2639_v4  ;;  %v1001_v10 = vadd.f32 %v2785_v8, %v3169_v5  ;;  %v1257_v11 = vadd.f32 %v2849_v9, %v3169_v5  ;;  %v992_v12 = vpop.f32.mrb[17].mxu0  ;;  %v1248_v13 = vpop.f32.mrb[17].mxu1 }
 0x11b   : > { %2093 = vst.msk [vmem:[%s3182_s27 + $0x34] sm:$0xf] %vm2079_vm1, %v2573_v6  ;;  %2157 = vst.msk [vmem:[%s3182_s27 + $0x134] sm:$0xf] %vm2079_vm1, %v2637_v7  ;;  %v993_v14 = vadd.f32 %v3169_v5, %v992_v12  ;;  %v1249_v15 = vadd.f32 %v3169_v5, %v1248_v13  ;;  %v2786_v16 = vpop.f32.mrb[18].mxu0  ;;  %v2850_v17 = vpop.f32.mrb[18].mxu1 }
 0x11c   : > { %v1457_v18 = vmax.f32 %v1001_v10, 0.0  ;;  %v1521_v19 = vmax.f32 %v1257_v11, 0.0  ;;  %v1004_v20 = vadd.f32 %v2786_v16, %v3169_v5  ;;  %v1260_v21 = vadd.f32 %v2850_v17, %v3169_v5  ;;  %v995_v22 = vpop.f32.mrb[19].mxu0  ;;  %v1251_v23 = vpop.f32.mrb[19].mxu1 }
 0x11d   : > { %v1455_v24 = vmax.f32 %v993_v14, 0.0  ;;  %v1519_v25 = vmax.f32 %v1249_v15, 0.0  ;;  %v996_v26 = vadd.f32 %v3169_v5, %v995_v22  ;;  %v1252_v27 = vadd.f32 %v3169_v5, %v1251_v23 }
 0x11e   : > { %v2578_v28 = vpack.c.bf16 %v1457_v18, %v1457_v18  ;;  %v2642_v29 = vpack.c.bf16 %v1521_v19, %v1521_v19  ;;  %v1458_v30 = vmax.f32 %v1004_v20, 0.0  ;;  %v1522_v31 = vmax.f32 %v1260_v21, 0.0 }
 0x11f   : > { %v2576_v32 = vpack.c.bf16 %v1455_v24, %v1455_v24  ;;  %v2640_v33 = vpack.c.bf16 %v1519_v25, %v1519_v25  ;;  %v1456_v34 = vmax.f32 %v996_v26, 0.0  ;;  %v1520_v35 = vmax.f32 %v1252_v27, 0.0 }
 0x120   : > { %2098 = vst.msk [vmem:[%s3182_s27 + $0x48] sm:$0xf] %vm2079_vm1, %v2578_v28  ;;  %2162 = vst.msk [vmem:[%s3182_s27 + $0x148] sm:$0xf] %vm2079_vm1, %v2642_v29  ;;  %v2579_v36 = vpack.c.bf16 %v1458_v30, %v1458_v30  ;;  %v2643_v37 = vpack.c.bf16 %v1522_v31, %v1522_v31 }
 0x121   : > { %2096 = vst.msk [vmem:[%s3182_s27 + $0x40] sm:$0xf] %vm2079_vm1, %v2576_v32  ;;  %2160 = vst.msk [vmem:[%s3182_s27 + $0x140] sm:$0xf] %vm2079_vm1, %v2640_v33  ;;  %v2577_v38 = vpack.c.bf16 %v1456_v34, %v1456_v34  ;;  %v2641_v39 = vpack.c.bf16 %v1520_v35, %v1520_v35  ;;  %v2789_v40 = vpop.f32.mrb[20].mxu0  ;;  %v2853_v41 = vpop.f32.mrb[20].mxu1 }
 0x122   : > { %2099 = vst.msk [vmem:[%s3182_s27 + $0x4c] sm:$0xf] %vm2079_vm1, %v2579_v36  ;;  %2163 = vst.msk [vmem:[%s3182_s27 + $0x14c] sm:$0xf] %vm2079_vm1, %v2643_v37  ;;  %v1017_v42 = vadd.f32 %v2789_v40, %v3169_v5  ;;  %v1273_v43 = vadd.f32 %v2853_v41, %v3169_v5  ;;  %v1008_v44 = vpop.f32.mrb[21].mxu0  ;;  %v1264_v45 = vpop.f32.mrb[21].mxu1 }
 0x123   : > { %2097 = vst.msk [vmem:[%s3182_s27 + $0x44] sm:$0xf] %vm2079_vm1, %v2577_v38  ;;  %2161 = vst.msk [vmem:[%s3182_s27 + $0x144] sm:$0xf] %vm2079_vm1, %v2641_v39  ;;  %v1009_v46 = vadd.f32 %v3169_v5, %v1008_v44  ;;  %v1265_v47 = vadd.f32 %v3169_v5, %v1264_v45  ;;  %v2790_v48 = vpop.f32.mrb[22].mxu0  ;;  %v2854_v49 = vpop.f32.mrb[22].mxu1 }
 0x124   : > { %v1461_v50 = vmax.f32 %v1017_v42, 0.0  ;;  %v1525_v51 = vmax.f32 %v1273_v43, 0.0  ;;  %v1020_v52 = vadd.f32 %v2790_v48, %v3169_v5  ;;  %v1276_v53 = vadd.f32 %v2854_v49, %v3169_v5  ;;  %v1011_v54 = vpop.f32.mrb[23].mxu0  ;;  %v1267_v55 = vpop.f32.mrb[23].mxu1 }
 0x125   : > { %v1459_v56 = vmax.f32 %v1009_v46, 0.0  ;;  %v1523_v57 = vmax.f32 %v1265_v47, 0.0  ;;  %v1012_v58 = vadd.f32 %v3169_v5, %v1011_v54  ;;  %v1268_v59 = vadd.f32 %v3169_v5, %v1267_v55 }
 0x126   : > { %v2582_v60 = vpack.c.bf16 %v1461_v50, %v1461_v50  ;;  %v2646_v61 = vpack.c.bf16 %v1525_v51, %v1525_v51  ;;  %v1462_v62 = vmax.f32 %v1020_v52, 0.0  ;;  %v1526_v63 = vmax.f32 %v1276_v53, 0.0 }
 0x127   : > { %v2580_v0 = vpack.c.bf16 %v1459_v56, %v1459_v56  ;;  %v2644_v1 = vpack.c.bf16 %v1523_v57, %v1523_v57  ;;  %v1460_v2 = vmax.f32 %v1012_v58, 0.0  ;;  %v1524_v3 = vmax.f32 %v1268_v59, 0.0 }
 0x128   : > { %2102 = vst.msk [vmem:[%s3182_s27 + $0x58] sm:$0xf] %vm2079_vm1, %v2582_v60  ;;  %2166 = vst.msk [vmem:[%s3182_s27 + $0x158] sm:$0xf] %vm2079_vm1, %v2646_v61  ;;  %v2583_v4 = vpack.c.bf16 %v1462_v62, %v1462_v62  ;;  %v2647_v6 = vpack.c.bf16 %v1526_v63, %v1526_v63 }
 0x129   : > { %2100 = vst.msk [vmem:[%s3182_s27 + $0x50] sm:$0xf] %vm2079_vm1, %v2580_v0  ;;  %2164 = vst.msk [vmem:[%s3182_s27 + $0x150] sm:$0xf] %vm2079_vm1, %v2644_v1  ;;  %v2581_v7 = vpack.c.bf16 %v1460_v2, %v1460_v2  ;;  %v2645_v8 = vpack.c.bf16 %v1524_v3, %v1524_v3  ;;  %v2793_v9 = vpop.f32.mrb[24].mxu0  ;;  %v2857_v10 = vpop.f32.mrb[24].mxu1 }
 0x12a   : > { %2103 = vst.msk [vmem:[%s3182_s27 + $0x5c] sm:$0xf] %vm2079_vm1, %v2583_v4  ;;  %2167 = vst.msk [vmem:[%s3182_s27 + $0x15c] sm:$0xf] %vm2079_vm1, %v2647_v6  ;;  %v1033_v11 = vadd.f32 %v2793_v9, %v3169_v5  ;;  %v1289_v12 = vadd.f32 %v2857_v10, %v3169_v5  ;;  %v1024_v13 = vpop.f32.mrb[25].mxu0  ;;  %v1280_v14 = vpop.f32.mrb[25].mxu1 }
 0x12b   : > { %2101 = vst.msk [vmem:[%s3182_s27 + $0x54] sm:$0xf] %vm2079_vm1, %v2581_v7  ;;  %2165 = vst.msk [vmem:[%s3182_s27 + $0x154] sm:$0xf] %vm2079_vm1, %v2645_v8  ;;  %v1025_v15 = vadd.f32 %v3169_v5, %v1024_v13  ;;  %v1281_v16 = vadd.f32 %v3169_v5, %v1280_v14  ;;  %v2794_v17 = vpop.f32.mrb[26].mxu0  ;;  %v2858_v18 = vpop.f32.mrb[26].mxu1 }
 0x12c   : > { %v1465_v19 = vmax.f32 %v1033_v11, 0.0  ;;  %v1529_v20 = vmax.f32 %v1289_v12, 0.0  ;;  %v1036_v21 = vadd.f32 %v2794_v17, %v3169_v5  ;;  %v1292_v22 = vadd.f32 %v2858_v18, %v3169_v5  ;;  %v1027_v23 = vpop.f32.mrb[27].mxu0  ;;  %v1283_v24 = vpop.f32.mrb[27].mxu1 }
 0x12d   : > { %v1463_v25 = vmax.f32 %v1025_v15, 0.0  ;;  %v1527_v26 = vmax.f32 %v1281_v16, 0.0  ;;  %v1028_v27 = vadd.f32 %v3169_v5, %v1027_v23  ;;  %v1284_v28 = vadd.f32 %v3169_v5, %v1283_v24 }
 0x12e   : > { %v2586_v29 = vpack.c.bf16 %v1465_v19, %v1465_v19  ;;  %v2650_v30 = vpack.c.bf16 %v1529_v20, %v1529_v20  ;;  %v1466_v31 = vmax.f32 %v1036_v21, 0.0  ;;  %v1530_v32 = vmax.f32 %v1292_v22, 0.0 }
 0x12f   : > { %v2584_v33 = vpack.c.bf16 %v1463_v25, %v1463_v25  ;;  %v2648_v34 = vpack.c.bf16 %v1527_v26, %v1527_v26  ;;  %v1464_v35 = vmax.f32 %v1028_v27, 0.0  ;;  %v1528_v36 = vmax.f32 %v1284_v28, 0.0 }
 0x130   : > { %2106 = vst.msk [vmem:[%s3182_s27 + $0x68] sm:$0xf] %vm2079_vm1, %v2586_v29  ;;  %2170 = vst.msk [vmem:[%s3182_s27 + $0x168] sm:$0xf] %vm2079_vm1, %v2650_v30  ;;  %v2587_v37 = vpack.c.bf16 %v1466_v31, %v1466_v31  ;;  %v2651_v38 = vpack.c.bf16 %v1530_v32, %v1530_v32 }
 0x131   : > { %2104 = vst.msk [vmem:[%s3182_s27 + $0x60] sm:$0xf] %vm2079_vm1, %v2584_v33  ;;  %2168 = vst.msk [vmem:[%s3182_s27 + $0x160] sm:$0xf] %vm2079_vm1, %v2648_v34  ;;  %v2585_v39 = vpack.c.bf16 %v1464_v35, %v1464_v35  ;;  %v2649_v40 = vpack.c.bf16 %v1528_v36, %v1528_v36  ;;  %v2797_v41 = vpop.f32.mrb[28].mxu0  ;;  %v2861_v42 = vpop.f32.mrb[28].mxu1 }
 0x132   : > { %2107 = vst.msk [vmem:[%s3182_s27 + $0x6c] sm:$0xf] %vm2079_vm1, %v2587_v37  ;;  %2171 = vst.msk [vmem:[%s3182_s27 + $0x16c] sm:$0xf] %vm2079_vm1, %v2651_v38  ;;  %v1049_v43 = vadd.f32 %v2797_v41, %v3169_v5  ;;  %v1305_v44 = vadd.f32 %v2861_v42, %v3169_v5  ;;  %v1040_v45 = vpop.f32.mrb[29].mxu0  ;;  %v1296_v46 = vpop.f32.mrb[29].mxu1 }
 0x133   : > { %2105 = vst.msk [vmem:[%s3182_s27 + $0x64] sm:$0xf] %vm2079_vm1, %v2585_v39  ;;  %2169 = vst.msk [vmem:[%s3182_s27 + $0x164] sm:$0xf] %vm2079_vm1, %v2649_v40  ;;  %v1041_v47 = vadd.f32 %v3169_v5, %v1040_v45  ;;  %v1297_v48 = vadd.f32 %v3169_v5, %v1296_v46  ;;  %v2798_v49 = vpop.f32.mrb[30].mxu0  ;;  %v2862_v50 = vpop.f32.mrb[30].mxu1 }
 0x134   : > { %v1469_v51 = vmax.f32 %v1049_v43, 0.0  ;;  %v1533_v52 = vmax.f32 %v1305_v44, 0.0  ;;  %v1052_v53 = vadd.f32 %v2798_v49, %v3169_v5  ;;  %v1308_v54 = vadd.f32 %v2862_v50, %v3169_v5  ;;  %v1043_v55 = vpop.f32.mrb[31].mxu0  ;;  %v1299_v56 = vpop.f32.mrb[31].mxu1 }
 0x135   : > { %v1467_v57 = vmax.f32 %v1041_v47, 0.0  ;;  %v1531_v58 = vmax.f32 %v1297_v48, 0.0  ;;  %v1044_v59 = vadd.f32 %v3169_v5, %v1043_v55  ;;  %v1300_v60 = vadd.f32 %v3169_v5, %v1299_v56 }
 0x136   : > { %v2590_v61 = vpack.c.bf16 %v1469_v51, %v1469_v51  ;;  %v2654_v62 = vpack.c.bf16 %v1533_v52, %v1533_v52  ;;  %v1470_v63 = vmax.f32 %v1052_v53, 0.0  ;;  %v1534_v0 = vmax.f32 %v1308_v54, 0.0 }
 0x137   : > { %v2588_v1 = vpack.c.bf16 %v1467_v57, %v1467_v57  ;;  %v2652_v2 = vpack.c.bf16 %v1531_v58, %v1531_v58  ;;  %v1468_v3 = vmax.f32 %v1044_v59, 0.0  ;;  %v1532_v4 = vmax.f32 %v1300_v60, 0.0 }
 0x138   : > { %2110 = vst.msk [vmem:[%s3182_s27 + $0x78] sm:$0xf] %vm2079_vm1, %v2590_v61  ;;  %2174 = vst.msk [vmem:[%s3182_s27 + $0x178] sm:$0xf] %vm2079_vm1, %v2654_v62  ;;  %v2591_v6 = vpack.c.bf16 %v1470_v63, %v1470_v63  ;;  %v2655_v7 = vpack.c.bf16 %v1534_v0, %v1534_v0 }
 0x139   : > { %2108 = vst.msk [vmem:[%s3182_s27 + $0x70] sm:$0xf] %vm2079_vm1, %v2588_v1  ;;  %2172 = vst.msk [vmem:[%s3182_s27 + $0x170] sm:$0xf] %vm2079_vm1, %v2652_v2  ;;  %v2589_v8 = vpack.c.bf16 %v1468_v3, %v1468_v3  ;;  %v2653_v9 = vpack.c.bf16 %v1532_v4, %v1532_v4  ;;  %v2801_v10 = vpop.f32.mrb[32].mxu0  ;;  %v2865_v11 = vpop.f32.mrb[32].mxu1 }
 0x13a   : > { %2111 = vst.msk [vmem:[%s3182_s27 + $0x7c] sm:$0xf] %vm2079_vm1, %v2591_v6  ;;  %2175 = vst.msk [vmem:[%s3182_s27 + $0x17c] sm:$0xf] %vm2079_vm1, %v2655_v7  ;;  %v1065_v12 = vadd.f32 %v2801_v10, %v3169_v5  ;;  %v1321_v13 = vadd.f32 %v2865_v11, %v3169_v5  ;;  %v1056_v14 = vpop.f32.mrb[33].mxu0  ;;  %v1312_v15 = vpop.f32.mrb[33].mxu1 }
 0x13b   : > { %2109 = vst.msk [vmem:[%s3182_s27 + $0x74] sm:$0xf] %vm2079_vm1, %v2589_v8  ;;  %2173 = vst.msk [vmem:[%s3182_s27 + $0x174] sm:$0xf] %vm2079_vm1, %v2653_v9  ;;  %v1057_v16 = vadd.f32 %v3169_v5, %v1056_v14  ;;  %v1313_v17 = vadd.f32 %v3169_v5, %v1312_v15  ;;  %v2802_v18 = vpop.f32.mrb[34].mxu0  ;;  %v2866_v19 = vpop.f32.mrb[34].mxu1 }
 0x13c   : > { %v1473_v20 = vmax.f32 %v1065_v12, 0.0  ;;  %v1537_v21 = vmax.f32 %v1321_v13, 0.0  ;;  %v1068_v22 = vadd.f32 %v2802_v18, %v3169_v5  ;;  %v1324_v23 = vadd.f32 %v2866_v19, %v3169_v5  ;;  %v1059_v24 = vpop.f32.mrb[35].mxu0  ;;  %v1315_v25 = vpop.f32.mrb[35].mxu1 }
 0x13d   : > { %v1471_v26 = vmax.f32 %v1057_v16, 0.0  ;;  %v1535_v27 = vmax.f32 %v1313_v17, 0.0  ;;  %v1060_v28 = vadd.f32 %v3169_v5, %v1059_v24  ;;  %v1316_v29 = vadd.f32 %v3169_v5, %v1315_v25 }
 0x13e   : > { %v2594_v30 = vpack.c.bf16 %v1473_v20, %v1473_v20  ;;  %v2658_v31 = vpack.c.bf16 %v1537_v21, %v1537_v21  ;;  %v1474_v32 = vmax.f32 %v1068_v22, 0.0  ;;  %v1538_v33 = vmax.f32 %v1324_v23, 0.0 }
 0x13f   : > { %v2592_v34 = vpack.c.bf16 %v1471_v26, %v1471_v26  ;;  %v2656_v35 = vpack.c.bf16 %v1535_v27, %v1535_v27  ;;  %v1472_v36 = vmax.f32 %v1060_v28, 0.0  ;;  %v1536_v37 = vmax.f32 %v1316_v29, 0.0 }
 0x140   : > { %2114 = vst.msk [vmem:[%s3182_s27 + $0x88] sm:$0xf] %vm2079_vm1, %v2594_v30  ;;  %2178 = vst.msk [vmem:[%s3182_s27 + $0x188] sm:$0xf] %vm2079_vm1, %v2658_v31  ;;  %v2595_v38 = vpack.c.bf16 %v1474_v32, %v1474_v32  ;;  %v2659_v39 = vpack.c.bf16 %v1538_v33, %v1538_v33 }
 0x141   : > { %2112 = vst.msk [vmem:[%s3182_s27 + $0x80] sm:$0xf] %vm2079_vm1, %v2592_v34  ;;  %2176 = vst.msk [vmem:[%s3182_s27 + $0x180] sm:$0xf] %vm2079_vm1, %v2656_v35  ;;  %v2593_v40 = vpack.c.bf16 %v1472_v36, %v1472_v36  ;;  %v2657_v41 = vpack.c.bf16 %v1536_v37, %v1536_v37  ;;  %v2805_v42 = vpop.f32.mrb[36].mxu0  ;;  %v2869_v43 = vpop.f32.mrb[36].mxu1 }
 0x142   : > { %2115 = vst.msk [vmem:[%s3182_s27 + $0x8c] sm:$0xf] %vm2079_vm1, %v2595_v38  ;;  %2179 = vst.msk [vmem:[%s3182_s27 + $0x18c] sm:$0xf] %vm2079_vm1, %v2659_v39  ;;  %v1081_v44 = vadd.f32 %v2805_v42, %v3169_v5  ;;  %v1337_v45 = vadd.f32 %v2869_v43, %v3169_v5  ;;  %v1072_v46 = vpop.f32.mrb[37].mxu0  ;;  %v1328_v47 = vpop.f32.mrb[37].mxu1 }
 0x143   : > { %2113 = vst.msk [vmem:[%s3182_s27 + $0x84] sm:$0xf] %vm2079_vm1, %v2593_v40  ;;  %2177 = vst.msk [vmem:[%s3182_s27 + $0x184] sm:$0xf] %vm2079_vm1, %v2657_v41  ;;  %v1073_v48 = vadd.f32 %v3169_v5, %v1072_v46  ;;  %v1329_v49 = vadd.f32 %v3169_v5, %v1328_v47  ;;  %v2806_v50 = vpop.f32.mrb[38].mxu0  ;;  %v2870_v51 = vpop.f32.mrb[38].mxu1 }
 0x144   : > { %v1477_v52 = vmax.f32 %v1081_v44, 0.0  ;;  %v1541_v53 = vmax.f32 %v1337_v45, 0.0  ;;  %v1084_v54 = vadd.f32 %v2806_v50, %v3169_v5  ;;  %v1340_v55 = vadd.f32 %v2870_v51, %v3169_v5  ;;  %v1075_v56 = vpop.f32.mrb[39].mxu0  ;;  %v1331_v57 = vpop.f32.mrb[39].mxu1 }
 0x145   : > { %v1475_v58 = vmax.f32 %v1073_v48, 0.0  ;;  %v1539_v59 = vmax.f32 %v1329_v49, 0.0  ;;  %v1076_v60 = vadd.f32 %v3169_v5, %v1075_v56  ;;  %v1332_v61 = vadd.f32 %v3169_v5, %v1331_v57 }
 0x146   : > { %v2598_v62 = vpack.c.bf16 %v1477_v52, %v1477_v52  ;;  %v2662_v63 = vpack.c.bf16 %v1541_v53, %v1541_v53  ;;  %v1478_v0 = vmax.f32 %v1084_v54, 0.0  ;;  %v1542_v1 = vmax.f32 %v1340_v55, 0.0 }
 0x147   : > { %v2596_v2 = vpack.c.bf16 %v1475_v58, %v1475_v58  ;;  %v2660_v3 = vpack.c.bf16 %v1539_v59, %v1539_v59  ;;  %v1476_v4 = vmax.f32 %v1076_v60, 0.0  ;;  %v1540_v6 = vmax.f32 %v1332_v61, 0.0 }
 0x148   : > { %2118 = vst.msk [vmem:[%s3182_s27 + $0x98] sm:$0xf] %vm2079_vm1, %v2598_v62  ;;  %2182 = vst.msk [vmem:[%s3182_s27 + $0x198] sm:$0xf] %vm2079_vm1, %v2662_v63  ;;  %v2599_v7 = vpack.c.bf16 %v1478_v0, %v1478_v0  ;;  %v2663_v8 = vpack.c.bf16 %v1542_v1, %v1542_v1 }
 0x149   : > { %2116 = vst.msk [vmem:[%s3182_s27 + $0x90] sm:$0xf] %vm2079_vm1, %v2596_v2  ;;  %2180 = vst.msk [vmem:[%s3182_s27 + $0x190] sm:$0xf] %vm2079_vm1, %v2660_v3  ;;  %v2597_v9 = vpack.c.bf16 %v1476_v4, %v1476_v4  ;;  %v2661_v10 = vpack.c.bf16 %v1540_v6, %v1540_v6  ;;  %v2809_v11 = vpop.f32.mrb[40].mxu0  ;;  %v2873_v12 = vpop.f32.mrb[40].mxu1 }
 0x14a   : > { %2119 = vst.msk [vmem:[%s3182_s27 + $0x9c] sm:$0xf] %vm2079_vm1, %v2599_v7  ;;  %2183 = vst.msk [vmem:[%s3182_s27 + $0x19c] sm:$0xf] %vm2079_vm1, %v2663_v8  ;;  %v1097_v13 = vadd.f32 %v2809_v11, %v3169_v5  ;;  %v1353_v14 = vadd.f32 %v2873_v12, %v3169_v5  ;;  %v1088_v15 = vpop.f32.mrb[41].mxu0  ;;  %v1344_v16 = vpop.f32.mrb[41].mxu1 }
 0x14b   : > { %2117 = vst.msk [vmem:[%s3182_s27 + $0x94] sm:$0xf] %vm2079_vm1, %v2597_v9  ;;  %2181 = vst.msk [vmem:[%s3182_s27 + $0x194] sm:$0xf] %vm2079_vm1, %v2661_v10  ;;  %v1089_v17 = vadd.f32 %v3169_v5, %v1088_v15  ;;  %v1345_v18 = vadd.f32 %v3169_v5, %v1344_v16  ;;  %v2810_v19 = vpop.f32.mrb[42].mxu0  ;;  %v2874_v20 = vpop.f32.mrb[42].mxu1 }
 0x14c   : > { %v1481_v21 = vmax.f32 %v1097_v13, 0.0  ;;  %v1545_v22 = vmax.f32 %v1353_v14, 0.0  ;;  %v1100_v23 = vadd.f32 %v2810_v19, %v3169_v5  ;;  %v1356_v24 = vadd.f32 %v2874_v20, %v3169_v5  ;;  %v1091_v25 = vpop.f32.mrb[43].mxu0  ;;  %v1347_v26 = vpop.f32.mrb[43].mxu1 }
 0x14d   : > { %v1479_v27 = vmax.f32 %v1089_v17, 0.0  ;;  %v1543_v28 = vmax.f32 %v1345_v18, 0.0  ;;  %v1092_v29 = vadd.f32 %v3169_v5, %v1091_v25  ;;  %v1348_v30 = vadd.f32 %v3169_v5, %v1347_v26 }
 0x14e   : > { %v2602_v31 = vpack.c.bf16 %v1481_v21, %v1481_v21  ;;  %v2666_v32 = vpack.c.bf16 %v1545_v22, %v1545_v22  ;;  %v1482_v33 = vmax.f32 %v1100_v23, 0.0  ;;  %v1546_v34 = vmax.f32 %v1356_v24, 0.0 }
 0x14f   : > { %v2600_v35 = vpack.c.bf16 %v1479_v27, %v1479_v27  ;;  %v2664_v36 = vpack.c.bf16 %v1543_v28, %v1543_v28  ;;  %v1480_v37 = vmax.f32 %v1092_v29, 0.0  ;;  %v1544_v38 = vmax.f32 %v1348_v30, 0.0 }
 0x150   : > { %2122 = vst.msk [vmem:[%s3182_s27 + $0xa8] sm:$0xf] %vm2079_vm1, %v2602_v31  ;;  %2186 = vst.msk [vmem:[%s3182_s27 + $0x1a8] sm:$0xf] %vm2079_vm1, %v2666_v32  ;;  %v2603_v39 = vpack.c.bf16 %v1482_v33, %v1482_v33  ;;  %v2667_v40 = vpack.c.bf16 %v1546_v34, %v1546_v34 }
 0x151   : > { %2120 = vst.msk [vmem:[%s3182_s27 + $0xa0] sm:$0xf] %vm2079_vm1, %v2600_v35  ;;  %2184 = vst.msk [vmem:[%s3182_s27 + $0x1a0] sm:$0xf] %vm2079_vm1, %v2664_v36  ;;  %v2601_v41 = vpack.c.bf16 %v1480_v37, %v1480_v37  ;;  %v2665_v42 = vpack.c.bf16 %v1544_v38, %v1544_v38  ;;  %v2813_v43 = vpop.f32.mrb[44].mxu0  ;;  %v2877_v44 = vpop.f32.mrb[44].mxu1 }
 0x152   : > { %2123 = vst.msk [vmem:[%s3182_s27 + $0xac] sm:$0xf] %vm2079_vm1, %v2603_v39  ;;  %2187 = vst.msk [vmem:[%s3182_s27 + $0x1ac] sm:$0xf] %vm2079_vm1, %v2667_v40  ;;  %v1113_v45 = vadd.f32 %v2813_v43, %v3169_v5  ;;  %v1369_v46 = vadd.f32 %v2877_v44, %v3169_v5  ;;  %v1104_v47 = vpop.f32.mrb[45].mxu0  ;;  %v1360_v48 = vpop.f32.mrb[45].mxu1 }
 0x153   : > { %2121 = vst.msk [vmem:[%s3182_s27 + $0xa4] sm:$0xf] %vm2079_vm1, %v2601_v41  ;;  %2185 = vst.msk [vmem:[%s3182_s27 + $0x1a4] sm:$0xf] %vm2079_vm1, %v2665_v42  ;;  %v1105_v49 = vadd.f32 %v3169_v5, %v1104_v47  ;;  %v1361_v50 = vadd.f32 %v3169_v5, %v1360_v48  ;;  %v2814_v51 = vpop.f32.mrb[46].mxu0  ;;  %v2878_v52 = vpop.f32.mrb[46].mxu1 }
 0x154   : > { %v1485_v53 = vmax.f32 %v1113_v45, 0.0  ;;  %v1549_v54 = vmax.f32 %v1369_v46, 0.0  ;;  %v1116_v55 = vadd.f32 %v2814_v51, %v3169_v5  ;;  %v1372_v56 = vadd.f32 %v2878_v52, %v3169_v5  ;;  %v1107_v57 = vpop.f32.mrb[47].mxu0  ;;  %v1363_v58 = vpop.f32.mrb[47].mxu1  ;;  %v3487_v45 = vld [vmem:[%s3166_s24] ss:$0 sm:$0xff] }
 0x155   : > { %v1483_v59 = vmax.f32 %v1105_v49, 0.0  ;;  %v1547_v60 = vmax.f32 %v1361_v50, 0.0  ;;  %v1108_v61 = vadd.f32 %v3169_v5, %v1107_v57  ;;  %v1364_v62 = vadd.f32 %v3169_v5, %v1363_v58 }
 0x156   : > { %v2606_v63 = vpack.c.bf16 %v1485_v53, %v1485_v53  ;;  %v2670_v0 = vpack.c.bf16 %v1549_v54, %v1549_v54  ;;  %v1486_v1 = vmax.f32 %v1116_v55, 0.0  ;;  %v1550_v2 = vmax.f32 %v1372_v56, 0.0 }
 0x157   : > { %v2604_v3 = vpack.c.bf16 %v1483_v59, %v1483_v59  ;;  %v2668_v4 = vpack.c.bf16 %v1547_v60, %v1547_v60  ;;  %v1484_v6 = vmax.f32 %v1108_v61, 0.0  ;;  %v1548_v7 = vmax.f32 %v1364_v62, 0.0 }
 0x158   : > { %2126 = vst.msk [vmem:[%s3182_s27 + $0xb8] sm:$0xf] %vm2079_vm1, %v2606_v63  ;;  %2190 = vst.msk [vmem:[%s3182_s27 + $0x1b8] sm:$0xf] %vm2079_vm1, %v2670_v0  ;;  %v2607_v8 = vpack.c.bf16 %v1486_v1, %v1486_v1  ;;  %v2671_v9 = vpack.c.bf16 %v1550_v2, %v1550_v2 }
 0x159   : > { %2124 = vst.msk [vmem:[%s3182_s27 + $0xb0] sm:$0xf] %vm2079_vm1, %v2604_v3  ;;  %2188 = vst.msk [vmem:[%s3182_s27 + $0x1b0] sm:$0xf] %vm2079_vm1, %v2668_v4  ;;  %v2605_v10 = vpack.c.bf16 %v1484_v6, %v1484_v6  ;;  %v2669_v11 = vpack.c.bf16 %v1548_v7, %v1548_v7  ;;  %v2817_v12 = vpop.f32.mrb[48].mxu0  ;;  %v2881_v13 = vpop.f32.mrb[48].mxu1 }
 0x15a   : > { %2127 = vst.msk [vmem:[%s3182_s27 + $0xbc] sm:$0xf] %vm2079_vm1, %v2607_v8  ;;  %2191 = vst.msk [vmem:[%s3182_s27 + $0x1bc] sm:$0xf] %vm2079_vm1, %v2671_v9  ;;  %v1129_v14 = vadd.f32 %v2817_v12, %v3169_v5  ;;  %v1385_v15 = vadd.f32 %v2881_v13, %v3169_v5  ;;  %v1120_v16 = vpop.f32.mrb[49].mxu0  ;;  %v1376_v17 = vpop.f32.mrb[49].mxu1 }
 0x15b   : > { %2125 = vst.msk [vmem:[%s3182_s27 + $0xb4] sm:$0xf] %vm2079_vm1, %v2605_v10  ;;  %2189 = vst.msk [vmem:[%s3182_s27 + $0x1b4] sm:$0xf] %vm2079_vm1, %v2669_v11  ;;  %v1121_v18 = vadd.f32 %v3169_v5, %v1120_v16  ;;  %v1377_v19 = vadd.f32 %v3169_v5, %v1376_v17  ;;  %v2818_v20 = vpop.f32.mrb[50].mxu0  ;;  %v2882_v21 = vpop.f32.mrb[50].mxu1 }
 0x15c   : > { %v1489_v22 = vmax.f32 %v1129_v14, 0.0  ;;  %v1553_v23 = vmax.f32 %v1385_v15, 0.0  ;;  %v1132_v24 = vadd.f32 %v2818_v20, %v3169_v5  ;;  %v1388_v25 = vadd.f32 %v2882_v21, %v3169_v5  ;;  %v1123_v26 = vpop.f32.mrb[51].mxu0  ;;  %v1379_v27 = vpop.f32.mrb[51].mxu1 }
 0x15d   : > { %v1487_v28 = vmax.f32 %v1121_v18, 0.0  ;;  %v1551_v29 = vmax.f32 %v1377_v19, 0.0  ;;  %v1124_v30 = vadd.f32 %v3169_v5, %v1123_v26  ;;  %v1380_v31 = vadd.f32 %v3169_v5, %v1379_v27 }
 0x15e   : > { %v2610_v32 = vpack.c.bf16 %v1489_v22, %v1489_v22  ;;  %v2674_v33 = vpack.c.bf16 %v1553_v23, %v1553_v23  ;;  %v1490_v34 = vmax.f32 %v1132_v24, 0.0  ;;  %v1554_v35 = vmax.f32 %v1388_v25, 0.0 }
 0x15f   : > { %v2608_v36 = vpack.c.bf16 %v1487_v28, %v1487_v28  ;;  %v2672_v37 = vpack.c.bf16 %v1551_v29, %v1551_v29  ;;  %v1488_v38 = vmax.f32 %v1124_v30, 0.0  ;;  %v1552_v39 = vmax.f32 %v1380_v31, 0.0 }
 0x160   : > { %2130 = vst.msk [vmem:[%s3182_s27 + $0xc8] sm:$0xf] %vm2079_vm1, %v2610_v32  ;;  %2194 = vst.msk [vmem:[%s3182_s27 + $0x1c8] sm:$0xf] %vm2079_vm1, %v2674_v33  ;;  %v2611_v40 = vpack.c.bf16 %v1490_v34, %v1490_v34  ;;  %v2675_v41 = vpack.c.bf16 %v1554_v35, %v1554_v35 }
 0x161   : > { %2128 = vst.msk [vmem:[%s3182_s27 + $0xc0] sm:$0xf] %vm2079_vm1, %v2608_v36  ;;  %2192 = vst.msk [vmem:[%s3182_s27 + $0x1c0] sm:$0xf] %vm2079_vm1, %v2672_v37  ;;  %v2609_v5 = vpack.c.bf16 %v1488_v38, %v1488_v38  ;;  %v2673_v42 = vpack.c.bf16 %v1552_v39, %v1552_v39  ;;  %v2821_v43 = vpop.f32.mrb[52].mxu0  ;;  %v2885_v44 = vpop.f32.mrb[52].mxu1 }
 0x162   : > { %2131 = vst.msk [vmem:[%s3182_s27 + $0xcc] sm:$0xf] %vm2079_vm1, %v2611_v40  ;;  %2195 = vst.msk [vmem:[%s3182_s27 + $0x1cc] sm:$0xf] %vm2079_vm1, %v2675_v41  ;;  %v1145_v46 = vadd.f32 %v3487_v45, %v2821_v43  ;;  %v1401_v47 = vadd.f32 %v3487_v45, %v2885_v44  ;;  %v1136_v48 = vpop.f32.mrb[53].mxu0  ;;  %v1392_v49 = vpop.f32.mrb[53].mxu1 }
 0x163   : > { %2129 = vst.msk [vmem:[%s3182_s27 + $0xc4] sm:$0xf] %vm2079_vm1, %v2609_v5  ;;  %2193 = vst.msk [vmem:[%s3182_s27 + $0x1c4] sm:$0xf] %vm2079_vm1, %v2673_v42  ;;  %v1137_v50 = vadd.f32 %v3487_v45, %v1136_v48  ;;  %v1393_v51 = vadd.f32 %v3487_v45, %v1392_v49  ;;  %v2822_v52 = vpop.f32.mrb[54].mxu0  ;;  %v2886_v53 = vpop.f32.mrb[54].mxu1 }
 0x164   : > { %v1493_v54 = vmax.f32 %v1145_v46, 0.0  ;;  %v1557_v55 = vmax.f32 %v1401_v47, 0.0  ;;  %v1148_v56 = vadd.f32 %v3487_v45, %v2822_v52  ;;  %v1404_v57 = vadd.f32 %v3487_v45, %v2886_v53  ;;  %v1139_v58 = vpop.f32.mrb[55].mxu0  ;;  %v1395_v59 = vpop.f32.mrb[55].mxu1 }
 0x165   : > { %v1491_v60 = vmax.f32 %v1137_v50, 0.0  ;;  %v1555_v61 = vmax.f32 %v1393_v51, 0.0  ;;  %v1140_v62 = vadd.f32 %v3487_v45, %v1139_v58  ;;  %v1396_v63 = vadd.f32 %v3487_v45, %v1395_v59 }
 0x166   : > { %v2614_v0 = vpack.c.bf16 %v1493_v54, %v1493_v54  ;;  %v2678_v1 = vpack.c.bf16 %v1557_v55, %v1557_v55  ;;  %v1494_v2 = vmax.f32 %v1148_v56, 0.0  ;;  %v1558_v3 = vmax.f32 %v1404_v57, 0.0 }
 0x167   : > { %v2612_v4 = vpack.c.bf16 %v1491_v60, %v1491_v60  ;;  %v2676_v6 = vpack.c.bf16 %v1555_v61, %v1555_v61  ;;  %v1492_v7 = vmax.f32 %v1140_v62, 0.0  ;;  %v1556_v8 = vmax.f32 %v1396_v63, 0.0 }
 0x168   : > { %2134 = vst.msk [vmem:[%s3182_s27 + $0xd8] sm:$0xf] %vm2079_vm1, %v2614_v0  ;;  %2198 = vst.msk [vmem:[%s3182_s27 + $0x1d8] sm:$0xf] %vm2079_vm1, %v2678_v1  ;;  %v2615_v9 = vpack.c.bf16 %v1494_v2, %v1494_v2  ;;  %v2679_v10 = vpack.c.bf16 %v1558_v3, %v1558_v3 }
 0x169   : > { %2132 = vst.msk [vmem:[%s3182_s27 + $0xd0] sm:$0xf] %vm2079_vm1, %v2612_v4  ;;  %2196 = vst.msk [vmem:[%s3182_s27 + $0x1d0] sm:$0xf] %vm2079_vm1, %v2676_v6  ;;  %v2613_v11 = vpack.c.bf16 %v1492_v7, %v1492_v7  ;;  %v2677_v12 = vpack.c.bf16 %v1556_v8, %v1556_v8  ;;  %v2825_v13 = vpop.f32.mrb[56].mxu0  ;;  %v2889_v14 = vpop.f32.mrb[56].mxu1 }
 0x16a   : > { %2135 = vst.msk [vmem:[%s3182_s27 + $0xdc] sm:$0xf] %vm2079_vm1, %v2615_v9  ;;  %2199 = vst.msk [vmem:[%s3182_s27 + $0x1dc] sm:$0xf] %vm2079_vm1, %v2679_v10  ;;  %v1161_v15 = vadd.f32 %v3487_v45, %v2825_v13  ;;  %v1417_v16 = vadd.f32 %v3487_v45, %v2889_v14  ;;  %v1152_v17 = vpop.f32.mrb[57].mxu0  ;;  %v1408_v18 = vpop.f32.mrb[57].mxu1 }
 0x16b   : > { %2133 = vst.msk [vmem:[%s3182_s27 + $0xd4] sm:$0xf] %vm2079_vm1, %v2613_v11  ;;  %2197 = vst.msk [vmem:[%s3182_s27 + $0x1d4] sm:$0xf] %vm2079_vm1, %v2677_v12  ;;  %v1153_v19 = vadd.f32 %v3487_v45, %v1152_v17  ;;  %v1409_v20 = vadd.f32 %v3487_v45, %v1408_v18  ;;  %v2826_v21 = vpop.f32.mrb[58].mxu0  ;;  %v2890_v22 = vpop.f32.mrb[58].mxu1 }
 0x16c   : > { %v1497_v23 = vmax.f32 %v1161_v15, 0.0  ;;  %v1561_v24 = vmax.f32 %v1417_v16, 0.0  ;;  %v1164_v25 = vadd.f32 %v3487_v45, %v2826_v21  ;;  %v1420_v26 = vadd.f32 %v3487_v45, %v2890_v22  ;;  %v1155_v27 = vpop.f32.mrb[59].mxu0  ;;  %v1411_v28 = vpop.f32.mrb[59].mxu1 }
 0x16d   : > { %v1495_v29 = vmax.f32 %v1153_v19, 0.0  ;;  %v1559_v30 = vmax.f32 %v1409_v20, 0.0  ;;  %v1156_v31 = vadd.f32 %v3487_v45, %v1155_v27  ;;  %v1412_v32 = vadd.f32 %v3487_v45, %v1411_v28 }
 0x16e   : > { %v2618_v33 = vpack.c.bf16 %v1497_v23, %v1497_v23  ;;  %v2682_v34 = vpack.c.bf16 %v1561_v24, %v1561_v24  ;;  %v1498_v35 = vmax.f32 %v1164_v25, 0.0  ;;  %v1562_v36 = vmax.f32 %v1420_v26, 0.0 }
 0x16f   : > { %v2616_v37 = vpack.c.bf16 %v1495_v29, %v1495_v29  ;;  %v2680_v38 = vpack.c.bf16 %v1559_v30, %v1559_v30  ;;  %v1496_v39 = vmax.f32 %v1156_v31, 0.0  ;;  %v1560_v40 = vmax.f32 %v1412_v32, 0.0 }
 0x170   : > { %2138 = vst.msk [vmem:[%s3182_s27 + $0xe8] sm:$0xf] %vm2079_vm1, %v2618_v33  ;;  %2202 = vst.msk [vmem:[%s3182_s27 + $0x1e8] sm:$0xf] %vm2079_vm1, %v2682_v34  ;;  %v2619_v41 = vpack.c.bf16 %v1498_v35, %v1498_v35  ;;  %v2683_v5 = vpack.c.bf16 %v1562_v36, %v1562_v36 }
 0x171   : > { %2136 = vst.msk [vmem:[%s3182_s27 + $0xe0] sm:$0xf] %vm2079_vm1, %v2616_v37  ;;  %2200 = vst.msk [vmem:[%s3182_s27 + $0x1e0] sm:$0xf] %vm2079_vm1, %v2680_v38  ;;  %v2617_v42 = vpack.c.bf16 %v1496_v39, %v1496_v39  ;;  %v2681_v43 = vpack.c.bf16 %v1560_v40, %v1560_v40  ;;  %v2829_v44 = vpop.f32.mrb[60].mxu0  ;;  %v2893_v46 = vpop.f32.mrb[60].mxu1 }
 0x172   : > { %2139 = vst.msk [vmem:[%s3182_s27 + $0xec] sm:$0xf] %vm2079_vm1, %v2619_v41  ;;  %2203 = vst.msk [vmem:[%s3182_s27 + $0x1ec] sm:$0xf] %vm2079_vm1, %v2683_v5  ;;  %v1177_v47 = vadd.f32 %v3487_v45, %v2829_v44  ;;  %v1433_v48 = vadd.f32 %v3487_v45, %v2893_v46  ;;  %v1168_v49 = vpop.f32.mrb[61].mxu0  ;;  %v1424_v50 = vpop.f32.mrb[61].mxu1 }
 0x173   : > { %2137 = vst.msk [vmem:[%s3182_s27 + $0xe4] sm:$0xf] %vm2079_vm1, %v2617_v42  ;;  %2201 = vst.msk [vmem:[%s3182_s27 + $0x1e4] sm:$0xf] %vm2079_vm1, %v2681_v43  ;;  %v1169_v51 = vadd.f32 %v3487_v45, %v1168_v49  ;;  %v1425_v52 = vadd.f32 %v3487_v45, %v1424_v50  ;;  %v2830_v53 = vpop.f32.mrb[62].mxu0  ;;  %v2894_v54 = vpop.f32.mrb[62].mxu1 }
 0x174   : > { %v1501_v55 = vmax.f32 %v1177_v47, 0.0  ;;  %v1565_v56 = vmax.f32 %v1433_v48, 0.0  ;;  %v1180_v57 = vadd.f32 %v3487_v45, %v2830_v53  ;;  %v1436_v58 = vadd.f32 %v3487_v45, %v2894_v54  ;;  %v1171_v59 = vpop.f32.mrb[63].mxu0  ;;  %v1427_v60 = vpop.f32.mrb[63].mxu1 }
 0x175   : > { %v1499_v61 = vmax.f32 %v1169_v51, 0.0  ;;  %v1563_v62 = vmax.f32 %v1425_v52, 0.0  ;;  %v1172_v63 = vadd.f32 %v3487_v45, %v1171_v59  ;;  %v1428_v0 = vadd.f32 %v3487_v45, %v1427_v60 }
 0x176   : > { %v2622_v1 = vpack.c.bf16 %v1501_v55, %v1501_v55  ;;  %v2686_v2 = vpack.c.bf16 %v1565_v56, %v1565_v56  ;;  %v1502_v3 = vmax.f32 %v1180_v57, 0.0  ;;  %v1566_v4 = vmax.f32 %v1436_v58, 0.0 }
 0x177   : > { %v2620_v6 = vpack.c.bf16 %v1499_v61, %v1499_v61  ;;  %v2684_v7 = vpack.c.bf16 %v1563_v62, %v1563_v62  ;;  %v1500_v8 = vmax.f32 %v1172_v63, 0.0  ;;  %v1564_v9 = vmax.f32 %v1428_v0, 0.0 }
 0x178   : > { %2142 = vst.msk [vmem:[%s3182_s27 + $0xf8] sm:$0xf] %vm2079_vm1, %v2622_v1  ;;  %2206 = vst.msk [vmem:[%s3182_s27 + $0x1f8] sm:$0xf] %vm2079_vm1, %v2686_v2  ;;  %v2623_v10 = vpack.c.bf16 %v1502_v3, %v1502_v3  ;;  %v2687_v11 = vpack.c.bf16 %v1566_v4, %v1566_v4 }
 0x179   : > { %2140 = vst.msk [vmem:[%s3182_s27 + $0xf0] sm:$0xf] %vm2079_vm1, %v2620_v6  ;;  %2204 = vst.msk [vmem:[%s3182_s27 + $0x1f0] sm:$0xf] %vm2079_vm1, %v2684_v7  ;;  %v2621_v45 = vpack.c.bf16 %v1500_v8, %v1500_v8  ;;  %v2685_v12 = vpack.c.bf16 %v1564_v9, %v1564_v9 }
 0x17a   : > { %2143 = vst.msk [vmem:[%s3182_s27 + $0xfc] sm:$0xf] %vm2079_vm1, %v2623_v10  ;;  %2207 = vst.msk [vmem:[%s3182_s27 + $0x1fc] sm:$0xf] %vm2079_vm1, %v2687_v11 }
 0x17b   : > { %2141 = vst.msk [vmem:[%s3182_s27 + $0xf4] sm:$0xf] %vm2079_vm1, %v2621_v45  ;;  %2205 = vst.msk [vmem:[%s3182_s27 + $0x1f4] sm:$0xf] %vm2079_vm1, %v2685_v12 }
 0x17c PF: > { %s13_s12 = sadd.s32 1, %s2990_s12  }
 0x17d   : > { %p10_p4 = scmp.ge.s32.totalorder %s13_s12, 4  }
 0x17f   :  { %12 = sbr.rel (!%p10_p4) target bundleno = 1 (0x1), region = 68 }

// kernel: forward.5
= control target key start
LH: loop header
LB: loop body
LE: loop exit
PB: predicated region body
PF: predicated region fallthrough
CT: control target
= control target key end

     0   :  { %s1486_s13 = smov 0   ;;  %s1707_s0 = inlined_call_operand.vmem [shape: f32[2,8,512], index: 0, kind: input, shape index: {}]   ;;  %s1708_s1 = inlined_call_operand.vmem [shape: f32[2,32,128], index: 1, kind: input, shape index: {}]   ;;  %s1709_s2 = inlined_call_operand.vmem [shape: f32[2,32,128], index: 2, kind: input, shape index: {}]   ;;  %s1710_s3 = inlined_call_operand.vmem [shape: f32[2,32,128], index: 3, kind: input, shape index: {}]   ;;  %s1711_s4 = inlined_call_operand.vmem [shape: f32[32,16], index: 4, kind: input, shape index: {}]   ;;  %s1712_s5 = inlined_call_operand.vmem [shape: f32[16,16], index: 5, kind: input, shape index: {}]   ;;  %s1713_s6 = inlined_call_operand.vmem [shape: f32[128,8], index: 6, kind: input, shape index: {}]   ;;  %s1714_s7 = inlined_call_operand.vmem [shape: f32[8,128], index: 7, kind: input, shape index: {}]   ;;  %s1715_s8 = inlined_call_operand.vmem [shape: f32[128,16], index: 8, kind: input, shape index: {}]   ;;  %s1716_s9 = inlined_call_operand.vmem [shape: f32[16,128], index: 9, kind: input, shape index: {}]   ;;  %s1717_s10 = inlined_call_operand.vmem [shape: f32[8,128], index: 10, kind: output, shape index: {}]  }
   0x1 LB: > { %s1492_s14 = sadd.s32 4294967295, %s1428_s13   ;;  %p1130_p0 = scmp.ge.s32.totalorder %s1428_s13, 1  ;;  %s1428_s13 = sphi %s1486_s13, %s20_s13  }
   0x2   : > { %p337_p1 = scmp.lt.s32.totalorder %s1428_s13, 3 }
   0x4   : > { %p338_p2 = pnand %p1130_p0, %p337_p1 }
   0x5   : > { %p385_p3 = scmp.lt.s32.totalorder (!%p338_p2), %s1492_s14, 1  ;;  %p1139_p4 = scmp.ne.s32.totalorder (!%p338_p2), %s1492_s14, 0 }
   0x6   : > { %341 = sbr.rel (%p338_p2) target bundleno = 1608 (0x648), region = 60 }
   0xd   : > { %s386_s15 = scalar_select %p385_p3, %s1492_s14, 1 }
   0xe   : > { %408 = sbr.rel (%p1139_p4) target bundleno = 21 (0x15), region = 64  ;;  %v409_v0 = vld [vmem:[%s1711_s4] sm:$0xff] (!%p1139_p4)  ;;  %vm413_vm0 = vcmask (!%p1139_p4), 130048   ;;  %v410_v1 = vld [vmem:[%s1711_s4 + $0x8] sm:$0xff] (!%p1139_p4)  ;;  %v411_v2 = vld [vmem:[%s1711_s4 + $0x10] sm:$0xff] (!%p1139_p4)  ;;  %v1430_v4 = vmov (!%p1139_p4), 0.0  }
   0xf   : > { %s1156_s16 = sshll.u32 %s386_s15, 5  ;;  %414 = vst.msk [vmem:[#allocation2] sm:$0xff] (!%p1139_p4), %vm413_vm0, %v409_v0  ;;  %415 = vst.msk [vmem:[#allocation2 + $0x8] sm:$0xff] (!%p1139_p4), %vm413_vm0, %v410_v1  ;;  %v412_v3 = vld [vmem:[%s1711_s4 + $0x18] sm:$0xff] (!%p1139_p4) }
  0x10   : > { %s1501_s19 = scalar_lea.vmem %s1707_s0, %s1156_s16  ;;  %s1506_s22 = scalar_lea.vmem %s1708_s1, %s1156_s16  ;;  %416 = vst.msk [vmem:[#allocation2 + $0x10] sm:$0xff] (!%p1139_p4), %vm413_vm0, %v411_v2  ;;  %418 = vst.msk [vmem:[#allocation3] sm:$0xff] (!%p1139_p4), %vm413_vm0, %v1430_v4 }
  0x11   : > { %s1511_s25 = scalar_lea.vmem %s1709_s2, %s1156_s16  ;;  %s1516_s28 = scalar_lea.vmem %s1710_s3, %s1156_s16  ;;  %417 = vst.msk [vmem:[#allocation2 + $0x18] sm:$0xff] (!%p1139_p4), %vm413_vm0, %v412_v3 }
  0x15 PF: > { %v477_v5 = vld [vmem:[%s1716_s9] sm:$0xff]  ;;  %v478_v6 = vld [vmem:[%s1716_s9 + $0x8] sm:$0xff]  ;;  %vm479_vm1 = vcmask 130048   ;;  %v583_v11 = vld [vmem:[%s1713_s6 + $0x10] sm:$0xff]  ;;  %vm682_vm2 = vcmask 64512   ;;  %p1152_p5 = scmp.ne.s32.totalorder %s1492_s14, 1 }
  0x16   : > { %v1537_v7 = vld [vmem:[#allocation2] sm:$0xff]  ;;  %v1321_v8 = vpack.c.bf16 %v478_v6, %v477_v5  ;;  %v582_v10 = vld [vmem:[%s1713_s6 + $0x8] sm:$0xff]  ;;  %v584_v13 = vld [vmem:[%s1713_s6 + $0x18] sm:$0xff] }
  0x17   : > { %1221 = vmatprep.mubr.msk.f32.mxu0 %vm479_vm1, %v1537_v7  ;;  %v581_v9 = vld [vmem:[%s1713_s6] sm:$0xff]  ;;  %v1553_v14 = vld [vmem:[#allocation2 + $0x8] sm:$0xff]  ;;  %v1329_v15 = vpack.c.bf16 %v584_v13, %v583_v11  ;;  %v1561_v18 = vld [vmem:[#allocation2 + $0x10] sm:$0xff] }
  0x18   : > { %1322 = vmatprep.subr.bf16.mxu0 %v1321_v8  ;;  %v1325_v12 = vpack.c.bf16 %v582_v10, %v581_v9  ;;  %v585_v16 = vld [vmem:[%s1713_s6 + $0x20] sm:$0xff]  ;;  %v586_v17 = vld [vmem:[%s1713_s6 + $0x28] sm:$0xff]  ;;  %v1567_v20 = vld [vmem:[#allocation2 + $0x18] sm:$0xff] }
  0x19   : > { %1324 = vmatpush3.bf16.msra.mxu0 %v1321_v8  ;;  %v1333_v19 = vpack.c.bf16 %v586_v17, %v585_v16  ;;  %v587_v21 = vld [vmem:[%s1713_s6 + $0x30] sm:$0xff]  ;;  %v588_v22 = vld [vmem:[%s1713_s6 + $0x38] sm:$0xff]  ;;  %v589_v24 = vld [vmem:[%s1713_s6 + $0x40] sm:$0xff] }
  0x1a   : > { %1326 = vmatprep.subr.bf16.mxu1 %v1325_v12  ;;  %v1337_v23 = vpack.c.bf16 %v588_v22, %v587_v21  ;;  %v590_v25 = vld [vmem:[%s1713_s6 + $0x48] sm:$0xff]  ;;  %v591_v27 = vld [vmem:[%s1713_s6 + $0x50] sm:$0xff]  ;;  %v592_v28 = vld [vmem:[%s1713_s6 + $0x58] sm:$0xff] }
  0x1b   : > { %1328 = vmatpush3.bf16.msra.mxu1 %v1325_v12  ;;  %v1341_v26 = vpack.c.bf16 %v590_v25, %v589_v24  ;;  %v1345_v29 = vpack.c.bf16 %v592_v28, %v591_v27  ;;  %v593_v30 = vld [vmem:[%s1713_s6 + $0x60] sm:$0xff]  ;;  %v594_v31 = vld [vmem:[%s1713_s6 + $0x68] sm:$0xff]  ;;  %v595_v33 = vld [vmem:[%s1713_s6 + $0x70] sm:$0xff] }
  0x1c   : > { %1222 = vmatmul.mubr.msk.f32.vlgmr.msra.gmra.mrb[0].mxu0 %vm479_vm1, %v1553_v14  ;;  %1330 = vmatprep.subr.bf16.mxu1 %v1329_v15  ;;  %v1349_v32 = vpack.c.bf16 %v594_v31, %v593_v30  ;;  %v596_v34 = vld [vmem:[%s1713_s6 + $0x78] sm:$0xff]  ;;  %v420_v36 = vld [vmem:[%s1501_s19 + $0x8] sm:$0xff]  ;;  %v419_v39 = vld [vmem:[%s1501_s19] sm:$0xff] }
  0x1d   : > { %1224 = vmatprep.mubr.msk.f32.mxu0 %vm479_vm1, %v1561_v18  ;;  %v1353_v35 = vpack.c.bf16 %v596_v34, %v595_v33  ;;  %v424_v37 = vld [vmem:[%s1506_s22 + $0x8] sm:$0xff]  ;;  %v423_v40 = vld [vmem:[%s1506_s22] sm:$0xff]  ;;  %v421_v42 = vld [vmem:[%s1501_s19 + $0x10] sm:$0xff] }
  0x1e   : > { %v440_v38 = vmul.f32 %v424_v37, %v420_v36  ;;  %v428_v41 = vld [vmem:[%s1511_s25 + $0x8] sm:$0xff]  ;;  %v425_v43 = vld [vmem:[%s1506_s22 + $0x10] sm:$0xff]  ;;  %v439_v44 = vmul.f32 %v423_v40, %v419_v39  ;;  %v422_v46 = vld [vmem:[%s1501_s19 + $0x18] sm:$0xff] }
  0x1f   : > { %1332 = vmatpush3.bf16.msra.mxu1 %v1329_v15  ;;  %v426_v47 = vld [vmem:[%s1506_s22 + $0x18] sm:$0xff]  ;;  %v427_v48 = vld [vmem:[%s1511_s25] sm:$0xff]  ;;  %v441_v49 = vmul.f32 %v425_v43, %v421_v42  ;;  %v429_v50 = vld [vmem:[%s1511_s25 + $0x10] sm:$0xff] }
  0x20   : > { %1225 = vmatmul.mubr.msk.f32.gmra.mrb[2].mxu0 %vm479_vm1, %v1567_v20  ;;  %1334 = vmatprep.subr.bf16.mxu1 %v1333_v19  ;;  %v444_v45 = vmul.f32 %v440_v38, %v428_v41  ;;  %v430_v51 = vld [vmem:[%s1511_s25 + $0x18] sm:$0xff]  ;;  %v442_v52 = vmul.f32 %v426_v47, %v422_v46  ;;  %v443_v53 = vmul.f32 %v439_v44, %v427_v48 }
  0x21   : > { %v447_v55 = vmul.f32 %v441_v49, %v429_v50  ;;  %v462_v56 = vmul.f32 %v440_v38, %v430_v51  ;;  %v453_v57 = vmul.f32 %v439_v44, %v428_v41  ;;  %v454_v58 = vmul.f32 %v440_v38, %v427_v48 }
  0x22   : > { %v445_v54 = vsub.f32 0.0, %v444_v45  ;;  %v456_v59 = vmul.f32 %v441_v49, %v430_v51  ;;  %v458_v60 = vmul.f32 %v442_v52, %v429_v50  ;;  %v450_v63 = vmul.f32 %v442_v52, %v430_v51 }
  0x23   : > { %1336 = vmatpush3.bf16.msra.mxu1 %v1333_v19  ;;  %v448_v62 = vsub.f32 0.0, %v447_v55  ;;  %v461_v0 = vmul.f32 %v439_v44, %v429_v50  ;;  %v463_v1 = vsub.f32 0.0, %v462_v56  ;;  %v455_v2 = vadd.f32 %v454_v58, %v453_v57 }
  0x24   : > { %1338 = vmatprep.subr.bf16.mxu1 %v1337_v23  ;;  %v446_v61 = vadd.f32 %v445_v54, %v443_v53  ;;  %v469_v3 = vmul.f32 %v439_v44, %v430_v51  ;;  %v470_v4 = vmul.f32 %v440_v38, %v429_v50  ;;  %v472_v5 = vmul.f32 %v441_v49, %v428_v41 }
  0x25   : > { %v451_v8 = vsub.f32 0.0, %v450_v63  ;;  %v464_v9 = vadd.f32 %v463_v1, %v461_v0  ;;  %v465_v10 = vmul.f32 %v441_v49, %v427_v48  ;;  %v457_v11 = vadd.f32 %v456_v59, %v455_v2  ;;  %v829_v63 = vld [vmem:[%s1715_s8] sm:$0xff]  ;;  %v830_v0 = vld [vmem:[%s1715_s8 + $0x8] sm:$0xff] }
  0x26   : > { %v449_v6 = vadd.f32 %v448_v62, %v446_v61  ;;  %v459_v12 = vsub.f32 0.0, %v458_v60  ;;  %v471_v13 = vadd.f32 %v470_v4, %v469_v3  ;;  %v473_v15 = vsub.f32 0.0, %v472_v5  ;;  %v727_v62 = vld [vmem:[%s1714_s7] sm:$0xff] }
  0x27   : > { %1340 = vmatpush3.bf16.msra.mxu1 %v1337_v23  ;;  %v466_v17 = vadd.f32 %v465_v10, %v464_v9  ;;  %v467_v19 = vmul.f32 %v442_v52, %v428_v41  ;;  %v475_v23 = vmul.f32 %v442_v52, %v427_v48  ;;  %1265 = vmatprep.subr.mxu0 %v727_v62  ;;  %v831_v9 = vld [vmem:[%s1715_s8 + $0x10] sm:$0xff]  ;;  %v832_v10 = vld [vmem:[%s1715_s8 + $0x18] sm:$0xff] }
  0x28   : > { %1342 = vmatprep.subr.bf16.mxu1 %v1341_v26  ;;  %v452_v16 = vadd.f32 %v451_v8, %v449_v6  ;;  %v460_v21 = vadd.f32 %v459_v12, %v457_v11  ;;  %v474_v22 = vadd.f32 %v473_v15, %v471_v13  ;;  %1266 = vmatpush3.msra.mxu0 %v727_v62 }
  0x29   : > { %v468_v27 = vadd.f32 %v467_v19, %v466_v17  ;;  %v1357_v1 = vpack.c.bf16 %v830_v0, %v829_v63  ;;  %v1361_v15 = vpack.c.bf16 %v832_v10, %v831_v9  ;;  %v833_v17 = vld [vmem:[%s1715_s8 + $0x20] sm:$0xff]  ;;  %v834_v19 = vld [vmem:[%s1715_s8 + $0x28] sm:$0xff] }
  0x2b   : > { %1344 = vmatpush3.bf16.msra.mxu1 %v1341_v26  ;;  %1358 = vmatprep.subr.bf16.mxu0 %v1357_v1 }
  0x2c   : > { %1346 = vmatprep.subr.bf16.mxu1 %v1345_v29 }
  0x2f   : > { %1348 = vmatpush3.bf16.msra.mxu1 %v1345_v29  ;;  %v476_v29 = vadd.f32 %v475_v23, %v474_v22  ;;  %v1365_v23 = vpack.c.bf16 %v834_v19, %v833_v17 }
  0x30   : > { %1350 = vmatprep.subr.bf16.mxu1 %v1349_v32 }
  0x33   : > { %1352 = vmatpush3.bf16.msra.mxu1 %v1349_v32 }
  0x34   : > { %1354 = vmatprep.subr.bf16.mxu1 %v1353_v35 }
  0x37   : > { %1356 = vmatpush3.bf16.msra.mxu1 %v1353_v35 }
  0xef   : > { %v1223_v24 = vpop.f32.mrb[0].mxu0 }
  0xf0   : > { %v558_v25 = vpop.f32.mrb[1].mxu0  ;;  %v578_v28 = vmul.f32 %v1223_v24, %v460_v21  ;;  %v835_v24 = vld [vmem:[%s1715_s8 + $0x30] sm:$0xff] }
  0xf1   : > { %v577_v26 = vmul.f32 %v558_v25, %v452_v16  ;;  %v836_v25 = vld [vmem:[%s1715_s8 + $0x38] sm:$0xff] }
  0xf3   : > { %v1226_v30 = vpop.f32.mrb[2].mxu0  ;;  %1259 = vmatprep.mubr.f32.mxu1 %v577_v26  ;;  %v1369_v26 = vpack.c.bf16 %v836_v25, %v835_v24 }
  0xf4   : > { %v568_v31 = vpop.f32.mrb[3].mxu0  ;;  %1260 = vmatmul.mubr.f32.vlgmr.msra.gmra.mrb[0].mxu1 %v578_v28  ;;  %v580_v33 = vmul.f32 %v1226_v30, %v476_v29  ;;  %v838_v28 = vld [vmem:[%s1715_s8 + $0x48] sm:$0xff]  ;;  %v839_v30 = vld [vmem:[%s1715_s8 + $0x50] sm:$0xff] }
  0xf5   : > { %v579_v32 = vmul.f32 %v568_v31, %v468_v27  ;;  %v837_v27 = vld [vmem:[%s1715_s8 + $0x40] sm:$0xff]  ;;  %v840_v31 = vld [vmem:[%s1715_s8 + $0x58] sm:$0xff] }
  0xf6   : > { %v1373_v29 = vpack.c.bf16 %v838_v28, %v837_v27 }
  0xf7   : > { %1262 = vmatprep.mubr.f32.mxu1 %v579_v32  ;;  %v1377_v32 = vpack.c.bf16 %v840_v31, %v839_v30 }
  0xf8   : > { %1263 = vmatmul.mubr.f32.gmra.mrb[2].mxu1 %v580_v33  ;;  %v841_v33 = vld [vmem:[%s1715_s8 + $0x60] sm:$0xff] }
 0x1c7   : > { %v1261_v34 = vpop.f32.mrb[0].mxu1 }
 0x1c8   : > { %v663_v35 = vpop.f32.mrb[1].mxu1  ;;  %v686_v39 = vsel %vm682_vm2, %v1261_v34, -inf }
 0x1c9   : > { %v683_v36 = vsel %vm682_vm2, %v663_v35, -inf }
 0x1ca   : > { %684 = vmax.xlane.f32.xlu0 %v683_v36  ;;  %v843_v36 = vld [vmem:[%s1715_s8 + $0x70] sm:$0xff] }
 0x1cb   : > { %v1264_v37 = vpop.f32.mrb[2].mxu1 }
 0x1cc   : > { %v673_v38 = vpop.f32.mrb[3].mxu1  ;;  %v692_v41 = vsel %vm682_vm2, %v1264_v37, -inf }
 0x1cd   : > { %v689_v40 = vsel %vm682_vm2, %v673_v38, -inf }
 0x1ce   : > { %687 = vmax.xlane.f32.xlu0 %v686_v39  ;;  %690 = vmax.xlane.f32.xlu1 %v689_v40  ;;  %v937_v39 = vld [vmem:[%s1712_s5] sm:$0xff]  ;;  %v938_v40 = vld [vmem:[%s1712_s5 + $0x8] sm:$0xff] }
 0x1d2   : > { %693 = vmax.xlane.f32.xlu1 %v692_v41  ;;  %v1389_v41 = vpack.c.bf16 %v938_v40, %v937_v39 }
 0x1d4   : > { %1390 = vmatprep.subr.bf16.mxu1 %v1389_v41 }
 0x1d5   : > { %1392 = vmatpush3.bf16.msra.mxu1 %v1389_v41 }
 0x257   : > { %v685_v42 = vpop.xlane.xlu0 %684 }
 0x258   : > { %v695_v43 = vsub.f32 %v663_v35, %v685_v42  ;;  %v431_v42 = vld [vmem:[%s1516_s28] sm:$0xff] }
 0x25a   : > { %v699_v44 = vmul.f32 1.442695, %v695_v43  ;;  %v432_v43 = vld [vmem:[%s1516_s28 + $0x8] sm:$0xff] }
 0x25b   : > { %v688_v45 = vpop.xlane.xlu0 %687  ;;  %v691_v46 = vpop.xlane.xlu1 %690 }
 0x25c   : > { %1402 = vpow2.f32 %v699_v44  ;;  %v696_v47 = vsub.f32 %v1261_v34, %v688_v45  ;;  %v697_v48 = vsub.f32 %v673_v38, %v691_v46  ;;  %v842_v34 = vld [vmem:[%s1715_s8 + $0x68] sm:$0xff] }
 0x25d   : > { %v1381_v35 = vpack.c.bf16 %v842_v34, %v841_v33 }
 0x25e   : > { %v701_v49 = vmul.f32 1.442695, %v696_v47  ;;  %v703_v50 = vmul.f32 1.442695, %v697_v48  ;;  %v433_v48 = vld [vmem:[%s1516_s28 + $0x10] sm:$0xff] }
 0x25f   : > { %v694_v51 = vpop.xlane.xlu1 %693 }
 0x260   : > { %1404 = vpow2.f32 %v701_v49  ;;  %v698_v52 = vsub.f32 %v1264_v37, %v694_v51  ;;  %v844_v37 = vld [vmem:[%s1715_s8 + $0x78] sm:$0xff] }
 0x261   : > { %1406 = vpow2.f32 %v703_v50  ;;  %v1385_v38 = vpack.c.bf16 %v844_v37, %v843_v36  ;;  %v434_v49 = vld [vmem:[%s1516_s28 + $0x18] sm:$0xff] }
 0x262   : > { %v705_v53 = vmul.f32 1.442695, %v698_v52 }
 0x264   : > { %1408 = vpow2.f32 %v705_v53 }
 0x266   : > { %v1403_v54 = vpop.eup %1402 }
 0x267   : > { %v707_v55 = vsel %vm682_vm2, %v1403_v54, 0.0 }
 0x268   : > { %708 = vadd.xlane.f32.xlu0 %v707_v55 }
 0x26a   : > { %v1405_v56 = vpop.eup %1404 }
 0x26b   : > { %v1407_v57 = vpop.eup %1406  ;;  %v710_v58 = vsel %vm682_vm2, %v1405_v56, 0.0 }
 0x26c   : > { %711 = vadd.xlane.f32.xlu1 %v710_v58  ;;  %v713_v59 = vsel %vm682_vm2, %v1407_v57, 0.0 }
 0x26d   : > { %714 = vadd.xlane.f32.xlu0 %v713_v59 }
 0x26e   : > { %v1409_v60 = vpop.eup %1408 }
 0x26f   : > { %v716_v61 = vsel %vm682_vm2, %v1409_v60, 0.0 }
 0x270   : > { %717 = vadd.xlane.f32.xlu1 %v716_v61 }
 0x2f5   : > { %v709_v2 = vpop.xlane.xlu0 %708 }
 0x2f6   : > { %1410 = vrcp.f32 %v709_v2 }
 0x2f9   : > { %v712_v3 = vpop.xlane.xlu1 %711 }
 0x2fa   : > { %v715_v4 = vpop.xlane.xlu0 %714  ;;  %1412 = vrcp.f32 %v712_v3 }
 0x2fb   : > { %1414 = vrcp.f32 %v715_v4 }
 0x2fd   : > { %v718_v5 = vpop.xlane.xlu1 %717 }
 0x2fe   : > { %1416 = vrcp.f32 %v718_v5 }
 0x300   : > { %v1411_v6 = vpop.eup %1410 }
 0x301   : > { %v723_v8 = vmul.f32 %v1411_v6, %v1403_v54  ;;  %v930_v54 = vld [vmem:[#allocation3] sm:$0xff] }
 0x303   : > { %1267 = vmatprep.mubr.msk.f32.mxu0 %vm682_vm2, %v723_v8 }
 0x304   : > { %v1413_v11 = vpop.eup %1412 }
 0x305   : > { %v1415_v12 = vpop.eup %1414  ;;  %v724_v13 = vmul.f32 %v1413_v11, %v1405_v56 }
 0x306   : > { %v725_v16 = vmul.f32 %v1415_v12, %v1407_v57 }
 0x307   : > { %1268 = vmatmul.mubr.msk.f32.vlgmr.msra.gmra.mrb[4].mxu0 %vm682_vm2, %v724_v13 }
 0x308   : > { %v1417_v21 = vpop.eup %1416  ;;  %1270 = vmatprep.mubr.msk.f32.mxu0 %vm682_vm2, %v725_v16  ;;  %1360 = vmatpush3.bf16.msra.mxu0 %v1357_v1 }
 0x309   : > { %v726_v22 = vmul.f32 %v1417_v21, %v1409_v60  ;;  %1362 = vmatprep.subr.bf16.mxu0 %v1361_v15 }
 0x30b   : > { %1271 = vmatmul.mubr.msk.f32.gmra.mrb[6].mxu0 %vm682_vm2, %v726_v22 }
 0x30c   : > { %1364 = vmatpush3.bf16.msra.mxu0 %v1361_v15 }
 0x30d   : > { %1366 = vmatprep.subr.bf16.mxu0 %v1365_v23 }
 0x310   : > { %1368 = vmatpush3.bf16.msra.mxu0 %v1365_v23 }
 0x311   : > { %1370 = vmatprep.subr.bf16.mxu0 %v1369_v26 }
 0x314   : > { %1372 = vmatpush3.bf16.msra.mxu0 %v1369_v26 }
 0x315   : > { %1374 = vmatprep.subr.bf16.mxu0 %v1373_v29 }
 0x318   : > { %1376 = vmatpush3.bf16.msra.mxu0 %v1373_v29 }
 0x319   : > { %1378 = vmatprep.subr.bf16.mxu0 %v1377_v32 }
 0x31c   : > { %1380 = vmatpush3.bf16.msra.mxu0 %v1377_v32 }
 0x31d   : > { %1382 = vmatprep.subr.bf16.mxu0 %v1381_v35 }
 0x320   : > { %1384 = vmatpush3.bf16.msra.mxu0 %v1381_v35 }
 0x321   : > { %1386 = vmatprep.subr.bf16.mxu0 %v1385_v38 }
 0x324   : > { %1388 = vmatpush3.bf16.msra.mxu0 %v1385_v38 }
 0x3da   : > { %v1269_v44 = vpop.f32.mrb[4].mxu0 }
 0x3db   : > { %v806_v45 = vpop.f32.mrb[5].mxu0  ;;  %v826_v47 = vmul.f32 %v1269_v44, %v432_v43 }
 0x3dc   : > { %v825_v46 = vmul.f32 %v806_v45, %v431_v42 }
 0x3de   : > { %v1272_v50 = vpop.f32.mrb[6].mxu0  ;;  %1305 = vmatprep.mubr.f32.mxu0 %v825_v46 }
 0x3df   : > { %v816_v51 = vpop.f32.mrb[7].mxu0  ;;  %1306 = vmatmul.mubr.f32.vlgmr.msra.gmra.mrb[8].mxu0 %v826_v47  ;;  %v828_v53 = vmul.f32 %v1272_v50, %v434_v49 }
 0x3e0   : > { %v827_v52 = vmul.f32 %v816_v51, %v433_v48 }
 0x3e2   : > { %1308 = vmatprep.mubr.f32.mxu0 %v827_v52 }
 0x3e3   : > { %1309 = vmatmul.mubr.f32.gmra.mrb[10].mxu0 %v828_v53 }
 0x4b2   : > { %v1307_v55 = vpop.f32.mrb[8].mxu0 }
 0x4b3   : > { %v911_v56 = vpop.f32.mrb[9].mxu0  ;;  %v934_v59 = vadd.f32 %v1307_v55, %v1553_v14 }
 0x4b4   : > { %v931_v57 = vadd.f32 %v930_v54, %v911_v56  ;;  %v933_v58 = vadd.f32 %v911_v56, %v1537_v7 }
 0x4b6   : > { %932 = vst.msk [vmem:[#allocation3] sm:$0xff] %vm479_vm1, %v931_v57  ;;  %v1310_v60 = vpop.f32.mrb[10].mxu0  ;;  %1315 = vmatprep.mubr.msk.f32.mxu1 %vm479_vm1, %v933_v58 }
 0x4b7   : > { %v921_v61 = vpop.f32.mrb[11].mxu0  ;;  %1316 = vmatmul.mubr.msk.f32.vlgmr.msra.gmra.mrb[4].mxu1 %vm479_vm1, %v934_v59  ;;  %v936_v63 = vadd.f32 %v1310_v60, %v1567_v20 }
 0x4b8   : > { %v935_v62 = vadd.f32 %v921_v61, %v1561_v18 }
 0x4ba   : > { %1318 = vmatprep.mubr.msk.f32.mxu1 %vm479_vm1, %v935_v62 }
 0x4bb   : > { %1319 = vmatmul.mubr.msk.f32.gmra.mrb[6].mxu1 %vm479_vm1, %v936_v63 }
 0x4bd   : > { %v1051_v6 = vld [vmem:[#allocation3] sm:$0xff] (!%p1152_p5) }
 0x58a   : > { %v1317_v0 = vpop.f32.mrb[4].mxu1  ;;  %1043 = sbr.rel (%p1152_p5) target bundleno = 1608 (0x648), region = 68 }
 0x58b   : > { %1037 = vst.msk [vmem:[#allocation2 + $0x8] sm:$0xff] %vm479_vm1, %v1317_v0  ;;  %v1017_v7 = vpop.f32.mrb[5].mxu1 }
 0x58c   : > { %1036 = vst.msk [vmem:[#allocation2] sm:$0xff] %vm479_vm1, %v1017_v7 }
 0x58e   : > { %v1320_v14 = vpop.f32.mrb[6].mxu1 }
 0x58f   : > { %1039 = vst.msk [vmem:[#allocation2 + $0x18] sm:$0xff] %vm479_vm1, %v1320_v14  ;;  %v1027_v1 = vpop.f32.mrb[7].mxu1 }
 0x590   : > { %1038 = vst.msk [vmem:[#allocation2 + $0x10] sm:$0xff] %vm479_vm1, %v1027_v1 }
 0x592   : > { %v1045_v20 = vld [vmem:[#allocation2 + $0x8] sm:$0xff] }
 0x593   : > { %v1044_v18 = vld [vmem:[#allocation2] sm:$0xff] }
 0x594   : > { %v1048_v3 = vadd.f32 %v1045_v20, %v1044_v18 }
 0x596   : > { %v1047_v4 = vld [vmem:[#allocation2 + $0x18] sm:$0xff] }
 0x597   : > { %v1046_v2 = vld [vmem:[#allocation2 + $0x10] sm:$0xff] }
 0x598   : > { %v1049_v5 = vadd.f32 %v1048_v3, %v1046_v2 }
 0x59a   : > { %v1050_v8 = vadd.f32 %v1049_v5, %v1047_v4 }
 0x59c   : > { %v1052_v9 = vmul.f32 %v1051_v6, %v1050_v8 }
 0x59e   : > { %v1053_v10 = vsel %vm479_vm1, %v1052_v9, 0.0 }
 0x59f   : > { %1054 = vadd.xlane.f32.xlu0 %v1053_v10 }
 0x62c   : > { %v1055_v11 = vpop.xlane.xlu0 %1054 }
 0x62d   : > { %v1153_v12 = vmul.f32 -1.442695, %v1055_v11 }
 0x62f   : > { %1418 = vpow2.f32 %v1153_v12 }
 0x639   : > { %v1419_v13 = vpop.eup %1418 }
 0x63a   : > { %v1059_v15 = vadd.f32 1.0, %v1419_v13 }
 0x63c   : > { %1420 = vrcp.f32 %v1059_v15 }
 0x646   : > { %v1421_v16 = vpop.eup %1420 }
 0x647   : > { %1062 = vst [vmem:[%s1717_s10] sm:$0xff] %v1421_v16 }
 0x648 PF: > { %s20_s13 = sadd.s32 1, %s1428_s13  }
 0x649   : > { %p17_p6 = scmp.ge.s32.totalorder %s20_s13, 4  }
 0x64b   :  { %19 = sbr.rel (!%p17_p6) target bundleno = 1 (0x1), region = 103 }

// kernel: forward.4
= control target key start
LH: loop header
LB: loop body
LE: loop exit
PB: predicated region body
PF: predicated region fallthrough
CT: control target
= control target key end

     0   :  { %s10702_s12 = smov 0   ;;  %s11865_s0 = inlined_call_operand.vmem [shape: bf16[2,8,4096], index: 0, kind: input, shape index: {}]   ;;  %s11866_s1 = inlined_call_operand.vmem [shape: bf16[2,4096,512], index: 1, kind: input, shape index: {}]   ;;  %s11867_s2 = inlined_call_operand.vmem [shape: f32[2,1,512], index: 2, kind: input, shape index: {}]   ;;  %s11868_s3 = inlined_call_operand.vmem [shape: f32[2,8,512], index: 3, kind: output, shape index: {}]  }
   0x1 LB: > { %s7901_s13 = sadd.s32 4294967295, %s10680_s12   ;;  %p7905_p0 = scmp.ge.s32.totalorder %s10680_s12, 1  ;;  %s10680_s12 = sphi %s10702_s12, %s13_s12  }
   0x2   : > { %p156_p1 = scmp.lt.s32.totalorder %s10680_s12, 3 }
   0x4   : > { %p157_p2 = pnand %p7905_p0, %p156_p1 }
   0x5   : > { %p189_p3 = scmp.lt.s32.totalorder (!%p157_p2), %s7901_s13, 1 }
   0x6   : > { %160 = sbr.rel (%p157_p2) target bundleno = 1259 (0x4eb), region = 32 }
   0xd   : > { %s11870_s13 = smov (!%p189_p3, %s7901_s13), 1 }
   0xe   : > { %s8972_s14 = sshll.u32 %s11870_s13, 13  ;;  %s8971_s18 = sshll.u32 %s11870_s13, 7 }
   0xf   : > { %s10716_s17 = scalar_lea.vmem %s11866_s1, %s8972_s14  ;;  %s10766_s21 = scalar_lea.vmem %s11865_s0, %s8971_s18 }
  0x10   : > { %v9106_v0 = vld [vmem:[%s10716_s17 + $0x4] ss:$16 sps:$4 sm:$0xff]   ;;  %v9108_v1 = vld [vmem:[%s10716_s17 + $0xc] ss:$16 sps:$4 sm:$0xff]   ;;  %v9110_v2 = vld [vmem:[%s10716_s17] ss:$16 sps:$4 sm:$0xff]  }
  0x11   : > { %6502 = vmatprep.subr.bf16.mxu0 %v9106_v0  ;;  %v9111_v3 = vld [vmem:[%s10716_s17 + $0x8] ss:$16 sps:$4 sm:$0xff]   ;;  %7158 = vmatprep.subr.bf16.mxu1 %v9108_v1  ;;  %v9112_v4 = vld [vmem:[%s10716_s17 + $0x24] ss:$16 sps:$4 sm:$0xff]   ;;  %v9114_v5 = vld [vmem:[%s10716_s17 + $0x2c] ss:$16 sps:$4 sm:$0xff]  }
  0x12   : > { %6503 = vmatpush1.bf16.msra.mxu0 %v9110_v2  ;;  %7159 = vmatpush1.bf16.msra.mxu1 %v9111_v3  ;;  %v9116_v6 = vld [vmem:[%s10716_s17 + $0x20] ss:$16 sps:$4 sm:$0xff]   ;;  %v9117_v7 = vld [vmem:[%s10716_s17 + $0x28] ss:$16 sps:$4 sm:$0xff]   ;;  %v9118_v8 = vld [vmem:[%s10716_s17 + $0x44] ss:$16 sps:$4 sm:$0xff]  }
  0x13   : > { %6504 = vmatprep.subr.bf16.mxu0 %v9112_v4  ;;  %7160 = vmatprep.subr.bf16.mxu1 %v9114_v5  ;;  %v9120_v9 = vld [vmem:[%s10716_s17 + $0x4c] ss:$16 sps:$4 sm:$0xff]   ;;  %v9122_v10 = vld [vmem:[%s10716_s17 + $0x40] ss:$16 sps:$4 sm:$0xff]   ;;  %v9123_v11 = vld [vmem:[%s10716_s17 + $0x48] ss:$16 sps:$4 sm:$0xff]  }
  0x14   : > { %v9124_v12 = vld [vmem:[%s10716_s17 + $0x64] ss:$16 sps:$4 sm:$0xff]   ;;  %v9126_v13 = vld [vmem:[%s10716_s17 + $0x6c] ss:$16 sps:$4 sm:$0xff]   ;;  %v9128_v14 = vld [vmem:[%s10716_s17 + $0x60] ss:$16 sps:$4 sm:$0xff]  }
  0x15   : > { %v9129_v15 = vld [vmem:[%s10716_s17 + $0x68] ss:$16 sps:$4 sm:$0xff]   ;;  %v9130_v16 = vld [vmem:[%s10716_s17 + $0x84] ss:$16 sps:$4 sm:$0xff]   ;;  %v9132_v17 = vld [vmem:[%s10716_s17 + $0x8c] ss:$16 sps:$4 sm:$0xff]  }
  0x16   : > { %6505 = vmatpush1.bf16.msra.mxu0 %v9116_v6  ;;  %7161 = vmatpush1.bf16.msra.mxu1 %v9117_v7  ;;  %v9134_v18 = vld [vmem:[%s10716_s17 + $0x80] ss:$16 sps:$4 sm:$0xff]   ;;  %v9135_v19 = vld [vmem:[%s10716_s17 + $0x88] ss:$16 sps:$4 sm:$0xff]   ;;  %v9136_v20 = vld [vmem:[%s10716_s17 + $0xa4] ss:$16 sps:$4 sm:$0xff]  }
  0x17   : > { %6506 = vmatprep.subr.bf16.mxu0 %v9118_v8  ;;  %7162 = vmatprep.subr.bf16.mxu1 %v9120_v9  ;;  %v9138_v21 = vld [vmem:[%s10716_s17 + $0xac] ss:$16 sps:$4 sm:$0xff]   ;;  %v9140_v22 = vld [vmem:[%s10716_s17 + $0xa0] ss:$16 sps:$4 sm:$0xff]   ;;  %v9141_v23 = vld [vmem:[%s10716_s17 + $0xa8] ss:$16 sps:$4 sm:$0xff]  }
  0x18   : > { %v9142_v24 = vld [vmem:[%s10716_s17 + $0xc4] ss:$16 sps:$4 sm:$0xff]   ;;  %v9144_v25 = vld [vmem:[%s10716_s17 + $0xcc] ss:$16 sps:$4 sm:$0xff]   ;;  %v9146_v26 = vld [vmem:[%s10716_s17 + $0xc0] ss:$16 sps:$4 sm:$0xff]  }
  0x19   : > { %v9147_v27 = vld [vmem:[%s10716_s17 + $0xc8] ss:$16 sps:$4 sm:$0xff]   ;;  %v9148_v28 = vld [vmem:[%s10716_s17 + $0xe4] ss:$16 sps:$4 sm:$0xff]   ;;  %v9150_v29 = vld [vmem:[%s10716_s17 + $0xec] ss:$16 sps:$4 sm:$0xff]  }
  0x1a   : > { %6507 = vmatpush1.bf16.msra.mxu0 %v9122_v10  ;;  %7163 = vmatpush1.bf16.msra.mxu1 %v9123_v11  ;;  %v9152_v30 = vld [vmem:[%s10716_s17 + $0xe0] ss:$16 sps:$4 sm:$0xff]   ;;  %v9153_v31 = vld [vmem:[%s10716_s17 + $0xe8] ss:$16 sps:$4 sm:$0xff]   ;;  %v9154_v32 = vld [vmem:[%s10716_s17 + $0x104] ss:$16 sps:$4 sm:$0xff]  }
  0x1b   : > { %6508 = vmatprep.subr.bf16.mxu0 %v9124_v12  ;;  %7164 = vmatprep.subr.bf16.mxu1 %v9126_v13  ;;  %v9156_v33 = vld [vmem:[%s10716_s17 + $0x10c] ss:$16 sps:$4 sm:$0xff]   ;;  %v9158_v34 = vld [vmem:[%s10716_s17 + $0x100] ss:$16 sps:$4 sm:$0xff]   ;;  %v9159_v35 = vld [vmem:[%s10716_s17 + $0x108] ss:$16 sps:$4 sm:$0xff]  }
  0x1c   : > { %v9160_v36 = vld [vmem:[%s10716_s17 + $0x124] ss:$16 sps:$4 sm:$0xff]   ;;  %v9162_v37 = vld [vmem:[%s10716_s17 + $0x12c] ss:$16 sps:$4 sm:$0xff]   ;;  %v9164_v38 = vld [vmem:[%s10716_s17 + $0x120] ss:$16 sps:$4 sm:$0xff]  }
  0x1d   : > { %v9165_v39 = vld [vmem:[%s10716_s17 + $0x128] ss:$16 sps:$4 sm:$0xff]   ;;  %v9166_v40 = vld [vmem:[%s10716_s17 + $0x144] ss:$16 sps:$4 sm:$0xff]   ;;  %v9168_v41 = vld [vmem:[%s10716_s17 + $0x14c] ss:$16 sps:$4 sm:$0xff]  }
  0x1e   : > { %6509 = vmatpush1.bf16.msra.mxu0 %v9128_v14  ;;  %7165 = vmatpush1.bf16.msra.mxu1 %v9129_v15  ;;  %v9170_v42 = vld [vmem:[%s10716_s17 + $0x140] ss:$16 sps:$4 sm:$0xff]   ;;  %v9171_v43 = vld [vmem:[%s10716_s17 + $0x148] ss:$16 sps:$4 sm:$0xff]   ;;  %v9172_v44 = vld [vmem:[%s10716_s17 + $0x164] ss:$16 sps:$4 sm:$0xff]  }
  0x1f   : > { %6510 = vmatprep.subr.bf16.mxu0 %v9130_v16  ;;  %7166 = vmatprep.subr.bf16.mxu1 %v9132_v17  ;;  %v9174_v45 = vld [vmem:[%s10716_s17 + $0x16c] ss:$16 sps:$4 sm:$0xff]   ;;  %v208_v46 = vld [vmem:[%s10766_s21] sm:$0xff]  ;;  %v9177_v49 = vld [vmem:[%s10716_s17 + $0x168] ss:$16 sps:$4 sm:$0xff]   ;;  %s7910_s22 = sshll.u32 %s11870_s13, 2 }
  0x20   : > { %v9176_v47 = vld [vmem:[%s10716_s17 + $0x160] ss:$16 sps:$4 sm:$0xff]   ;;  %v7914_v48 = vcombine.high %v208_v46, %v208_v46  ;;  %v9178_v50 = vld [vmem:[%s10716_s17 + $0x184] ss:$16 sps:$4 sm:$0xff]   ;;  %v9180_v51 = vld [vmem:[%s10716_s17 + $0x18c] ss:$16 sps:$4 sm:$0xff]   ;;  %v7913_v4 = vcombine.low %v208_v46, %v208_v46  ;;  %s202_s25 = scalar_lea.vmem %s11867_s2, %s7910_s22 }
  0x21   : > { %v9182_v52 = vld [vmem:[%s10716_s17 + $0x180] ss:$16 sps:$4 sm:$0xff]   ;;  %v9183_v53 = vld [vmem:[%s10716_s17 + $0x188] ss:$16 sps:$4 sm:$0xff]   ;;  %v9184_v54 = vld [vmem:[%s10716_s17 + $0x1a4] ss:$16 sps:$4 sm:$0xff]  }
  0x22   : > { %6511 = vmatpush1.bf16.msra.mxu0 %v9134_v18  ;;  %7167 = vmatpush1.bf16.msra.mxu1 %v9135_v19  ;;  %v9186_v55 = vld [vmem:[%s10716_s17 + $0x1ac] ss:$16 sps:$4 sm:$0xff]   ;;  %v9188_v56 = vld [vmem:[%s10716_s17 + $0x1a0] ss:$16 sps:$4 sm:$0xff]   ;;  %v9189_v57 = vld [vmem:[%s10716_s17 + $0x1a8] ss:$16 sps:$4 sm:$0xff]  }
  0x23   : > { %6512 = vmatprep.subr.bf16.mxu0 %v9136_v20  ;;  %7168 = vmatprep.subr.bf16.mxu1 %v9138_v21  ;;  %v9190_v58 = vld [vmem:[%s10716_s17 + $0x1c4] ss:$16 sps:$4 sm:$0xff]   ;;  %v9192_v59 = vld [vmem:[%s10716_s17 + $0x1cc] ss:$16 sps:$4 sm:$0xff]   ;;  %v9194_v60 = vld [vmem:[%s10716_s17 + $0x1c0] ss:$16 sps:$4 sm:$0xff]  }
  0x24   : > { %6534 = vmatprep.mubr.bf16.mxu0 %v7914_v48  ;;  %7190 = vmatprep.mubr.bf16.mxu1 %v7914_v48  ;;  %v9195_v61 = vld [vmem:[%s10716_s17 + $0x1c8] ss:$16 sps:$4 sm:$0xff]   ;;  %v9196_v62 = vld [vmem:[%s10716_s17 + $0x1e4] ss:$16 sps:$4 sm:$0xff]   ;;  %v9198_v63 = vld [vmem:[%s10716_s17 + $0x1ec] ss:$16 sps:$4 sm:$0xff]  }
  0x25   : > { %v9200_v0 = vld [vmem:[%s10716_s17 + $0x1e0] ss:$16 sps:$4 sm:$0xff]   ;;  %v9201_v1 = vld [vmem:[%s10716_s17 + $0x1e8] ss:$16 sps:$4 sm:$0xff]   ;;  %v9206_v2 = vld [vmem:[%s10716_s17 + $0x204] ss:$16 sps:$4 sm:$0xff]  }
  0x26   : > { %6513 = vmatpush1.bf16.msra.mxu0 %v9140_v22  ;;  %7169 = vmatpush1.bf16.msra.mxu1 %v9141_v23  ;;  %v9209_v3 = vld [vmem:[%s10716_s17 + $0x20c] ss:$16 sps:$4 sm:$0xff]   ;;  %v9204_v5 = vld [vmem:[%s10716_s17 + $0x200] ss:$16 sps:$4 sm:$0xff]   ;;  %v9207_v6 = vld [vmem:[%s10716_s17 + $0x208] ss:$16 sps:$4 sm:$0xff]  }
  0x27   : > { %6514 = vmatprep.subr.bf16.mxu0 %v9142_v24  ;;  %7170 = vmatprep.subr.bf16.mxu1 %v9144_v25  ;;  %v9212_v7 = vld [vmem:[%s10716_s17 + $0x224] ss:$16 sps:$4 sm:$0xff]   ;;  %v9215_v8 = vld [vmem:[%s10716_s17 + $0x22c] ss:$16 sps:$4 sm:$0xff]   ;;  %v9210_v9 = vld [vmem:[%s10716_s17 + $0x220] ss:$16 sps:$4 sm:$0xff]  }
  0x28   : > { %v9213_v10 = vld [vmem:[%s10716_s17 + $0x228] ss:$16 sps:$4 sm:$0xff]   ;;  %v9218_v11 = vld [vmem:[%s10716_s17 + $0x244] ss:$16 sps:$4 sm:$0xff]   ;;  %v9221_v12 = vld [vmem:[%s10716_s17 + $0x24c] ss:$16 sps:$4 sm:$0xff]  }
  0x29   : > { %v9216_v13 = vld [vmem:[%s10716_s17 + $0x240] ss:$16 sps:$4 sm:$0xff]   ;;  %v9219_v14 = vld [vmem:[%s10716_s17 + $0x248] ss:$16 sps:$4 sm:$0xff]   ;;  %v9224_v15 = vld [vmem:[%s10716_s17 + $0x264] ss:$16 sps:$4 sm:$0xff]  }
  0x2a   : > { %6515 = vmatpush1.bf16.msra.mxu0 %v9146_v26  ;;  %7171 = vmatpush1.bf16.msra.mxu1 %v9147_v27  ;;  %v9227_v16 = vld [vmem:[%s10716_s17 + $0x26c] ss:$16 sps:$4 sm:$0xff]   ;;  %v9222_v17 = vld [vmem:[%s10716_s17 + $0x260] ss:$16 sps:$4 sm:$0xff]   ;;  %v9225_v18 = vld [vmem:[%s10716_s17 + $0x268] ss:$16 sps:$4 sm:$0xff]  }
  0x2b   : > { %6516 = vmatprep.subr.bf16.mxu0 %v9148_v28  ;;  %7172 = vmatprep.subr.bf16.mxu1 %v9150_v29  ;;  %v9230_v19 = vld [vmem:[%s10716_s17 + $0x284] ss:$16 sps:$4 sm:$0xff]   ;;  %v9233_v20 = vld [vmem:[%s10716_s17 + $0x28c] ss:$16 sps:$4 sm:$0xff]   ;;  %v9228_v21 = vld [vmem:[%s10716_s17 + $0x280] ss:$16 sps:$4 sm:$0xff]  }
  0x2c   : > { %v9231_v22 = vld [vmem:[%s10716_s17 + $0x288] ss:$16 sps:$4 sm:$0xff]   ;;  %v9236_v23 = vld [vmem:[%s10716_s17 + $0x2a4] ss:$16 sps:$4 sm:$0xff]   ;;  %v9239_v24 = vld [vmem:[%s10716_s17 + $0x2ac] ss:$16 sps:$4 sm:$0xff]  }
  0x2d   : > { %v9234_v25 = vld [vmem:[%s10716_s17 + $0x2a0] ss:$16 sps:$4 sm:$0xff]   ;;  %v9237_v26 = vld [vmem:[%s10716_s17 + $0x2a8] ss:$16 sps:$4 sm:$0xff]   ;;  %v9242_v27 = vld [vmem:[%s10716_s17 + $0x2c4] ss:$16 sps:$4 sm:$0xff]  }
  0x2e   : > { %6517 = vmatpush1.bf16.msra.mxu0 %v9152_v30  ;;  %7173 = vmatpush1.bf16.msra.mxu1 %v9153_v31  ;;  %v9245_v28 = vld [vmem:[%s10716_s17 + $0x2cc] ss:$16 sps:$4 sm:$0xff]   ;;  %v9240_v31 = vld [vmem:[%s10716_s17 + $0x2c0] ss:$16 sps:$4 sm:$0xff]   ;;  %v9267_v48 = vld [vmem:[%s10716_s17 + $0x348] ss:$16 sps:$4 sm:$0xff]  }
  0x2f   : > { %6518 = vmatprep.subr.bf16.mxu0 %v9154_v32  ;;  %7174 = vmatprep.subr.bf16.mxu1 %v9156_v33  ;;  %v10816_v29 = vld [vmem:[%s10766_s21 + $0x8] sm:$0xff]  ;;  %v9248_v33 = vld [vmem:[%s10716_s17 + $0x2e4] ss:$16 sps:$4 sm:$0xff]   ;;  %s8973_s26 = sshll.u32 %s11870_s13, 5 }
  0x30   : > { %v7916_v30 = vcombine.high %v10816_v29, %v10816_v29  ;;  %v9243_v32 = vld [vmem:[%s10716_s17 + $0x2c8] ss:$16 sps:$4 sm:$0xff]   ;;  %v9269_v46 = vld [vmem:[%s10716_s17 + $0x34c] ss:$16 sps:$4 sm:$0xff]   ;;  %s207_s29 = scalar_lea.vmem %s11868_s3, %s8973_s26 }
  0x32   : > { %6519 = vmatpush1.bf16.msra.mxu0 %v9158_v34  ;;  %7175 = vmatpush1.bf16.msra.mxu1 %v9159_v35  ;;  %v9251_v34 = vld [vmem:[%s10716_s17 + $0x2ec] ss:$16 sps:$4 sm:$0xff]   ;;  %v9246_v35 = vld [vmem:[%s10716_s17 + $0x2e0] ss:$16 sps:$4 sm:$0xff]  }
  0x33   : > { %6520 = vmatprep.subr.bf16.mxu0 %v9160_v36  ;;  %7176 = vmatprep.subr.bf16.mxu1 %v9162_v37  ;;  %v9249_v36 = vld [vmem:[%s10716_s17 + $0x2e8] ss:$16 sps:$4 sm:$0xff]   ;;  %v9254_v37 = vld [vmem:[%s10716_s17 + $0x304] ss:$16 sps:$4 sm:$0xff]  }
  0x36   : > { %6521 = vmatpush1.bf16.msra.mxu0 %v9164_v38  ;;  %7177 = vmatpush1.bf16.msra.mxu1 %v9165_v39  ;;  %v9257_v38 = vld [vmem:[%s10716_s17 + $0x30c] ss:$16 sps:$4 sm:$0xff]   ;;  %v9252_v39 = vld [vmem:[%s10716_s17 + $0x300] ss:$16 sps:$4 sm:$0xff]  }
  0x37   : > { %6522 = vmatprep.subr.bf16.mxu0 %v9166_v40  ;;  %7178 = vmatprep.subr.bf16.mxu1 %v9168_v41  ;;  %v9255_v40 = vld [vmem:[%s10716_s17 + $0x308] ss:$16 sps:$4 sm:$0xff]   ;;  %v9260_v41 = vld [vmem:[%s10716_s17 + $0x324] ss:$16 sps:$4 sm:$0xff]  }
  0x3a   : > { %6523 = vmatpush1.bf16.msra.mxu0 %v9170_v42  ;;  %7179 = vmatpush1.bf16.msra.mxu1 %v9171_v43  ;;  %v9263_v42 = vld [vmem:[%s10716_s17 + $0x32c] ss:$16 sps:$4 sm:$0xff]   ;;  %v9258_v43 = vld [vmem:[%s10716_s17 + $0x320] ss:$16 sps:$4 sm:$0xff]  }
  0x3b   : > { %6524 = vmatprep.subr.bf16.mxu0 %v9172_v44  ;;  %7180 = vmatprep.subr.bf16.mxu1 %v9174_v45  ;;  %v9261_v44 = vld [vmem:[%s10716_s17 + $0x328] ss:$16 sps:$4 sm:$0xff]   ;;  %v9266_v45 = vld [vmem:[%s10716_s17 + $0x344] ss:$16 sps:$4 sm:$0xff]  }
  0x3e   : > { %6525 = vmatpush1.bf16.msra.mxu0 %v9176_v47  ;;  %7181 = vmatpush1.bf16.msra.mxu1 %v9177_v49  ;;  %v9264_v47 = vld [vmem:[%s10716_s17 + $0x340] ss:$16 sps:$4 sm:$0xff]   ;;  %v9272_v49 = vld [vmem:[%s10716_s17 + $0x364] ss:$16 sps:$4 sm:$0xff]  }
  0x3f   : > { %6526 = vmatprep.subr.bf16.mxu0 %v9178_v50  ;;  %7182 = vmatprep.subr.bf16.mxu1 %v9180_v51  ;;  %v9275_v50 = vld [vmem:[%s10716_s17 + $0x36c] ss:$16 sps:$4 sm:$0xff]   ;;  %v9270_v51 = vld [vmem:[%s10716_s17 + $0x360] ss:$16 sps:$4 sm:$0xff]  }
  0x42   : > { %6527 = vmatpush1.bf16.msra.mxu0 %v9182_v52  ;;  %7183 = vmatpush1.bf16.msra.mxu1 %v9183_v53  ;;  %v9273_v52 = vld [vmem:[%s10716_s17 + $0x368] ss:$16 sps:$4 sm:$0xff]   ;;  %v9278_v53 = vld [vmem:[%s10716_s17 + $0x384] ss:$16 sps:$4 sm:$0xff]  }
  0x43   : > { %6528 = vmatprep.subr.bf16.mxu0 %v9184_v54  ;;  %7184 = vmatprep.subr.bf16.mxu1 %v9186_v55  ;;  %v9281_v54 = vld [vmem:[%s10716_s17 + $0x38c] ss:$16 sps:$4 sm:$0xff]   ;;  %v9276_v55 = vld [vmem:[%s10716_s17 + $0x380] ss:$16 sps:$4 sm:$0xff]  }
  0x46   : > { %6529 = vmatpush1.bf16.msra.mxu0 %v9188_v56  ;;  %7185 = vmatpush1.bf16.msra.mxu1 %v9189_v57  ;;  %v9279_v56 = vld [vmem:[%s10716_s17 + $0x388] ss:$16 sps:$4 sm:$0xff]   ;;  %v9284_v57 = vld [vmem:[%s10716_s17 + $0x3a4] ss:$16 sps:$4 sm:$0xff]  }
  0x47   : > { %6530 = vmatprep.subr.bf16.mxu0 %v9190_v58  ;;  %7186 = vmatprep.subr.bf16.mxu1 %v9192_v59  ;;  %v9287_v58 = vld [vmem:[%s10716_s17 + $0x3ac] ss:$16 sps:$4 sm:$0xff]   ;;  %v9282_v59 = vld [vmem:[%s10716_s17 + $0x3a0] ss:$16 sps:$4 sm:$0xff]  }
  0x4a   : > { %6531 = vmatpush1.bf16.msra.mxu0 %v9194_v60  ;;  %7187 = vmatpush1.bf16.msra.mxu1 %v9195_v61  ;;  %v9285_v60 = vld [vmem:[%s10716_s17 + $0x3a8] ss:$16 sps:$4 sm:$0xff]   ;;  %v9290_v61 = vld [vmem:[%s10716_s17 + $0x3c4] ss:$16 sps:$4 sm:$0xff]  }
  0x4b   : > { %6532 = vmatprep.subr.bf16.mxu0 %v9196_v62  ;;  %7188 = vmatprep.subr.bf16.mxu1 %v9198_v63  ;;  %v9293_v62 = vld [vmem:[%s10716_s17 + $0x3cc] ss:$16 sps:$4 sm:$0xff]   ;;  %v9288_v63 = vld [vmem:[%s10716_s17 + $0x3c0] ss:$16 sps:$4 sm:$0xff]  }
  0x4e   : > { %6533 = vmatpush1.bf16.msra.mxu0 %v9200_v0  ;;  %7189 = vmatpush1.bf16.msra.mxu1 %v9201_v1  ;;  %v9291_v0 = vld [vmem:[%s10716_s17 + $0x3c8] ss:$16 sps:$4 sm:$0xff]   ;;  %v9296_v1 = vld [vmem:[%s10716_s17 + $0x3e4] ss:$16 sps:$4 sm:$0xff]  }
  0x4f   : > { %6543 = vmatprep.subr.bf16.mxu0 %v9206_v2  ;;  %7199 = vmatprep.subr.bf16.mxu1 %v9209_v3  ;;  %v9299_v2 = vld [vmem:[%s10716_s17 + $0x3ec] ss:$16 sps:$4 sm:$0xff]   ;;  %v9294_v3 = vld [vmem:[%s10716_s17 + $0x3e0] ss:$16 sps:$4 sm:$0xff]  }
  0x51   : > { %6535 = vmatmul.mubr.bf16.vlgmr.msra.gmra.mrb[0].mxu0 %v7913_v4  ;;  %7191 = vmatmul.mubr.bf16.vlgmr.msra.gmra.mrb[0].mxu1 %v7913_v4  ;;  %v9297_v4 = vld [vmem:[%s10716_s17 + $0x3e8] ss:$16 sps:$4 sm:$0xff]  }
  0x52   : > { %6544 = vmatpush1.bf16.msra.mxu0 %v9204_v5  ;;  %7200 = vmatpush1.bf16.msra.mxu1 %v9207_v6  ;;  %v9304_v5 = vld [vmem:[%s10716_s17 + $0x404] ss:$16 sps:$4 sm:$0xff]   ;;  %v9307_v6 = vld [vmem:[%s10716_s17 + $0x40c] ss:$16 sps:$4 sm:$0xff]  }
  0x53   : > { %6545 = vmatprep.subr.bf16.mxu0 %v9212_v7  ;;  %7201 = vmatprep.subr.bf16.mxu1 %v9215_v8  ;;  %v7915_v7 = vcombine.low %v10816_v29, %v10816_v29  ;;  %v9302_v8 = vld [vmem:[%s10716_s17 + $0x400] ss:$16 sps:$4 sm:$0xff]   ;;  %v9337_v29 = vld [vmem:[%s10716_s17 + $0x4ac] ss:$16 sps:$4 sm:$0xff]  }
  0x54   : > { %6575 = vmatprep.mubr.bf16.mxu0 %v7916_v30  ;;  %7231 = vmatprep.mubr.bf16.mxu1 %v7916_v30  ;;  %v9332_v30 = vld [vmem:[%s10716_s17 + $0x4a0] ss:$16 sps:$4 sm:$0xff]  }
  0x56   : > { %6546 = vmatpush1.bf16.msra.mxu0 %v9210_v9  ;;  %7202 = vmatpush1.bf16.msra.mxu1 %v9213_v10  ;;  %v9305_v9 = vld [vmem:[%s10716_s17 + $0x408] ss:$16 sps:$4 sm:$0xff]   ;;  %v9310_v10 = vld [vmem:[%s10716_s17 + $0x424] ss:$16 sps:$4 sm:$0xff]  }
  0x57   : > { %6547 = vmatprep.subr.bf16.mxu0 %v9218_v11  ;;  %7203 = vmatprep.subr.bf16.mxu1 %v9221_v12  ;;  %v10866_v11 = vld [vmem:[%s10766_s21 + $0x10] sm:$0xff]  ;;  %v9313_v12 = vld [vmem:[%s10716_s17 + $0x42c] ss:$16 sps:$4 sm:$0xff]  }
  0x5a   : > { %6548 = vmatpush1.bf16.msra.mxu0 %v9216_v13  ;;  %7204 = vmatpush1.bf16.msra.mxu1 %v9219_v14  ;;  %v7918_v13 = vcombine.high %v10866_v11, %v10866_v11  ;;  %v9308_v14 = vld [vmem:[%s10716_s17 + $0x420] ss:$16 sps:$4 sm:$0xff]  }
  0x5b   : > { %6549 = vmatprep.subr.bf16.mxu0 %v9224_v15  ;;  %7205 = vmatprep.subr.bf16.mxu1 %v9227_v16  ;;  %v9311_v15 = vld [vmem:[%s10716_s17 + $0x428] ss:$16 sps:$4 sm:$0xff]   ;;  %v9316_v16 = vld [vmem:[%s10716_s17 + $0x444] ss:$16 sps:$4 sm:$0xff]  }
  0x5e   : > { %6550 = vmatpush1.bf16.msra.mxu0 %v9222_v17  ;;  %7206 = vmatpush1.bf16.msra.mxu1 %v9225_v18  ;;  %v9319_v17 = vld [vmem:[%s10716_s17 + $0x44c] ss:$16 sps:$4 sm:$0xff]   ;;  %v9314_v18 = vld [vmem:[%s10716_s17 + $0x440] ss:$16 sps:$4 sm:$0xff]  }
  0x5f   : > { %6551 = vmatprep.subr.bf16.mxu0 %v9230_v19  ;;  %7207 = vmatprep.subr.bf16.mxu1 %v9233_v20  ;;  %v9317_v19 = vld [vmem:[%s10716_s17 + $0x448] ss:$16 sps:$4 sm:$0xff]   ;;  %v9322_v20 = vld [vmem:[%s10716_s17 + $0x464] ss:$16 sps:$4 sm:$0xff]  }
  0x62   : > { %6552 = vmatpush1.bf16.msra.mxu0 %v9228_v21  ;;  %7208 = vmatpush1.bf16.msra.mxu1 %v9231_v22  ;;  %v9325_v21 = vld [vmem:[%s10716_s17 + $0x46c] ss:$16 sps:$4 sm:$0xff]   ;;  %v9320_v22 = vld [vmem:[%s10716_s17 + $0x460] ss:$16 sps:$4 sm:$0xff]  }
  0x63   : > { %6553 = vmatprep.subr.bf16.mxu0 %v9236_v23  ;;  %7209 = vmatprep.subr.bf16.mxu1 %v9239_v24  ;;  %v9323_v23 = vld [vmem:[%s10716_s17 + $0x468] ss:$16 sps:$4 sm:$0xff]   ;;  %v9328_v24 = vld [vmem:[%s10716_s17 + $0x484] ss:$16 sps:$4 sm:$0xff]  }
  0x66   : > { %6554 = vmatpush1.bf16.msra.mxu0 %v9234_v25  ;;  %7210 = vmatpush1.bf16.msra.mxu1 %v9237_v26  ;;  %v9331_v25 = vld [vmem:[%s10716_s17 + $0x48c] ss:$16 sps:$4 sm:$0xff]   ;;  %v9326_v26 = vld [vmem:[%s10716_s17 + $0x480] ss:$16 sps:$4 sm:$0xff]  }
  0x67   : > { %6555 = vmatprep.subr.bf16.mxu0 %v9242_v27  ;;  %7211 = vmatprep.subr.bf16.mxu1 %v9245_v28  ;;  %v9329_v27 = vld [vmem:[%s10716_s17 + $0x488] ss:$16 sps:$4 sm:$0xff]   ;;  %v9334_v28 = vld [vmem:[%s10716_s17 + $0x4a4] ss:$16 sps:$4 sm:$0xff]  }
  0x6a   : > { %6556 = vmatpush1.bf16.msra.mxu0 %v9240_v31  ;;  %7212 = vmatpush1.bf16.msra.mxu1 %v9243_v32  ;;  %v9335_v31 = vld [vmem:[%s10716_s17 + $0x4a8] ss:$16 sps:$4 sm:$0xff]   ;;  %v9340_v32 = vld [vmem:[%s10716_s17 + $0x4c4] ss:$16 sps:$4 sm:$0xff]  }
  0x6b   : > { %6557 = vmatprep.subr.bf16.mxu0 %v9248_v33  ;;  %7213 = vmatprep.subr.bf16.mxu1 %v9251_v34  ;;  %v9343_v33 = vld [vmem:[%s10716_s17 + $0x4cc] ss:$16 sps:$4 sm:$0xff]   ;;  %v9338_v34 = vld [vmem:[%s10716_s17 + $0x4c0] ss:$16 sps:$4 sm:$0xff]  }
  0x6e   : > { %6558 = vmatpush1.bf16.msra.mxu0 %v9246_v35  ;;  %7214 = vmatpush1.bf16.msra.mxu1 %v9249_v36  ;;  %v9341_v35 = vld [vmem:[%s10716_s17 + $0x4c8] ss:$16 sps:$4 sm:$0xff]   ;;  %v9346_v36 = vld [vmem:[%s10716_s17 + $0x4e4] ss:$16 sps:$4 sm:$0xff]  }
  0x6f   : > { %6559 = vmatprep.subr.bf16.mxu0 %v9254_v37  ;;  %7215 = vmatprep.subr.bf16.mxu1 %v9257_v38  ;;  %v9349_v37 = vld [vmem:[%s10716_s17 + $0x4ec] ss:$16 sps:$4 sm:$0xff]   ;;  %v9344_v38 = vld [vmem:[%s10716_s17 + $0x4e0] ss:$16 sps:$4 sm:$0xff]  }
  0x72   : > { %6560 = vmatpush1.bf16.msra.mxu0 %v9252_v39  ;;  %7216 = vmatpush1.bf16.msra.mxu1 %v9255_v40  ;;  %v9347_v39 = vld [vmem:[%s10716_s17 + $0x4e8] ss:$16 sps:$4 sm:$0xff]   ;;  %v9352_v40 = vld [vmem:[%s10716_s17 + $0x504] ss:$16 sps:$4 sm:$0xff]  }
  0x73   : > { %6561 = vmatprep.subr.bf16.mxu0 %v9260_v41  ;;  %7217 = vmatprep.subr.bf16.mxu1 %v9263_v42  ;;  %v9355_v41 = vld [vmem:[%s10716_s17 + $0x50c] ss:$16 sps:$4 sm:$0xff]   ;;  %v9350_v42 = vld [vmem:[%s10716_s17 + $0x500] ss:$16 sps:$4 sm:$0xff]  }
  0x76   : > { %6562 = vmatpush1.bf16.msra.mxu0 %v9258_v43  ;;  %7218 = vmatpush1.bf16.msra.mxu1 %v9261_v44  ;;  %v9353_v43 = vld [vmem:[%s10716_s17 + $0x508] ss:$16 sps:$4 sm:$0xff]   ;;  %v9358_v44 = vld [vmem:[%s10716_s17 + $0x524] ss:$16 sps:$4 sm:$0xff]  }
  0x77   : > { %6563 = vmatprep.subr.bf16.mxu0 %v9266_v45  ;;  %7219 = vmatprep.subr.bf16.mxu1 %v9269_v46  ;;  %v9361_v45 = vld [vmem:[%s10716_s17 + $0x52c] ss:$16 sps:$4 sm:$0xff]   ;;  %v9356_v46 = vld [vmem:[%s10716_s17 + $0x520] ss:$16 sps:$4 sm:$0xff]  }
  0x7a   : > { %6564 = vmatpush1.bf16.msra.mxu0 %v9264_v47  ;;  %7220 = vmatpush1.bf16.msra.mxu1 %v9267_v48  ;;  %v9359_v47 = vld [vmem:[%s10716_s17 + $0x528] ss:$16 sps:$4 sm:$0xff]   ;;  %v9364_v48 = vld [vmem:[%s10716_s17 + $0x544] ss:$16 sps:$4 sm:$0xff]  }
  0x7b   : > { %6565 = vmatprep.subr.bf16.mxu0 %v9272_v49  ;;  %7221 = vmatprep.subr.bf16.mxu1 %v9275_v50  ;;  %v9367_v49 = vld [vmem:[%s10716_s17 + $0x54c] ss:$16 sps:$4 sm:$0xff]   ;;  %v9362_v50 = vld [vmem:[%s10716_s17 + $0x540] ss:$16 sps:$4 sm:$0xff]  }
  0x7e   : > { %6566 = vmatpush1.bf16.msra.mxu0 %v9270_v51  ;;  %7222 = vmatpush1.bf16.msra.mxu1 %v9273_v52  ;;  %v9365_v51 = vld [vmem:[%s10716_s17 + $0x548] ss:$16 sps:$4 sm:$0xff]   ;;  %v9370_v52 = vld [vmem:[%s10716_s17 + $0x564] ss:$16 sps:$4 sm:$0xff]  }
  0x7f   : > { %6567 = vmatprep.subr.bf16.mxu0 %v9278_v53  ;;  %7223 = vmatprep.subr.bf16.mxu1 %v9281_v54  ;;  %v9373_v53 = vld [vmem:[%s10716_s17 + $0x56c] ss:$16 sps:$4 sm:$0xff]   ;;  %v9368_v54 = vld [vmem:[%s10716_s17 + $0x560] ss:$16 sps:$4 sm:$0xff]  }
  0x82   : > { %6568 = vmatpush1.bf16.msra.mxu0 %v9276_v55  ;;  %7224 = vmatpush1.bf16.msra.mxu1 %v9279_v56  ;;  %v9371_v55 = vld [vmem:[%s10716_s17 + $0x568] ss:$16 sps:$4 sm:$0xff]   ;;  %v9376_v56 = vld [vmem:[%s10716_s17 + $0x584] ss:$16 sps:$4 sm:$0xff]  }
  0x83   : > { %6569 = vmatprep.subr.bf16.mxu0 %v9284_v57  ;;  %7225 = vmatprep.subr.bf16.mxu1 %v9287_v58  ;;  %v9379_v57 = vld [vmem:[%s10716_s17 + $0x58c] ss:$16 sps:$4 sm:$0xff]   ;;  %v9374_v58 = vld [vmem:[%s10716_s17 + $0x580] ss:$16 sps:$4 sm:$0xff]  }
  0x86   : > { %6570 = vmatpush1.bf16.msra.mxu0 %v9282_v59  ;;  %7226 = vmatpush1.bf16.msra.mxu1 %v9285_v60  ;;  %v9377_v59 = vld [vmem:[%s10716_s17 + $0x588] ss:$16 sps:$4 sm:$0xff]   ;;  %v9382_v60 = vld [vmem:[%s10716_s17 + $0x5a4] ss:$16 sps:$4 sm:$0xff]  }
  0x87   : > { %6571 = vmatprep.subr.bf16.mxu0 %v9290_v61  ;;  %7227 = vmatprep.subr.bf16.mxu1 %v9293_v62  ;;  %v9385_v61 = vld [vmem:[%s10716_s17 + $0x5ac] ss:$16 sps:$4 sm:$0xff]   ;;  %v9380_v62 = vld [vmem:[%s10716_s17 + $0x5a0] ss:$16 sps:$4 sm:$0xff]  }
  0x8a   : > { %6572 = vmatpush1.bf16.msra.mxu0 %v9288_v63  ;;  %7228 = vmatpush1.bf16.msra.mxu1 %v9291_v0  ;;  %v9383_v63 = vld [vmem:[%s10716_s17 + $0x5a8] ss:$16 sps:$4 sm:$0xff]   ;;  %v9388_v0 = vld [vmem:[%s10716_s17 + $0x5c4] ss:$16 sps:$4 sm:$0xff]  }
  0x8b   : > { %6573 = vmatprep.subr.bf16.mxu0 %v9296_v1  ;;  %7229 = vmatprep.subr.bf16.mxu1 %v9299_v2  ;;  %v9391_v1 = vld [vmem:[%s10716_s17 + $0x5cc] ss:$16 sps:$4 sm:$0xff]   ;;  %v9386_v2 = vld [vmem:[%s10716_s17 + $0x5c0] ss:$16 sps:$4 sm:$0xff]  }
  0x8e   : > { %6574 = vmatpush1.bf16.msra.mxu0 %v9294_v3  ;;  %7230 = vmatpush1.bf16.msra.mxu1 %v9297_v4  ;;  %v9389_v3 = vld [vmem:[%s10716_s17 + $0x5c8] ss:$16 sps:$4 sm:$0xff]   ;;  %v9394_v4 = vld [vmem:[%s10716_s17 + $0x5e4] ss:$16 sps:$4 sm:$0xff]  }
  0x8f   : > { %6584 = vmatprep.subr.bf16.mxu0 %v9304_v5  ;;  %7240 = vmatprep.subr.bf16.mxu1 %v9307_v6  ;;  %v9397_v5 = vld [vmem:[%s10716_s17 + $0x5ec] ss:$16 sps:$4 sm:$0xff]   ;;  %v9392_v6 = vld [vmem:[%s10716_s17 + $0x5e0] ss:$16 sps:$4 sm:$0xff]  }
  0x91   : > { %6576 = vmatmul.mubr.bf16.vlgmr.msra.gmra.mrb[0].mxu0 %v7915_v7  ;;  %7232 = vmatmul.mubr.bf16.vlgmr.msra.gmra.mrb[0].mxu1 %v7915_v7  ;;  %v9395_v7 = vld [vmem:[%s10716_s17 + $0x5e8] ss:$16 sps:$4 sm:$0xff]  }
  0x92   : > { %6585 = vmatpush1.bf16.msra.mxu0 %v9302_v8  ;;  %7241 = vmatpush1.bf16.msra.mxu1 %v9305_v9  ;;  %v9402_v8 = vld [vmem:[%s10716_s17 + $0x604] ss:$16 sps:$4 sm:$0xff]   ;;  %v9405_v9 = vld [vmem:[%s10716_s17 + $0x60c] ss:$16 sps:$4 sm:$0xff]  }
  0x93   : > { %6586 = vmatprep.subr.bf16.mxu0 %v9310_v10  ;;  %7242 = vmatprep.subr.bf16.mxu1 %v9313_v12  ;;  %v9400_v10 = vld [vmem:[%s10716_s17 + $0x600] ss:$16 sps:$4 sm:$0xff]   ;;  %v7917_v12 = vcombine.low %v10866_v11, %v10866_v11 }
  0x94   : > { %6616 = vmatprep.mubr.bf16.mxu0 %v7918_v13  ;;  %7272 = vmatprep.mubr.bf16.mxu1 %v7918_v13  ;;  %v9403_v13 = vld [vmem:[%s10716_s17 + $0x608] ss:$16 sps:$4 sm:$0xff]   ;;  %v9406_v11 = vld [vmem:[%s10716_s17 + $0x620] ss:$16 sps:$4 sm:$0xff]  }
  0x96   : > { %6587 = vmatpush1.bf16.msra.mxu0 %v9308_v14  ;;  %7243 = vmatpush1.bf16.msra.mxu1 %v9311_v15  ;;  %v10936_v14 = vld [vmem:[%s10766_s21 + $0x18] sm:$0xff]  ;;  %v9408_v15 = vld [vmem:[%s10716_s17 + $0x624] ss:$16 sps:$4 sm:$0xff]  }
  0x97   : > { %6588 = vmatprep.subr.bf16.mxu0 %v9316_v16  ;;  %7244 = vmatprep.subr.bf16.mxu1 %v9319_v17  ;;  %v9411_v16 = vld [vmem:[%s10716_s17 + $0x62c] ss:$16 sps:$4 sm:$0xff]   ;;  %v7920_v17 = vcombine.high %v10936_v14, %v10936_v14 }
  0x9a   : > { %6589 = vmatpush1.bf16.msra.mxu0 %v9314_v18  ;;  %7245 = vmatpush1.bf16.msra.mxu1 %v9317_v19  ;;  %v9409_v18 = vld [vmem:[%s10716_s17 + $0x628] ss:$16 sps:$4 sm:$0xff]   ;;  %v9414_v19 = vld [vmem:[%s10716_s17 + $0x644] ss:$16 sps:$4 sm:$0xff]  }
  0x9b   : > { %6590 = vmatprep.subr.bf16.mxu0 %v9322_v20  ;;  %7246 = vmatprep.subr.bf16.mxu1 %v9325_v21  ;;  %v9417_v20 = vld [vmem:[%s10716_s17 + $0x64c] ss:$16 sps:$4 sm:$0xff]   ;;  %v9412_v21 = vld [vmem:[%s10716_s17 + $0x640] ss:$16 sps:$4 sm:$0xff]  }
  0x9e   : > { %6591 = vmatpush1.bf16.msra.mxu0 %v9320_v22  ;;  %7247 = vmatpush1.bf16.msra.mxu1 %v9323_v23  ;;  %v9415_v22 = vld [vmem:[%s10716_s17 + $0x648] ss:$16 sps:$4 sm:$0xff]   ;;  %v9420_v23 = vld [vmem:[%s10716_s17 + $0x664] ss:$16 sps:$4 sm:$0xff]  }
  0x9f   : > { %6592 = vmatprep.subr.bf16.mxu0 %v9328_v24  ;;  %7248 = vmatprep.subr.bf16.mxu1 %v9331_v25  ;;  %v9423_v24 = vld [vmem:[%s10716_s17 + $0x66c] ss:$16 sps:$4 sm:$0xff]   ;;  %v9418_v25 = vld [vmem:[%s10716_s17 + $0x660] ss:$16 sps:$4 sm:$0xff]  }
  0xa2   : > { %6593 = vmatpush1.bf16.msra.mxu0 %v9326_v26  ;;  %7249 = vmatpush1.bf16.msra.mxu1 %v9329_v27  ;;  %v9421_v26 = vld [vmem:[%s10716_s17 + $0x668] ss:$16 sps:$4 sm:$0xff]   ;;  %v9426_v27 = vld [vmem:[%s10716_s17 + $0x684] ss:$16 sps:$4 sm:$0xff]  }
  0xa3   : > { %6594 = vmatprep.subr.bf16.mxu0 %v9334_v28  ;;  %7250 = vmatprep.subr.bf16.mxu1 %v9337_v29  ;;  %v9429_v28 = vld [vmem:[%s10716_s17 + $0x68c] ss:$16 sps:$4 sm:$0xff]   ;;  %v9424_v29 = vld [vmem:[%s10716_s17 + $0x680] ss:$16 sps:$4 sm:$0xff]  }
  0xa6   : > { %6595 = vmatpush1.bf16.msra.mxu0 %v9332_v30  ;;  %7251 = vmatpush1.bf16.msra.mxu1 %v9335_v31  ;;  %v9427_v30 = vld [vmem:[%s10716_s17 + $0x688] ss:$16 sps:$4 sm:$0xff]   ;;  %v9432_v31 = vld [vmem:[%s10716_s17 + $0x6a4] ss:$16 sps:$4 sm:$0xff]  }
  0xa7   : > { %6596 = vmatprep.subr.bf16.mxu0 %v9340_v32  ;;  %7252 = vmatprep.subr.bf16.mxu1 %v9343_v33  ;;  %v9435_v32 = vld [vmem:[%s10716_s17 + $0x6ac] ss:$16 sps:$4 sm:$0xff]   ;;  %v9430_v33 = vld [vmem:[%s10716_s17 + $0x6a0] ss:$16 sps:$4 sm:$0xff]  }
  0xaa   : > { %6597 = vmatpush1.bf16.msra.mxu0 %v9338_v34  ;;  %7253 = vmatpush1.bf16.msra.mxu1 %v9341_v35  ;;  %v9433_v34 = vld [vmem:[%s10716_s17 + $0x6a8] ss:$16 sps:$4 sm:$0xff]   ;;  %v9438_v35 = vld [vmem:[%s10716_s17 + $0x6c4] ss:$16 sps:$4 sm:$0xff]  }
  0xab   : > { %6598 = vmatprep.subr.bf16.mxu0 %v9346_v36  ;;  %7254 = vmatprep.subr.bf16.mxu1 %v9349_v37  ;;  %v9441_v36 = vld [vmem:[%s10716_s17 + $0x6cc] ss:$16 sps:$4 sm:$0xff]   ;;  %v9436_v37 = vld [vmem:[%s10716_s17 + $0x6c0] ss:$16 sps:$4 sm:$0xff]  }
  0xae   : > { %6599 = vmatpush1.bf16.msra.mxu0 %v9344_v38  ;;  %7255 = vmatpush1.bf16.msra.mxu1 %v9347_v39  ;;  %v9439_v38 = vld [vmem:[%s10716_s17 + $0x6c8] ss:$16 sps:$4 sm:$0xff]   ;;  %v9444_v39 = vld [vmem:[%s10716_s17 + $0x6e4] ss:$16 sps:$4 sm:$0xff]  }
  0xaf   : > { %6600 = vmatprep.subr.bf16.mxu0 %v9352_v40  ;;  %7256 = vmatprep.subr.bf16.mxu1 %v9355_v41  ;;  %v9447_v40 = vld [vmem:[%s10716_s17 + $0x6ec] ss:$16 sps:$4 sm:$0xff]   ;;  %v9442_v41 = vld [vmem:[%s10716_s17 + $0x6e0] ss:$16 sps:$4 sm:$0xff]  }
  0xb2   : > { %6601 = vmatpush1.bf16.msra.mxu0 %v9350_v42  ;;  %7257 = vmatpush1.bf16.msra.mxu1 %v9353_v43  ;;  %v9445_v42 = vld [vmem:[%s10716_s17 + $0x6e8] ss:$16 sps:$4 sm:$0xff]   ;;  %v9450_v43 = vld [vmem:[%s10716_s17 + $0x704] ss:$16 sps:$4 sm:$0xff]  }
  0xb3   : > { %6602 = vmatprep.subr.bf16.mxu0 %v9358_v44  ;;  %7258 = vmatprep.subr.bf16.mxu1 %v9361_v45  ;;  %v9453_v44 = vld [vmem:[%s10716_s17 + $0x70c] ss:$16 sps:$4 sm:$0xff]   ;;  %v9448_v45 = vld [vmem:[%s10716_s17 + $0x700] ss:$16 sps:$4 sm:$0xff]  }
  0xb6   : > { %6603 = vmatpush1.bf16.msra.mxu0 %v9356_v46  ;;  %7259 = vmatpush1.bf16.msra.mxu1 %v9359_v47  ;;  %v9451_v46 = vld [vmem:[%s10716_s17 + $0x708] ss:$16 sps:$4 sm:$0xff]   ;;  %v9456_v47 = vld [vmem:[%s10716_s17 + $0x724] ss:$16 sps:$4 sm:$0xff]  }
  0xb7   : > { %6604 = vmatprep.subr.bf16.mxu0 %v9364_v48  ;;  %7260 = vmatprep.subr.bf16.mxu1 %v9367_v49  ;;  %v9459_v48 = vld [vmem:[%s10716_s17 + $0x72c] ss:$16 sps:$4 sm:$0xff]   ;;  %v9454_v49 = vld [vmem:[%s10716_s17 + $0x720] ss:$16 sps:$4 sm:$0xff]  }
  0xba   : > { %6605 = vmatpush1.bf16.msra.mxu0 %v9362_v50  ;;  %7261 = vmatpush1.bf16.msra.mxu1 %v9365_v51  ;;  %v9457_v50 = vld [vmem:[%s10716_s17 + $0x728] ss:$16 sps:$4 sm:$0xff]   ;;  %v9462_v51 = vld [vmem:[%s10716_s17 + $0x744] ss:$16 sps:$4 sm:$0xff]  }
  0xbb   : > { %6606 = vmatprep.subr.bf16.mxu0 %v9370_v52  ;;  %7262 = vmatprep.subr.bf16.mxu1 %v9373_v53  ;;  %v9465_v52 = vld [vmem:[%s10716_s17 + $0x74c] ss:$16 sps:$4 sm:$0xff]   ;;  %v9460_v53 = vld [vmem:[%s10716_s17 + $0x740] ss:$16 sps:$4 sm:$0xff]  }
  0xbe   : > { %6607 = vmatpush1.bf16.msra.mxu0 %v9368_v54  ;;  %7263 = vmatpush1.bf16.msra.mxu1 %v9371_v55  ;;  %v9463_v54 = vld [vmem:[%s10716_s17 + $0x748] ss:$16 sps:$4 sm:$0xff]   ;;  %v9468_v55 = vld [vmem:[%s10716_s17 + $0x764] ss:$16 sps:$4 sm:$0xff]  }
  0xbf   : > { %6608 = vmatprep.subr.bf16.mxu0 %v9376_v56  ;;  %7264 = vmatprep.subr.bf16.mxu1 %v9379_v57  ;;  %v9471_v56 = vld [vmem:[%s10716_s17 + $0x76c] ss:$16 sps:$4 sm:$0xff]   ;;  %v9466_v57 = vld [vmem:[%s10716_s17 + $0x760] ss:$16 sps:$4 sm:$0xff]  }
  0xc2   : > { %6609 = vmatpush1.bf16.msra.mxu0 %v9374_v58  ;;  %7265 = vmatpush1.bf16.msra.mxu1 %v9377_v59  ;;  %v9469_v58 = vld [vmem:[%s10716_s17 + $0x768] ss:$16 sps:$4 sm:$0xff]   ;;  %v9474_v59 = vld [vmem:[%s10716_s17 + $0x784] ss:$16 sps:$4 sm:$0xff]  }
  0xc3   : > { %6610 = vmatprep.subr.bf16.mxu0 %v9382_v60  ;;  %7266 = vmatprep.subr.bf16.mxu1 %v9385_v61  ;;  %v9477_v60 = vld [vmem:[%s10716_s17 + $0x78c] ss:$16 sps:$4 sm:$0xff]   ;;  %v9472_v61 = vld [vmem:[%s10716_s17 + $0x780] ss:$16 sps:$4 sm:$0xff]  }
  0xc6   : > { %6611 = vmatpush1.bf16.msra.mxu0 %v9380_v62  ;;  %7267 = vmatpush1.bf16.msra.mxu1 %v9383_v63  ;;  %v9475_v62 = vld [vmem:[%s10716_s17 + $0x788] ss:$16 sps:$4 sm:$0xff]   ;;  %v9480_v63 = vld [vmem:[%s10716_s17 + $0x7a4] ss:$16 sps:$4 sm:$0xff]  }
  0xc7   : > { %6612 = vmatprep.subr.bf16.mxu0 %v9388_v0  ;;  %7268 = vmatprep.subr.bf16.mxu1 %v9391_v1  ;;  %v9483_v0 = vld [vmem:[%s10716_s17 + $0x7ac] ss:$16 sps:$4 sm:$0xff]   ;;  %v9478_v1 = vld [vmem:[%s10716_s17 + $0x7a0] ss:$16 sps:$4 sm:$0xff]  }
  0xca   : > { %6613 = vmatpush1.bf16.msra.mxu0 %v9386_v2  ;;  %7269 = vmatpush1.bf16.msra.mxu1 %v9389_v3  ;;  %v9481_v2 = vld [vmem:[%s10716_s17 + $0x7a8] ss:$16 sps:$4 sm:$0xff]   ;;  %v9486_v3 = vld [vmem:[%s10716_s17 + $0x7c4] ss:$16 sps:$4 sm:$0xff]  }
  0xcb   : > { %6614 = vmatprep.subr.bf16.mxu0 %v9394_v4  ;;  %7270 = vmatprep.subr.bf16.mxu1 %v9397_v5  ;;  %v9489_v4 = vld [vmem:[%s10716_s17 + $0x7cc] ss:$16 sps:$4 sm:$0xff]   ;;  %v9484_v5 = vld [vmem:[%s10716_s17 + $0x7c0] ss:$16 sps:$4 sm:$0xff]  }
  0xce   : > { %6615 = vmatpush1.bf16.msra.mxu0 %v9392_v6  ;;  %7271 = vmatpush1.bf16.msra.mxu1 %v9395_v7  ;;  %v9487_v6 = vld [vmem:[%s10716_s17 + $0x7c8] ss:$16 sps:$4 sm:$0xff]   ;;  %v9492_v7 = vld [vmem:[%s10716_s17 + $0x7e4] ss:$16 sps:$4 sm:$0xff]  }
  0xcf   : > { %6625 = vmatprep.subr.bf16.mxu0 %v9402_v8  ;;  %7281 = vmatprep.subr.bf16.mxu1 %v9405_v9  ;;  %v9495_v8 = vld [vmem:[%s10716_s17 + $0x7ec] ss:$16 sps:$4 sm:$0xff]   ;;  %v9490_v9 = vld [vmem:[%s10716_s17 + $0x7e0] ss:$16 sps:$4 sm:$0xff]  }
  0xd1   : > { %6617 = vmatmul.mubr.bf16.vlgmr.msra.gmra.mrb[0].mxu0 %v7917_v12  ;;  %7273 = vmatmul.mubr.bf16.vlgmr.msra.gmra.mrb[0].mxu1 %v7917_v12  ;;  %v9500_v12 = vld [vmem:[%s10716_s17 + $0x804] ss:$16 sps:$4 sm:$0xff]  }
  0xd2   : > { %6626 = vmatpush1.bf16.msra.mxu0 %v9400_v10  ;;  %7282 = vmatpush1.bf16.msra.mxu1 %v9403_v13  ;;  %v9493_v10 = vld [vmem:[%s10716_s17 + $0x7e8] ss:$16 sps:$4 sm:$0xff]   ;;  %v9503_v13 = vld [vmem:[%s10716_s17 + $0x80c] ss:$16 sps:$4 sm:$0xff]  }
  0xd3   : > { %6627 = vmatprep.subr.bf16.mxu0 %v9408_v15  ;;  %7283 = vmatprep.subr.bf16.mxu1 %v9411_v16  ;;  %v9498_v15 = vld [vmem:[%s10716_s17 + $0x800] ss:$16 sps:$4 sm:$0xff]   ;;  %v7919_v16 = vcombine.low %v10936_v14, %v10936_v14 }
  0xd4   : > { %6657 = vmatprep.mubr.bf16.mxu0 %v7920_v17  ;;  %7313 = vmatprep.mubr.bf16.mxu1 %v7920_v17  ;;  %v11006_v17 = vld [vmem:[%s10766_s21 + $0x20] sm:$0xff] }
  0xd5   : > { %v9504_v14 = vld [vmem:[%s10716_s17 + $0x820] ss:$16 sps:$4 sm:$0xff]  }
  0xd6   : > { %6628 = vmatpush1.bf16.msra.mxu0 %v9406_v11  ;;  %7284 = vmatpush1.bf16.msra.mxu1 %v9409_v18  ;;  %v9501_v11 = vld [vmem:[%s10716_s17 + $0x808] ss:$16 sps:$4 sm:$0xff]   ;;  %v9506_v18 = vld [vmem:[%s10716_s17 + $0x824] ss:$16 sps:$4 sm:$0xff]  }
  0xd7   : > { %6629 = vmatprep.subr.bf16.mxu0 %v9414_v19  ;;  %7285 = vmatprep.subr.bf16.mxu1 %v9417_v20  ;;  %v9509_v19 = vld [vmem:[%s10716_s17 + $0x82c] ss:$16 sps:$4 sm:$0xff]   ;;  %v7922_v20 = vcombine.high %v11006_v17, %v11006_v17 }
  0xda   : > { %6630 = vmatpush1.bf16.msra.mxu0 %v9412_v21  ;;  %7286 = vmatpush1.bf16.msra.mxu1 %v9415_v22  ;;  %v9507_v21 = vld [vmem:[%s10716_s17 + $0x828] ss:$16 sps:$4 sm:$0xff]   ;;  %v9512_v22 = vld [vmem:[%s10716_s17 + $0x844] ss:$16 sps:$4 sm:$0xff]  }
  0xdb   : > { %6631 = vmatprep.subr.bf16.mxu0 %v9420_v23  ;;  %7287 = vmatprep.subr.bf16.mxu1 %v9423_v24  ;;  %v9515_v23 = vld [vmem:[%s10716_s17 + $0x84c] ss:$16 sps:$4 sm:$0xff]   ;;  %v9510_v24 = vld [vmem:[%s10716_s17 + $0x840] ss:$16 sps:$4 sm:$0xff]  }
  0xde   : > { %6632 = vmatpush1.bf16.msra.mxu0 %v9418_v25  ;;  %7288 = vmatpush1.bf16.msra.mxu1 %v9421_v26  ;;  %v9513_v25 = vld [vmem:[%s10716_s17 + $0x848] ss:$16 sps:$4 sm:$0xff]   ;;  %v9518_v26 = vld [vmem:[%s10716_s17 + $0x864] ss:$16 sps:$4 sm:$0xff]  }
  0xdf   : > { %6633 = vmatprep.subr.bf16.mxu0 %v9426_v27  ;;  %7289 = vmatprep.subr.bf16.mxu1 %v9429_v28  ;;  %v9521_v27 = vld [vmem:[%s10716_s17 + $0x86c] ss:$16 sps:$4 sm:$0xff]   ;;  %v9516_v28 = vld [vmem:[%s10716_s17 + $0x860] ss:$16 sps:$4 sm:$0xff]  }
  0xe2   : > { %6634 = vmatpush1.bf16.msra.mxu0 %v9424_v29  ;;  %7290 = vmatpush1.bf16.msra.mxu1 %v9427_v30  ;;  %v9519_v29 = vld [vmem:[%s10716_s17 + $0x868] ss:$16 sps:$4 sm:$0xff]   ;;  %v9524_v30 = vld [vmem:[%s10716_s17 + $0x884] ss:$16 sps:$4 sm:$0xff]  }
  0xe3   : > { %6635 = vmatprep.subr.bf16.mxu0 %v9432_v31  ;;  %7291 = vmatprep.subr.bf16.mxu1 %v9435_v32  ;;  %v9527_v31 = vld [vmem:[%s10716_s17 + $0x88c] ss:$16 sps:$4 sm:$0xff]   ;;  %v9522_v32 = vld [vmem:[%s10716_s17 + $0x880] ss:$16 sps:$4 sm:$0xff]  }
  0xe6   : > { %6636 = vmatpush1.bf16.msra.mxu0 %v9430_v33  ;;  %7292 = vmatpush1.bf16.msra.mxu1 %v9433_v34  ;;  %v9525_v33 = vld [vmem:[%s10716_s17 + $0x888] ss:$16 sps:$4 sm:$0xff]   ;;  %v9530_v34 = vld [vmem:[%s10716_s17 + $0x8a4] ss:$16 sps:$4 sm:$0xff]  }
  0xe7   : > { %6637 = vmatprep.subr.bf16.mxu0 %v9438_v35  ;;  %7293 = vmatprep.subr.bf16.mxu1 %v9441_v36  ;;  %v9533_v35 = vld [vmem:[%s10716_s17 + $0x8ac] ss:$16 sps:$4 sm:$0xff]   ;;  %v9528_v36 = vld [vmem:[%s10716_s17 + $0x8a0] ss:$16 sps:$4 sm:$0xff]  }
  0xea   : > { %6638 = vmatpush1.bf16.msra.mxu0 %v9436_v37  ;;  %7294 = vmatpush1.bf16.msra.mxu1 %v9439_v38  ;;  %v9531_v37 = vld [vmem:[%s10716_s17 + $0x8a8] ss:$16 sps:$4 sm:$0xff]   ;;  %v9536_v38 = vld [vmem:[%s10716_s17 + $0x8c4] ss:$16 sps:$4 sm:$0xff]  }
  0xeb   : > { %6639 = vmatprep.subr.bf16.mxu0 %v9444_v39  ;;  %7295 = vmatprep.subr.bf16.mxu1 %v9447_v40  ;;  %v9539_v39 = vld [vmem:[%s10716_s17 + $0x8cc] ss:$16 sps:$4 sm:$0xff]   ;;  %v9534_v40 = vld [vmem:[%s10716_s17 + $0x8c0] ss:$16 sps:$4 sm:$0xff]  }
  0xee   : > { %6640 = vmatpush1.bf16.msra.mxu0 %v9442_v41  ;;  %7296 = vmatpush1.bf16.msra.mxu1 %v9445_v42  ;;  %v9537_v41 = vld [vmem:[%s10716_s17 + $0x8c8] ss:$16 sps:$4 sm:$0xff]   ;;  %v9542_v42 = vld [vmem:[%s10716_s17 + $0x8e4] ss:$16 sps:$4 sm:$0xff]  }
  0xef   : > { %6641 = vmatprep.subr.bf16.mxu0 %v9450_v43  ;;  %7297 = vmatprep.subr.bf16.mxu1 %v9453_v44  ;;  %v9545_v43 = vld [vmem:[%s10716_s17 + $0x8ec] ss:$16 sps:$4 sm:$0xff]   ;;  %v9540_v44 = vld [vmem:[%s10716_s17 + $0x8e0] ss:$16 sps:$4 sm:$0xff]  }
  0xf2   : > { %6642 = vmatpush1.bf16.msra.mxu0 %v9448_v45  ;;  %7298 = vmatpush1.bf16.msra.mxu1 %v9451_v46  ;;  %v9543_v45 = vld [vmem:[%s10716_s17 + $0x8e8] ss:$16 sps:$4 sm:$0xff]   ;;  %v9548_v46 = vld [vmem:[%s10716_s17 + $0x904] ss:$16 sps:$4 sm:$0xff]  }
  0xf3   : > { %6643 = vmatprep.subr.bf16.mxu0 %v9456_v47  ;;  %7299 = vmatprep.subr.bf16.mxu1 %v9459_v48  ;;  %v9551_v47 = vld [vmem:[%s10716_s17 + $0x90c] ss:$16 sps:$4 sm:$0xff]   ;;  %v9546_v48 = vld [vmem:[%s10716_s17 + $0x900] ss:$16 sps:$4 sm:$0xff]  }
  0xf6   : > { %6644 = vmatpush1.bf16.msra.mxu0 %v9454_v49  ;;  %7300 = vmatpush1.bf16.msra.mxu1 %v9457_v50  ;;  %v9549_v49 = vld [vmem:[%s10716_s17 + $0x908] ss:$16 sps:$4 sm:$0xff]   ;;  %v9554_v50 = vld [vmem:[%s10716_s17 + $0x924] ss:$16 sps:$4 sm:$0xff]  }
  0xf7   : > { %6645 = vmatprep.subr.bf16.mxu0 %v9462_v51  ;;  %7301 = vmatprep.subr.bf16.mxu1 %v9465_v52  ;;  %v9557_v51 = vld [vmem:[%s10716_s17 + $0x92c] ss:$16 sps:$4 sm:$0xff]   ;;  %v9552_v52 = vld [vmem:[%s10716_s17 + $0x920] ss:$16 sps:$4 sm:$0xff]  }
  0xfa   : > { %6646 = vmatpush1.bf16.msra.mxu0 %v9460_v53  ;;  %7302 = vmatpush1.bf16.msra.mxu1 %v9463_v54  ;;  %v9555_v53 = vld [vmem:[%s10716_s17 + $0x928] ss:$16 sps:$4 sm:$0xff]   ;;  %v9560_v54 = vld [vmem:[%s10716_s17 + $0x944] ss:$16 sps:$4 sm:$0xff]  }
  0xfb   : > { %6647 = vmatprep.subr.bf16.mxu0 %v9468_v55  ;;  %7303 = vmatprep.subr.bf16.mxu1 %v9471_v56  ;;  %v9563_v55 = vld [vmem:[%s10716_s17 + $0x94c] ss:$16 sps:$4 sm:$0xff]   ;;  %v9558_v56 = vld [vmem:[%s10716_s17 + $0x940] ss:$16 sps:$4 sm:$0xff]  }
  0xfe   : > { %6648 = vmatpush1.bf16.msra.mxu0 %v9466_v57  ;;  %7304 = vmatpush1.bf16.msra.mxu1 %v9469_v58  ;;  %v9561_v57 = vld [vmem:[%s10716_s17 + $0x948] ss:$16 sps:$4 sm:$0xff]   ;;  %v9566_v58 = vld [vmem:[%s10716_s17 + $0x964] ss:$16 sps:$4 sm:$0xff]  }
  0xff   : > { %6649 = vmatprep.subr.bf16.mxu0 %v9474_v59  ;;  %7305 = vmatprep.subr.bf16.mxu1 %v9477_v60  ;;  %v9569_v59 = vld [vmem:[%s10716_s17 + $0x96c] ss:$16 sps:$4 sm:$0xff]   ;;  %v9564_v60 = vld [vmem:[%s10716_s17 + $0x960] ss:$16 sps:$4 sm:$0xff]  }
 0x102   : > { %6650 = vmatpush1.bf16.msra.mxu0 %v9472_v61  ;;  %7306 = vmatpush1.bf16.msra.mxu1 %v9475_v62  ;;  %v9567_v61 = vld [vmem:[%s10716_s17 + $0x968] ss:$16 sps:$4 sm:$0xff]   ;;  %v9572_v62 = vld [vmem:[%s10716_s17 + $0x984] ss:$16 sps:$4 sm:$0xff]  }
 0x103   : > { %6651 = vmatprep.subr.bf16.mxu0 %v9480_v63  ;;  %7307 = vmatprep.subr.bf16.mxu1 %v9483_v0  ;;  %v9575_v63 = vld [vmem:[%s10716_s17 + $0x98c] ss:$16 sps:$4 sm:$0xff]   ;;  %v9570_v0 = vld [vmem:[%s10716_s17 + $0x980] ss:$16 sps:$4 sm:$0xff]  }
 0x106   : > { %6652 = vmatpush1.bf16.msra.mxu0 %v9478_v1  ;;  %7308 = vmatpush1.bf16.msra.mxu1 %v9481_v2  ;;  %v9573_v1 = vld [vmem:[%s10716_s17 + $0x988] ss:$16 sps:$4 sm:$0xff]   ;;  %v9578_v2 = vld [vmem:[%s10716_s17 + $0x9a4] ss:$16 sps:$4 sm:$0xff]  }
 0x107   : > { %6653 = vmatprep.subr.bf16.mxu0 %v9486_v3  ;;  %7309 = vmatprep.subr.bf16.mxu1 %v9489_v4  ;;  %v9581_v3 = vld [vmem:[%s10716_s17 + $0x9ac] ss:$16 sps:$4 sm:$0xff]   ;;  %v9576_v4 = vld [vmem:[%s10716_s17 + $0x9a0] ss:$16 sps:$4 sm:$0xff]  }
 0x10a   : > { %6654 = vmatpush1.bf16.msra.mxu0 %v9484_v5  ;;  %7310 = vmatpush1.bf16.msra.mxu1 %v9487_v6  ;;  %v9579_v5 = vld [vmem:[%s10716_s17 + $0x9a8] ss:$16 sps:$4 sm:$0xff]   ;;  %v9584_v6 = vld [vmem:[%s10716_s17 + $0x9c4] ss:$16 sps:$4 sm:$0xff]  }
 0x10b   : > { %6655 = vmatprep.subr.bf16.mxu0 %v9492_v7  ;;  %7311 = vmatprep.subr.bf16.mxu1 %v9495_v8  ;;  %v9587_v7 = vld [vmem:[%s10716_s17 + $0x9cc] ss:$16 sps:$4 sm:$0xff]   ;;  %v9582_v8 = vld [vmem:[%s10716_s17 + $0x9c0] ss:$16 sps:$4 sm:$0xff]  }
 0x10e   : > { %6656 = vmatpush1.bf16.msra.mxu0 %v9490_v9  ;;  %7312 = vmatpush1.bf16.msra.mxu1 %v9493_v10  ;;  %v9585_v9 = vld [vmem:[%s10716_s17 + $0x9c8] ss:$16 sps:$4 sm:$0xff]   ;;  %v9590_v10 = vld [vmem:[%s10716_s17 + $0x9e4] ss:$16 sps:$4 sm:$0xff]  }
 0x10f   : > { %6666 = vmatprep.subr.bf16.mxu0 %v9500_v12  ;;  %7322 = vmatprep.subr.bf16.mxu1 %v9503_v13  ;;  %v9593_v12 = vld [vmem:[%s10716_s17 + $0x9ec] ss:$16 sps:$4 sm:$0xff]   ;;  %v9588_v13 = vld [vmem:[%s10716_s17 + $0x9e0] ss:$16 sps:$4 sm:$0xff]  }
 0x111   : > { %6658 = vmatmul.mubr.bf16.vlgmr.msra.gmra.mrb[0].mxu0 %v7919_v16  ;;  %7314 = vmatmul.mubr.bf16.vlgmr.msra.gmra.mrb[0].mxu1 %v7919_v16  ;;  %v9598_v16 = vld [vmem:[%s10716_s17 + $0xa04] ss:$16 sps:$4 sm:$0xff]  }
 0x112   : > { %6667 = vmatpush1.bf16.msra.mxu0 %v9498_v15  ;;  %7323 = vmatpush1.bf16.msra.mxu1 %v9501_v11  ;;  %v9591_v15 = vld [vmem:[%s10716_s17 + $0x9e8] ss:$16 sps:$4 sm:$0xff]   ;;  %v9601_v11 = vld [vmem:[%s10716_s17 + $0xa0c] ss:$16 sps:$4 sm:$0xff]  }
 0x113   : > { %6668 = vmatprep.subr.bf16.mxu0 %v9506_v18  ;;  %7324 = vmatprep.subr.bf16.mxu1 %v9509_v19  ;;  %v11074_v18 = vld [vmem:[%s10766_s21 + $0x28] sm:$0xff]  ;;  %v7921_v19 = vcombine.low %v11006_v17, %v11006_v17  ;;  %v9602_v17 = vld [vmem:[%s10716_s17 + $0xa20] ss:$16 sps:$4 sm:$0xff]  }
 0x114   : > { %6698 = vmatprep.mubr.bf16.mxu0 %v7922_v20  ;;  %7354 = vmatprep.mubr.bf16.mxu1 %v7922_v20  ;;  %v9596_v20 = vld [vmem:[%s10716_s17 + $0xa00] ss:$16 sps:$4 sm:$0xff]  }
 0x116   : > { %6669 = vmatpush1.bf16.msra.mxu0 %v9504_v14  ;;  %7325 = vmatpush1.bf16.msra.mxu1 %v9507_v21  ;;  %v9599_v14 = vld [vmem:[%s10716_s17 + $0xa08] ss:$16 sps:$4 sm:$0xff]   ;;  %v9604_v21 = vld [vmem:[%s10716_s17 + $0xa24] ss:$16 sps:$4 sm:$0xff]  }
 0x117   : > { %6670 = vmatprep.subr.bf16.mxu0 %v9512_v22  ;;  %7326 = vmatprep.subr.bf16.mxu1 %v9515_v23  ;;  %v9607_v22 = vld [vmem:[%s10716_s17 + $0xa2c] ss:$16 sps:$4 sm:$0xff]   ;;  %v7924_v23 = vcombine.high %v11074_v18, %v11074_v18 }
 0x11a   : > { %6671 = vmatpush1.bf16.msra.mxu0 %v9510_v24  ;;  %7327 = vmatpush1.bf16.msra.mxu1 %v9513_v25  ;;  %v9605_v24 = vld [vmem:[%s10716_s17 + $0xa28] ss:$16 sps:$4 sm:$0xff]   ;;  %v9610_v25 = vld [vmem:[%s10716_s17 + $0xa44] ss:$16 sps:$4 sm:$0xff]  }
 0x11b   : > { %6672 = vmatprep.subr.bf16.mxu0 %v9518_v26  ;;  %7328 = vmatprep.subr.bf16.mxu1 %v9521_v27  ;;  %v9613_v26 = vld [vmem:[%s10716_s17 + $0xa4c] ss:$16 sps:$4 sm:$0xff]   ;;  %v9608_v27 = vld [vmem:[%s10716_s17 + $0xa40] ss:$16 sps:$4 sm:$0xff]  }
 0x11e   : > { %6673 = vmatpush1.bf16.msra.mxu0 %v9516_v28  ;;  %7329 = vmatpush1.bf16.msra.mxu1 %v9519_v29  ;;  %v9611_v28 = vld [vmem:[%s10716_s17 + $0xa48] ss:$16 sps:$4 sm:$0xff]   ;;  %v9616_v29 = vld [vmem:[%s10716_s17 + $0xa64] ss:$16 sps:$4 sm:$0xff]  }
 0x11f   : > { %6674 = vmatprep.subr.bf16.mxu0 %v9524_v30  ;;  %7330 = vmatprep.subr.bf16.mxu1 %v9527_v31  ;;  %v9619_v30 = vld [vmem:[%s10716_s17 + $0xa6c] ss:$16 sps:$4 sm:$0xff]   ;;  %v9614_v31 = vld [vmem:[%s10716_s17 + $0xa60] ss:$16 sps:$4 sm:$0xff]  }
 0x122   : > { %6675 = vmatpush1.bf16.msra.mxu0 %v9522_v32  ;;  %7331 = vmatpush1.bf16.msra.mxu1 %v9525_v33  ;;  %v9617_v32 = vld [vmem:[%s10716_s17 + $0xa68] ss:$16 sps:$4 sm:$0xff]   ;;  %v9622_v33 = vld [vmem:[%s10716_s17 + $0xa84] ss:$16 sps:$4 sm:$0xff]  }
 0x123   : > { %6676 = vmatprep.subr.bf16.mxu0 %v9530_v34  ;;  %7332 = vmatprep.subr.bf16.mxu1 %v9533_v35  ;;  %v9625_v34 = vld [vmem:[%s10716_s17 + $0xa8c] ss:$16 sps:$4 sm:$0xff]   ;;  %v9620_v35 = vld [vmem:[%s10716_s17 + $0xa80] ss:$16 sps:$4 sm:$0xff]  }
 0x126   : > { %6677 = vmatpush1.bf16.msra.mxu0 %v9528_v36  ;;  %7333 = vmatpush1.bf16.msra.mxu1 %v9531_v37  ;;  %v9623_v36 = vld [vmem:[%s10716_s17 + $0xa88] ss:$16 sps:$4 sm:$0xff]   ;;  %v9628_v37 = vld [vmem:[%s10716_s17 + $0xaa4] ss:$16 sps:$4 sm:$0xff]  }
 0x127   : > { %6678 = vmatprep.subr.bf16.mxu0 %v9536_v38  ;;  %7334 = vmatprep.subr.bf16.mxu1 %v9539_v39  ;;  %v9631_v38 = vld [vmem:[%s10716_s17 + $0xaac] ss:$16 sps:$4 sm:$0xff]   ;;  %v9626_v39 = vld [vmem:[%s10716_s17 + $0xaa0] ss:$16 sps:$4 sm:$0xff]  }
 0x12a   : > { %6679 = vmatpush1.bf16.msra.mxu0 %v9534_v40  ;;  %7335 = vmatpush1.bf16.msra.mxu1 %v9537_v41  ;;  %v9629_v40 = vld [vmem:[%s10716_s17 + $0xaa8] ss:$16 sps:$4 sm:$0xff]   ;;  %v9634_v41 = vld [vmem:[%s10716_s17 + $0xac4] ss:$16 sps:$4 sm:$0xff]  }
 0x12b   : > { %6680 = vmatprep.subr.bf16.mxu0 %v9542_v42  ;;  %7336 = vmatprep.subr.bf16.mxu1 %v9545_v43  ;;  %v9637_v42 = vld [vmem:[%s10716_s17 + $0xacc] ss:$16 sps:$4 sm:$0xff]   ;;  %v9632_v43 = vld [vmem:[%s10716_s17 + $0xac0] ss:$16 sps:$4 sm:$0xff]  }
 0x12e   : > { %6681 = vmatpush1.bf16.msra.mxu0 %v9540_v44  ;;  %7337 = vmatpush1.bf16.msra.mxu1 %v9543_v45  ;;  %v9635_v44 = vld [vmem:[%s10716_s17 + $0xac8] ss:$16 sps:$4 sm:$0xff]   ;;  %v9640_v45 = vld [vmem:[%s10716_s17 + $0xae4] ss:$16 sps:$4 sm:$0xff]  }
 0x12f   : > { %6682 = vmatprep.subr.bf16.mxu0 %v9548_v46  ;;  %7338 = vmatprep.subr.bf16.mxu1 %v9551_v47  ;;  %v9643_v46 = vld [vmem:[%s10716_s17 + $0xaec] ss:$16 sps:$4 sm:$0xff]   ;;  %v9638_v47 = vld [vmem:[%s10716_s17 + $0xae0] ss:$16 sps:$4 sm:$0xff]  }
 0x132   : > { %6683 = vmatpush1.bf16.msra.mxu0 %v9546_v48  ;;  %7339 = vmatpush1.bf16.msra.mxu1 %v9549_v49  ;;  %v9641_v48 = vld [vmem:[%s10716_s17 + $0xae8] ss:$16 sps:$4 sm:$0xff]   ;;  %v9646_v49 = vld [vmem:[%s10716_s17 + $0xb04] ss:$16 sps:$4 sm:$0xff]  }
 0x133   : > { %6684 = vmatprep.subr.bf16.mxu0 %v9554_v50  ;;  %7340 = vmatprep.subr.bf16.mxu1 %v9557_v51  ;;  %v9649_v50 = vld [vmem:[%s10716_s17 + $0xb0c] ss:$16 sps:$4 sm:$0xff]   ;;  %v9644_v51 = vld [vmem:[%s10716_s17 + $0xb00] ss:$16 sps:$4 sm:$0xff]  }
 0x136   : > { %6685 = vmatpush1.bf16.msra.mxu0 %v9552_v52  ;;  %7341 = vmatpush1.bf16.msra.mxu1 %v9555_v53  ;;  %v9647_v52 = vld [vmem:[%s10716_s17 + $0xb08] ss:$16 sps:$4 sm:$0xff]   ;;  %v9652_v53 = vld [vmem:[%s10716_s17 + $0xb24] ss:$16 sps:$4 sm:$0xff]  }
 0x137   : > { %6686 = vmatprep.subr.bf16.mxu0 %v9560_v54  ;;  %7342 = vmatprep.subr.bf16.mxu1 %v9563_v55  ;;  %v9655_v54 = vld [vmem:[%s10716_s17 + $0xb2c] ss:$16 sps:$4 sm:$0xff]   ;;  %v9650_v55 = vld [vmem:[%s10716_s17 + $0xb20] ss:$16 sps:$4 sm:$0xff]  }
 0x13a   : > { %6687 = vmatpush1.bf16.msra.mxu0 %v9558_v56  ;;  %7343 = vmatpush1.bf16.msra.mxu1 %v9561_v57  ;;  %v9653_v56 = vld [vmem:[%s10716_s17 + $0xb28] ss:$16 sps:$4 sm:$0xff]   ;;  %v9658_v57 = vld [vmem:[%s10716_s17 + $0xb44] ss:$16 sps:$4 sm:$0xff]  }
 0x13b   : > { %6688 = vmatprep.subr.bf16.mxu0 %v9566_v58  ;;  %7344 = vmatprep.subr.bf16.mxu1 %v9569_v59  ;;  %v9661_v58 = vld [vmem:[%s10716_s17 + $0xb4c] ss:$16 sps:$4 sm:$0xff]   ;;  %v9656_v59 = vld [vmem:[%s10716_s17 + $0xb40] ss:$16 sps:$4 sm:$0xff]  }
 0x13e   : > { %6689 = vmatpush1.bf16.msra.mxu0 %v9564_v60  ;;  %7345 = vmatpush1.bf16.msra.mxu1 %v9567_v61  ;;  %v9659_v60 = vld [vmem:[%s10716_s17 + $0xb48] ss:$16 sps:$4 sm:$0xff]   ;;  %v9664_v61 = vld [vmem:[%s10716_s17 + $0xb64] ss:$16 sps:$4 sm:$0xff]  }
 0x13f   : > { %6690 = vmatprep.subr.bf16.mxu0 %v9572_v62  ;;  %7346 = vmatprep.subr.bf16.mxu1 %v9575_v63  ;;  %v9667_v62 = vld [vmem:[%s10716_s17 + $0xb6c] ss:$16 sps:$4 sm:$0xff]   ;;  %v9662_v63 = vld [vmem:[%s10716_s17 + $0xb60] ss:$16 sps:$4 sm:$0xff]  }
 0x142   : > { %6691 = vmatpush1.bf16.msra.mxu0 %v9570_v0  ;;  %7347 = vmatpush1.bf16.msra.mxu1 %v9573_v1  ;;  %v9665_v0 = vld [vmem:[%s10716_s17 + $0xb68] ss:$16 sps:$4 sm:$0xff]   ;;  %v9670_v1 = vld [vmem:[%s10716_s17 + $0xb84] ss:$16 sps:$4 sm:$0xff]  }
 0x143   : > { %6692 = vmatprep.subr.bf16.mxu0 %v9578_v2  ;;  %7348 = vmatprep.subr.bf16.mxu1 %v9581_v3  ;;  %v9673_v2 = vld [vmem:[%s10716_s17 + $0xb8c] ss:$16 sps:$4 sm:$0xff]   ;;  %v9668_v3 = vld [vmem:[%s10716_s17 + $0xb80] ss:$16 sps:$4 sm:$0xff]  }
 0x146   : > { %6693 = vmatpush1.bf16.msra.mxu0 %v9576_v4  ;;  %7349 = vmatpush1.bf16.msra.mxu1 %v9579_v5  ;;  %v9671_v4 = vld [vmem:[%s10716_s17 + $0xb88] ss:$16 sps:$4 sm:$0xff]   ;;  %v9676_v5 = vld [vmem:[%s10716_s17 + $0xba4] ss:$16 sps:$4 sm:$0xff]  }
 0x147   : > { %6694 = vmatprep.subr.bf16.mxu0 %v9584_v6  ;;  %7350 = vmatprep.subr.bf16.mxu1 %v9587_v7  ;;  %v9679_v6 = vld [vmem:[%s10716_s17 + $0xbac] ss:$16 sps:$4 sm:$0xff]   ;;  %v9674_v7 = vld [vmem:[%s10716_s17 + $0xba0] ss:$16 sps:$4 sm:$0xff]  }
 0x14a   : > { %6695 = vmatpush1.bf16.msra.mxu0 %v9582_v8  ;;  %7351 = vmatpush1.bf16.msra.mxu1 %v9585_v9  ;;  %v9677_v8 = vld [vmem:[%s10716_s17 + $0xba8] ss:$16 sps:$4 sm:$0xff]   ;;  %v9682_v9 = vld [vmem:[%s10716_s17 + $0xbc4] ss:$16 sps:$4 sm:$0xff]  }
 0x14b   : > { %6696 = vmatprep.subr.bf16.mxu0 %v9590_v10  ;;  %7352 = vmatprep.subr.bf16.mxu1 %v9593_v12  ;;  %v9685_v10 = vld [vmem:[%s10716_s17 + $0xbcc] ss:$16 sps:$4 sm:$0xff]   ;;  %v9680_v12 = vld [vmem:[%s10716_s17 + $0xbc0] ss:$16 sps:$4 sm:$0xff]  }
 0x14e   : > { %6697 = vmatpush1.bf16.msra.mxu0 %v9588_v13  ;;  %7353 = vmatpush1.bf16.msra.mxu1 %v9591_v15  ;;  %v9683_v13 = vld [vmem:[%s10716_s17 + $0xbc8] ss:$16 sps:$4 sm:$0xff]   ;;  %v9688_v15 = vld [vmem:[%s10716_s17 + $0xbe4] ss:$16 sps:$4 sm:$0xff]  }
 0x14f   : > { %6707 = vmatprep.subr.bf16.mxu0 %v9598_v16  ;;  %7363 = vmatprep.subr.bf16.mxu1 %v9601_v11  ;;  %v9691_v16 = vld [vmem:[%s10716_s17 + $0xbec] ss:$16 sps:$4 sm:$0xff]   ;;  %v9686_v11 = vld [vmem:[%s10716_s17 + $0xbe0] ss:$16 sps:$4 sm:$0xff]  }
 0x151   : > { %6699 = vmatmul.mubr.bf16.vlgmr.msra.gmra.mrb[0].mxu0 %v7921_v19  ;;  %7355 = vmatmul.mubr.bf16.vlgmr.msra.gmra.mrb[0].mxu1 %v7921_v19  ;;  %v9689_v19 = vld [vmem:[%s10716_s17 + $0xbe8] ss:$16 sps:$4 sm:$0xff]  }
 0x152   : > { %6708 = vmatpush1.bf16.msra.mxu0 %v9596_v20  ;;  %7364 = vmatpush1.bf16.msra.mxu1 %v9599_v14  ;;  %v9696_v20 = vld [vmem:[%s10716_s17 + $0xc04] ss:$16 sps:$4 sm:$0xff]   ;;  %v9699_v14 = vld [vmem:[%s10716_s17 + $0xc0c] ss:$16 sps:$4 sm:$0xff]  }
 0x153   : > { %6709 = vmatprep.subr.bf16.mxu0 %v9604_v21  ;;  %7365 = vmatprep.subr.bf16.mxu1 %v9607_v22  ;;  %v11145_v21 = vld [vmem:[%s10766_s21 + $0x30] sm:$0xff]  ;;  %v7923_v22 = vcombine.low %v11074_v18, %v11074_v18 }
 0x154   : > { %6739 = vmatprep.mubr.bf16.mxu0 %v7924_v23  ;;  %7395 = vmatprep.mubr.bf16.mxu1 %v7924_v23  ;;  %v9694_v23 = vld [vmem:[%s10716_s17 + $0xc00] ss:$16 sps:$4 sm:$0xff]  }
 0x155   : > { %v9700_v18 = vld [vmem:[%s10716_s17 + $0xc20] ss:$16 sps:$4 sm:$0xff]  }
 0x156   : > { %6710 = vmatpush1.bf16.msra.mxu0 %v9602_v17  ;;  %7366 = vmatpush1.bf16.msra.mxu1 %v9605_v24  ;;  %v9697_v17 = vld [vmem:[%s10716_s17 + $0xc08] ss:$16 sps:$4 sm:$0xff]   ;;  %v9702_v24 = vld [vmem:[%s10716_s17 + $0xc24] ss:$16 sps:$4 sm:$0xff]  }
 0x157   : > { %6711 = vmatprep.subr.bf16.mxu0 %v9610_v25  ;;  %7367 = vmatprep.subr.bf16.mxu1 %v9613_v26  ;;  %v9705_v25 = vld [vmem:[%s10716_s17 + $0xc2c] ss:$16 sps:$4 sm:$0xff]   ;;  %v7926_v26 = vcombine.high %v11145_v21, %v11145_v21 }
 0x15a   : > { %6712 = vmatpush1.bf16.msra.mxu0 %v9608_v27  ;;  %7368 = vmatpush1.bf16.msra.mxu1 %v9611_v28  ;;  %v9703_v27 = vld [vmem:[%s10716_s17 + $0xc28] ss:$16 sps:$4 sm:$0xff]   ;;  %v9708_v28 = vld [vmem:[%s10716_s17 + $0xc44] ss:$16 sps:$4 sm:$0xff]  }
 0x15b   : > { %6713 = vmatprep.subr.bf16.mxu0 %v9616_v29  ;;  %7369 = vmatprep.subr.bf16.mxu1 %v9619_v30  ;;  %v9711_v29 = vld [vmem:[%s10716_s17 + $0xc4c] ss:$16 sps:$4 sm:$0xff]   ;;  %v9706_v30 = vld [vmem:[%s10716_s17 + $0xc40] ss:$16 sps:$4 sm:$0xff]  }
 0x15e   : > { %6714 = vmatpush1.bf16.msra.mxu0 %v9614_v31  ;;  %7370 = vmatpush1.bf16.msra.mxu1 %v9617_v32  ;;  %v9709_v31 = vld [vmem:[%s10716_s17 + $0xc48] ss:$16 sps:$4 sm:$0xff]   ;;  %v9714_v32 = vld [vmem:[%s10716_s17 + $0xc64] ss:$16 sps:$4 sm:$0xff]  }
 0x15f   : > { %6715 = vmatprep.subr.bf16.mxu0 %v9622_v33  ;;  %7371 = vmatprep.subr.bf16.mxu1 %v9625_v34  ;;  %v9717_v33 = vld [vmem:[%s10716_s17 + $0xc6c] ss:$16 sps:$4 sm:$0xff]   ;;  %v9712_v34 = vld [vmem:[%s10716_s17 + $0xc60] ss:$16 sps:$4 sm:$0xff]  }
 0x162   : > { %6716 = vmatpush1.bf16.msra.mxu0 %v9620_v35  ;;  %7372 = vmatpush1.bf16.msra.mxu1 %v9623_v36  ;;  %v9715_v35 = vld [vmem:[%s10716_s17 + $0xc68] ss:$16 sps:$4 sm:$0xff]   ;;  %v9720_v36 = vld [vmem:[%s10716_s17 + $0xc84] ss:$16 sps:$4 sm:$0xff]  }
 0x163   : > { %6717 = vmatprep.subr.bf16.mxu0 %v9628_v37  ;;  %7373 = vmatprep.subr.bf16.mxu1 %v9631_v38  ;;  %v9723_v37 = vld [vmem:[%s10716_s17 + $0xc8c] ss:$16 sps:$4 sm:$0xff]   ;;  %v9718_v38 = vld [vmem:[%s10716_s17 + $0xc80] ss:$16 sps:$4 sm:$0xff]  }
 0x166   : > { %6718 = vmatpush1.bf16.msra.mxu0 %v9626_v39  ;;  %7374 = vmatpush1.bf16.msra.mxu1 %v9629_v40  ;;  %v9721_v39 = vld [vmem:[%s10716_s17 + $0xc88] ss:$16 sps:$4 sm:$0xff]   ;;  %v9726_v40 = vld [vmem:[%s10716_s17 + $0xca4] ss:$16 sps:$4 sm:$0xff]  }
 0x167   : > { %6719 = vmatprep.subr.bf16.mxu0 %v9634_v41  ;;  %7375 = vmatprep.subr.bf16.mxu1 %v9637_v42  ;;  %v9729_v41 = vld [vmem:[%s10716_s17 + $0xcac] ss:$16 sps:$4 sm:$0xff]   ;;  %v9724_v42 = vld [vmem:[%s10716_s17 + $0xca0] ss:$16 sps:$4 sm:$0xff]  }
 0x16a   : > { %6720 = vmatpush1.bf16.msra.mxu0 %v9632_v43  ;;  %7376 = vmatpush1.bf16.msra.mxu1 %v9635_v44  ;;  %v9727_v43 = vld [vmem:[%s10716_s17 + $0xca8] ss:$16 sps:$4 sm:$0xff]   ;;  %v9732_v44 = vld [vmem:[%s10716_s17 + $0xcc4] ss:$16 sps:$4 sm:$0xff]  }
 0x16b   : > { %6721 = vmatprep.subr.bf16.mxu0 %v9640_v45  ;;  %7377 = vmatprep.subr.bf16.mxu1 %v9643_v46  ;;  %v9735_v45 = vld [vmem:[%s10716_s17 + $0xccc] ss:$16 sps:$4 sm:$0xff]   ;;  %v9730_v46 = vld [vmem:[%s10716_s17 + $0xcc0] ss:$16 sps:$4 sm:$0xff]  }
 0x16e   : > { %6722 = vmatpush1.bf16.msra.mxu0 %v9638_v47  ;;  %7378 = vmatpush1.bf16.msra.mxu1 %v9641_v48  ;;  %v9733_v47 = vld [vmem:[%s10716_s17 + $0xcc8] ss:$16 sps:$4 sm:$0xff]   ;;  %v9738_v48 = vld [vmem:[%s10716_s17 + $0xce4] ss:$16 sps:$4 sm:$0xff]  }
 0x16f   : > { %6723 = vmatprep.subr.bf16.mxu0 %v9646_v49  ;;  %7379 = vmatprep.subr.bf16.mxu1 %v9649_v50  ;;  %v9741_v49 = vld [vmem:[%s10716_s17 + $0xcec] ss:$16 sps:$4 sm:$0xff]   ;;  %v9736_v50 = vld [vmem:[%s10716_s17 + $0xce0] ss:$16 sps:$4 sm:$0xff]  }
 0x172   : > { %6724 = vmatpush1.bf16.msra.mxu0 %v9644_v51  ;;  %7380 = vmatpush1.bf16.msra.mxu1 %v9647_v52  ;;  %v9739_v51 = vld [vmem:[%s10716_s17 + $0xce8] ss:$16 sps:$4 sm:$0xff]   ;;  %v9744_v52 = vld [vmem:[%s10716_s17 + $0xd04] ss:$16 sps:$4 sm:$0xff]  }
 0x173   : > { %6725 = vmatprep.subr.bf16.mxu0 %v9652_v53  ;;  %7381 = vmatprep.subr.bf16.mxu1 %v9655_v54  ;;  %v9747_v53 = vld [vmem:[%s10716_s17 + $0xd0c] ss:$16 sps:$4 sm:$0xff]   ;;  %v9742_v54 = vld [vmem:[%s10716_s17 + $0xd00] ss:$16 sps:$4 sm:$0xff]  }
 0x176   : > { %6726 = vmatpush1.bf16.msra.mxu0 %v9650_v55  ;;  %7382 = vmatpush1.bf16.msra.mxu1 %v9653_v56  ;;  %v9745_v55 = vld [vmem:[%s10716_s17 + $0xd08] ss:$16 sps:$4 sm:$0xff]   ;;  %v9750_v56 = vld [vmem:[%s10716_s17 + $0xd24] ss:$16 sps:$4 sm:$0xff]  }
 0x177   : > { %6727 = vmatprep.subr.bf16.mxu0 %v9658_v57  ;;  %7383 = vmatprep.subr.bf16.mxu1 %v9661_v58  ;;  %v9753_v57 = vld [vmem:[%s10716_s17 + $0xd2c] ss:$16 sps:$4 sm:$0xff]   ;;  %v9748_v58 = vld [vmem:[%s10716_s17 + $0xd20] ss:$16 sps:$4 sm:$0xff]  }
 0x17a   : > { %6728 = vmatpush1.bf16.msra.mxu0 %v9656_v59  ;;  %7384 = vmatpush1.bf16.msra.mxu1 %v9659_v60  ;;  %v9751_v59 = vld [vmem:[%s10716_s17 + $0xd28] ss:$16 sps:$4 sm:$0xff]   ;;  %v9756_v60 = vld [vmem:[%s10716_s17 + $0xd44] ss:$16 sps:$4 sm:$0xff]  }
 0x17b   : > { %6729 = vmatprep.subr.bf16.mxu0 %v9664_v61  ;;  %7385 = vmatprep.subr.bf16.mxu1 %v9667_v62  ;;  %v9759_v61 = vld [vmem:[%s10716_s17 + $0xd4c] ss:$16 sps:$4 sm:$0xff]   ;;  %v9754_v62 = vld [vmem:[%s10716_s17 + $0xd40] ss:$16 sps:$4 sm:$0xff]  }
 0x17e   : > { %6730 = vmatpush1.bf16.msra.mxu0 %v9662_v63  ;;  %7386 = vmatpush1.bf16.msra.mxu1 %v9665_v0  ;;  %v9757_v63 = vld [vmem:[%s10716_s17 + $0xd48] ss:$16 sps:$4 sm:$0xff]   ;;  %v9762_v0 = vld [vmem:[%s10716_s17 + $0xd64] ss:$16 sps:$4 sm:$0xff]  }
 0x17f   : > { %6731 = vmatprep.subr.bf16.mxu0 %v9670_v1  ;;  %7387 = vmatprep.subr.bf16.mxu1 %v9673_v2  ;;  %v9765_v1 = vld [vmem:[%s10716_s17 + $0xd6c] ss:$16 sps:$4 sm:$0xff]   ;;  %v9760_v2 = vld [vmem:[%s10716_s17 + $0xd60] ss:$16 sps:$4 sm:$0xff]  }
 0x182   : > { %6732 = vmatpush1.bf16.msra.mxu0 %v9668_v3  ;;  %7388 = vmatpush1.bf16.msra.mxu1 %v9671_v4  ;;  %v9763_v3 = vld [vmem:[%s10716_s17 + $0xd68] ss:$16 sps:$4 sm:$0xff]   ;;  %v9768_v4 = vld [vmem:[%s10716_s17 + $0xd84] ss:$16 sps:$4 sm:$0xff]  }
 0x183   : > { %6733 = vmatprep.subr.bf16.mxu0 %v9676_v5  ;;  %7389 = vmatprep.subr.bf16.mxu1 %v9679_v6  ;;  %v9771_v5 = vld [vmem:[%s10716_s17 + $0xd8c] ss:$16 sps:$4 sm:$0xff]   ;;  %v9766_v6 = vld [vmem:[%s10716_s17 + $0xd80] ss:$16 sps:$4 sm:$0xff]  }
 0x186   : > { %6734 = vmatpush1.bf16.msra.mxu0 %v9674_v7  ;;  %7390 = vmatpush1.bf16.msra.mxu1 %v9677_v8  ;;  %v9769_v7 = vld [vmem:[%s10716_s17 + $0xd88] ss:$16 sps:$4 sm:$0xff]   ;;  %v9774_v8 = vld [vmem:[%s10716_s17 + $0xda4] ss:$16 sps:$4 sm:$0xff]  }
 0x187   : > { %6735 = vmatprep.subr.bf16.mxu0 %v9682_v9  ;;  %7391 = vmatprep.subr.bf16.mxu1 %v9685_v10  ;;  %v9777_v9 = vld [vmem:[%s10716_s17 + $0xdac] ss:$16 sps:$4 sm:$0xff]   ;;  %v9772_v10 = vld [vmem:[%s10716_s17 + $0xda0] ss:$16 sps:$4 sm:$0xff]  }
 0x18a   : > { %6736 = vmatpush1.bf16.msra.mxu0 %v9680_v12  ;;  %7392 = vmatpush1.bf16.msra.mxu1 %v9683_v13  ;;  %v9775_v12 = vld [vmem:[%s10716_s17 + $0xda8] ss:$16 sps:$4 sm:$0xff]   ;;  %v9780_v13 = vld [vmem:[%s10716_s17 + $0xdc4] ss:$16 sps:$4 sm:$0xff]  }
 0x18b   : > { %6737 = vmatprep.subr.bf16.mxu0 %v9688_v15  ;;  %7393 = vmatprep.subr.bf16.mxu1 %v9691_v16  ;;  %v9783_v15 = vld [vmem:[%s10716_s17 + $0xdcc] ss:$16 sps:$4 sm:$0xff]   ;;  %v9778_v16 = vld [vmem:[%s10716_s17 + $0xdc0] ss:$16 sps:$4 sm:$0xff]  }
 0x18e   : > { %6738 = vmatpush1.bf16.msra.mxu0 %v9686_v11  ;;  %7394 = vmatpush1.bf16.msra.mxu1 %v9689_v19  ;;  %v9781_v11 = vld [vmem:[%s10716_s17 + $0xdc8] ss:$16 sps:$4 sm:$0xff]   ;;  %v9786_v19 = vld [vmem:[%s10716_s17 + $0xde4] ss:$16 sps:$4 sm:$0xff]  }
 0x18f   : > { %6748 = vmatprep.subr.bf16.mxu0 %v9696_v20  ;;  %7404 = vmatprep.subr.bf16.mxu1 %v9699_v14  ;;  %v9789_v20 = vld [vmem:[%s10716_s17 + $0xdec] ss:$16 sps:$4 sm:$0xff]   ;;  %v9784_v14 = vld [vmem:[%s10716_s17 + $0xde0] ss:$16 sps:$4 sm:$0xff]  }
 0x191   : > { %6740 = vmatmul.mubr.bf16.vlgmr.msra.gmra.mrb[0].mxu0 %v7923_v22  ;;  %7396 = vmatmul.mubr.bf16.vlgmr.msra.gmra.mrb[0].mxu1 %v7923_v22  ;;  %v9787_v22 = vld [vmem:[%s10716_s17 + $0xde8] ss:$16 sps:$4 sm:$0xff]  }
 0x192   : > { %6749 = vmatpush1.bf16.msra.mxu0 %v9694_v23  ;;  %7405 = vmatpush1.bf16.msra.mxu1 %v9697_v17  ;;  %v9794_v23 = vld [vmem:[%s10716_s17 + $0xe04] ss:$16 sps:$4 sm:$0xff]   ;;  %v9797_v17 = vld [vmem:[%s10716_s17 + $0xe0c] ss:$16 sps:$4 sm:$0xff]  }
 0x193   : > { %6750 = vmatprep.subr.bf16.mxu0 %v9702_v24  ;;  %7406 = vmatprep.subr.bf16.mxu1 %v9705_v25  ;;  %v11216_v24 = vld [vmem:[%s10766_s21 + $0x38] sm:$0xff]  ;;  %v7925_v25 = vcombine.low %v11145_v21, %v11145_v21  ;;  %v9798_v21 = vld [vmem:[%s10716_s17 + $0xe20] ss:$16 sps:$4 sm:$0xff]  }
 0x194   : > { %6780 = vmatprep.mubr.bf16.mxu0 %v7926_v26  ;;  %7436 = vmatprep.mubr.bf16.mxu1 %v7926_v26  ;;  %v9792_v26 = vld [vmem:[%s10716_s17 + $0xe00] ss:$16 sps:$4 sm:$0xff]  }
 0x196   : > { %6751 = vmatpush1.bf16.msra.mxu0 %v9700_v18  ;;  %7407 = vmatpush1.bf16.msra.mxu1 %v9703_v27  ;;  %v9795_v18 = vld [vmem:[%s10716_s17 + $0xe08] ss:$16 sps:$4 sm:$0xff]   ;;  %v9800_v27 = vld [vmem:[%s10716_s17 + $0xe24] ss:$16 sps:$4 sm:$0xff]  }
 0x197   : > { %6752 = vmatprep.subr.bf16.mxu0 %v9708_v28  ;;  %7408 = vmatprep.subr.bf16.mxu1 %v9711_v29  ;;  %v9803_v28 = vld [vmem:[%s10716_s17 + $0xe2c] ss:$16 sps:$4 sm:$0xff]   ;;  %v7928_v29 = vcombine.high %v11216_v24, %v11216_v24 }
 0x19a   : > { %6753 = vmatpush1.bf16.msra.mxu0 %v9706_v30  ;;  %7409 = vmatpush1.bf16.msra.mxu1 %v9709_v31  ;;  %v9801_v30 = vld [vmem:[%s10716_s17 + $0xe28] ss:$16 sps:$4 sm:$0xff]   ;;  %v9806_v31 = vld [vmem:[%s10716_s17 + $0xe44] ss:$16 sps:$4 sm:$0xff]  }
 0x19b   : > { %6754 = vmatprep.subr.bf16.mxu0 %v9714_v32  ;;  %7410 = vmatprep.subr.bf16.mxu1 %v9717_v33  ;;  %v9809_v32 = vld [vmem:[%s10716_s17 + $0xe4c] ss:$16 sps:$4 sm:$0xff]   ;;  %v9804_v33 = vld [vmem:[%s10716_s17 + $0xe40] ss:$16 sps:$4 sm:$0xff]  }
 0x19e   : > { %6755 = vmatpush1.bf16.msra.mxu0 %v9712_v34  ;;  %7411 = vmatpush1.bf16.msra.mxu1 %v9715_v35  ;;  %v9807_v34 = vld [vmem:[%s10716_s17 + $0xe48] ss:$16 sps:$4 sm:$0xff]   ;;  %v9812_v35 = vld [vmem:[%s10716_s17 + $0xe64] ss:$16 sps:$4 sm:$0xff]  }
 0x19f   : > { %6756 = vmatprep.subr.bf16.mxu0 %v9720_v36  ;;  %7412 = vmatprep.subr.bf16.mxu1 %v9723_v37  ;;  %v9815_v36 = vld [vmem:[%s10716_s17 + $0xe6c] ss:$16 sps:$4 sm:$0xff]   ;;  %v9810_v37 = vld [vmem:[%s10716_s17 + $0xe60] ss:$16 sps:$4 sm:$0xff]  }
 0x1a2   : > { %6757 = vmatpush1.bf16.msra.mxu0 %v9718_v38  ;;  %7413 = vmatpush1.bf16.msra.mxu1 %v9721_v39  ;;  %v9813_v38 = vld [vmem:[%s10716_s17 + $0xe68] ss:$16 sps:$4 sm:$0xff]   ;;  %v9818_v39 = vld [vmem:[%s10716_s17 + $0xe84] ss:$16 sps:$4 sm:$0xff]  }
 0x1a3   : > { %6758 = vmatprep.subr.bf16.mxu0 %v9726_v40  ;;  %7414 = vmatprep.subr.bf16.mxu1 %v9729_v41  ;;  %v9821_v40 = vld [vmem:[%s10716_s17 + $0xe8c] ss:$16 sps:$4 sm:$0xff]   ;;  %v9816_v41 = vld [vmem:[%s10716_s17 + $0xe80] ss:$16 sps:$4 sm:$0xff]  }
 0x1a6   : > { %6759 = vmatpush1.bf16.msra.mxu0 %v9724_v42  ;;  %7415 = vmatpush1.bf16.msra.mxu1 %v9727_v43  ;;  %v9819_v42 = vld [vmem:[%s10716_s17 + $0xe88] ss:$16 sps:$4 sm:$0xff]   ;;  %v9824_v43 = vld [vmem:[%s10716_s17 + $0xea4] ss:$16 sps:$4 sm:$0xff]  }
 0x1a7   : > { %6760 = vmatprep.subr.bf16.mxu0 %v9732_v44  ;;  %7416 = vmatprep.subr.bf16.mxu1 %v9735_v45  ;;  %v9827_v44 = vld [vmem:[%s10716_s17 + $0xeac] ss:$16 sps:$4 sm:$0xff]   ;;  %v9822_v45 = vld [vmem:[%s10716_s17 + $0xea0] ss:$16 sps:$4 sm:$0xff]  }
 0x1aa   : > { %6761 = vmatpush1.bf16.msra.mxu0 %v9730_v46  ;;  %7417 = vmatpush1.bf16.msra.mxu1 %v9733_v47  ;;  %v9825_v46 = vld [vmem:[%s10716_s17 + $0xea8] ss:$16 sps:$4 sm:$0xff]   ;;  %v9830_v47 = vld [vmem:[%s10716_s17 + $0xec4] ss:$16 sps:$4 sm:$0xff]  }
 0x1ab   : > { %6762 = vmatprep.subr.bf16.mxu0 %v9738_v48  ;;  %7418 = vmatprep.subr.bf16.mxu1 %v9741_v49  ;;  %v9833_v48 = vld [vmem:[%s10716_s17 + $0xecc] ss:$16 sps:$4 sm:$0xff]   ;;  %v9828_v49 = vld [vmem:[%s10716_s17 + $0xec0] ss:$16 sps:$4 sm:$0xff]  }
 0x1ae   : > { %6763 = vmatpush1.bf16.msra.mxu0 %v9736_v50  ;;  %7419 = vmatpush1.bf16.msra.mxu1 %v9739_v51  ;;  %v9831_v50 = vld [vmem:[%s10716_s17 + $0xec8] ss:$16 sps:$4 sm:$0xff]   ;;  %v9836_v51 = vld [vmem:[%s10716_s17 + $0xee4] ss:$16 sps:$4 sm:$0xff]  }
 0x1af   : > { %6764 = vmatprep.subr.bf16.mxu0 %v9744_v52  ;;  %7420 = vmatprep.subr.bf16.mxu1 %v9747_v53  ;;  %v9839_v52 = vld [vmem:[%s10716_s17 + $0xeec] ss:$16 sps:$4 sm:$0xff]   ;;  %v9834_v53 = vld [vmem:[%s10716_s17 + $0xee0] ss:$16 sps:$4 sm:$0xff]  }
 0x1b2   : > { %6765 = vmatpush1.bf16.msra.mxu0 %v9742_v54  ;;  %7421 = vmatpush1.bf16.msra.mxu1 %v9745_v55  ;;  %v9837_v54 = vld [vmem:[%s10716_s17 + $0xee8] ss:$16 sps:$4 sm:$0xff]   ;;  %v9842_v55 = vld [vmem:[%s10716_s17 + $0xf04] ss:$16 sps:$4 sm:$0xff]  }
 0x1b3   : > { %6766 = vmatprep.subr.bf16.mxu0 %v9750_v56  ;;  %7422 = vmatprep.subr.bf16.mxu1 %v9753_v57  ;;  %v9845_v56 = vld [vmem:[%s10716_s17 + $0xf0c] ss:$16 sps:$4 sm:$0xff]   ;;  %v9840_v57 = vld [vmem:[%s10716_s17 + $0xf00] ss:$16 sps:$4 sm:$0xff]  }
 0x1b6   : > { %6767 = vmatpush1.bf16.msra.mxu0 %v9748_v58  ;;  %7423 = vmatpush1.bf16.msra.mxu1 %v9751_v59  ;;  %v9843_v58 = vld [vmem:[%s10716_s17 + $0xf08] ss:$16 sps:$4 sm:$0xff]   ;;  %v9848_v59 = vld [vmem:[%s10716_s17 + $0xf24] ss:$16 sps:$4 sm:$0xff]  }
 0x1b7   : > { %6768 = vmatprep.subr.bf16.mxu0 %v9756_v60  ;;  %7424 = vmatprep.subr.bf16.mxu1 %v9759_v61  ;;  %v9851_v60 = vld [vmem:[%s10716_s17 + $0xf2c] ss:$16 sps:$4 sm:$0xff]   ;;  %v9846_v61 = vld [vmem:[%s10716_s17 + $0xf20] ss:$16 sps:$4 sm:$0xff]  }
 0x1ba   : > { %6769 = vmatpush1.bf16.msra.mxu0 %v9754_v62  ;;  %7425 = vmatpush1.bf16.msra.mxu1 %v9757_v63  ;;  %v9849_v62 = vld [vmem:[%s10716_s17 + $0xf28] ss:$16 sps:$4 sm:$0xff]   ;;  %v9854_v63 = vld [vmem:[%s10716_s17 + $0xf44] ss:$16 sps:$4 sm:$0xff]  }
 0x1bb   : > { %6770 = vmatprep.subr.bf16.mxu0 %v9762_v0  ;;  %7426 = vmatprep.subr.bf16.mxu1 %v9765_v1  ;;  %v9857_v0 = vld [vmem:[%s10716_s17 + $0xf4c] ss:$16 sps:$4 sm:$0xff]   ;;  %v9852_v1 = vld [vmem:[%s10716_s17 + $0xf40] ss:$16 sps:$4 sm:$0xff]  }
 0x1be   : > { %6771 = vmatpush1.bf16.msra.mxu0 %v9760_v2  ;;  %7427 = vmatpush1.bf16.msra.mxu1 %v9763_v3  ;;  %v9855_v2 = vld [vmem:[%s10716_s17 + $0xf48] ss:$16 sps:$4 sm:$0xff]   ;;  %v9860_v3 = vld [vmem:[%s10716_s17 + $0xf64] ss:$16 sps:$4 sm:$0xff]  }
 0x1bf   : > { %6772 = vmatprep.subr.bf16.mxu0 %v9768_v4  ;;  %7428 = vmatprep.subr.bf16.mxu1 %v9771_v5  ;;  %v9863_v4 = vld [vmem:[%s10716_s17 + $0xf6c] ss:$16 sps:$4 sm:$0xff]   ;;  %v9858_v5 = vld [vmem:[%s10716_s17 + $0xf60] ss:$16 sps:$4 sm:$0xff]  }
 0x1c2   : > { %6773 = vmatpush1.bf16.msra.mxu0 %v9766_v6  ;;  %7429 = vmatpush1.bf16.msra.mxu1 %v9769_v7  ;;  %v9861_v6 = vld [vmem:[%s10716_s17 + $0xf68] ss:$16 sps:$4 sm:$0xff]   ;;  %v9866_v7 = vld [vmem:[%s10716_s17 + $0xf84] ss:$16 sps:$4 sm:$0xff]  }
 0x1c3   : > { %6774 = vmatprep.subr.bf16.mxu0 %v9774_v8  ;;  %7430 = vmatprep.subr.bf16.mxu1 %v9777_v9  ;;  %v9869_v8 = vld [vmem:[%s10716_s17 + $0xf8c] ss:$16 sps:$4 sm:$0xff]   ;;  %v9864_v9 = vld [vmem:[%s10716_s17 + $0xf80] ss:$16 sps:$4 sm:$0xff]  }
 0x1c6   : > { %6775 = vmatpush1.bf16.msra.mxu0 %v9772_v10  ;;  %7431 = vmatpush1.bf16.msra.mxu1 %v9775_v12  ;;  %v9867_v10 = vld [vmem:[%s10716_s17 + $0xf88] ss:$16 sps:$4 sm:$0xff]   ;;  %v9872_v12 = vld [vmem:[%s10716_s17 + $0xfa4] ss:$16 sps:$4 sm:$0xff]  }
 0x1c7   : > { %6776 = vmatprep.subr.bf16.mxu0 %v9780_v13  ;;  %7432 = vmatprep.subr.bf16.mxu1 %v9783_v15  ;;  %v9875_v13 = vld [vmem:[%s10716_s17 + $0xfac] ss:$16 sps:$4 sm:$0xff]   ;;  %v9870_v15 = vld [vmem:[%s10716_s17 + $0xfa0] ss:$16 sps:$4 sm:$0xff]  }
 0x1ca   : > { %6777 = vmatpush1.bf16.msra.mxu0 %v9778_v16  ;;  %7433 = vmatpush1.bf16.msra.mxu1 %v9781_v11  ;;  %v9873_v16 = vld [vmem:[%s10716_s17 + $0xfa8] ss:$16 sps:$4 sm:$0xff]   ;;  %v9878_v11 = vld [vmem:[%s10716_s17 + $0xfc4] ss:$16 sps:$4 sm:$0xff]  }
 0x1cb   : > { %6778 = vmatprep.subr.bf16.mxu0 %v9786_v19  ;;  %7434 = vmatprep.subr.bf16.mxu1 %v9789_v20  ;;  %v9881_v19 = vld [vmem:[%s10716_s17 + $0xfcc] ss:$16 sps:$4 sm:$0xff]   ;;  %v9876_v20 = vld [vmem:[%s10716_s17 + $0xfc0] ss:$16 sps:$4 sm:$0xff]  }
 0x1ce   : > { %6779 = vmatpush1.bf16.msra.mxu0 %v9784_v14  ;;  %7435 = vmatpush1.bf16.msra.mxu1 %v9787_v22  ;;  %v9879_v14 = vld [vmem:[%s10716_s17 + $0xfc8] ss:$16 sps:$4 sm:$0xff]   ;;  %v9884_v22 = vld [vmem:[%s10716_s17 + $0xfe4] ss:$16 sps:$4 sm:$0xff]  }
 0x1cf   : > { %6789 = vmatprep.subr.bf16.mxu0 %v9794_v23  ;;  %7445 = vmatprep.subr.bf16.mxu1 %v9797_v17  ;;  %v9887_v23 = vld [vmem:[%s10716_s17 + $0xfec] ss:$16 sps:$4 sm:$0xff]   ;;  %v9882_v17 = vld [vmem:[%s10716_s17 + $0xfe0] ss:$16 sps:$4 sm:$0xff]  }
 0x1d1   : > { %6781 = vmatmul.mubr.bf16.vlgmr.msra.gmra.mrb[0].mxu0 %v7925_v25  ;;  %7437 = vmatmul.mubr.bf16.vlgmr.msra.gmra.mrb[0].mxu1 %v7925_v25  ;;  %v9885_v25 = vld [vmem:[%s10716_s17 + $0xfe8] ss:$16 sps:$4 sm:$0xff]  }
 0x1d2   : > { %6790 = vmatpush1.bf16.msra.mxu0 %v9792_v26  ;;  %7446 = vmatpush1.bf16.msra.mxu1 %v9795_v18  ;;  %v9892_v26 = vld [vmem:[%s10716_s17 + $0x1004] ss:$16 sps:$4 sm:$0xff]   ;;  %v9895_v18 = vld [vmem:[%s10716_s17 + $0x100c] ss:$16 sps:$4 sm:$0xff]  }
 0x1d3   : > { %6791 = vmatprep.subr.bf16.mxu0 %v9800_v27  ;;  %7447 = vmatprep.subr.bf16.mxu1 %v9803_v28  ;;  %v11287_v27 = vld [vmem:[%s10766_s21 + $0x40] sm:$0xff]  ;;  %v7927_v28 = vcombine.low %v11216_v24, %v11216_v24 }
 0x1d4   : > { %6821 = vmatprep.mubr.bf16.mxu0 %v7928_v29  ;;  %7477 = vmatprep.mubr.bf16.mxu1 %v7928_v29  ;;  %v9890_v29 = vld [vmem:[%s10716_s17 + $0x1000] ss:$16 sps:$4 sm:$0xff]  }
 0x1d5   : > { %v9896_v24 = vld [vmem:[%s10716_s17 + $0x1020] ss:$16 sps:$4 sm:$0xff]  }
 0x1d6   : > { %6792 = vmatpush1.bf16.msra.mxu0 %v9798_v21  ;;  %7448 = vmatpush1.bf16.msra.mxu1 %v9801_v30  ;;  %v9893_v21 = vld [vmem:[%s10716_s17 + $0x1008] ss:$16 sps:$4 sm:$0xff]   ;;  %v9898_v30 = vld [vmem:[%s10716_s17 + $0x1024] ss:$16 sps:$4 sm:$0xff]  }
 0x1d7   : > { %6793 = vmatprep.subr.bf16.mxu0 %v9806_v31  ;;  %7449 = vmatprep.subr.bf16.mxu1 %v9809_v32  ;;  %v9901_v31 = vld [vmem:[%s10716_s17 + $0x102c] ss:$16 sps:$4 sm:$0xff]   ;;  %v7930_v32 = vcombine.high %v11287_v27, %v11287_v27 }
 0x1da   : > { %6794 = vmatpush1.bf16.msra.mxu0 %v9804_v33  ;;  %7450 = vmatpush1.bf16.msra.mxu1 %v9807_v34  ;;  %v9899_v33 = vld [vmem:[%s10716_s17 + $0x1028] ss:$16 sps:$4 sm:$0xff]   ;;  %v9904_v34 = vld [vmem:[%s10716_s17 + $0x1044] ss:$16 sps:$4 sm:$0xff]  }
 0x1db   : > { %6795 = vmatprep.subr.bf16.mxu0 %v9812_v35  ;;  %7451 = vmatprep.subr.bf16.mxu1 %v9815_v36  ;;  %v9907_v35 = vld [vmem:[%s10716_s17 + $0x104c] ss:$16 sps:$4 sm:$0xff]   ;;  %v9902_v36 = vld [vmem:[%s10716_s17 + $0x1040] ss:$16 sps:$4 sm:$0xff]  }
 0x1de   : > { %6796 = vmatpush1.bf16.msra.mxu0 %v9810_v37  ;;  %7452 = vmatpush1.bf16.msra.mxu1 %v9813_v38  ;;  %v9905_v37 = vld [vmem:[%s10716_s17 + $0x1048] ss:$16 sps:$4 sm:$0xff]   ;;  %v9910_v38 = vld [vmem:[%s10716_s17 + $0x1064] ss:$16 sps:$4 sm:$0xff]  }
 0x1df   : > { %6797 = vmatprep.subr.bf16.mxu0 %v9818_v39  ;;  %7453 = vmatprep.subr.bf16.mxu1 %v9821_v40  ;;  %v9913_v39 = vld [vmem:[%s10716_s17 + $0x106c] ss:$16 sps:$4 sm:$0xff]   ;;  %v9908_v40 = vld [vmem:[%s10716_s17 + $0x1060] ss:$16 sps:$4 sm:$0xff]  }
 0x1e2   : > { %6798 = vmatpush1.bf16.msra.mxu0 %v9816_v41  ;;  %7454 = vmatpush1.bf16.msra.mxu1 %v9819_v42  ;;  %v9911_v41 = vld [vmem:[%s10716_s17 + $0x1068] ss:$16 sps:$4 sm:$0xff]   ;;  %v9916_v42 = vld [vmem:[%s10716_s17 + $0x1084] ss:$16 sps:$4 sm:$0xff]  }
 0x1e3   : > { %6799 = vmatprep.subr.bf16.mxu0 %v9824_v43  ;;  %7455 = vmatprep.subr.bf16.mxu1 %v9827_v44  ;;  %v9919_v43 = vld [vmem:[%s10716_s17 + $0x108c] ss:$16 sps:$4 sm:$0xff]   ;;  %v9914_v44 = vld [vmem:[%s10716_s17 + $0x1080] ss:$16 sps:$4 sm:$0xff]  }
 0x1e6   : > { %6800 = vmatpush1.bf16.msra.mxu0 %v9822_v45  ;;  %7456 = vmatpush1.bf16.msra.mxu1 %v9825_v46  ;;  %v9917_v45 = vld [vmem:[%s10716_s17 + $0x1088] ss:$16 sps:$4 sm:$0xff]   ;;  %v9922_v46 = vld [vmem:[%s10716_s17 + $0x10a4] ss:$16 sps:$4 sm:$0xff]  }
 0x1e7   : > { %6801 = vmatprep.subr.bf16.mxu0 %v9830_v47  ;;  %7457 = vmatprep.subr.bf16.mxu1 %v9833_v48  ;;  %v9925_v47 = vld [vmem:[%s10716_s17 + $0x10ac] ss:$16 sps:$4 sm:$0xff]   ;;  %v9920_v48 = vld [vmem:[%s10716_s17 + $0x10a0] ss:$16 sps:$4 sm:$0xff]  }
 0x1ea   : > { %6802 = vmatpush1.bf16.msra.mxu0 %v9828_v49  ;;  %7458 = vmatpush1.bf16.msra.mxu1 %v9831_v50  ;;  %v9923_v49 = vld [vmem:[%s10716_s17 + $0x10a8] ss:$16 sps:$4 sm:$0xff]   ;;  %v9928_v50 = vld [vmem:[%s10716_s17 + $0x10c4] ss:$16 sps:$4 sm:$0xff]  }
 0x1eb   : > { %6803 = vmatprep.subr.bf16.mxu0 %v9836_v51  ;;  %7459 = vmatprep.subr.bf16.mxu1 %v9839_v52  ;;  %v9931_v51 = vld [vmem:[%s10716_s17 + $0x10cc] ss:$16 sps:$4 sm:$0xff]   ;;  %v9926_v52 = vld [vmem:[%s10716_s17 + $0x10c0] ss:$16 sps:$4 sm:$0xff]  }
 0x1ee   : > { %6804 = vmatpush1.bf16.msra.mxu0 %v9834_v53  ;;  %7460 = vmatpush1.bf16.msra.mxu1 %v9837_v54  ;;  %v9929_v53 = vld [vmem:[%s10716_s17 + $0x10c8] ss:$16 sps:$4 sm:$0xff]   ;;  %v9934_v54 = vld [vmem:[%s10716_s17 + $0x10e4] ss:$16 sps:$4 sm:$0xff]  }
 0x1ef   : > { %6805 = vmatprep.subr.bf16.mxu0 %v9842_v55  ;;  %7461 = vmatprep.subr.bf16.mxu1 %v9845_v56  ;;  %v9937_v55 = vld [vmem:[%s10716_s17 + $0x10ec] ss:$16 sps:$4 sm:$0xff]   ;;  %v9932_v56 = vld [vmem:[%s10716_s17 + $0x10e0] ss:$16 sps:$4 sm:$0xff]  }
 0x1f2   : > { %6806 = vmatpush1.bf16.msra.mxu0 %v9840_v57  ;;  %7462 = vmatpush1.bf16.msra.mxu1 %v9843_v58  ;;  %v9935_v57 = vld [vmem:[%s10716_s17 + $0x10e8] ss:$16 sps:$4 sm:$0xff]   ;;  %v9940_v58 = vld [vmem:[%s10716_s17 + $0x1104] ss:$16 sps:$4 sm:$0xff]  }
 0x1f3   : > { %6807 = vmatprep.subr.bf16.mxu0 %v9848_v59  ;;  %7463 = vmatprep.subr.bf16.mxu1 %v9851_v60  ;;  %v9943_v59 = vld [vmem:[%s10716_s17 + $0x110c] ss:$16 sps:$4 sm:$0xff]   ;;  %v9938_v60 = vld [vmem:[%s10716_s17 + $0x1100] ss:$16 sps:$4 sm:$0xff]  }
 0x1f6   : > { %6808 = vmatpush1.bf16.msra.mxu0 %v9846_v61  ;;  %7464 = vmatpush1.bf16.msra.mxu1 %v9849_v62  ;;  %v9941_v61 = vld [vmem:[%s10716_s17 + $0x1108] ss:$16 sps:$4 sm:$0xff]   ;;  %v9946_v62 = vld [vmem:[%s10716_s17 + $0x1124] ss:$16 sps:$4 sm:$0xff]  }
 0x1f7   : > { %6809 = vmatprep.subr.bf16.mxu0 %v9854_v63  ;;  %7465 = vmatprep.subr.bf16.mxu1 %v9857_v0  ;;  %v9949_v63 = vld [vmem:[%s10716_s17 + $0x112c] ss:$16 sps:$4 sm:$0xff]   ;;  %v9944_v0 = vld [vmem:[%s10716_s17 + $0x1120] ss:$16 sps:$4 sm:$0xff]  }
 0x1fa   : > { %6810 = vmatpush1.bf16.msra.mxu0 %v9852_v1  ;;  %7466 = vmatpush1.bf16.msra.mxu1 %v9855_v2  ;;  %v9947_v1 = vld [vmem:[%s10716_s17 + $0x1128] ss:$16 sps:$4 sm:$0xff]   ;;  %v9952_v2 = vld [vmem:[%s10716_s17 + $0x1144] ss:$16 sps:$4 sm:$0xff]  }
 0x1fb   : > { %6811 = vmatprep.subr.bf16.mxu0 %v9860_v3  ;;  %7467 = vmatprep.subr.bf16.mxu1 %v9863_v4  ;;  %v9955_v3 = vld [vmem:[%s10716_s17 + $0x114c] ss:$16 sps:$4 sm:$0xff]   ;;  %v9950_v4 = vld [vmem:[%s10716_s17 + $0x1140] ss:$16 sps:$4 sm:$0xff]  }
 0x1fe   : > { %6812 = vmatpush1.bf16.msra.mxu0 %v9858_v5  ;;  %7468 = vmatpush1.bf16.msra.mxu1 %v9861_v6  ;;  %v9953_v5 = vld [vmem:[%s10716_s17 + $0x1148] ss:$16 sps:$4 sm:$0xff]   ;;  %v9958_v6 = vld [vmem:[%s10716_s17 + $0x1164] ss:$16 sps:$4 sm:$0xff]  }
 0x1ff   : > { %6813 = vmatprep.subr.bf16.mxu0 %v9866_v7  ;;  %7469 = vmatprep.subr.bf16.mxu1 %v9869_v8  ;;  %v9961_v7 = vld [vmem:[%s10716_s17 + $0x116c] ss:$16 sps:$4 sm:$0xff]   ;;  %v9956_v8 = vld [vmem:[%s10716_s17 + $0x1160] ss:$16 sps:$4 sm:$0xff]  }
 0x202   : > { %6814 = vmatpush1.bf16.msra.mxu0 %v9864_v9  ;;  %7470 = vmatpush1.bf16.msra.mxu1 %v9867_v10  ;;  %v9959_v9 = vld [vmem:[%s10716_s17 + $0x1168] ss:$16 sps:$4 sm:$0xff]   ;;  %v9964_v10 = vld [vmem:[%s10716_s17 + $0x1184] ss:$16 sps:$4 sm:$0xff]  }
 0x203   : > { %6815 = vmatprep.subr.bf16.mxu0 %v9872_v12  ;;  %7471 = vmatprep.subr.bf16.mxu1 %v9875_v13  ;;  %v9967_v12 = vld [vmem:[%s10716_s17 + $0x118c] ss:$16 sps:$4 sm:$0xff]   ;;  %v9962_v13 = vld [vmem:[%s10716_s17 + $0x1180] ss:$16 sps:$4 sm:$0xff]  }
 0x206   : > { %6816 = vmatpush1.bf16.msra.mxu0 %v9870_v15  ;;  %7472 = vmatpush1.bf16.msra.mxu1 %v9873_v16  ;;  %v9965_v15 = vld [vmem:[%s10716_s17 + $0x1188] ss:$16 sps:$4 sm:$0xff]   ;;  %v9970_v16 = vld [vmem:[%s10716_s17 + $0x11a4] ss:$16 sps:$4 sm:$0xff]  }
 0x207   : > { %6817 = vmatprep.subr.bf16.mxu0 %v9878_v11  ;;  %7473 = vmatprep.subr.bf16.mxu1 %v9881_v19  ;;  %v9973_v11 = vld [vmem:[%s10716_s17 + $0x11ac] ss:$16 sps:$4 sm:$0xff]   ;;  %v9968_v19 = vld [vmem:[%s10716_s17 + $0x11a0] ss:$16 sps:$4 sm:$0xff]  }
 0x20a   : > { %6818 = vmatpush1.bf16.msra.mxu0 %v9876_v20  ;;  %7474 = vmatpush1.bf16.msra.mxu1 %v9879_v14  ;;  %v9971_v20 = vld [vmem:[%s10716_s17 + $0x11a8] ss:$16 sps:$4 sm:$0xff]   ;;  %v9976_v14 = vld [vmem:[%s10716_s17 + $0x11c4] ss:$16 sps:$4 sm:$0xff]  }
 0x20b   : > { %6819 = vmatprep.subr.bf16.mxu0 %v9884_v22  ;;  %7475 = vmatprep.subr.bf16.mxu1 %v9887_v23  ;;  %v9979_v22 = vld [vmem:[%s10716_s17 + $0x11cc] ss:$16 sps:$4 sm:$0xff]   ;;  %v9974_v23 = vld [vmem:[%s10716_s17 + $0x11c0] ss:$16 sps:$4 sm:$0xff]  }
 0x20e   : > { %6820 = vmatpush1.bf16.msra.mxu0 %v9882_v17  ;;  %7476 = vmatpush1.bf16.msra.mxu1 %v9885_v25  ;;  %v9977_v17 = vld [vmem:[%s10716_s17 + $0x11c8] ss:$16 sps:$4 sm:$0xff]   ;;  %v9982_v25 = vld [vmem:[%s10716_s17 + $0x11e4] ss:$16 sps:$4 sm:$0xff]  }
 0x20f   : > { %6830 = vmatprep.subr.bf16.mxu0 %v9892_v26  ;;  %7486 = vmatprep.subr.bf16.mxu1 %v9895_v18  ;;  %v9985_v26 = vld [vmem:[%s10716_s17 + $0x11ec] ss:$16 sps:$4 sm:$0xff]   ;;  %v9980_v18 = vld [vmem:[%s10716_s17 + $0x11e0] ss:$16 sps:$4 sm:$0xff]  }
 0x211   : > { %6822 = vmatmul.mubr.bf16.vlgmr.msra.gmra.mrb[0].mxu0 %v7927_v28  ;;  %7478 = vmatmul.mubr.bf16.vlgmr.msra.gmra.mrb[0].mxu1 %v7927_v28  ;;  %v9983_v28 = vld [vmem:[%s10716_s17 + $0x11e8] ss:$16 sps:$4 sm:$0xff]  }
 0x212   : > { %6831 = vmatpush1.bf16.msra.mxu0 %v9890_v29  ;;  %7487 = vmatpush1.bf16.msra.mxu1 %v9893_v21  ;;  %v9990_v29 = vld [vmem:[%s10716_s17 + $0x1204] ss:$16 sps:$4 sm:$0xff]   ;;  %v9993_v21 = vld [vmem:[%s10716_s17 + $0x120c] ss:$16 sps:$4 sm:$0xff]  }
 0x213   : > { %6832 = vmatprep.subr.bf16.mxu0 %v9898_v30  ;;  %7488 = vmatprep.subr.bf16.mxu1 %v9901_v31  ;;  %v11358_v30 = vld [vmem:[%s10766_s21 + $0x48] sm:$0xff]  ;;  %v7929_v31 = vcombine.low %v11287_v27, %v11287_v27  ;;  %v9994_v27 = vld [vmem:[%s10716_s17 + $0x1220] ss:$16 sps:$4 sm:$0xff]  }
 0x214   : > { %6862 = vmatprep.mubr.bf16.mxu0 %v7930_v32  ;;  %7518 = vmatprep.mubr.bf16.mxu1 %v7930_v32  ;;  %v9988_v32 = vld [vmem:[%s10716_s17 + $0x1200] ss:$16 sps:$4 sm:$0xff]  }
 0x216   : > { %6833 = vmatpush1.bf16.msra.mxu0 %v9896_v24  ;;  %7489 = vmatpush1.bf16.msra.mxu1 %v9899_v33  ;;  %v9991_v24 = vld [vmem:[%s10716_s17 + $0x1208] ss:$16 sps:$4 sm:$0xff]   ;;  %v9996_v33 = vld [vmem:[%s10716_s17 + $0x1224] ss:$16 sps:$4 sm:$0xff]  }
 0x217   : > { %6834 = vmatprep.subr.bf16.mxu0 %v9904_v34  ;;  %7490 = vmatprep.subr.bf16.mxu1 %v9907_v35  ;;  %v9999_v34 = vld [vmem:[%s10716_s17 + $0x122c] ss:$16 sps:$4 sm:$0xff]   ;;  %v7932_v35 = vcombine.high %v11358_v30, %v11358_v30 }
 0x21a   : > { %6835 = vmatpush1.bf16.msra.mxu0 %v9902_v36  ;;  %7491 = vmatpush1.bf16.msra.mxu1 %v9905_v37  ;;  %v9997_v36 = vld [vmem:[%s10716_s17 + $0x1228] ss:$16 sps:$4 sm:$0xff]   ;;  %v10002_v37 = vld [vmem:[%s10716_s17 + $0x1244] ss:$16 sps:$4 sm:$0xff]  }
 0x21b   : > { %6836 = vmatprep.subr.bf16.mxu0 %v9910_v38  ;;  %7492 = vmatprep.subr.bf16.mxu1 %v9913_v39  ;;  %v10005_v38 = vld [vmem:[%s10716_s17 + $0x124c] ss:$16 sps:$4 sm:$0xff]   ;;  %v10000_v39 = vld [vmem:[%s10716_s17 + $0x1240] ss:$16 sps:$4 sm:$0xff]  }
 0x21e   : > { %6837 = vmatpush1.bf16.msra.mxu0 %v9908_v40  ;;  %7493 = vmatpush1.bf16.msra.mxu1 %v9911_v41  ;;  %v10003_v40 = vld [vmem:[%s10716_s17 + $0x1248] ss:$16 sps:$4 sm:$0xff]   ;;  %v10008_v41 = vld [vmem:[%s10716_s17 + $0x1264] ss:$16 sps:$4 sm:$0xff]  }
 0x21f   : > { %6838 = vmatprep.subr.bf16.mxu0 %v9916_v42  ;;  %7494 = vmatprep.subr.bf16.mxu1 %v9919_v43  ;;  %v10011_v42 = vld [vmem:[%s10716_s17 + $0x126c] ss:$16 sps:$4 sm:$0xff]   ;;  %v10006_v43 = vld [vmem:[%s10716_s17 + $0x1260] ss:$16 sps:$4 sm:$0xff]  }
 0x222   : > { %6839 = vmatpush1.bf16.msra.mxu0 %v9914_v44  ;;  %7495 = vmatpush1.bf16.msra.mxu1 %v9917_v45  ;;  %v10009_v44 = vld [vmem:[%s10716_s17 + $0x1268] ss:$16 sps:$4 sm:$0xff]   ;;  %v10014_v45 = vld [vmem:[%s10716_s17 + $0x1284] ss:$16 sps:$4 sm:$0xff]  }
 0x223   : > { %6840 = vmatprep.subr.bf16.mxu0 %v9922_v46  ;;  %7496 = vmatprep.subr.bf16.mxu1 %v9925_v47  ;;  %v10017_v46 = vld [vmem:[%s10716_s17 + $0x128c] ss:$16 sps:$4 sm:$0xff]   ;;  %v10012_v47 = vld [vmem:[%s10716_s17 + $0x1280] ss:$16 sps:$4 sm:$0xff]  }
 0x226   : > { %6841 = vmatpush1.bf16.msra.mxu0 %v9920_v48  ;;  %7497 = vmatpush1.bf16.msra.mxu1 %v9923_v49  ;;  %v10015_v48 = vld [vmem:[%s10716_s17 + $0x1288] ss:$16 sps:$4 sm:$0xff]   ;;  %v10020_v49 = vld [vmem:[%s10716_s17 + $0x12a4] ss:$16 sps:$4 sm:$0xff]  }
 0x227   : > { %6842 = vmatprep.subr.bf16.mxu0 %v9928_v50  ;;  %7498 = vmatprep.subr.bf16.mxu1 %v9931_v51  ;;  %v10023_v50 = vld [vmem:[%s10716_s17 + $0x12ac] ss:$16 sps:$4 sm:$0xff]   ;;  %v10018_v51 = vld [vmem:[%s10716_s17 + $0x12a0] ss:$16 sps:$4 sm:$0xff]  }
 0x22a   : > { %6843 = vmatpush1.bf16.msra.mxu0 %v9926_v52  ;;  %7499 = vmatpush1.bf16.msra.mxu1 %v9929_v53  ;;  %v10021_v52 = vld [vmem:[%s10716_s17 + $0x12a8] ss:$16 sps:$4 sm:$0xff]   ;;  %v10026_v53 = vld [vmem:[%s10716_s17 + $0x12c4] ss:$16 sps:$4 sm:$0xff]  }
 0x22b   : > { %6844 = vmatprep.subr.bf16.mxu0 %v9934_v54  ;;  %7500 = vmatprep.subr.bf16.mxu1 %v9937_v55  ;;  %v10029_v54 = vld [vmem:[%s10716_s17 + $0x12cc] ss:$16 sps:$4 sm:$0xff]   ;;  %v10024_v55 = vld [vmem:[%s10716_s17 + $0x12c0] ss:$16 sps:$4 sm:$0xff]  }
 0x22e   : > { %6845 = vmatpush1.bf16.msra.mxu0 %v9932_v56  ;;  %7501 = vmatpush1.bf16.msra.mxu1 %v9935_v57  ;;  %v10027_v56 = vld [vmem:[%s10716_s17 + $0x12c8] ss:$16 sps:$4 sm:$0xff]   ;;  %v10032_v57 = vld [vmem:[%s10716_s17 + $0x12e4] ss:$16 sps:$4 sm:$0xff]  }
 0x22f   : > { %6846 = vmatprep.subr.bf16.mxu0 %v9940_v58  ;;  %7502 = vmatprep.subr.bf16.mxu1 %v9943_v59  ;;  %v10035_v58 = vld [vmem:[%s10716_s17 + $0x12ec] ss:$16 sps:$4 sm:$0xff]   ;;  %v10030_v59 = vld [vmem:[%s10716_s17 + $0x12e0] ss:$16 sps:$4 sm:$0xff]  }
 0x232   : > { %6847 = vmatpush1.bf16.msra.mxu0 %v9938_v60  ;;  %7503 = vmatpush1.bf16.msra.mxu1 %v9941_v61  ;;  %v10033_v60 = vld [vmem:[%s10716_s17 + $0x12e8] ss:$16 sps:$4 sm:$0xff]   ;;  %v10038_v61 = vld [vmem:[%s10716_s17 + $0x1304] ss:$16 sps:$4 sm:$0xff]  }
 0x233   : > { %6848 = vmatprep.subr.bf16.mxu0 %v9946_v62  ;;  %7504 = vmatprep.subr.bf16.mxu1 %v9949_v63  ;;  %v10041_v62 = vld [vmem:[%s10716_s17 + $0x130c] ss:$16 sps:$4 sm:$0xff]   ;;  %v10036_v63 = vld [vmem:[%s10716_s17 + $0x1300] ss:$16 sps:$4 sm:$0xff]  }
 0x236   : > { %6849 = vmatpush1.bf16.msra.mxu0 %v9944_v0  ;;  %7505 = vmatpush1.bf16.msra.mxu1 %v9947_v1  ;;  %v10039_v0 = vld [vmem:[%s10716_s17 + $0x1308] ss:$16 sps:$4 sm:$0xff]   ;;  %v10044_v1 = vld [vmem:[%s10716_s17 + $0x1324] ss:$16 sps:$4 sm:$0xff]  }
 0x237   : > { %6850 = vmatprep.subr.bf16.mxu0 %v9952_v2  ;;  %7506 = vmatprep.subr.bf16.mxu1 %v9955_v3  ;;  %v10047_v2 = vld [vmem:[%s10716_s17 + $0x132c] ss:$16 sps:$4 sm:$0xff]   ;;  %v10042_v3 = vld [vmem:[%s10716_s17 + $0x1320] ss:$16 sps:$4 sm:$0xff]  }
 0x23a   : > { %6851 = vmatpush1.bf16.msra.mxu0 %v9950_v4  ;;  %7507 = vmatpush1.bf16.msra.mxu1 %v9953_v5  ;;  %v10045_v4 = vld [vmem:[%s10716_s17 + $0x1328] ss:$16 sps:$4 sm:$0xff]   ;;  %v10050_v5 = vld [vmem:[%s10716_s17 + $0x1344] ss:$16 sps:$4 sm:$0xff]  }
 0x23b   : > { %6852 = vmatprep.subr.bf16.mxu0 %v9958_v6  ;;  %7508 = vmatprep.subr.bf16.mxu1 %v9961_v7  ;;  %v10053_v6 = vld [vmem:[%s10716_s17 + $0x134c] ss:$16 sps:$4 sm:$0xff]   ;;  %v10048_v7 = vld [vmem:[%s10716_s17 + $0x1340] ss:$16 sps:$4 sm:$0xff]  }
 0x23e   : > { %6853 = vmatpush1.bf16.msra.mxu0 %v9956_v8  ;;  %7509 = vmatpush1.bf16.msra.mxu1 %v9959_v9  ;;  %v10051_v8 = vld [vmem:[%s10716_s17 + $0x1348] ss:$16 sps:$4 sm:$0xff]   ;;  %v10056_v9 = vld [vmem:[%s10716_s17 + $0x1364] ss:$16 sps:$4 sm:$0xff]  }
 0x23f   : > { %6854 = vmatprep.subr.bf16.mxu0 %v9964_v10  ;;  %7510 = vmatprep.subr.bf16.mxu1 %v9967_v12  ;;  %v10059_v10 = vld [vmem:[%s10716_s17 + $0x136c] ss:$16 sps:$4 sm:$0xff]   ;;  %v10054_v12 = vld [vmem:[%s10716_s17 + $0x1360] ss:$16 sps:$4 sm:$0xff]  }
 0x242   : > { %6855 = vmatpush1.bf16.msra.mxu0 %v9962_v13  ;;  %7511 = vmatpush1.bf16.msra.mxu1 %v9965_v15  ;;  %v10057_v13 = vld [vmem:[%s10716_s17 + $0x1368] ss:$16 sps:$4 sm:$0xff]   ;;  %v10062_v15 = vld [vmem:[%s10716_s17 + $0x1384] ss:$16 sps:$4 sm:$0xff]  }
 0x243   : > { %6856 = vmatprep.subr.bf16.mxu0 %v9970_v16  ;;  %7512 = vmatprep.subr.bf16.mxu1 %v9973_v11  ;;  %v10065_v16 = vld [vmem:[%s10716_s17 + $0x138c] ss:$16 sps:$4 sm:$0xff]   ;;  %v10060_v11 = vld [vmem:[%s10716_s17 + $0x1380] ss:$16 sps:$4 sm:$0xff]  }
 0x246   : > { %6857 = vmatpush1.bf16.msra.mxu0 %v9968_v19  ;;  %7513 = vmatpush1.bf16.msra.mxu1 %v9971_v20  ;;  %v10063_v19 = vld [vmem:[%s10716_s17 + $0x1388] ss:$16 sps:$4 sm:$0xff]   ;;  %v10068_v20 = vld [vmem:[%s10716_s17 + $0x13a4] ss:$16 sps:$4 sm:$0xff]  }
 0x247   : > { %6858 = vmatprep.subr.bf16.mxu0 %v9976_v14  ;;  %7514 = vmatprep.subr.bf16.mxu1 %v9979_v22  ;;  %v10071_v14 = vld [vmem:[%s10716_s17 + $0x13ac] ss:$16 sps:$4 sm:$0xff]   ;;  %v10066_v22 = vld [vmem:[%s10716_s17 + $0x13a0] ss:$16 sps:$4 sm:$0xff]  }
 0x24a   : > { %6859 = vmatpush1.bf16.msra.mxu0 %v9974_v23  ;;  %7515 = vmatpush1.bf16.msra.mxu1 %v9977_v17  ;;  %v10069_v23 = vld [vmem:[%s10716_s17 + $0x13a8] ss:$16 sps:$4 sm:$0xff]   ;;  %v10074_v17 = vld [vmem:[%s10716_s17 + $0x13c4] ss:$16 sps:$4 sm:$0xff]  }
 0x24b   : > { %6860 = vmatprep.subr.bf16.mxu0 %v9982_v25  ;;  %7516 = vmatprep.subr.bf16.mxu1 %v9985_v26  ;;  %v10077_v25 = vld [vmem:[%s10716_s17 + $0x13cc] ss:$16 sps:$4 sm:$0xff]   ;;  %v10072_v26 = vld [vmem:[%s10716_s17 + $0x13c0] ss:$16 sps:$4 sm:$0xff]  }
 0x24e   : > { %6861 = vmatpush1.bf16.msra.mxu0 %v9980_v18  ;;  %7517 = vmatpush1.bf16.msra.mxu1 %v9983_v28  ;;  %v10075_v18 = vld [vmem:[%s10716_s17 + $0x13c8] ss:$16 sps:$4 sm:$0xff]   ;;  %v10080_v28 = vld [vmem:[%s10716_s17 + $0x13e4] ss:$16 sps:$4 sm:$0xff]  }
 0x24f   : > { %6871 = vmatprep.subr.bf16.mxu0 %v9990_v29  ;;  %7527 = vmatprep.subr.bf16.mxu1 %v9993_v21  ;;  %v10083_v29 = vld [vmem:[%s10716_s17 + $0x13ec] ss:$16 sps:$4 sm:$0xff]   ;;  %v10078_v21 = vld [vmem:[%s10716_s17 + $0x13e0] ss:$16 sps:$4 sm:$0xff]  }
 0x251   : > { %6863 = vmatmul.mubr.bf16.vlgmr.msra.gmra.mrb[0].mxu0 %v7929_v31  ;;  %7519 = vmatmul.mubr.bf16.vlgmr.msra.gmra.mrb[0].mxu1 %v7929_v31  ;;  %v10081_v31 = vld [vmem:[%s10716_s17 + $0x13e8] ss:$16 sps:$4 sm:$0xff]  }
 0x252   : > { %6872 = vmatpush1.bf16.msra.mxu0 %v9988_v32  ;;  %7528 = vmatpush1.bf16.msra.mxu1 %v9991_v24  ;;  %v10088_v32 = vld [vmem:[%s10716_s17 + $0x1404] ss:$16 sps:$4 sm:$0xff]   ;;  %v10091_v24 = vld [vmem:[%s10716_s17 + $0x140c] ss:$16 sps:$4 sm:$0xff]  }
 0x253   : > { %6873 = vmatprep.subr.bf16.mxu0 %v9996_v33  ;;  %7529 = vmatprep.subr.bf16.mxu1 %v9999_v34  ;;  %v7931_v33 = vcombine.low %v11358_v30, %v11358_v30  ;;  %v11431_v34 = vld [vmem:[%s10766_s21 + $0x50] sm:$0xff] }
 0x254   : > { %6903 = vmatprep.mubr.bf16.mxu0 %v7932_v35  ;;  %7559 = vmatprep.mubr.bf16.mxu1 %v7932_v35  ;;  %v10086_v35 = vld [vmem:[%s10716_s17 + $0x1400] ss:$16 sps:$4 sm:$0xff]  }
 0x255   : > { %v10092_v30 = vld [vmem:[%s10716_s17 + $0x1420] ss:$16 sps:$4 sm:$0xff]  }
 0x256   : > { %6874 = vmatpush1.bf16.msra.mxu0 %v9994_v27  ;;  %7530 = vmatpush1.bf16.msra.mxu1 %v9997_v36  ;;  %v10089_v27 = vld [vmem:[%s10716_s17 + $0x1408] ss:$16 sps:$4 sm:$0xff]   ;;  %v10094_v36 = vld [vmem:[%s10716_s17 + $0x1424] ss:$16 sps:$4 sm:$0xff]  }
 0x257   : > { %6875 = vmatprep.subr.bf16.mxu0 %v10002_v37  ;;  %7531 = vmatprep.subr.bf16.mxu1 %v10005_v38  ;;  %v10097_v37 = vld [vmem:[%s10716_s17 + $0x142c] ss:$16 sps:$4 sm:$0xff]   ;;  %v7934_v38 = vcombine.high %v11431_v34, %v11431_v34 }
 0x25a   : > { %6876 = vmatpush1.bf16.msra.mxu0 %v10000_v39  ;;  %7532 = vmatpush1.bf16.msra.mxu1 %v10003_v40  ;;  %v10095_v39 = vld [vmem:[%s10716_s17 + $0x1428] ss:$16 sps:$4 sm:$0xff]   ;;  %v10100_v40 = vld [vmem:[%s10716_s17 + $0x1444] ss:$16 sps:$4 sm:$0xff]  }
 0x25b   : > { %6877 = vmatprep.subr.bf16.mxu0 %v10008_v41  ;;  %7533 = vmatprep.subr.bf16.mxu1 %v10011_v42  ;;  %v10103_v41 = vld [vmem:[%s10716_s17 + $0x144c] ss:$16 sps:$4 sm:$0xff]   ;;  %v10098_v42 = vld [vmem:[%s10716_s17 + $0x1440] ss:$16 sps:$4 sm:$0xff]  }
 0x25e   : > { %6878 = vmatpush1.bf16.msra.mxu0 %v10006_v43  ;;  %7534 = vmatpush1.bf16.msra.mxu1 %v10009_v44  ;;  %v10101_v43 = vld [vmem:[%s10716_s17 + $0x1448] ss:$16 sps:$4 sm:$0xff]   ;;  %v10106_v44 = vld [vmem:[%s10716_s17 + $0x1464] ss:$16 sps:$4 sm:$0xff]  }
 0x25f   : > { %6879 = vmatprep.subr.bf16.mxu0 %v10014_v45  ;;  %7535 = vmatprep.subr.bf16.mxu1 %v10017_v46  ;;  %v10109_v45 = vld [vmem:[%s10716_s17 + $0x146c] ss:$16 sps:$4 sm:$0xff]   ;;  %v10104_v46 = vld [vmem:[%s10716_s17 + $0x1460] ss:$16 sps:$4 sm:$0xff]  }
 0x262   : > { %6880 = vmatpush1.bf16.msra.mxu0 %v10012_v47  ;;  %7536 = vmatpush1.bf16.msra.mxu1 %v10015_v48  ;;  %v10107_v47 = vld [vmem:[%s10716_s17 + $0x1468] ss:$16 sps:$4 sm:$0xff]   ;;  %v10112_v48 = vld [vmem:[%s10716_s17 + $0x1484] ss:$16 sps:$4 sm:$0xff]  }
 0x263   : > { %6881 = vmatprep.subr.bf16.mxu0 %v10020_v49  ;;  %7537 = vmatprep.subr.bf16.mxu1 %v10023_v50  ;;  %v10115_v49 = vld [vmem:[%s10716_s17 + $0x148c] ss:$16 sps:$4 sm:$0xff]   ;;  %v10110_v50 = vld [vmem:[%s10716_s17 + $0x1480] ss:$16 sps:$4 sm:$0xff]  }
 0x266   : > { %6882 = vmatpush1.bf16.msra.mxu0 %v10018_v51  ;;  %7538 = vmatpush1.bf16.msra.mxu1 %v10021_v52  ;;  %v10113_v51 = vld [vmem:[%s10716_s17 + $0x1488] ss:$16 sps:$4 sm:$0xff]   ;;  %v10118_v52 = vld [vmem:[%s10716_s17 + $0x14a4] ss:$16 sps:$4 sm:$0xff]  }
 0x267   : > { %6883 = vmatprep.subr.bf16.mxu0 %v10026_v53  ;;  %7539 = vmatprep.subr.bf16.mxu1 %v10029_v54  ;;  %v10121_v53 = vld [vmem:[%s10716_s17 + $0x14ac] ss:$16 sps:$4 sm:$0xff]   ;;  %v10116_v54 = vld [vmem:[%s10716_s17 + $0x14a0] ss:$16 sps:$4 sm:$0xff]  }
 0x26a   : > { %6884 = vmatpush1.bf16.msra.mxu0 %v10024_v55  ;;  %7540 = vmatpush1.bf16.msra.mxu1 %v10027_v56  ;;  %v10119_v55 = vld [vmem:[%s10716_s17 + $0x14a8] ss:$16 sps:$4 sm:$0xff]   ;;  %v10124_v56 = vld [vmem:[%s10716_s17 + $0x14c4] ss:$16 sps:$4 sm:$0xff]  }
 0x26b   : > { %6885 = vmatprep.subr.bf16.mxu0 %v10032_v57  ;;  %7541 = vmatprep.subr.bf16.mxu1 %v10035_v58  ;;  %v10127_v57 = vld [vmem:[%s10716_s17 + $0x14cc] ss:$16 sps:$4 sm:$0xff]   ;;  %v10122_v58 = vld [vmem:[%s10716_s17 + $0x14c0] ss:$16 sps:$4 sm:$0xff]  }
 0x26e   : > { %6886 = vmatpush1.bf16.msra.mxu0 %v10030_v59  ;;  %7542 = vmatpush1.bf16.msra.mxu1 %v10033_v60  ;;  %v10125_v59 = vld [vmem:[%s10716_s17 + $0x14c8] ss:$16 sps:$4 sm:$0xff]   ;;  %v10130_v60 = vld [vmem:[%s10716_s17 + $0x14e4] ss:$16 sps:$4 sm:$0xff]  }
 0x26f   : > { %6887 = vmatprep.subr.bf16.mxu0 %v10038_v61  ;;  %7543 = vmatprep.subr.bf16.mxu1 %v10041_v62  ;;  %v10133_v61 = vld [vmem:[%s10716_s17 + $0x14ec] ss:$16 sps:$4 sm:$0xff]   ;;  %v10128_v62 = vld [vmem:[%s10716_s17 + $0x14e0] ss:$16 sps:$4 sm:$0xff]  }
 0x272   : > { %6888 = vmatpush1.bf16.msra.mxu0 %v10036_v63  ;;  %7544 = vmatpush1.bf16.msra.mxu1 %v10039_v0  ;;  %v10131_v63 = vld [vmem:[%s10716_s17 + $0x14e8] ss:$16 sps:$4 sm:$0xff]   ;;  %v10136_v0 = vld [vmem:[%s10716_s17 + $0x1504] ss:$16 sps:$4 sm:$0xff]  }
 0x273   : > { %6889 = vmatprep.subr.bf16.mxu0 %v10044_v1  ;;  %7545 = vmatprep.subr.bf16.mxu1 %v10047_v2  ;;  %v10139_v1 = vld [vmem:[%s10716_s17 + $0x150c] ss:$16 sps:$4 sm:$0xff]   ;;  %v10134_v2 = vld [vmem:[%s10716_s17 + $0x1500] ss:$16 sps:$4 sm:$0xff]  }
 0x276   : > { %6890 = vmatpush1.bf16.msra.mxu0 %v10042_v3  ;;  %7546 = vmatpush1.bf16.msra.mxu1 %v10045_v4  ;;  %v10137_v3 = vld [vmem:[%s10716_s17 + $0x1508] ss:$16 sps:$4 sm:$0xff]   ;;  %v10142_v4 = vld [vmem:[%s10716_s17 + $0x1524] ss:$16 sps:$4 sm:$0xff]  }
 0x277   : > { %6891 = vmatprep.subr.bf16.mxu0 %v10050_v5  ;;  %7547 = vmatprep.subr.bf16.mxu1 %v10053_v6  ;;  %v10145_v5 = vld [vmem:[%s10716_s17 + $0x152c] ss:$16 sps:$4 sm:$0xff]   ;;  %v10140_v6 = vld [vmem:[%s10716_s17 + $0x1520] ss:$16 sps:$4 sm:$0xff]  }
 0x27a   : > { %6892 = vmatpush1.bf16.msra.mxu0 %v10048_v7  ;;  %7548 = vmatpush1.bf16.msra.mxu1 %v10051_v8  ;;  %v10143_v7 = vld [vmem:[%s10716_s17 + $0x1528] ss:$16 sps:$4 sm:$0xff]   ;;  %v10148_v8 = vld [vmem:[%s10716_s17 + $0x1544] ss:$16 sps:$4 sm:$0xff]  }
 0x27b   : > { %6893 = vmatprep.subr.bf16.mxu0 %v10056_v9  ;;  %7549 = vmatprep.subr.bf16.mxu1 %v10059_v10  ;;  %v10151_v9 = vld [vmem:[%s10716_s17 + $0x154c] ss:$16 sps:$4 sm:$0xff]   ;;  %v10146_v10 = vld [vmem:[%s10716_s17 + $0x1540] ss:$16 sps:$4 sm:$0xff]  }
 0x27e   : > { %6894 = vmatpush1.bf16.msra.mxu0 %v10054_v12  ;;  %7550 = vmatpush1.bf16.msra.mxu1 %v10057_v13  ;;  %v10149_v12 = vld [vmem:[%s10716_s17 + $0x1548] ss:$16 sps:$4 sm:$0xff]   ;;  %v10154_v13 = vld [vmem:[%s10716_s17 + $0x1564] ss:$16 sps:$4 sm:$0xff]  }
 0x27f   : > { %6895 = vmatprep.subr.bf16.mxu0 %v10062_v15  ;;  %7551 = vmatprep.subr.bf16.mxu1 %v10065_v16  ;;  %v10157_v15 = vld [vmem:[%s10716_s17 + $0x156c] ss:$16 sps:$4 sm:$0xff]   ;;  %v10152_v16 = vld [vmem:[%s10716_s17 + $0x1560] ss:$16 sps:$4 sm:$0xff]  }
 0x282   : > { %6896 = vmatpush1.bf16.msra.mxu0 %v10060_v11  ;;  %7552 = vmatpush1.bf16.msra.mxu1 %v10063_v19  ;;  %v10155_v11 = vld [vmem:[%s10716_s17 + $0x1568] ss:$16 sps:$4 sm:$0xff]   ;;  %v10160_v19 = vld [vmem:[%s10716_s17 + $0x1584] ss:$16 sps:$4 sm:$0xff]  }
 0x283   : > { %6897 = vmatprep.subr.bf16.mxu0 %v10068_v20  ;;  %7553 = vmatprep.subr.bf16.mxu1 %v10071_v14  ;;  %v10163_v20 = vld [vmem:[%s10716_s17 + $0x158c] ss:$16 sps:$4 sm:$0xff]   ;;  %v10158_v14 = vld [vmem:[%s10716_s17 + $0x1580] ss:$16 sps:$4 sm:$0xff]  }
 0x286   : > { %6898 = vmatpush1.bf16.msra.mxu0 %v10066_v22  ;;  %7554 = vmatpush1.bf16.msra.mxu1 %v10069_v23  ;;  %v10161_v22 = vld [vmem:[%s10716_s17 + $0x1588] ss:$16 sps:$4 sm:$0xff]   ;;  %v10166_v23 = vld [vmem:[%s10716_s17 + $0x15a4] ss:$16 sps:$4 sm:$0xff]  }
 0x287   : > { %6899 = vmatprep.subr.bf16.mxu0 %v10074_v17  ;;  %7555 = vmatprep.subr.bf16.mxu1 %v10077_v25  ;;  %v10169_v17 = vld [vmem:[%s10716_s17 + $0x15ac] ss:$16 sps:$4 sm:$0xff]   ;;  %v10164_v25 = vld [vmem:[%s10716_s17 + $0x15a0] ss:$16 sps:$4 sm:$0xff]  }
 0x28a   : > { %6900 = vmatpush1.bf16.msra.mxu0 %v10072_v26  ;;  %7556 = vmatpush1.bf16.msra.mxu1 %v10075_v18  ;;  %v10167_v26 = vld [vmem:[%s10716_s17 + $0x15a8] ss:$16 sps:$4 sm:$0xff]   ;;  %v10172_v18 = vld [vmem:[%s10716_s17 + $0x15c4] ss:$16 sps:$4 sm:$0xff]  }
 0x28b   : > { %6901 = vmatprep.subr.bf16.mxu0 %v10080_v28  ;;  %7557 = vmatprep.subr.bf16.mxu1 %v10083_v29  ;;  %v10175_v28 = vld [vmem:[%s10716_s17 + $0x15cc] ss:$16 sps:$4 sm:$0xff]   ;;  %v10170_v29 = vld [vmem:[%s10716_s17 + $0x15c0] ss:$16 sps:$4 sm:$0xff]  }
 0x28e   : > { %6902 = vmatpush1.bf16.msra.mxu0 %v10078_v21  ;;  %7558 = vmatpush1.bf16.msra.mxu1 %v10081_v31  ;;  %v10173_v21 = vld [vmem:[%s10716_s17 + $0x15c8] ss:$16 sps:$4 sm:$0xff]   ;;  %v10178_v31 = vld [vmem:[%s10716_s17 + $0x15e4] ss:$16 sps:$4 sm:$0xff]  }
 0x28f   : > { %6912 = vmatprep.subr.bf16.mxu0 %v10088_v32  ;;  %7568 = vmatprep.subr.bf16.mxu1 %v10091_v24  ;;  %v10181_v32 = vld [vmem:[%s10716_s17 + $0x15ec] ss:$16 sps:$4 sm:$0xff]   ;;  %v10176_v24 = vld [vmem:[%s10716_s17 + $0x15e0] ss:$16 sps:$4 sm:$0xff]  }
 0x291   : > { %6904 = vmatmul.mubr.bf16.vlgmr.msra.gmra.mrb[0].mxu0 %v7931_v33  ;;  %7560 = vmatmul.mubr.bf16.vlgmr.msra.gmra.mrb[0].mxu1 %v7931_v33  ;;  %v10179_v33 = vld [vmem:[%s10716_s17 + $0x15e8] ss:$16 sps:$4 sm:$0xff]  }
 0x292   : > { %6913 = vmatpush1.bf16.msra.mxu0 %v10086_v35  ;;  %7569 = vmatpush1.bf16.msra.mxu1 %v10089_v27  ;;  %v10186_v35 = vld [vmem:[%s10716_s17 + $0x1604] ss:$16 sps:$4 sm:$0xff]   ;;  %v10189_v27 = vld [vmem:[%s10716_s17 + $0x160c] ss:$16 sps:$4 sm:$0xff]  }
 0x293   : > { %6914 = vmatprep.subr.bf16.mxu0 %v10094_v36  ;;  %7570 = vmatprep.subr.bf16.mxu1 %v10097_v37  ;;  %v7933_v36 = vcombine.low %v11431_v34, %v11431_v34  ;;  %v11502_v37 = vld [vmem:[%s10766_s21 + $0x58] sm:$0xff]  ;;  %v10190_v34 = vld [vmem:[%s10716_s17 + $0x1620] ss:$16 sps:$4 sm:$0xff]  }
 0x294   : > { %6944 = vmatprep.mubr.bf16.mxu0 %v7934_v38  ;;  %7600 = vmatprep.mubr.bf16.mxu1 %v7934_v38  ;;  %v10184_v38 = vld [vmem:[%s10716_s17 + $0x1600] ss:$16 sps:$4 sm:$0xff]  }
 0x296   : > { %6915 = vmatpush1.bf16.msra.mxu0 %v10092_v30  ;;  %7571 = vmatpush1.bf16.msra.mxu1 %v10095_v39  ;;  %v10187_v30 = vld [vmem:[%s10716_s17 + $0x1608] ss:$16 sps:$4 sm:$0xff]   ;;  %v10192_v39 = vld [vmem:[%s10716_s17 + $0x1624] ss:$16 sps:$4 sm:$0xff]  }
 0x297   : > { %6916 = vmatprep.subr.bf16.mxu0 %v10100_v40  ;;  %7572 = vmatprep.subr.bf16.mxu1 %v10103_v41  ;;  %v10195_v40 = vld [vmem:[%s10716_s17 + $0x162c] ss:$16 sps:$4 sm:$0xff]   ;;  %v7936_v41 = vcombine.high %v11502_v37, %v11502_v37 }
 0x29a   : > { %6917 = vmatpush1.bf16.msra.mxu0 %v10098_v42  ;;  %7573 = vmatpush1.bf16.msra.mxu1 %v10101_v43  ;;  %v10193_v42 = vld [vmem:[%s10716_s17 + $0x1628] ss:$16 sps:$4 sm:$0xff]   ;;  %v10198_v43 = vld [vmem:[%s10716_s17 + $0x1644] ss:$16 sps:$4 sm:$0xff]  }
 0x29b   : > { %6918 = vmatprep.subr.bf16.mxu0 %v10106_v44  ;;  %7574 = vmatprep.subr.bf16.mxu1 %v10109_v45  ;;  %v10201_v44 = vld [vmem:[%s10716_s17 + $0x164c] ss:$16 sps:$4 sm:$0xff]   ;;  %v10196_v45 = vld [vmem:[%s10716_s17 + $0x1640] ss:$16 sps:$4 sm:$0xff]  }
 0x29e   : > { %6919 = vmatpush1.bf16.msra.mxu0 %v10104_v46  ;;  %7575 = vmatpush1.bf16.msra.mxu1 %v10107_v47  ;;  %v10199_v46 = vld [vmem:[%s10716_s17 + $0x1648] ss:$16 sps:$4 sm:$0xff]   ;;  %v10204_v47 = vld [vmem:[%s10716_s17 + $0x1664] ss:$16 sps:$4 sm:$0xff]  }
 0x29f   : > { %6920 = vmatprep.subr.bf16.mxu0 %v10112_v48  ;;  %7576 = vmatprep.subr.bf16.mxu1 %v10115_v49  ;;  %v10207_v48 = vld [vmem:[%s10716_s17 + $0x166c] ss:$16 sps:$4 sm:$0xff]   ;;  %v10202_v49 = vld [vmem:[%s10716_s17 + $0x1660] ss:$16 sps:$4 sm:$0xff]  }
 0x2a2   : > { %6921 = vmatpush1.bf16.msra.mxu0 %v10110_v50  ;;  %7577 = vmatpush1.bf16.msra.mxu1 %v10113_v51  ;;  %v10205_v50 = vld [vmem:[%s10716_s17 + $0x1668] ss:$16 sps:$4 sm:$0xff]   ;;  %v10210_v51 = vld [vmem:[%s10716_s17 + $0x1684] ss:$16 sps:$4 sm:$0xff]  }
 0x2a3   : > { %6922 = vmatprep.subr.bf16.mxu0 %v10118_v52  ;;  %7578 = vmatprep.subr.bf16.mxu1 %v10121_v53  ;;  %v10213_v52 = vld [vmem:[%s10716_s17 + $0x168c] ss:$16 sps:$4 sm:$0xff]   ;;  %v10208_v53 = vld [vmem:[%s10716_s17 + $0x1680] ss:$16 sps:$4 sm:$0xff]  }
 0x2a6   : > { %6923 = vmatpush1.bf16.msra.mxu0 %v10116_v54  ;;  %7579 = vmatpush1.bf16.msra.mxu1 %v10119_v55  ;;  %v10211_v54 = vld [vmem:[%s10716_s17 + $0x1688] ss:$16 sps:$4 sm:$0xff]   ;;  %v10216_v55 = vld [vmem:[%s10716_s17 + $0x16a4] ss:$16 sps:$4 sm:$0xff]  }
 0x2a7   : > { %6924 = vmatprep.subr.bf16.mxu0 %v10124_v56  ;;  %7580 = vmatprep.subr.bf16.mxu1 %v10127_v57  ;;  %v10219_v56 = vld [vmem:[%s10716_s17 + $0x16ac] ss:$16 sps:$4 sm:$0xff]   ;;  %v10214_v57 = vld [vmem:[%s10716_s17 + $0x16a0] ss:$16 sps:$4 sm:$0xff]  }
 0x2aa   : > { %6925 = vmatpush1.bf16.msra.mxu0 %v10122_v58  ;;  %7581 = vmatpush1.bf16.msra.mxu1 %v10125_v59  ;;  %v10217_v58 = vld [vmem:[%s10716_s17 + $0x16a8] ss:$16 sps:$4 sm:$0xff]   ;;  %v10222_v59 = vld [vmem:[%s10716_s17 + $0x16c4] ss:$16 sps:$4 sm:$0xff]  }
 0x2ab   : > { %6926 = vmatprep.subr.bf16.mxu0 %v10130_v60  ;;  %7582 = vmatprep.subr.bf16.mxu1 %v10133_v61  ;;  %v10225_v60 = vld [vmem:[%s10716_s17 + $0x16cc] ss:$16 sps:$4 sm:$0xff]   ;;  %v10220_v61 = vld [vmem:[%s10716_s17 + $0x16c0] ss:$16 sps:$4 sm:$0xff]  }
 0x2ae   : > { %6927 = vmatpush1.bf16.msra.mxu0 %v10128_v62  ;;  %7583 = vmatpush1.bf16.msra.mxu1 %v10131_v63  ;;  %v10223_v62 = vld [vmem:[%s10716_s17 + $0x16c8] ss:$16 sps:$4 sm:$0xff]   ;;  %v10228_v63 = vld [vmem:[%s10716_s17 + $0x16e4] ss:$16 sps:$4 sm:$0xff]  }
 0x2af   : > { %6928 = vmatprep.subr.bf16.mxu0 %v10136_v0  ;;  %7584 = vmatprep.subr.bf16.mxu1 %v10139_v1  ;;  %v10231_v0 = vld [vmem:[%s10716_s17 + $0x16ec] ss:$16 sps:$4 sm:$0xff]   ;;  %v10226_v1 = vld [vmem:[%s10716_s17 + $0x16e0] ss:$16 sps:$4 sm:$0xff]  }
 0x2b2   : > { %6929 = vmatpush1.bf16.msra.mxu0 %v10134_v2  ;;  %7585 = vmatpush1.bf16.msra.mxu1 %v10137_v3  ;;  %v10229_v2 = vld [vmem:[%s10716_s17 + $0x16e8] ss:$16 sps:$4 sm:$0xff]   ;;  %v10234_v3 = vld [vmem:[%s10716_s17 + $0x1704] ss:$16 sps:$4 sm:$0xff]  }
 0x2b3   : > { %6930 = vmatprep.subr.bf16.mxu0 %v10142_v4  ;;  %7586 = vmatprep.subr.bf16.mxu1 %v10145_v5  ;;  %v10237_v4 = vld [vmem:[%s10716_s17 + $0x170c] ss:$16 sps:$4 sm:$0xff]   ;;  %v10232_v5 = vld [vmem:[%s10716_s17 + $0x1700] ss:$16 sps:$4 sm:$0xff]  }
 0x2b6   : > { %6931 = vmatpush1.bf16.msra.mxu0 %v10140_v6  ;;  %7587 = vmatpush1.bf16.msra.mxu1 %v10143_v7  ;;  %v10235_v6 = vld [vmem:[%s10716_s17 + $0x1708] ss:$16 sps:$4 sm:$0xff]   ;;  %v10240_v7 = vld [vmem:[%s10716_s17 + $0x1724] ss:$16 sps:$4 sm:$0xff]  }
 0x2b7   : > { %6932 = vmatprep.subr.bf16.mxu0 %v10148_v8  ;;  %7588 = vmatprep.subr.bf16.mxu1 %v10151_v9  ;;  %v10243_v8 = vld [vmem:[%s10716_s17 + $0x172c] ss:$16 sps:$4 sm:$0xff]   ;;  %v10238_v9 = vld [vmem:[%s10716_s17 + $0x1720] ss:$16 sps:$4 sm:$0xff]  }
 0x2ba   : > { %6933 = vmatpush1.bf16.msra.mxu0 %v10146_v10  ;;  %7589 = vmatpush1.bf16.msra.mxu1 %v10149_v12  ;;  %v10241_v10 = vld [vmem:[%s10716_s17 + $0x1728] ss:$16 sps:$4 sm:$0xff]   ;;  %v10246_v12 = vld [vmem:[%s10716_s17 + $0x1744] ss:$16 sps:$4 sm:$0xff]  }
 0x2bb   : > { %6934 = vmatprep.subr.bf16.mxu0 %v10154_v13  ;;  %7590 = vmatprep.subr.bf16.mxu1 %v10157_v15  ;;  %v10249_v13 = vld [vmem:[%s10716_s17 + $0x174c] ss:$16 sps:$4 sm:$0xff]   ;;  %v10244_v15 = vld [vmem:[%s10716_s17 + $0x1740] ss:$16 sps:$4 sm:$0xff]  }
 0x2be   : > { %6935 = vmatpush1.bf16.msra.mxu0 %v10152_v16  ;;  %7591 = vmatpush1.bf16.msra.mxu1 %v10155_v11  ;;  %v10247_v16 = vld [vmem:[%s10716_s17 + $0x1748] ss:$16 sps:$4 sm:$0xff]   ;;  %v10252_v11 = vld [vmem:[%s10716_s17 + $0x1764] ss:$16 sps:$4 sm:$0xff]  }
 0x2bf   : > { %6936 = vmatprep.subr.bf16.mxu0 %v10160_v19  ;;  %7592 = vmatprep.subr.bf16.mxu1 %v10163_v20  ;;  %v10255_v19 = vld [vmem:[%s10716_s17 + $0x176c] ss:$16 sps:$4 sm:$0xff]   ;;  %v10250_v20 = vld [vmem:[%s10716_s17 + $0x1760] ss:$16 sps:$4 sm:$0xff]  }
 0x2c2   : > { %6937 = vmatpush1.bf16.msra.mxu0 %v10158_v14  ;;  %7593 = vmatpush1.bf16.msra.mxu1 %v10161_v22  ;;  %v10253_v14 = vld [vmem:[%s10716_s17 + $0x1768] ss:$16 sps:$4 sm:$0xff]   ;;  %v10258_v22 = vld [vmem:[%s10716_s17 + $0x1784] ss:$16 sps:$4 sm:$0xff]  }
 0x2c3   : > { %6938 = vmatprep.subr.bf16.mxu0 %v10166_v23  ;;  %7594 = vmatprep.subr.bf16.mxu1 %v10169_v17  ;;  %v10261_v23 = vld [vmem:[%s10716_s17 + $0x178c] ss:$16 sps:$4 sm:$0xff]   ;;  %v10256_v17 = vld [vmem:[%s10716_s17 + $0x1780] ss:$16 sps:$4 sm:$0xff]  }
 0x2c6   : > { %6939 = vmatpush1.bf16.msra.mxu0 %v10164_v25  ;;  %7595 = vmatpush1.bf16.msra.mxu1 %v10167_v26  ;;  %v10259_v25 = vld [vmem:[%s10716_s17 + $0x1788] ss:$16 sps:$4 sm:$0xff]   ;;  %v10264_v26 = vld [vmem:[%s10716_s17 + $0x17a4] ss:$16 sps:$4 sm:$0xff]  }
 0x2c7   : > { %6940 = vmatprep.subr.bf16.mxu0 %v10172_v18  ;;  %7596 = vmatprep.subr.bf16.mxu1 %v10175_v28  ;;  %v10267_v18 = vld [vmem:[%s10716_s17 + $0x17ac] ss:$16 sps:$4 sm:$0xff]   ;;  %v10262_v28 = vld [vmem:[%s10716_s17 + $0x17a0] ss:$16 sps:$4 sm:$0xff]  }
 0x2ca   : > { %6941 = vmatpush1.bf16.msra.mxu0 %v10170_v29  ;;  %7597 = vmatpush1.bf16.msra.mxu1 %v10173_v21  ;;  %v10265_v29 = vld [vmem:[%s10716_s17 + $0x17a8] ss:$16 sps:$4 sm:$0xff]   ;;  %v10270_v21 = vld [vmem:[%s10716_s17 + $0x17c4] ss:$16 sps:$4 sm:$0xff]  }
 0x2cb   : > { %6942 = vmatprep.subr.bf16.mxu0 %v10178_v31  ;;  %7598 = vmatprep.subr.bf16.mxu1 %v10181_v32  ;;  %v10273_v31 = vld [vmem:[%s10716_s17 + $0x17cc] ss:$16 sps:$4 sm:$0xff]   ;;  %v10268_v32 = vld [vmem:[%s10716_s17 + $0x17c0] ss:$16 sps:$4 sm:$0xff]  }
 0x2ce   : > { %6943 = vmatpush1.bf16.msra.mxu0 %v10176_v24  ;;  %7599 = vmatpush1.bf16.msra.mxu1 %v10179_v33  ;;  %v10271_v24 = vld [vmem:[%s10716_s17 + $0x17c8] ss:$16 sps:$4 sm:$0xff]   ;;  %v10276_v33 = vld [vmem:[%s10716_s17 + $0x17e4] ss:$16 sps:$4 sm:$0xff]  }
 0x2cf   : > { %6953 = vmatprep.subr.bf16.mxu0 %v10186_v35  ;;  %7609 = vmatprep.subr.bf16.mxu1 %v10189_v27  ;;  %v10279_v35 = vld [vmem:[%s10716_s17 + $0x17ec] ss:$16 sps:$4 sm:$0xff]   ;;  %v10274_v27 = vld [vmem:[%s10716_s17 + $0x17e0] ss:$16 sps:$4 sm:$0xff]  }
 0x2d1   : > { %6945 = vmatmul.mubr.bf16.vlgmr.msra.gmra.mrb[0].mxu0 %v7933_v36  ;;  %7601 = vmatmul.mubr.bf16.vlgmr.msra.gmra.mrb[0].mxu1 %v7933_v36  ;;  %v10277_v36 = vld [vmem:[%s10716_s17 + $0x17e8] ss:$16 sps:$4 sm:$0xff]  }
 0x2d2   : > { %6954 = vmatpush1.bf16.msra.mxu0 %v10184_v38  ;;  %7610 = vmatpush1.bf16.msra.mxu1 %v10187_v30  ;;  %v10284_v38 = vld [vmem:[%s10716_s17 + $0x1804] ss:$16 sps:$4 sm:$0xff]   ;;  %v10287_v30 = vld [vmem:[%s10716_s17 + $0x180c] ss:$16 sps:$4 sm:$0xff]  }
 0x2d3   : > { %6955 = vmatprep.subr.bf16.mxu0 %v10192_v39  ;;  %7611 = vmatprep.subr.bf16.mxu1 %v10195_v40  ;;  %v7935_v39 = vcombine.low %v11502_v37, %v11502_v37  ;;  %v11573_v40 = vld [vmem:[%s10766_s21 + $0x60] sm:$0xff] }
 0x2d4   : > { %6985 = vmatprep.mubr.bf16.mxu0 %v7936_v41  ;;  %7641 = vmatprep.mubr.bf16.mxu1 %v7936_v41  ;;  %v10282_v41 = vld [vmem:[%s10716_s17 + $0x1800] ss:$16 sps:$4 sm:$0xff]  }
 0x2d5   : > { %v10288_v37 = vld [vmem:[%s10716_s17 + $0x1820] ss:$16 sps:$4 sm:$0xff]  }
 0x2d6   : > { %6956 = vmatpush1.bf16.msra.mxu0 %v10190_v34  ;;  %7612 = vmatpush1.bf16.msra.mxu1 %v10193_v42  ;;  %v10285_v34 = vld [vmem:[%s10716_s17 + $0x1808] ss:$16 sps:$4 sm:$0xff]   ;;  %v10290_v42 = vld [vmem:[%s10716_s17 + $0x1824] ss:$16 sps:$4 sm:$0xff]  }
 0x2d7   : > { %6957 = vmatprep.subr.bf16.mxu0 %v10198_v43  ;;  %7613 = vmatprep.subr.bf16.mxu1 %v10201_v44  ;;  %v10293_v43 = vld [vmem:[%s10716_s17 + $0x182c] ss:$16 sps:$4 sm:$0xff]   ;;  %v7938_v44 = vcombine.high %v11573_v40, %v11573_v40 }
 0x2da   : > { %6958 = vmatpush1.bf16.msra.mxu0 %v10196_v45  ;;  %7614 = vmatpush1.bf16.msra.mxu1 %v10199_v46  ;;  %v10291_v45 = vld [vmem:[%s10716_s17 + $0x1828] ss:$16 sps:$4 sm:$0xff]   ;;  %v10296_v46 = vld [vmem:[%s10716_s17 + $0x1844] ss:$16 sps:$4 sm:$0xff]  }
 0x2db   : > { %6959 = vmatprep.subr.bf16.mxu0 %v10204_v47  ;;  %7615 = vmatprep.subr.bf16.mxu1 %v10207_v48  ;;  %v10299_v47 = vld [vmem:[%s10716_s17 + $0x184c] ss:$16 sps:$4 sm:$0xff]   ;;  %v10294_v48 = vld [vmem:[%s10716_s17 + $0x1840] ss:$16 sps:$4 sm:$0xff]  }
 0x2de   : > { %6960 = vmatpush1.bf16.msra.mxu0 %v10202_v49  ;;  %7616 = vmatpush1.bf16.msra.mxu1 %v10205_v50  ;;  %v10297_v49 = vld [vmem:[%s10716_s17 + $0x1848] ss:$16 sps:$4 sm:$0xff]   ;;  %v10302_v50 = vld [vmem:[%s10716_s17 + $0x1864] ss:$16 sps:$4 sm:$0xff]  }
 0x2df   : > { %6961 = vmatprep.subr.bf16.mxu0 %v10210_v51  ;;  %7617 = vmatprep.subr.bf16.mxu1 %v10213_v52  ;;  %v10305_v51 = vld [vmem:[%s10716_s17 + $0x186c] ss:$16 sps:$4 sm:$0xff]   ;;  %v10300_v52 = vld [vmem:[%s10716_s17 + $0x1860] ss:$16 sps:$4 sm:$0xff]  }
 0x2e2   : > { %6962 = vmatpush1.bf16.msra.mxu0 %v10208_v53  ;;  %7618 = vmatpush1.bf16.msra.mxu1 %v10211_v54  ;;  %v10303_v53 = vld [vmem:[%s10716_s17 + $0x1868] ss:$16 sps:$4 sm:$0xff]   ;;  %v10308_v54 = vld [vmem:[%s10716_s17 + $0x1884] ss:$16 sps:$4 sm:$0xff]  }
 0x2e3   : > { %6963 = vmatprep.subr.bf16.mxu0 %v10216_v55  ;;  %7619 = vmatprep.subr.bf16.mxu1 %v10219_v56  ;;  %v10311_v55 = vld [vmem:[%s10716_s17 + $0x188c] ss:$16 sps:$4 sm:$0xff]   ;;  %v10306_v56 = vld [vmem:[%s10716_s17 + $0x1880] ss:$16 sps:$4 sm:$0xff]  }
 0x2e6   : > { %6964 = vmatpush1.bf16.msra.mxu0 %v10214_v57  ;;  %7620 = vmatpush1.bf16.msra.mxu1 %v10217_v58  ;;  %v10309_v57 = vld [vmem:[%s10716_s17 + $0x1888] ss:$16 sps:$4 sm:$0xff]   ;;  %v10314_v58 = vld [vmem:[%s10716_s17 + $0x18a4] ss:$16 sps:$4 sm:$0xff]  }
 0x2e7   : > { %6965 = vmatprep.subr.bf16.mxu0 %v10222_v59  ;;  %7621 = vmatprep.subr.bf16.mxu1 %v10225_v60  ;;  %v10317_v59 = vld [vmem:[%s10716_s17 + $0x18ac] ss:$16 sps:$4 sm:$0xff]   ;;  %v10312_v60 = vld [vmem:[%s10716_s17 + $0x18a0] ss:$16 sps:$4 sm:$0xff]  }
 0x2ea   : > { %6966 = vmatpush1.bf16.msra.mxu0 %v10220_v61  ;;  %7622 = vmatpush1.bf16.msra.mxu1 %v10223_v62  ;;  %v10315_v61 = vld [vmem:[%s10716_s17 + $0x18a8] ss:$16 sps:$4 sm:$0xff]   ;;  %v10320_v62 = vld [vmem:[%s10716_s17 + $0x18c4] ss:$16 sps:$4 sm:$0xff]  }
 0x2eb   : > { %6967 = vmatprep.subr.bf16.mxu0 %v10228_v63  ;;  %7623 = vmatprep.subr.bf16.mxu1 %v10231_v0  ;;  %v10323_v63 = vld [vmem:[%s10716_s17 + $0x18cc] ss:$16 sps:$4 sm:$0xff]   ;;  %v10318_v0 = vld [vmem:[%s10716_s17 + $0x18c0] ss:$16 sps:$4 sm:$0xff]  }
 0x2ee   : > { %6968 = vmatpush1.bf16.msra.mxu0 %v10226_v1  ;;  %7624 = vmatpush1.bf16.msra.mxu1 %v10229_v2  ;;  %v10321_v1 = vld [vmem:[%s10716_s17 + $0x18c8] ss:$16 sps:$4 sm:$0xff]   ;;  %v10326_v2 = vld [vmem:[%s10716_s17 + $0x18e4] ss:$16 sps:$4 sm:$0xff]  }
 0x2ef   : > { %6969 = vmatprep.subr.bf16.mxu0 %v10234_v3  ;;  %7625 = vmatprep.subr.bf16.mxu1 %v10237_v4  ;;  %v10329_v3 = vld [vmem:[%s10716_s17 + $0x18ec] ss:$16 sps:$4 sm:$0xff]   ;;  %v10324_v4 = vld [vmem:[%s10716_s17 + $0x18e0] ss:$16 sps:$4 sm:$0xff]  }
 0x2f2   : > { %6970 = vmatpush1.bf16.msra.mxu0 %v10232_v5  ;;  %7626 = vmatpush1.bf16.msra.mxu1 %v10235_v6  ;;  %v10327_v5 = vld [vmem:[%s10716_s17 + $0x18e8] ss:$16 sps:$4 sm:$0xff]   ;;  %v10332_v6 = vld [vmem:[%s10716_s17 + $0x1904] ss:$16 sps:$4 sm:$0xff]  }
 0x2f3   : > { %6971 = vmatprep.subr.bf16.mxu0 %v10240_v7  ;;  %7627 = vmatprep.subr.bf16.mxu1 %v10243_v8  ;;  %v10335_v7 = vld [vmem:[%s10716_s17 + $0x190c] ss:$16 sps:$4 sm:$0xff]   ;;  %v10330_v8 = vld [vmem:[%s10716_s17 + $0x1900] ss:$16 sps:$4 sm:$0xff]  }
 0x2f6   : > { %6972 = vmatpush1.bf16.msra.mxu0 %v10238_v9  ;;  %7628 = vmatpush1.bf16.msra.mxu1 %v10241_v10  ;;  %v10333_v9 = vld [vmem:[%s10716_s17 + $0x1908] ss:$16 sps:$4 sm:$0xff]   ;;  %v10338_v10 = vld [vmem:[%s10716_s17 + $0x1924] ss:$16 sps:$4 sm:$0xff]  }
 0x2f7   : > { %6973 = vmatprep.subr.bf16.mxu0 %v10246_v12  ;;  %7629 = vmatprep.subr.bf16.mxu1 %v10249_v13  ;;  %v10341_v12 = vld [vmem:[%s10716_s17 + $0x192c] ss:$16 sps:$4 sm:$0xff]   ;;  %v10336_v13 = vld [vmem:[%s10716_s17 + $0x1920] ss:$16 sps:$4 sm:$0xff]  }
 0x2fa   : > { %6974 = vmatpush1.bf16.msra.mxu0 %v10244_v15  ;;  %7630 = vmatpush1.bf16.msra.mxu1 %v10247_v16  ;;  %v10339_v15 = vld [vmem:[%s10716_s17 + $0x1928] ss:$16 sps:$4 sm:$0xff]   ;;  %v10344_v16 = vld [vmem:[%s10716_s17 + $0x1944] ss:$16 sps:$4 sm:$0xff]  }
 0x2fb   : > { %6975 = vmatprep.subr.bf16.mxu0 %v10252_v11  ;;  %7631 = vmatprep.subr.bf16.mxu1 %v10255_v19  ;;  %v10347_v11 = vld [vmem:[%s10716_s17 + $0x194c] ss:$16 sps:$4 sm:$0xff]   ;;  %v10342_v19 = vld [vmem:[%s10716_s17 + $0x1940] ss:$16 sps:$4 sm:$0xff]  }
 0x2fe   : > { %6976 = vmatpush1.bf16.msra.mxu0 %v10250_v20  ;;  %7632 = vmatpush1.bf16.msra.mxu1 %v10253_v14  ;;  %v10345_v20 = vld [vmem:[%s10716_s17 + $0x1948] ss:$16 sps:$4 sm:$0xff]   ;;  %v10350_v14 = vld [vmem:[%s10716_s17 + $0x1964] ss:$16 sps:$4 sm:$0xff]  }
 0x2ff   : > { %6977 = vmatprep.subr.bf16.mxu0 %v10258_v22  ;;  %7633 = vmatprep.subr.bf16.mxu1 %v10261_v23  ;;  %v10353_v22 = vld [vmem:[%s10716_s17 + $0x196c] ss:$16 sps:$4 sm:$0xff]   ;;  %v10348_v23 = vld [vmem:[%s10716_s17 + $0x1960] ss:$16 sps:$4 sm:$0xff]  }
 0x302   : > { %6978 = vmatpush1.bf16.msra.mxu0 %v10256_v17  ;;  %7634 = vmatpush1.bf16.msra.mxu1 %v10259_v25  ;;  %v10351_v17 = vld [vmem:[%s10716_s17 + $0x1968] ss:$16 sps:$4 sm:$0xff]   ;;  %v10356_v25 = vld [vmem:[%s10716_s17 + $0x1984] ss:$16 sps:$4 sm:$0xff]  }
 0x303   : > { %6979 = vmatprep.subr.bf16.mxu0 %v10264_v26  ;;  %7635 = vmatprep.subr.bf16.mxu1 %v10267_v18  ;;  %v10359_v26 = vld [vmem:[%s10716_s17 + $0x198c] ss:$16 sps:$4 sm:$0xff]   ;;  %v10354_v18 = vld [vmem:[%s10716_s17 + $0x1980] ss:$16 sps:$4 sm:$0xff]  }
 0x306   : > { %6980 = vmatpush1.bf16.msra.mxu0 %v10262_v28  ;;  %7636 = vmatpush1.bf16.msra.mxu1 %v10265_v29  ;;  %v10357_v28 = vld [vmem:[%s10716_s17 + $0x1988] ss:$16 sps:$4 sm:$0xff]   ;;  %v10362_v29 = vld [vmem:[%s10716_s17 + $0x19a4] ss:$16 sps:$4 sm:$0xff]  }
 0x307   : > { %6981 = vmatprep.subr.bf16.mxu0 %v10270_v21  ;;  %7637 = vmatprep.subr.bf16.mxu1 %v10273_v31  ;;  %v10365_v21 = vld [vmem:[%s10716_s17 + $0x19ac] ss:$16 sps:$4 sm:$0xff]   ;;  %v10360_v31 = vld [vmem:[%s10716_s17 + $0x19a0] ss:$16 sps:$4 sm:$0xff]  }
 0x30a   : > { %6982 = vmatpush1.bf16.msra.mxu0 %v10268_v32  ;;  %7638 = vmatpush1.bf16.msra.mxu1 %v10271_v24  ;;  %v10363_v32 = vld [vmem:[%s10716_s17 + $0x19a8] ss:$16 sps:$4 sm:$0xff]   ;;  %v10368_v24 = vld [vmem:[%s10716_s17 + $0x19c4] ss:$16 sps:$4 sm:$0xff]  }
 0x30b   : > { %6983 = vmatprep.subr.bf16.mxu0 %v10276_v33  ;;  %7639 = vmatprep.subr.bf16.mxu1 %v10279_v35  ;;  %v10371_v33 = vld [vmem:[%s10716_s17 + $0x19cc] ss:$16 sps:$4 sm:$0xff]   ;;  %v10366_v35 = vld [vmem:[%s10716_s17 + $0x19c0] ss:$16 sps:$4 sm:$0xff]  }
 0x30e   : > { %6984 = vmatpush1.bf16.msra.mxu0 %v10274_v27  ;;  %7640 = vmatpush1.bf16.msra.mxu1 %v10277_v36  ;;  %v10369_v27 = vld [vmem:[%s10716_s17 + $0x19c8] ss:$16 sps:$4 sm:$0xff]   ;;  %v10374_v36 = vld [vmem:[%s10716_s17 + $0x19e4] ss:$16 sps:$4 sm:$0xff]  }
 0x30f   : > { %6994 = vmatprep.subr.bf16.mxu0 %v10284_v38  ;;  %7650 = vmatprep.subr.bf16.mxu1 %v10287_v30  ;;  %v10377_v38 = vld [vmem:[%s10716_s17 + $0x19ec] ss:$16 sps:$4 sm:$0xff]   ;;  %v10372_v30 = vld [vmem:[%s10716_s17 + $0x19e0] ss:$16 sps:$4 sm:$0xff]  }
 0x311   : > { %6986 = vmatmul.mubr.bf16.vlgmr.msra.gmra.mrb[0].mxu0 %v7935_v39  ;;  %7642 = vmatmul.mubr.bf16.vlgmr.msra.gmra.mrb[0].mxu1 %v7935_v39  ;;  %v10375_v39 = vld [vmem:[%s10716_s17 + $0x19e8] ss:$16 sps:$4 sm:$0xff]  }
 0x312   : > { %6995 = vmatpush1.bf16.msra.mxu0 %v10282_v41  ;;  %7651 = vmatpush1.bf16.msra.mxu1 %v10285_v34  ;;  %v10382_v41 = vld [vmem:[%s10716_s17 + $0x1a04] ss:$16 sps:$4 sm:$0xff]   ;;  %v10385_v34 = vld [vmem:[%s10716_s17 + $0x1a0c] ss:$16 sps:$4 sm:$0xff]  }
 0x313   : > { %6996 = vmatprep.subr.bf16.mxu0 %v10290_v42  ;;  %7652 = vmatprep.subr.bf16.mxu1 %v10293_v43  ;;  %v7937_v42 = vcombine.low %v11573_v40, %v11573_v40  ;;  %v11644_v43 = vld [vmem:[%s10766_s21 + $0x68] sm:$0xff]  ;;  %v10386_v40 = vld [vmem:[%s10716_s17 + $0x1a20] ss:$16 sps:$4 sm:$0xff]  }
 0x314   : > { %7026 = vmatprep.mubr.bf16.mxu0 %v7938_v44  ;;  %7682 = vmatprep.mubr.bf16.mxu1 %v7938_v44  ;;  %v10380_v44 = vld [vmem:[%s10716_s17 + $0x1a00] ss:$16 sps:$4 sm:$0xff]  }
 0x316   : > { %6997 = vmatpush1.bf16.msra.mxu0 %v10288_v37  ;;  %7653 = vmatpush1.bf16.msra.mxu1 %v10291_v45  ;;  %v10383_v37 = vld [vmem:[%s10716_s17 + $0x1a08] ss:$16 sps:$4 sm:$0xff]   ;;  %v10388_v45 = vld [vmem:[%s10716_s17 + $0x1a24] ss:$16 sps:$4 sm:$0xff]  }
 0x317   : > { %6998 = vmatprep.subr.bf16.mxu0 %v10296_v46  ;;  %7654 = vmatprep.subr.bf16.mxu1 %v10299_v47  ;;  %v10391_v46 = vld [vmem:[%s10716_s17 + $0x1a2c] ss:$16 sps:$4 sm:$0xff]   ;;  %v7940_v47 = vcombine.high %v11644_v43, %v11644_v43 }
 0x31a   : > { %6999 = vmatpush1.bf16.msra.mxu0 %v10294_v48  ;;  %7655 = vmatpush1.bf16.msra.mxu1 %v10297_v49  ;;  %v10389_v48 = vld [vmem:[%s10716_s17 + $0x1a28] ss:$16 sps:$4 sm:$0xff]   ;;  %v10394_v49 = vld [vmem:[%s10716_s17 + $0x1a44] ss:$16 sps:$4 sm:$0xff]  }
 0x31b   : > { %7000 = vmatprep.subr.bf16.mxu0 %v10302_v50  ;;  %7656 = vmatprep.subr.bf16.mxu1 %v10305_v51  ;;  %v10397_v50 = vld [vmem:[%s10716_s17 + $0x1a4c] ss:$16 sps:$4 sm:$0xff]   ;;  %v10392_v51 = vld [vmem:[%s10716_s17 + $0x1a40] ss:$16 sps:$4 sm:$0xff]  }
 0x31e   : > { %7001 = vmatpush1.bf16.msra.mxu0 %v10300_v52  ;;  %7657 = vmatpush1.bf16.msra.mxu1 %v10303_v53  ;;  %v10395_v52 = vld [vmem:[%s10716_s17 + $0x1a48] ss:$16 sps:$4 sm:$0xff]   ;;  %v10400_v53 = vld [vmem:[%s10716_s17 + $0x1a64] ss:$16 sps:$4 sm:$0xff]  }
 0x31f   : > { %7002 = vmatprep.subr.bf16.mxu0 %v10308_v54  ;;  %7658 = vmatprep.subr.bf16.mxu1 %v10311_v55  ;;  %v10403_v54 = vld [vmem:[%s10716_s17 + $0x1a6c] ss:$16 sps:$4 sm:$0xff]   ;;  %v10398_v55 = vld [vmem:[%s10716_s17 + $0x1a60] ss:$16 sps:$4 sm:$0xff]  }
 0x322   : > { %7003 = vmatpush1.bf16.msra.mxu0 %v10306_v56  ;;  %7659 = vmatpush1.bf16.msra.mxu1 %v10309_v57  ;;  %v10401_v56 = vld [vmem:[%s10716_s17 + $0x1a68] ss:$16 sps:$4 sm:$0xff]   ;;  %v10406_v57 = vld [vmem:[%s10716_s17 + $0x1a84] ss:$16 sps:$4 sm:$0xff]  }
 0x323   : > { %7004 = vmatprep.subr.bf16.mxu0 %v10314_v58  ;;  %7660 = vmatprep.subr.bf16.mxu1 %v10317_v59  ;;  %v10409_v58 = vld [vmem:[%s10716_s17 + $0x1a8c] ss:$16 sps:$4 sm:$0xff]   ;;  %v10404_v59 = vld [vmem:[%s10716_s17 + $0x1a80] ss:$16 sps:$4 sm:$0xff]  }
 0x326   : > { %7005 = vmatpush1.bf16.msra.mxu0 %v10312_v60  ;;  %7661 = vmatpush1.bf16.msra.mxu1 %v10315_v61  ;;  %v10407_v60 = vld [vmem:[%s10716_s17 + $0x1a88] ss:$16 sps:$4 sm:$0xff]   ;;  %v10412_v61 = vld [vmem:[%s10716_s17 + $0x1aa4] ss:$16 sps:$4 sm:$0xff]  }
 0x327   : > { %7006 = vmatprep.subr.bf16.mxu0 %v10320_v62  ;;  %7662 = vmatprep.subr.bf16.mxu1 %v10323_v63  ;;  %v10415_v62 = vld [vmem:[%s10716_s17 + $0x1aac] ss:$16 sps:$4 sm:$0xff]   ;;  %v10410_v63 = vld [vmem:[%s10716_s17 + $0x1aa0] ss:$16 sps:$4 sm:$0xff]  }
 0x32a   : > { %7007 = vmatpush1.bf16.msra.mxu0 %v10318_v0  ;;  %7663 = vmatpush1.bf16.msra.mxu1 %v10321_v1  ;;  %v10413_v0 = vld [vmem:[%s10716_s17 + $0x1aa8] ss:$16 sps:$4 sm:$0xff]   ;;  %v10418_v1 = vld [vmem:[%s10716_s17 + $0x1ac4] ss:$16 sps:$4 sm:$0xff]  }
 0x32b   : > { %7008 = vmatprep.subr.bf16.mxu0 %v10326_v2  ;;  %7664 = vmatprep.subr.bf16.mxu1 %v10329_v3  ;;  %v10421_v2 = vld [vmem:[%s10716_s17 + $0x1acc] ss:$16 sps:$4 sm:$0xff]   ;;  %v10416_v3 = vld [vmem:[%s10716_s17 + $0x1ac0] ss:$16 sps:$4 sm:$0xff]  }
 0x32e   : > { %7009 = vmatpush1.bf16.msra.mxu0 %v10324_v4  ;;  %7665 = vmatpush1.bf16.msra.mxu1 %v10327_v5  ;;  %v10419_v4 = vld [vmem:[%s10716_s17 + $0x1ac8] ss:$16 sps:$4 sm:$0xff]   ;;  %v10424_v5 = vld [vmem:[%s10716_s17 + $0x1ae4] ss:$16 sps:$4 sm:$0xff]  }
 0x32f   : > { %7010 = vmatprep.subr.bf16.mxu0 %v10332_v6  ;;  %7666 = vmatprep.subr.bf16.mxu1 %v10335_v7  ;;  %v10427_v6 = vld [vmem:[%s10716_s17 + $0x1aec] ss:$16 sps:$4 sm:$0xff]   ;;  %v10422_v7 = vld [vmem:[%s10716_s17 + $0x1ae0] ss:$16 sps:$4 sm:$0xff]  }
 0x332   : > { %7011 = vmatpush1.bf16.msra.mxu0 %v10330_v8  ;;  %7667 = vmatpush1.bf16.msra.mxu1 %v10333_v9  ;;  %v10425_v8 = vld [vmem:[%s10716_s17 + $0x1ae8] ss:$16 sps:$4 sm:$0xff]   ;;  %v10430_v9 = vld [vmem:[%s10716_s17 + $0x1b04] ss:$16 sps:$4 sm:$0xff]  }
 0x333   : > { %7012 = vmatprep.subr.bf16.mxu0 %v10338_v10  ;;  %7668 = vmatprep.subr.bf16.mxu1 %v10341_v12  ;;  %v10433_v10 = vld [vmem:[%s10716_s17 + $0x1b0c] ss:$16 sps:$4 sm:$0xff]   ;;  %v10428_v12 = vld [vmem:[%s10716_s17 + $0x1b00] ss:$16 sps:$4 sm:$0xff]  }
 0x336   : > { %7013 = vmatpush1.bf16.msra.mxu0 %v10336_v13  ;;  %7669 = vmatpush1.bf16.msra.mxu1 %v10339_v15  ;;  %v10431_v13 = vld [vmem:[%s10716_s17 + $0x1b08] ss:$16 sps:$4 sm:$0xff]   ;;  %v10436_v15 = vld [vmem:[%s10716_s17 + $0x1b24] ss:$16 sps:$4 sm:$0xff]  }
 0x337   : > { %7014 = vmatprep.subr.bf16.mxu0 %v10344_v16  ;;  %7670 = vmatprep.subr.bf16.mxu1 %v10347_v11  ;;  %v10439_v16 = vld [vmem:[%s10716_s17 + $0x1b2c] ss:$16 sps:$4 sm:$0xff]   ;;  %v10434_v11 = vld [vmem:[%s10716_s17 + $0x1b20] ss:$16 sps:$4 sm:$0xff]  }
 0x33a   : > { %7015 = vmatpush1.bf16.msra.mxu0 %v10342_v19  ;;  %7671 = vmatpush1.bf16.msra.mxu1 %v10345_v20  ;;  %v10437_v19 = vld [vmem:[%s10716_s17 + $0x1b28] ss:$16 sps:$4 sm:$0xff]   ;;  %v10442_v20 = vld [vmem:[%s10716_s17 + $0x1b44] ss:$16 sps:$4 sm:$0xff]  }
 0x33b   : > { %7016 = vmatprep.subr.bf16.mxu0 %v10350_v14  ;;  %7672 = vmatprep.subr.bf16.mxu1 %v10353_v22  ;;  %v10445_v14 = vld [vmem:[%s10716_s17 + $0x1b4c] ss:$16 sps:$4 sm:$0xff]   ;;  %v10440_v22 = vld [vmem:[%s10716_s17 + $0x1b40] ss:$16 sps:$4 sm:$0xff]  }
 0x33e   : > { %7017 = vmatpush1.bf16.msra.mxu0 %v10348_v23  ;;  %7673 = vmatpush1.bf16.msra.mxu1 %v10351_v17  ;;  %v10443_v23 = vld [vmem:[%s10716_s17 + $0x1b48] ss:$16 sps:$4 sm:$0xff]   ;;  %v10448_v17 = vld [vmem:[%s10716_s17 + $0x1b64] ss:$16 sps:$4 sm:$0xff]  }
 0x33f   : > { %7018 = vmatprep.subr.bf16.mxu0 %v10356_v25  ;;  %7674 = vmatprep.subr.bf16.mxu1 %v10359_v26  ;;  %v10451_v25 = vld [vmem:[%s10716_s17 + $0x1b6c] ss:$16 sps:$4 sm:$0xff]   ;;  %v10446_v26 = vld [vmem:[%s10716_s17 + $0x1b60] ss:$16 sps:$4 sm:$0xff]  }
 0x342   : > { %7019 = vmatpush1.bf16.msra.mxu0 %v10354_v18  ;;  %7675 = vmatpush1.bf16.msra.mxu1 %v10357_v28  ;;  %v10449_v18 = vld [vmem:[%s10716_s17 + $0x1b68] ss:$16 sps:$4 sm:$0xff]   ;;  %v10454_v28 = vld [vmem:[%s10716_s17 + $0x1b84] ss:$16 sps:$4 sm:$0xff]  }
 0x343   : > { %7020 = vmatprep.subr.bf16.mxu0 %v10362_v29  ;;  %7676 = vmatprep.subr.bf16.mxu1 %v10365_v21  ;;  %v10457_v29 = vld [vmem:[%s10716_s17 + $0x1b8c] ss:$16 sps:$4 sm:$0xff]   ;;  %v10452_v21 = vld [vmem:[%s10716_s17 + $0x1b80] ss:$16 sps:$4 sm:$0xff]  }
 0x346   : > { %7021 = vmatpush1.bf16.msra.mxu0 %v10360_v31  ;;  %7677 = vmatpush1.bf16.msra.mxu1 %v10363_v32  ;;  %v10455_v31 = vld [vmem:[%s10716_s17 + $0x1b88] ss:$16 sps:$4 sm:$0xff]   ;;  %v10460_v32 = vld [vmem:[%s10716_s17 + $0x1ba4] ss:$16 sps:$4 sm:$0xff]  }
 0x347   : > { %7022 = vmatprep.subr.bf16.mxu0 %v10368_v24  ;;  %7678 = vmatprep.subr.bf16.mxu1 %v10371_v33  ;;  %v10463_v24 = vld [vmem:[%s10716_s17 + $0x1bac] ss:$16 sps:$4 sm:$0xff]   ;;  %v10458_v33 = vld [vmem:[%s10716_s17 + $0x1ba0] ss:$16 sps:$4 sm:$0xff]  }
 0x34a   : > { %7023 = vmatpush1.bf16.msra.mxu0 %v10366_v35  ;;  %7679 = vmatpush1.bf16.msra.mxu1 %v10369_v27  ;;  %v10461_v35 = vld [vmem:[%s10716_s17 + $0x1ba8] ss:$16 sps:$4 sm:$0xff]   ;;  %v10466_v27 = vld [vmem:[%s10716_s17 + $0x1bc4] ss:$16 sps:$4 sm:$0xff]  }
 0x34b   : > { %7024 = vmatprep.subr.bf16.mxu0 %v10374_v36  ;;  %7680 = vmatprep.subr.bf16.mxu1 %v10377_v38  ;;  %v10469_v36 = vld [vmem:[%s10716_s17 + $0x1bcc] ss:$16 sps:$4 sm:$0xff]   ;;  %v10464_v38 = vld [vmem:[%s10716_s17 + $0x1bc0] ss:$16 sps:$4 sm:$0xff]  }
 0x34e   : > { %7025 = vmatpush1.bf16.msra.mxu0 %v10372_v30  ;;  %7681 = vmatpush1.bf16.msra.mxu1 %v10375_v39  ;;  %v10467_v30 = vld [vmem:[%s10716_s17 + $0x1bc8] ss:$16 sps:$4 sm:$0xff]   ;;  %v10472_v39 = vld [vmem:[%s10716_s17 + $0x1be4] ss:$16 sps:$4 sm:$0xff]  }
 0x34f   : > { %7035 = vmatprep.subr.bf16.mxu0 %v10382_v41  ;;  %7691 = vmatprep.subr.bf16.mxu1 %v10385_v34  ;;  %v10475_v41 = vld [vmem:[%s10716_s17 + $0x1bec] ss:$16 sps:$4 sm:$0xff]   ;;  %v10470_v34 = vld [vmem:[%s10716_s17 + $0x1be0] ss:$16 sps:$4 sm:$0xff]  }
 0x351   : > { %7027 = vmatmul.mubr.bf16.vlgmr.msra.gmra.mrb[0].mxu0 %v7937_v42  ;;  %7683 = vmatmul.mubr.bf16.vlgmr.msra.gmra.mrb[0].mxu1 %v7937_v42  ;;  %v10473_v42 = vld [vmem:[%s10716_s17 + $0x1be8] ss:$16 sps:$4 sm:$0xff]  }
 0x352   : > { %7036 = vmatpush1.bf16.msra.mxu0 %v10380_v44  ;;  %7692 = vmatpush1.bf16.msra.mxu1 %v10383_v37  ;;  %v10480_v44 = vld [vmem:[%s10716_s17 + $0x1c04] ss:$16 sps:$4 sm:$0xff]   ;;  %v10483_v37 = vld [vmem:[%s10716_s17 + $0x1c0c] ss:$16 sps:$4 sm:$0xff]  }
 0x353   : > { %7037 = vmatprep.subr.bf16.mxu0 %v10388_v45  ;;  %7693 = vmatprep.subr.bf16.mxu1 %v10391_v46  ;;  %v7939_v45 = vcombine.low %v11644_v43, %v11644_v43  ;;  %v11715_v46 = vld [vmem:[%s10766_s21 + $0x70] sm:$0xff] }
 0x354   : > { %7067 = vmatprep.mubr.bf16.mxu0 %v7940_v47  ;;  %7723 = vmatprep.mubr.bf16.mxu1 %v7940_v47  ;;  %v10478_v47 = vld [vmem:[%s10716_s17 + $0x1c00] ss:$16 sps:$4 sm:$0xff]  }
 0x355   : > { %v10484_v43 = vld [vmem:[%s10716_s17 + $0x1c20] ss:$16 sps:$4 sm:$0xff]  }
 0x356   : > { %7038 = vmatpush1.bf16.msra.mxu0 %v10386_v40  ;;  %7694 = vmatpush1.bf16.msra.mxu1 %v10389_v48  ;;  %v10481_v40 = vld [vmem:[%s10716_s17 + $0x1c08] ss:$16 sps:$4 sm:$0xff]   ;;  %v10486_v48 = vld [vmem:[%s10716_s17 + $0x1c24] ss:$16 sps:$4 sm:$0xff]  }
 0x357   : > { %7039 = vmatprep.subr.bf16.mxu0 %v10394_v49  ;;  %7695 = vmatprep.subr.bf16.mxu1 %v10397_v50  ;;  %v10489_v49 = vld [vmem:[%s10716_s17 + $0x1c2c] ss:$16 sps:$4 sm:$0xff]   ;;  %v7942_v50 = vcombine.high %v11715_v46, %v11715_v46 }
 0x35a   : > { %7040 = vmatpush1.bf16.msra.mxu0 %v10392_v51  ;;  %7696 = vmatpush1.bf16.msra.mxu1 %v10395_v52  ;;  %v10487_v51 = vld [vmem:[%s10716_s17 + $0x1c28] ss:$16 sps:$4 sm:$0xff]   ;;  %v10492_v52 = vld [vmem:[%s10716_s17 + $0x1c44] ss:$16 sps:$4 sm:$0xff]  }
 0x35b   : > { %7041 = vmatprep.subr.bf16.mxu0 %v10400_v53  ;;  %7697 = vmatprep.subr.bf16.mxu1 %v10403_v54  ;;  %v10495_v53 = vld [vmem:[%s10716_s17 + $0x1c4c] ss:$16 sps:$4 sm:$0xff]   ;;  %v10490_v54 = vld [vmem:[%s10716_s17 + $0x1c40] ss:$16 sps:$4 sm:$0xff]  }
 0x35e   : > { %7042 = vmatpush1.bf16.msra.mxu0 %v10398_v55  ;;  %7698 = vmatpush1.bf16.msra.mxu1 %v10401_v56  ;;  %v10493_v55 = vld [vmem:[%s10716_s17 + $0x1c48] ss:$16 sps:$4 sm:$0xff]   ;;  %v10498_v56 = vld [vmem:[%s10716_s17 + $0x1c64] ss:$16 sps:$4 sm:$0xff]  }
 0x35f   : > { %7043 = vmatprep.subr.bf16.mxu0 %v10406_v57  ;;  %7699 = vmatprep.subr.bf16.mxu1 %v10409_v58  ;;  %v10501_v57 = vld [vmem:[%s10716_s17 + $0x1c6c] ss:$16 sps:$4 sm:$0xff]   ;;  %v10496_v58 = vld [vmem:[%s10716_s17 + $0x1c60] ss:$16 sps:$4 sm:$0xff]  }
 0x362   : > { %7044 = vmatpush1.bf16.msra.mxu0 %v10404_v59  ;;  %7700 = vmatpush1.bf16.msra.mxu1 %v10407_v60  ;;  %v10499_v59 = vld [vmem:[%s10716_s17 + $0x1c68] ss:$16 sps:$4 sm:$0xff]   ;;  %v10504_v60 = vld [vmem:[%s10716_s17 + $0x1c84] ss:$16 sps:$4 sm:$0xff]  }
 0x363   : > { %7045 = vmatprep.subr.bf16.mxu0 %v10412_v61  ;;  %7701 = vmatprep.subr.bf16.mxu1 %v10415_v62  ;;  %v10507_v61 = vld [vmem:[%s10716_s17 + $0x1c8c] ss:$16 sps:$4 sm:$0xff]   ;;  %v10502_v62 = vld [vmem:[%s10716_s17 + $0x1c80] ss:$16 sps:$4 sm:$0xff]  }
 0x366   : > { %7046 = vmatpush1.bf16.msra.mxu0 %v10410_v63  ;;  %7702 = vmatpush1.bf16.msra.mxu1 %v10413_v0  ;;  %v10505_v63 = vld [vmem:[%s10716_s17 + $0x1c88] ss:$16 sps:$4 sm:$0xff]   ;;  %v10510_v0 = vld [vmem:[%s10716_s17 + $0x1ca4] ss:$16 sps:$4 sm:$0xff]  }
 0x367   : > { %7047 = vmatprep.subr.bf16.mxu0 %v10418_v1  ;;  %7703 = vmatprep.subr.bf16.mxu1 %v10421_v2  ;;  %v10513_v1 = vld [vmem:[%s10716_s17 + $0x1cac] ss:$16 sps:$4 sm:$0xff]   ;;  %v10508_v2 = vld [vmem:[%s10716_s17 + $0x1ca0] ss:$16 sps:$4 sm:$0xff]  }
 0x36a   : > { %7048 = vmatpush1.bf16.msra.mxu0 %v10416_v3  ;;  %7704 = vmatpush1.bf16.msra.mxu1 %v10419_v4  ;;  %v10511_v3 = vld [vmem:[%s10716_s17 + $0x1ca8] ss:$16 sps:$4 sm:$0xff]   ;;  %v10516_v4 = vld [vmem:[%s10716_s17 + $0x1cc4] ss:$16 sps:$4 sm:$0xff]  }
 0x36b   : > { %7049 = vmatprep.subr.bf16.mxu0 %v10424_v5  ;;  %7705 = vmatprep.subr.bf16.mxu1 %v10427_v6  ;;  %v10519_v5 = vld [vmem:[%s10716_s17 + $0x1ccc] ss:$16 sps:$4 sm:$0xff]   ;;  %v10514_v6 = vld [vmem:[%s10716_s17 + $0x1cc0] ss:$16 sps:$4 sm:$0xff]  }
 0x36e   : > { %7050 = vmatpush1.bf16.msra.mxu0 %v10422_v7  ;;  %7706 = vmatpush1.bf16.msra.mxu1 %v10425_v8  ;;  %v10517_v7 = vld [vmem:[%s10716_s17 + $0x1cc8] ss:$16 sps:$4 sm:$0xff]   ;;  %v10522_v8 = vld [vmem:[%s10716_s17 + $0x1ce4] ss:$16 sps:$4 sm:$0xff]  }
 0x36f   : > { %7051 = vmatprep.subr.bf16.mxu0 %v10430_v9  ;;  %7707 = vmatprep.subr.bf16.mxu1 %v10433_v10  ;;  %v10525_v9 = vld [vmem:[%s10716_s17 + $0x1cec] ss:$16 sps:$4 sm:$0xff]   ;;  %v10520_v10 = vld [vmem:[%s10716_s17 + $0x1ce0] ss:$16 sps:$4 sm:$0xff]  }
 0x372   : > { %7052 = vmatpush1.bf16.msra.mxu0 %v10428_v12  ;;  %7708 = vmatpush1.bf16.msra.mxu1 %v10431_v13  ;;  %v10523_v12 = vld [vmem:[%s10716_s17 + $0x1ce8] ss:$16 sps:$4 sm:$0xff]   ;;  %v10528_v13 = vld [vmem:[%s10716_s17 + $0x1d04] ss:$16 sps:$4 sm:$0xff]  }
 0x373   : > { %7053 = vmatprep.subr.bf16.mxu0 %v10436_v15  ;;  %7709 = vmatprep.subr.bf16.mxu1 %v10439_v16  ;;  %v10531_v15 = vld [vmem:[%s10716_s17 + $0x1d0c] ss:$16 sps:$4 sm:$0xff]   ;;  %v10526_v16 = vld [vmem:[%s10716_s17 + $0x1d00] ss:$16 sps:$4 sm:$0xff]  }
 0x376   : > { %7054 = vmatpush1.bf16.msra.mxu0 %v10434_v11  ;;  %7710 = vmatpush1.bf16.msra.mxu1 %v10437_v19  ;;  %v10529_v11 = vld [vmem:[%s10716_s17 + $0x1d08] ss:$16 sps:$4 sm:$0xff]   ;;  %v10534_v19 = vld [vmem:[%s10716_s17 + $0x1d24] ss:$16 sps:$4 sm:$0xff]  }
 0x377   : > { %7055 = vmatprep.subr.bf16.mxu0 %v10442_v20  ;;  %7711 = vmatprep.subr.bf16.mxu1 %v10445_v14  ;;  %v10537_v20 = vld [vmem:[%s10716_s17 + $0x1d2c] ss:$16 sps:$4 sm:$0xff]   ;;  %v10532_v14 = vld [vmem:[%s10716_s17 + $0x1d20] ss:$16 sps:$4 sm:$0xff]  }
 0x37a   : > { %7056 = vmatpush1.bf16.msra.mxu0 %v10440_v22  ;;  %7712 = vmatpush1.bf16.msra.mxu1 %v10443_v23  ;;  %v10535_v22 = vld [vmem:[%s10716_s17 + $0x1d28] ss:$16 sps:$4 sm:$0xff]   ;;  %v10540_v23 = vld [vmem:[%s10716_s17 + $0x1d44] ss:$16 sps:$4 sm:$0xff]  }
 0x37b   : > { %7057 = vmatprep.subr.bf16.mxu0 %v10448_v17  ;;  %7713 = vmatprep.subr.bf16.mxu1 %v10451_v25  ;;  %v10543_v17 = vld [vmem:[%s10716_s17 + $0x1d4c] ss:$16 sps:$4 sm:$0xff]   ;;  %v10538_v25 = vld [vmem:[%s10716_s17 + $0x1d40] ss:$16 sps:$4 sm:$0xff]  }
 0x37e   : > { %7058 = vmatpush1.bf16.msra.mxu0 %v10446_v26  ;;  %7714 = vmatpush1.bf16.msra.mxu1 %v10449_v18  ;;  %v10541_v26 = vld [vmem:[%s10716_s17 + $0x1d48] ss:$16 sps:$4 sm:$0xff]   ;;  %v10546_v18 = vld [vmem:[%s10716_s17 + $0x1d64] ss:$16 sps:$4 sm:$0xff]  }
 0x37f   : > { %7059 = vmatprep.subr.bf16.mxu0 %v10454_v28  ;;  %7715 = vmatprep.subr.bf16.mxu1 %v10457_v29  ;;  %v10549_v28 = vld [vmem:[%s10716_s17 + $0x1d6c] ss:$16 sps:$4 sm:$0xff]   ;;  %v10544_v29 = vld [vmem:[%s10716_s17 + $0x1d60] ss:$16 sps:$4 sm:$0xff]  }
 0x382   : > { %7060 = vmatpush1.bf16.msra.mxu0 %v10452_v21  ;;  %7716 = vmatpush1.bf16.msra.mxu1 %v10455_v31  ;;  %v10547_v21 = vld [vmem:[%s10716_s17 + $0x1d68] ss:$16 sps:$4 sm:$0xff]   ;;  %v10552_v31 = vld [vmem:[%s10716_s17 + $0x1d84] ss:$16 sps:$4 sm:$0xff]  }
 0x383   : > { %7061 = vmatprep.subr.bf16.mxu0 %v10460_v32  ;;  %7717 = vmatprep.subr.bf16.mxu1 %v10463_v24  ;;  %v10555_v32 = vld [vmem:[%s10716_s17 + $0x1d8c] ss:$16 sps:$4 sm:$0xff]   ;;  %v10550_v24 = vld [vmem:[%s10716_s17 + $0x1d80] ss:$16 sps:$4 sm:$0xff]  }
 0x386   : > { %7062 = vmatpush1.bf16.msra.mxu0 %v10458_v33  ;;  %7718 = vmatpush1.bf16.msra.mxu1 %v10461_v35  ;;  %v10553_v33 = vld [vmem:[%s10716_s17 + $0x1d88] ss:$16 sps:$4 sm:$0xff]   ;;  %v10558_v35 = vld [vmem:[%s10716_s17 + $0x1da4] ss:$16 sps:$4 sm:$0xff]  }
 0x387   : > { %7063 = vmatprep.subr.bf16.mxu0 %v10466_v27  ;;  %7719 = vmatprep.subr.bf16.mxu1 %v10469_v36  ;;  %v10561_v27 = vld [vmem:[%s10716_s17 + $0x1dac] ss:$16 sps:$4 sm:$0xff]   ;;  %v10556_v36 = vld [vmem:[%s10716_s17 + $0x1da0] ss:$16 sps:$4 sm:$0xff]  }
 0x38a   : > { %7064 = vmatpush1.bf16.msra.mxu0 %v10464_v38  ;;  %7720 = vmatpush1.bf16.msra.mxu1 %v10467_v30  ;;  %v10559_v38 = vld [vmem:[%s10716_s17 + $0x1da8] ss:$16 sps:$4 sm:$0xff]   ;;  %v10564_v30 = vld [vmem:[%s10716_s17 + $0x1dc4] ss:$16 sps:$4 sm:$0xff]  }
 0x38b   : > { %7065 = vmatprep.subr.bf16.mxu0 %v10472_v39  ;;  %7721 = vmatprep.subr.bf16.mxu1 %v10475_v41  ;;  %v10567_v39 = vld [vmem:[%s10716_s17 + $0x1dcc] ss:$16 sps:$4 sm:$0xff]   ;;  %v10562_v41 = vld [vmem:[%s10716_s17 + $0x1dc0] ss:$16 sps:$4 sm:$0xff]  }
 0x38e   : > { %7066 = vmatpush1.bf16.msra.mxu0 %v10470_v34  ;;  %7722 = vmatpush1.bf16.msra.mxu1 %v10473_v42  ;;  %v10565_v34 = vld [vmem:[%s10716_s17 + $0x1dc8] ss:$16 sps:$4 sm:$0xff]   ;;  %v10570_v42 = vld [vmem:[%s10716_s17 + $0x1de4] ss:$16 sps:$4 sm:$0xff]  }
 0x38f   : > { %7076 = vmatprep.subr.bf16.mxu0 %v10480_v44  ;;  %7732 = vmatprep.subr.bf16.mxu1 %v10483_v37  ;;  %v10573_v44 = vld [vmem:[%s10716_s17 + $0x1dec] ss:$16 sps:$4 sm:$0xff]   ;;  %v10568_v37 = vld [vmem:[%s10716_s17 + $0x1de0] ss:$16 sps:$4 sm:$0xff]  }
 0x391   : > { %7068 = vmatmul.mubr.bf16.vlgmr.msra.gmra.mrb[0].mxu0 %v7939_v45  ;;  %7724 = vmatmul.mubr.bf16.vlgmr.msra.gmra.mrb[0].mxu1 %v7939_v45  ;;  %v10571_v45 = vld [vmem:[%s10716_s17 + $0x1de8] ss:$16 sps:$4 sm:$0xff]  }
 0x392   : > { %7077 = vmatpush1.bf16.msra.mxu0 %v10478_v47  ;;  %7733 = vmatpush1.bf16.msra.mxu1 %v10481_v40  ;;  %v10578_v47 = vld [vmem:[%s10716_s17 + $0x1e04] ss:$16 sps:$4 sm:$0xff]   ;;  %v10581_v40 = vld [vmem:[%s10716_s17 + $0x1e0c] ss:$16 sps:$4 sm:$0xff]  }
 0x393   : > { %7078 = vmatprep.subr.bf16.mxu0 %v10486_v48  ;;  %7734 = vmatprep.subr.bf16.mxu1 %v10489_v49  ;;  %v7941_v48 = vcombine.low %v11715_v46, %v11715_v46  ;;  %v11786_v49 = vld [vmem:[%s10766_s21 + $0x78] sm:$0xff]  ;;  %v10582_v46 = vld [vmem:[%s10716_s17 + $0x1e20] ss:$16 sps:$4 sm:$0xff]  }
 0x394   : > { %7108 = vmatprep.mubr.bf16.mxu0 %v7942_v50  ;;  %7764 = vmatprep.mubr.bf16.mxu1 %v7942_v50  ;;  %v10576_v50 = vld [vmem:[%s10716_s17 + $0x1e00] ss:$16 sps:$4 sm:$0xff]  }
 0x396   : > { %7079 = vmatpush1.bf16.msra.mxu0 %v10484_v43  ;;  %7735 = vmatpush1.bf16.msra.mxu1 %v10487_v51  ;;  %v10579_v43 = vld [vmem:[%s10716_s17 + $0x1e08] ss:$16 sps:$4 sm:$0xff]   ;;  %v10584_v51 = vld [vmem:[%s10716_s17 + $0x1e24] ss:$16 sps:$4 sm:$0xff]  }
 0x397   : > { %7080 = vmatprep.subr.bf16.mxu0 %v10492_v52  ;;  %7736 = vmatprep.subr.bf16.mxu1 %v10495_v53  ;;  %v10587_v52 = vld [vmem:[%s10716_s17 + $0x1e2c] ss:$16 sps:$4 sm:$0xff]   ;;  %v7944_v53 = vcombine.high %v11786_v49, %v11786_v49 }
 0x39a   : > { %7081 = vmatpush1.bf16.msra.mxu0 %v10490_v54  ;;  %7737 = vmatpush1.bf16.msra.mxu1 %v10493_v55  ;;  %v10585_v54 = vld [vmem:[%s10716_s17 + $0x1e28] ss:$16 sps:$4 sm:$0xff]   ;;  %v10590_v55 = vld [vmem:[%s10716_s17 + $0x1e44] ss:$16 sps:$4 sm:$0xff]  }
 0x39b   : > { %7082 = vmatprep.subr.bf16.mxu0 %v10498_v56  ;;  %7738 = vmatprep.subr.bf16.mxu1 %v10501_v57  ;;  %v10593_v56 = vld [vmem:[%s10716_s17 + $0x1e4c] ss:$16 sps:$4 sm:$0xff]   ;;  %v10588_v57 = vld [vmem:[%s10716_s17 + $0x1e40] ss:$16 sps:$4 sm:$0xff]  }
 0x39e   : > { %7083 = vmatpush1.bf16.msra.mxu0 %v10496_v58  ;;  %7739 = vmatpush1.bf16.msra.mxu1 %v10499_v59  ;;  %v10591_v58 = vld [vmem:[%s10716_s17 + $0x1e48] ss:$16 sps:$4 sm:$0xff]   ;;  %v10596_v59 = vld [vmem:[%s10716_s17 + $0x1e64] ss:$16 sps:$4 sm:$0xff]  }
 0x39f   : > { %7084 = vmatprep.subr.bf16.mxu0 %v10504_v60  ;;  %7740 = vmatprep.subr.bf16.mxu1 %v10507_v61  ;;  %v10599_v60 = vld [vmem:[%s10716_s17 + $0x1e6c] ss:$16 sps:$4 sm:$0xff]   ;;  %v10594_v61 = vld [vmem:[%s10716_s17 + $0x1e60] ss:$16 sps:$4 sm:$0xff]  }
 0x3a2   : > { %7085 = vmatpush1.bf16.msra.mxu0 %v10502_v62  ;;  %7741 = vmatpush1.bf16.msra.mxu1 %v10505_v63  ;;  %v10597_v62 = vld [vmem:[%s10716_s17 + $0x1e68] ss:$16 sps:$4 sm:$0xff]   ;;  %v10602_v63 = vld [vmem:[%s10716_s17 + $0x1e84] ss:$16 sps:$4 sm:$0xff]  }
 0x3a3   : > { %7086 = vmatprep.subr.bf16.mxu0 %v10510_v0  ;;  %7742 = vmatprep.subr.bf16.mxu1 %v10513_v1  ;;  %v10605_v0 = vld [vmem:[%s10716_s17 + $0x1e8c] ss:$16 sps:$4 sm:$0xff]   ;;  %v10600_v1 = vld [vmem:[%s10716_s17 + $0x1e80] ss:$16 sps:$4 sm:$0xff]  }
 0x3a6   : > { %7087 = vmatpush1.bf16.msra.mxu0 %v10508_v2  ;;  %7743 = vmatpush1.bf16.msra.mxu1 %v10511_v3  ;;  %v10603_v2 = vld [vmem:[%s10716_s17 + $0x1e88] ss:$16 sps:$4 sm:$0xff]   ;;  %v10608_v3 = vld [vmem:[%s10716_s17 + $0x1ea4] ss:$16 sps:$4 sm:$0xff]  }
 0x3a7   : > { %7088 = vmatprep.subr.bf16.mxu0 %v10516_v4  ;;  %7744 = vmatprep.subr.bf16.mxu1 %v10519_v5  ;;  %v10611_v4 = vld [vmem:[%s10716_s17 + $0x1eac] ss:$16 sps:$4 sm:$0xff]   ;;  %v10606_v5 = vld [vmem:[%s10716_s17 + $0x1ea0] ss:$16 sps:$4 sm:$0xff]  }
 0x3aa   : > { %7089 = vmatpush1.bf16.msra.mxu0 %v10514_v6  ;;  %7745 = vmatpush1.bf16.msra.mxu1 %v10517_v7  ;;  %v10609_v6 = vld [vmem:[%s10716_s17 + $0x1ea8] ss:$16 sps:$4 sm:$0xff]   ;;  %v10614_v7 = vld [vmem:[%s10716_s17 + $0x1ec4] ss:$16 sps:$4 sm:$0xff]  }
 0x3ab   : > { %7090 = vmatprep.subr.bf16.mxu0 %v10522_v8  ;;  %7746 = vmatprep.subr.bf16.mxu1 %v10525_v9  ;;  %v10617_v8 = vld [vmem:[%s10716_s17 + $0x1ecc] ss:$16 sps:$4 sm:$0xff]   ;;  %v10612_v9 = vld [vmem:[%s10716_s17 + $0x1ec0] ss:$16 sps:$4 sm:$0xff]  }
 0x3ae   : > { %7091 = vmatpush1.bf16.msra.mxu0 %v10520_v10  ;;  %7747 = vmatpush1.bf16.msra.mxu1 %v10523_v12  ;;  %v10615_v10 = vld [vmem:[%s10716_s17 + $0x1ec8] ss:$16 sps:$4 sm:$0xff]   ;;  %v10620_v12 = vld [vmem:[%s10716_s17 + $0x1ee4] ss:$16 sps:$4 sm:$0xff]  }
 0x3af   : > { %7092 = vmatprep.subr.bf16.mxu0 %v10528_v13  ;;  %7748 = vmatprep.subr.bf16.mxu1 %v10531_v15  ;;  %v10623_v13 = vld [vmem:[%s10716_s17 + $0x1eec] ss:$16 sps:$4 sm:$0xff]   ;;  %v10618_v15 = vld [vmem:[%s10716_s17 + $0x1ee0] ss:$16 sps:$4 sm:$0xff]  }
 0x3b2   : > { %7093 = vmatpush1.bf16.msra.mxu0 %v10526_v16  ;;  %7749 = vmatpush1.bf16.msra.mxu1 %v10529_v11  ;;  %v10621_v16 = vld [vmem:[%s10716_s17 + $0x1ee8] ss:$16 sps:$4 sm:$0xff]   ;;  %v10626_v11 = vld [vmem:[%s10716_s17 + $0x1f04] ss:$16 sps:$4 sm:$0xff]  }
 0x3b3   : > { %7094 = vmatprep.subr.bf16.mxu0 %v10534_v19  ;;  %7750 = vmatprep.subr.bf16.mxu1 %v10537_v20  ;;  %v10629_v19 = vld [vmem:[%s10716_s17 + $0x1f0c] ss:$16 sps:$4 sm:$0xff]   ;;  %v10624_v20 = vld [vmem:[%s10716_s17 + $0x1f00] ss:$16 sps:$4 sm:$0xff]  }
 0x3b6   : > { %7095 = vmatpush1.bf16.msra.mxu0 %v10532_v14  ;;  %7751 = vmatpush1.bf16.msra.mxu1 %v10535_v22  ;;  %v10627_v14 = vld [vmem:[%s10716_s17 + $0x1f08] ss:$16 sps:$4 sm:$0xff]   ;;  %v10632_v22 = vld [vmem:[%s10716_s17 + $0x1f24] ss:$16 sps:$4 sm:$0xff]  }
 0x3b7   : > { %7096 = vmatprep.subr.bf16.mxu0 %v10540_v23  ;;  %7752 = vmatprep.subr.bf16.mxu1 %v10543_v17  ;;  %v10635_v23 = vld [vmem:[%s10716_s17 + $0x1f2c] ss:$16 sps:$4 sm:$0xff]   ;;  %v10630_v17 = vld [vmem:[%s10716_s17 + $0x1f20] ss:$16 sps:$4 sm:$0xff]  }
 0x3ba   : > { %7097 = vmatpush1.bf16.msra.mxu0 %v10538_v25  ;;  %7753 = vmatpush1.bf16.msra.mxu1 %v10541_v26  ;;  %v10633_v25 = vld [vmem:[%s10716_s17 + $0x1f28] ss:$16 sps:$4 sm:$0xff]   ;;  %v10638_v26 = vld [vmem:[%s10716_s17 + $0x1f44] ss:$16 sps:$4 sm:$0xff]  }
 0x3bb   : > { %7098 = vmatprep.subr.bf16.mxu0 %v10546_v18  ;;  %7754 = vmatprep.subr.bf16.mxu1 %v10549_v28  ;;  %v10641_v18 = vld [vmem:[%s10716_s17 + $0x1f4c] ss:$16 sps:$4 sm:$0xff]   ;;  %v10636_v28 = vld [vmem:[%s10716_s17 + $0x1f40] ss:$16 sps:$4 sm:$0xff]  }
 0x3be   : > { %7099 = vmatpush1.bf16.msra.mxu0 %v10544_v29  ;;  %7755 = vmatpush1.bf16.msra.mxu1 %v10547_v21  ;;  %v10639_v29 = vld [vmem:[%s10716_s17 + $0x1f48] ss:$16 sps:$4 sm:$0xff]   ;;  %v10644_v21 = vld [vmem:[%s10716_s17 + $0x1f64] ss:$16 sps:$4 sm:$0xff]  }
 0x3bf   : > { %7100 = vmatprep.subr.bf16.mxu0 %v10552_v31  ;;  %7756 = vmatprep.subr.bf16.mxu1 %v10555_v32  ;;  %v10647_v31 = vld [vmem:[%s10716_s17 + $0x1f6c] ss:$16 sps:$4 sm:$0xff]   ;;  %v10642_v32 = vld [vmem:[%s10716_s17 + $0x1f60] ss:$16 sps:$4 sm:$0xff]  }
 0x3c2   : > { %7101 = vmatpush1.bf16.msra.mxu0 %v10550_v24  ;;  %7757 = vmatpush1.bf16.msra.mxu1 %v10553_v33  ;;  %v10645_v24 = vld [vmem:[%s10716_s17 + $0x1f68] ss:$16 sps:$4 sm:$0xff]   ;;  %v10650_v33 = vld [vmem:[%s10716_s17 + $0x1f84] ss:$16 sps:$4 sm:$0xff]  }
 0x3c3   : > { %7102 = vmatprep.subr.bf16.mxu0 %v10558_v35  ;;  %7758 = vmatprep.subr.bf16.mxu1 %v10561_v27  ;;  %v10653_v35 = vld [vmem:[%s10716_s17 + $0x1f8c] ss:$16 sps:$4 sm:$0xff]   ;;  %v10648_v27 = vld [vmem:[%s10716_s17 + $0x1f80] ss:$16 sps:$4 sm:$0xff]  }
 0x3c6   : > { %7103 = vmatpush1.bf16.msra.mxu0 %v10556_v36  ;;  %7759 = vmatpush1.bf16.msra.mxu1 %v10559_v38  ;;  %v10651_v36 = vld [vmem:[%s10716_s17 + $0x1f88] ss:$16 sps:$4 sm:$0xff]   ;;  %v10656_v38 = vld [vmem:[%s10716_s17 + $0x1fa4] ss:$16 sps:$4 sm:$0xff]  }
 0x3c7   : > { %7104 = vmatprep.subr.bf16.mxu0 %v10564_v30  ;;  %7760 = vmatprep.subr.bf16.mxu1 %v10567_v39  ;;  %v10659_v30 = vld [vmem:[%s10716_s17 + $0x1fac] ss:$16 sps:$4 sm:$0xff]   ;;  %v10654_v39 = vld [vmem:[%s10716_s17 + $0x1fa0] ss:$16 sps:$4 sm:$0xff]  }
 0x3ca   : > { %7105 = vmatpush1.bf16.msra.mxu0 %v10562_v41  ;;  %7761 = vmatpush1.bf16.msra.mxu1 %v10565_v34  ;;  %v10657_v41 = vld [vmem:[%s10716_s17 + $0x1fa8] ss:$16 sps:$4 sm:$0xff]   ;;  %v10662_v34 = vld [vmem:[%s10716_s17 + $0x1fc4] ss:$16 sps:$4 sm:$0xff]  }
 0x3cb   : > { %7106 = vmatprep.subr.bf16.mxu0 %v10570_v42  ;;  %7762 = vmatprep.subr.bf16.mxu1 %v10573_v44  ;;  %v10665_v42 = vld [vmem:[%s10716_s17 + $0x1fcc] ss:$16 sps:$4 sm:$0xff]   ;;  %v10660_v44 = vld [vmem:[%s10716_s17 + $0x1fc0] ss:$16 sps:$4 sm:$0xff]  }
 0x3ce   : > { %7107 = vmatpush1.bf16.msra.mxu0 %v10568_v37  ;;  %7763 = vmatpush1.bf16.msra.mxu1 %v10571_v45  ;;  %v10663_v37 = vld [vmem:[%s10716_s17 + $0x1fc8] ss:$16 sps:$4 sm:$0xff]   ;;  %v10668_v45 = vld [vmem:[%s10716_s17 + $0x1fe4] ss:$16 sps:$4 sm:$0xff]  }
 0x3cf   : > { %7117 = vmatprep.subr.bf16.mxu0 %v10578_v47  ;;  %7773 = vmatprep.subr.bf16.mxu1 %v10581_v40  ;;  %v10671_v47 = vld [vmem:[%s10716_s17 + $0x1fec] ss:$16 sps:$4 sm:$0xff]   ;;  %v10666_v40 = vld [vmem:[%s10716_s17 + $0x1fe0] ss:$16 sps:$4 sm:$0xff]  }
 0x3d1   : > { %7109 = vmatmul.mubr.bf16.vlgmr.msra.gmra.mrb[0].mxu0 %v7941_v48  ;;  %7765 = vmatmul.mubr.bf16.vlgmr.msra.gmra.mrb[0].mxu1 %v7941_v48  ;;  %v10669_v48 = vld [vmem:[%s10716_s17 + $0x1fe8] ss:$16 sps:$4 sm:$0xff]  }
 0x3d2   : > { %7118 = vmatpush1.bf16.msra.mxu0 %v10576_v50  ;;  %7774 = vmatpush1.bf16.msra.mxu1 %v10579_v43  ;;  %v7943_v50 = vcombine.low %v11786_v49, %v11786_v49  ;;  %v1250_v43 = vlaneseq }
 0x3d3   : > { %7119 = vmatprep.subr.bf16.mxu0 %v10584_v51  ;;  %7775 = vmatprep.subr.bf16.mxu1 %v10587_v52 }
 0x3d4   : > { %7149 = vmatprep.mubr.bf16.mxu0 %v7944_v53  ;;  %7805 = vmatprep.mubr.bf16.mxu1 %v7944_v53  ;;  %v1251_v51 = vshrl.u32 %v1250_v43, 7 }
 0x3d6   : > { %7120 = vmatpush1.bf16.msra.mxu0 %v10582_v46  ;;  %7776 = vmatpush1.bf16.msra.mxu1 %v10585_v54  ;;  %v1252_v52 = vsub.s32 0, %v1251_v51  ;;  %v1260_v53 = vsub.s32 2, %v1251_v51  ;;  %v1248_v46 = vld [vmem:[%s202_s25] sm:$0xf]  ;;  %v1256_v54 = vsub.s32 1, %v1251_v51 }
 0x3d7   : > { %7121 = vmatprep.subr.bf16.mxu0 %v10590_v55  ;;  %7777 = vmatprep.subr.bf16.mxu1 %v10593_v56  ;;  %v1264_v55 = vsub.s32 3, %v1251_v51 }
 0x3d8   : > { %v1253_v56 = vrot.slane %v1248_v46, %v1252_v52  ;;  %v1257_v49 = vrot.slane %v1248_v46, %v1256_v54 }
 0x3da   : > { %7122 = vmatpush1.bf16.msra.mxu0 %v10588_v57  ;;  %7778 = vmatpush1.bf16.msra.mxu1 %v10591_v58  ;;  %v1261_v57 = vrot.slane %v1248_v46, %v1260_v53  ;;  %v1265_v58 = vrot.slane %v1248_v46, %v1264_v55 }
 0x3db   : > { %7123 = vmatprep.subr.bf16.mxu0 %v10596_v59  ;;  %7779 = vmatprep.subr.bf16.mxu1 %v10599_v60 }
 0x3de   : > { %7124 = vmatpush1.bf16.msra.mxu0 %v10594_v61  ;;  %7780 = vmatpush1.bf16.msra.mxu1 %v10597_v62 }
 0x3df   : > { %7125 = vmatprep.subr.bf16.mxu0 %v10602_v63  ;;  %7781 = vmatprep.subr.bf16.mxu1 %v10605_v0 }
 0x3e2   : > { %7126 = vmatpush1.bf16.msra.mxu0 %v10600_v1  ;;  %7782 = vmatpush1.bf16.msra.mxu1 %v10603_v2 }
 0x3e3   : > { %7127 = vmatprep.subr.bf16.mxu0 %v10608_v3  ;;  %7783 = vmatprep.subr.bf16.mxu1 %v10611_v4 }
 0x3e6   : > { %7128 = vmatpush1.bf16.msra.mxu0 %v10606_v5  ;;  %7784 = vmatpush1.bf16.msra.mxu1 %v10609_v6 }
 0x3e7   : > { %7129 = vmatprep.subr.bf16.mxu0 %v10614_v7  ;;  %7785 = vmatprep.subr.bf16.mxu1 %v10617_v8 }
 0x3ea   : > { %7130 = vmatpush1.bf16.msra.mxu0 %v10612_v9  ;;  %7786 = vmatpush1.bf16.msra.mxu1 %v10615_v10 }
 0x3eb   : > { %7131 = vmatprep.subr.bf16.mxu0 %v10620_v12  ;;  %7787 = vmatprep.subr.bf16.mxu1 %v10623_v13 }
 0x3ee   : > { %7132 = vmatpush1.bf16.msra.mxu0 %v10618_v15  ;;  %7788 = vmatpush1.bf16.msra.mxu1 %v10621_v16 }
 0x3ef   : > { %7133 = vmatprep.subr.bf16.mxu0 %v10626_v11  ;;  %7789 = vmatprep.subr.bf16.mxu1 %v10629_v19 }
 0x3f2   : > { %7134 = vmatpush1.bf16.msra.mxu0 %v10624_v20  ;;  %7790 = vmatpush1.bf16.msra.mxu1 %v10627_v14 }
 0x3f3   : > { %7135 = vmatprep.subr.bf16.mxu0 %v10632_v22  ;;  %7791 = vmatprep.subr.bf16.mxu1 %v10635_v23 }
 0x3f6   : > { %7136 = vmatpush1.bf16.msra.mxu0 %v10630_v17  ;;  %7792 = vmatpush1.bf16.msra.mxu1 %v10633_v25 }
 0x3f7   : > { %7137 = vmatprep.subr.bf16.mxu0 %v10638_v26  ;;  %7793 = vmatprep.subr.bf16.mxu1 %v10641_v18 }
 0x3fa   : > { %7138 = vmatpush1.bf16.msra.mxu0 %v10636_v28  ;;  %7794 = vmatpush1.bf16.msra.mxu1 %v10639_v29 }
 0x3fb   : > { %7139 = vmatprep.subr.bf16.mxu0 %v10644_v21  ;;  %7795 = vmatprep.subr.bf16.mxu1 %v10647_v31 }
 0x3fe   : > { %7140 = vmatpush1.bf16.msra.mxu0 %v10642_v32  ;;  %7796 = vmatpush1.bf16.msra.mxu1 %v10645_v24 }
 0x3ff   : > { %7141 = vmatprep.subr.bf16.mxu0 %v10650_v33  ;;  %7797 = vmatprep.subr.bf16.mxu1 %v10653_v35 }
 0x402   : > { %7142 = vmatpush1.bf16.msra.mxu0 %v10648_v27  ;;  %7798 = vmatpush1.bf16.msra.mxu1 %v10651_v36 }
 0x403   : > { %7143 = vmatprep.subr.bf16.mxu0 %v10656_v38  ;;  %7799 = vmatprep.subr.bf16.mxu1 %v10659_v30 }
 0x406   : > { %7144 = vmatpush1.bf16.msra.mxu0 %v10654_v39  ;;  %7800 = vmatpush1.bf16.msra.mxu1 %v10657_v41 }
 0x407   : > { %7145 = vmatprep.subr.bf16.mxu0 %v10662_v34  ;;  %7801 = vmatprep.subr.bf16.mxu1 %v10665_v42 }
 0x40a   : > { %7146 = vmatpush1.bf16.msra.mxu0 %v10660_v44  ;;  %7802 = vmatpush1.bf16.msra.mxu1 %v10663_v37 }
 0x40b   : > { %7147 = vmatprep.subr.bf16.mxu0 %v10668_v45  ;;  %7803 = vmatprep.subr.bf16.mxu1 %v10671_v47 }
 0x40e   : > { %7148 = vmatpush1.bf16.msra.mxu0 %v10666_v40  ;;  %7804 = vmatpush1.bf16.msra.mxu1 %v10669_v48 }
 0x411   : > { %7150 = vmatmul.mubr.bf16.vlgmr.msra.gmra.mrb[0].mxu0 %v7943_v50  ;;  %7806 = vmatmul.mubr.bf16.vlgmr.msra.gmra.mrb[0].mxu1 %v7943_v50 }
 0x4e4   : > { %v7151_v59 = vpop.f32.mrb[0].mxu0  ;;  %v7807_v60 = vpop.f32.mrb[0].mxu1 }
 0x4e5   : > { %v8974_v61 = vadd.f32 %v7151_v59, %v1253_v56  ;;  %v8976_v62 = vadd.f32 %v7807_v60, %v1261_v57  ;;  %v7153_v63 = vpop.f32.mrb[1].mxu0  ;;  %v7809_v0 = vpop.f32.mrb[1].mxu1 }
 0x4e6   : > { %v8975_v1 = vadd.f32 %v7153_v63, %v1257_v49  ;;  %v8977_v2 = vadd.f32 %v7809_v0, %v1265_v58  ;;  %v7155_v3 = vpop.f32.mrb[2].mxu0  ;;  %v7811_v4 = vpop.f32.mrb[2].mxu1 }
 0x4e7   : > { %v7814_v5 = vmax.f32 %v8974_v61, 0.0  ;;  %v7816_v6 = vmax.f32 %v8976_v62, 0.0  ;;  %v7156_v7 = vpop.f32.mrb[3].mxu0  ;;  %v7812_v8 = vpop.f32.mrb[3].mxu1 }
 0x4e8   : > { %v7815_v9 = vmax.f32 %v8975_v1, 0.0  ;;  %v7817_v10 = vmax.f32 %v8977_v2, 0.0 }
 0x4e9   : > { %7818 = vst [vmem:[%s207_s29] sm:$0xff] %v7814_v5  ;;  %7820 = vst [vmem:[%s207_s29 + $0x10] sm:$0xff] %v7816_v6 }
 0x4ea   : > { %7819 = vst [vmem:[%s207_s29 + $0x8] sm:$0xff] %v7815_v9  ;;  %7821 = vst [vmem:[%s207_s29 + $0x18] sm:$0xff] %v7817_v10 }
 0x4eb PF: > { %s13_s12 = sadd.s32 1, %s10680_s12  }
 0x4ec   : > { %p10_p4 = scmp.ge.s32.totalorder %s13_s12, 4  }
 0x4ee   :  { %12 = sbr.rel (!%p10_p4) target bundleno = 1 (0x1), region = 68 }

</bundles_post_ra>
